<compile_context>
chip_gen: v6e
topology: v6e:2x2x1
jax: 0.10.0
libtpu: 0.0.40
codegen_flags: <defaults>
</compile_context>

<pallas_src>
import functools

import numpy as np
import jax
import jax.numpy as jnp
from jax.experimental import pallas as pl
from jax.experimental.pallas import tpu as pltpu

EPS = 1e-5          # torch.nn.InstanceNorm2d default eps
NEG_SLOPE = 0.2     # LeakyReLU(0.2)


# --------------------------------------------------------------------------
# Host-side constant helpers (compile-time; no runtime XLA ops)
# --------------------------------------------------------------------------
def _pad_base(W):
    # interior starts at an 8-aligned sublane offset >= W + 1
    return ((W + 1 + 7) // 8) * 8


def _pad_rows(H, W):
    return _pad_base(W) + H * W + W + 1


def _x_masks(H, W):
    """(3, H*W, 1) {0,1} masks: tap dx is valid at flat pos p iff the source
    column x + dx - 1 stays inside [0, W). Row boundaries need no mask (the
    flattened padded scratch is zero there, or the column mask already hits)."""
    m = np.zeros((3, H * W, 1), np.float32)
    for dx in range(3):
        for p in range(H * W):
            x = p % W
            if 0 <= x + dx - 1 < W:
                m[dx, p, 0] = 1.0
    return m


def _pool_select(H, W):
    """(4, H*W/4, H*W) one-hot selection matrices, one per position of the
    2x2/stride-2 pooling window (row-major pooled output)."""
    Ho, Wo = H // 2, W // 2
    S = np.zeros((4, Ho * Wo, H * W), np.float32)
    for yo in range(Ho):
        for xo in range(Wo):
            q = yo * Wo + xo
            for j, (dy, dx) in enumerate(((0, 0), (0, 1), (1, 0), (1, 1))):
                S[j, q, (2 * yo + dy) * W + (2 * xo + dx)] = 1.0
    return S


# --------------------------------------------------------------------------
# Fused Pallas kernel (one batch element per grid step)
# --------------------------------------------------------------------------
def _disc_kernel(layer_hw, x_ref,
                 up_w_ref, up_b_ref,
                 c1_w_ref, c1_b_ref, m1_ref, s1_ref,
                 c2_w_ref, c2_b_ref, m2_ref, s2_ref,
                 c3_w_ref, c3_b_ref, m3_ref, s3_ref,
                 c4_w_ref, c4_b_ref, m4_ref, s4_ref,
                 fin_w_ref, fin_b_ref,
                 o_ref,
                 pad1_ref, pad2_ref, pad3_ref, pad4_ref):
    # upfeature: 1x1 conv == channel matmul over flattened spatial positions
    act = jnp.dot(x_ref[0], up_w_ref[...],
                  preferred_element_type=jnp.float32) + up_b_ref[...]

    layers = (
        (c1_w_ref, c1_b_ref, m1_ref, s1_ref, pad1_ref, False),
        (c2_w_ref, c2_b_ref, m2_ref, s2_ref, pad2_ref, True),
        (c3_w_ref, c3_b_ref, m3_ref, s3_ref, pad3_ref, True),
        (c4_w_ref, c4_b_ref, m4_ref, s4_ref, pad4_ref, True),
    )

    for (H, W), (w_ref, b_ref, m_ref, s_ref, pad_ref, use_in) in zip(layer_hw,
                                                                     layers):
        HW = H * W
        base = _pad_base(W)
        cout = w_ref.shape[2]

        # Stage this layer's input into the zero-padded flattened scratch.
        pad_ref[...] = jnp.zeros_like(pad_ref)
        pad_ref[base:base + HW, :] = act

        # 3x3 conv (padding=1): 9 accumulating matmuls on shifted taps.
        acc = jnp.zeros((HW, cout), jnp.float32)
        for dy in range(3):
            for dx in range(3):
                off = (dy - 1) * W + (dx - 1)
                tap = pad_ref[base + off:base + off + HW, :]
                if dx != 1:                       # column-wrap mask only
                    tap = tap * m_ref[dx]
                acc = acc + jnp.dot(tap, w_ref[dy * 3 + dx],
                                    preferred_element_type=jnp.float32)
        acc = acc + b_ref[...]

        if use_in:                                # InstanceNorm2d (affine=False)
            mu = jnp.mean(acc, axis=0, keepdims=True)
            var = jnp.mean(jnp.square(acc - mu), axis=0, keepdims=True)
            acc = (acc - mu) * jax.lax.rsqrt(var + EPS)

        acc = jnp.maximum(acc, NEG_SLOPE * acc)   # LeakyReLU(0.2)

        # Fused 2x2 / stride-2 maxpool: 4 one-hot selections + elementwise max.
        p00 = jnp.dot(s_ref[0], acc, preferred_element_type=jnp.float32)
        p01 = jnp.dot(s_ref[1], acc, preferred_element_type=jnp.float32)
        p10 = jnp.dot(s_ref[2], acc, preferred_element_type=jnp.float32)
        p11 = jnp.dot(s_ref[3], acc, preferred_element_type=jnp.float32)
        act = jnp.maximum(jnp.maximum(p00, p01), jnp.maximum(p10, p11))

    # final 1x1 conv to a single channel as a lane reduction (no 1-lane matmul)
    o_ref[0] = (jnp.sum(act * fin_w_ref[...], axis=1, keepdims=True)
                + fin_b_ref[...])


# --------------------------------------------------------------------------
# Wrapper
# --------------------------------------------------------------------------
def discriminator_whole(params, x_nchw, y_nchw):
    xy = jnp.concatenate([x_nchw, y_nchw], axis=1)          # NCHW channel cat
    N, Cin, H, W = xy.shape
    assert H % 16 == 0 and W % 16 == 0, "need 4 rounds of 2x2 pooling"
    x2 = jnp.transpose(xy, (0, 2, 3, 1)).reshape(N, H * W, Cin)
    x2 = x2.astype(jnp.float32)

    h = params["up_w"].shape[1]
    layer_hw = tuple((H >> i, W >> i) for i in range(4))     # per-block H, W
    cins = [h, 2 * h, 4 * h, 8 * h]                          # per-block C_in
    Hf, Wf = H // 16, W // 16
    HWf = Hf * Wf
    Cfin = 16 * h

    masks = [jnp.asarray(_x_masks(hl, wl)) for hl, wl in layer_hw]
    sels = [jnp.asarray(_pool_select(hl, wl)) for hl, wl in layer_hw]
    conv_w = [params[f"c{i}_w"].reshape(9, cins[i - 1], 2 * cins[i - 1])
              for i in range(1, 5)]
    conv_b = [params[f"c{i}_b"].reshape(1, -1) for i in range(1, 5)]

    def rep(shape):  # replicated (grid-invariant) full-array block
        nd = len(shape)
        return pl.BlockSpec(shape, lambda n, _nd=nd: (0,) * _nd)

    in_specs = [pl.BlockSpec((1, H * W, Cin), lambda n: (n, 0, 0)),
                rep((Cin, h)), rep((1, h))]
    operands = [x2, params["up_w"], params["up_b"].reshape(1, h)]
    for i in range(4):
        ci, co = cins[i], 2 * cins[i]
        hl, wl = layer_hw[i]
        in_specs += [rep((9, ci, co)), rep((1, co)),
                     rep((3, hl * wl, 1)),
                     rep((4, (hl * wl) // 4, hl * wl))]
        operands += [conv_w[i], conv_b[i], masks[i], sels[i]]
    in_specs += [rep((1, Cfin)), rep((1, 1))]
    operands += [params["fin_w"].reshape(1, Cfin),
                 params["fin_b"].reshape(1, 1)]

    scratch = [pltpu.VMEM((_pad_rows(hl, wl), cins[i]), jnp.float32)
               for i, (hl, wl) in enumerate(layer_hw)]

    out = pl.pallas_call(
        functools.partial(_disc_kernel, layer_hw),
        out_shape=jax.ShapeDtypeStruct((N, HWf, 1), jnp.float32),
        grid=(N,),
        in_specs=in_specs,
        out_specs=pl.BlockSpec((1, HWf, 1), lambda n: (n, 0, 0)),
        scratch_shapes=scratch,
        compiler_params=pltpu.CompilerParams(
            dimension_semantics=("parallel",)),
    )(*operands)

    # (N, Hf*Wf, 1) -> NCHW (N, 1, Hf, Wf)
    return jnp.transpose(out, (0, 2, 1)).reshape(N, 1, Hf, Wf)


# --------------------------------------------------------------------------
# Parameters (deterministic, synthetic)
# --------------------------------------------------------------------------
def init_params(key, input_channels, hidden_channels=8):
    h = hidden_channels

    def conv_init(k, shape, fan_in):
        return jax.random.normal(k, shape, jnp.float32) / jnp.sqrt(fan_in)

    ks = jax.random.split(key, 12)
    return {
        "up_w": conv_init(ks[0], (input_channels, h), input_channels),
        "up_b": conv_init(ks[1], (h,), input_channels),
        "c1_w": conv_init(ks[2], (3, 3, h, 2 * h), 9 * h),
        "c1_b": conv_init(ks[3], (2 * h,), 9 * h),
        "c2_w": conv_init(ks[4], (3, 3, 2 * h, 4 * h), 9 * 2 * h),
        "c2_b": conv_init(ks[5], (4 * h,), 9 * 2 * h),
        "c3_w": conv_init(ks[6], (3, 3, 4 * h, 8 * h), 9 * 4 * h),
        "c3_b": conv_init(ks[7], (8 * h,), 9 * 4 * h),
        "c4_w": conv_init(ks[8], (3, 3, 8 * h, 16 * h), 9 * 8 * h),
        "c4_b": conv_init(ks[9], (16 * h,), 9 * 8 * h),
        "fin_w": conv_init(ks[10], (16 * h, 1), 16 * h),
        "fin_b": conv_init(ks[11], (1,), 16 * h),
    }


if __name__ == "__main__":
    key = jax.random.PRNGKey(0)
    kx, ky, kp = jax.random.split(key, 3)

    # x and y each carry 2 channels -> concatenated input has 4 channels.
    x = jax.random.normal(kx, (2, 2, 16, 16), jnp.float32)
    y = jax.random.normal(ky, (2, 2, 16, 16), jnp.float32)
    params = init_params(kp, input_channels=4, hidden_channels=8)

    fwd = jax.jit(discriminator_whole)
    out = jax.block_until_ready(fwd(params, x, y))

    assert out.shape == (2, 1, 1, 1), out.shape
    assert jnp.all(jnp.isfinite(out))
    print("KERNEL_OK")
</pallas_src>

<mosaic_0001>
module attributes {stable_mosaic.version = 11 : i64} {
  func.func @_disc_kernel(%arg0: i32, %arg1: memref<1x256x4xf32, #tpu.memory_space<vmem>>, %arg2: memref<4x8xf32, #tpu.memory_space<vmem>>, %arg3: memref<1x8xf32, #tpu.memory_space<vmem>>, %arg4: memref<9x8x16xf32, #tpu.memory_space<vmem>>, %arg5: memref<1x16xf32, #tpu.memory_space<vmem>>, %arg6: memref<3x256x1xf32, #tpu.memory_space<vmem>>, %arg7: memref<4x64x256xf32, #tpu.memory_space<vmem>>, %arg8: memref<9x16x32xf32, #tpu.memory_space<vmem>>, %arg9: memref<1x32xf32, #tpu.memory_space<vmem>>, %arg10: memref<3x64x1xf32, #tpu.memory_space<vmem>>, %arg11: memref<4x16x64xf32, #tpu.memory_space<vmem>>, %arg12: memref<9x32x64xf32, #tpu.memory_space<vmem>>, %arg13: memref<1x64xf32, #tpu.memory_space<vmem>>, %arg14: memref<3x16x1xf32, #tpu.memory_space<vmem>>, %arg15: memref<4x4x16xf32, #tpu.memory_space<vmem>>, %arg16: memref<9x64x128xf32, #tpu.memory_space<vmem>>, %arg17: memref<1x128xf32, #tpu.memory_space<vmem>>, %arg18: memref<3x4x1xf32, #tpu.memory_space<vmem>>, %arg19: memref<4x1x4xf32, #tpu.memory_space<vmem>>, %arg20: memref<1x128xf32, #tpu.memory_space<vmem>>, %arg21: memref<1x1xf32, #tpu.memory_space<vmem>>, %arg22: memref<1x1x1xf32, #tpu.memory_space<vmem>>, %arg23: memref<297x8xf32, #tpu.memory_space<vmem>>, %arg24: memref<89x16xf32, #tpu.memory_space<vmem>>, %arg25: memref<29x32xf32, #tpu.memory_space<vmem>>, %arg26: memref<15x64xf32, #tpu.memory_space<vmem>>) attributes {dimension_semantics = [#tpu.dimension_semantics<parallel>], iteration_bounds = array<i64: 2>, scalar_prefetch = 0 : i64, scratch_operands = 4 : i64, tpu.core_type = #tpu.core_type<tc>, window_params = [{transform_indices = @transform_0, window_bounds = array<i64: 1, 256, 4>}, {pipeline_mode = #tpu.pipeline_mode<synchronous>, transform_indices = @transform_1, window_bounds = array<i64: 4, 8>}, {pipeline_mode = #tpu.pipeline_mode<synchronous>, transform_indices = @transform_2, window_bounds = array<i64: 1, 8>}, {pipeline_mode = #tpu.pipeline_mode<synchronous>, transform_indices = @transform_3, window_bounds = array<i64: 9, 8, 16>}, {pipeline_mode = #tpu.pipeline_mode<synchronous>, transform_indices = @transform_4, window_bounds = array<i64: 1, 16>}, {pipeline_mode = #tpu.pipeline_mode<synchronous>, transform_indices = @transform_5, window_bounds = array<i64: 3, 256, 1>}, {pipeline_mode = #tpu.pipeline_mode<synchronous>, transform_indices = @transform_6, window_bounds = array<i64: 4, 64, 256>}, {pipeline_mode = #tpu.pipeline_mode<synchronous>, transform_indices = @transform_7, window_bounds = array<i64: 9, 16, 32>}, {pipeline_mode = #tpu.pipeline_mode<synchronous>, transform_indices = @transform_8, window_bounds = array<i64: 1, 32>}, {pipeline_mode = #tpu.pipeline_mode<synchronous>, transform_indices = @transform_9, window_bounds = array<i64: 3, 64, 1>}, {pipeline_mode = #tpu.pipeline_mode<synchronous>, transform_indices = @transform_10, window_bounds = array<i64: 4, 16, 64>}, {pipeline_mode = #tpu.pipeline_mode<synchronous>, transform_indices = @transform_11, window_bounds = array<i64: 9, 32, 64>}, {pipeline_mode = #tpu.pipeline_mode<synchronous>, transform_indices = @transform_12, window_bounds = array<i64: 1, 64>}, {pipeline_mode = #tpu.pipeline_mode<synchronous>, transform_indices = @transform_13, window_bounds = array<i64: 3, 16, 1>}, {pipeline_mode = #tpu.pipeline_mode<synchronous>, transform_indices = @transform_14, window_bounds = array<i64: 4, 4, 16>}, {pipeline_mode = #tpu.pipeline_mode<synchronous>, transform_indices = @transform_15, window_bounds = array<i64: 9, 64, 128>}, {pipeline_mode = #tpu.pipeline_mode<synchronous>, transform_indices = @transform_16, window_bounds = array<i64: 1, 128>}, {pipeline_mode = #tpu.pipeline_mode<synchronous>, transform_indices = @transform_17, window_bounds = array<i64: 3, 4, 1>}, {pipeline_mode = #tpu.pipeline_mode<synchronous>, transform_indices = @transform_18, window_bounds = array<i64: 4, 1, 4>}, {pipeline_mode = #tpu.pipeline_mode<synchronous>, transform_indices = @transform_19, window_bounds = array<i64: 1, 128>}, {pipeline_mode = #tpu.pipeline_mode<synchronous>, transform_indices = @transform_20, window_bounds = array<i64: 1, 1>}, {transform_indices = @transform_21, window_bounds = array<i64: 1, 1, 1>}]} {
    %c0 = arith.constant 0 : index
    %c0_0 = arith.constant 0 : index
    %c0_1 = arith.constant 0 : index
    %0 = vector.load %arg1[%c0, %c0_0, %c0_1] : memref<1x256x4xf32, #tpu.memory_space<vmem>>, vector<1x256x4xf32>
    %1 = vector.shape_cast %0 : vector<1x256x4xf32> to vector<256x4xf32>
    %c0_2 = arith.constant 0 : index
    %c0_3 = arith.constant 0 : index
    %2 = vector.load %arg2[%c0_2, %c0_3] : memref<4x8xf32, #tpu.memory_space<vmem>>, vector<4x8xf32>
    %cst = arith.constant dense<0.000000e+00> : vector<256x8xf32>
    %3 = tpu.matmul %1, %2, %cst {dimension_numbers = #tpu.dot_dimension_numbers<[1], [0], [0], [1], [0, 0, 1, 1], [], []>} : vector<256x4xf32>, vector<4x8xf32>, vector<256x8xf32> -> vector<256x8xf32>
    %c0_4 = arith.constant 0 : index
    %c0_5 = arith.constant 0 : index
    %4 = vector.load %arg3[%c0_4, %c0_5] : memref<1x8xf32, #tpu.memory_space<vmem>>, vector<1x8xf32>
    %5 = vector.broadcast %4 : vector<1x8xf32> to vector<256x8xf32>
    %6 = arith.addf %3, %5 : vector<256x8xf32>
    %cst_6 = arith.constant 0.000000e+00 : f32
    %7 = vector.broadcast %cst_6 : f32 to vector<297x8xf32>
    %c0_7 = arith.constant 0 : index
    %c0_8 = arith.constant 0 : index
    %8 = vector.load %arg23[%c0_7, %c0_8] : memref<297x8xf32, #tpu.memory_space<vmem>>, vector<297x8xf32>
    tpu.vector_store %arg23[%c0_7, %c0_8], %7 {strides = array<i32>} : memref<297x8xf32, #tpu.memory_space<vmem>>, vector<297x8xf32>,
    %c24 = arith.constant 24 : index
    %c0_9 = arith.constant 0 : index
    %9 = vector.load %arg23[%c24, %c0_9] : memref<297x8xf32, #tpu.memory_space<vmem>>, vector<256x8xf32>
    tpu.vector_store %arg23[%c24, %c0_9], %6 {strides = array<i32>} : memref<297x8xf32, #tpu.memory_space<vmem>>, vector<256x8xf32>,
    %cst_10 = arith.constant 0.000000e+00 : f32
    %10 = vector.broadcast %cst_10 : f32 to vector<256x16xf32>
    %c7 = arith.constant 7 : index
    %c0_11 = arith.constant 0 : index
    %11 = vector.load %arg23[%c7, %c0_11] : memref<297x8xf32, #tpu.memory_space<vmem>>, vector<256x8xf32>
    %c0_12 = arith.constant 0 : index
    %c0_13 = arith.constant 0 : index
    %c0_14 = arith.constant 0 : index
    %12 = vector.load %arg6[%c0_12, %c0_13, %c0_14] : memref<3x256x1xf32, #tpu.memory_space<vmem>>, vector<1x256x1xf32>
    %13 = vector.shape_cast %12 : vector<1x256x1xf32> to vector<256x1xf32>
    %14 = vector.broadcast %13 : vector<256x1xf32> to vector<256x8xf32>
    %15 = arith.mulf %11, %14 : vector<256x8xf32>
    %c0_15 = arith.constant 0 : index
    %c0_16 = arith.constant 0 : index
    %c0_17 = arith.constant 0 : index
    %16 = vector.load %arg4[%c0_15, %c0_16, %c0_17] : memref<9x8x16xf32, #tpu.memory_space<vmem>>, vector<1x8x16xf32>
    %17 = vector.shape_cast %16 : vector<1x8x16xf32> to vector<8x16xf32>
    %cst_18 = arith.constant dense<0.000000e+00> : vector<256x16xf32>
    %18 = tpu.matmul %15, %17, %cst_18 {dimension_numbers = #tpu.dot_dimension_numbers<[1], [0], [0], [1], [0, 0, 1, 1], [], []>} : vector<256x8xf32>, vector<8x16xf32>, vector<256x16xf32> -> vector<256x16xf32>
    %19 = arith.addf %10, %18 : vector<256x16xf32>
    %c8 = arith.constant 8 : index
    %c0_19 = arith.constant 0 : index
    %20 = vector.load %arg23[%c8, %c0_19] : memref<297x8xf32, #tpu.memory_space<vmem>>, vector<256x8xf32>
    %c1 = arith.constant 1 : index
    %c0_20 = arith.constant 0 : index
    %c0_21 = arith.constant 0 : index
    %21 = vector.load %arg4[%c1, %c0_20, %c0_21] : memref<9x8x16xf32, #tpu.memory_space<vmem>>, vector<1x8x16xf32>
    %22 = vector.shape_cast %21 : vector<1x8x16xf32> to vector<8x16xf32>
    %cst_22 = arith.constant dense<0.000000e+00> : vector<256x16xf32>
    %23 = tpu.matmul %20, %22, %cst_22 {dimension_numbers = #tpu.dot_dimension_numbers<[1], [0], [0], [1], [0, 0, 1, 1], [], []>} : vector<256x8xf32>, vector<8x16xf32>, vector<256x16xf32> -> vector<256x16xf32>
    %24 = arith.addf %19, %23 : vector<256x16xf32>
    %c9 = arith.constant 9 : index
    %c0_23 = arith.constant 0 : index
    %25 = vector.load %arg23[%c9, %c0_23] : memref<297x8xf32, #tpu.memory_space<vmem>>, vector<256x8xf32>
    %c2 = arith.constant 2 : index
    %c0_24 = arith.constant 0 : index
    %c0_25 = arith.constant 0 : index
    %26 = vector.load %arg6[%c2, %c0_24, %c0_25] : memref<3x256x1xf32, #tpu.memory_space<vmem>>, vector<1x256x1xf32>
    %27 = vector.shape_cast %26 : vector<1x256x1xf32> to vector<256x1xf32>
    %28 = vector.broadcast %27 : vector<256x1xf32> to vector<256x8xf32>
    %29 = arith.mulf %25, %28 : vector<256x8xf32>
    %c2_26 = arith.constant 2 : index
    %c0_27 = arith.constant 0 : index
    %c0_28 = arith.constant 0 : index
    %30 = vector.load %arg4[%c2_26, %c0_27, %c0_28] : memref<9x8x16xf32, #tpu.memory_space<vmem>>, vector<1x8x16xf32>
    %31 = vector.shape_cast %30 : vector<1x8x16xf32> to vector<8x16xf32>
    %cst_29 = arith.constant dense<0.000000e+00> : vector<256x16xf32>
    %32 = tpu.matmul %29, %31, %cst_29 {dimension_numbers = #tpu.dot_dimension_numbers<[1], [0], [0], [1], [0, 0, 1, 1], [], []>} : vector<256x8xf32>, vector<8x16xf32>, vector<256x16xf32> -> vector<256x16xf32>
    %33 = arith.addf %24, %32 : vector<256x16xf32>
    %c23 = arith.constant 23 : index
    %c0_30 = arith.constant 0 : index
    %34 = vector.load %arg23[%c23, %c0_30] : memref<297x8xf32, #tpu.memory_space<vmem>>, vector<256x8xf32>
    %c0_31 = arith.constant 0 : index
    %c0_32 = arith.constant 0 : index
    %c0_33 = arith.constant 0 : index
    %35 = vector.load %arg6[%c0_31, %c0_32, %c0_33] : memref<3x256x1xf32, #tpu.memory_space<vmem>>, vector<1x256x1xf32>
    %36 = vector.shape_cast %35 : vector<1x256x1xf32> to vector<256x1xf32>
    %37 = vector.broadcast %36 : vector<256x1xf32> to vector<256x8xf32>
    %38 = arith.mulf %34, %37 : vector<256x8xf32>
    %c3 = arith.constant 3 : index
    %c0_34 = arith.constant 0 : index
    %c0_35 = arith.constant 0 : index
    %39 = vector.load %arg4[%c3, %c0_34, %c0_35] : memref<9x8x16xf32, #tpu.memory_space<vmem>>, vector<1x8x16xf32>
    %40 = vector.shape_cast %39 : vector<1x8x16xf32> to vector<8x16xf32>
    %cst_36 = arith.constant dense<0.000000e+00> : vector<256x16xf32>
    %41 = tpu.matmul %38, %40, %cst_36 {dimension_numbers = #tpu.dot_dimension_numbers<[1], [0], [0], [1], [0, 0, 1, 1], [], []>} : vector<256x8xf32>, vector<8x16xf32>, vector<256x16xf32> -> vector<256x16xf32>
    %42 = arith.addf %33, %41 : vector<256x16xf32>
    %c24_37 = arith.constant 24 : index
    %c0_38 = arith.constant 0 : index
    %43 = vector.load %arg23[%c24_37, %c0_38] : memref<297x8xf32, #tpu.memory_space<vmem>>, vector<256x8xf32>
    %c4 = arith.constant 4 : index
    %c0_39 = arith.constant 0 : index
    %c0_40 = arith.constant 0 : index
    %44 = vector.load %arg4[%c4, %c0_39, %c0_40] : memref<9x8x16xf32, #tpu.memory_space<vmem>>, vector<1x8x16xf32>
    %45 = vector.shape_cast %44 : vector<1x8x16xf32> to vector<8x16xf32>
    %cst_41 = arith.constant dense<0.000000e+00> : vector<256x16xf32>
    %46 = tpu.matmul %43, %45, %cst_41 {dimension_numbers = #tpu.dot_dimension_numbers<[1], [0], [0], [1], [0, 0, 1, 1], [], []>} : vector<256x8xf32>, vector<8x16xf32>, vector<256x16xf32> -> vector<256x16xf32>
    %47 = arith.addf %42, %46 : vector<256x16xf32>
    %c25 = arith.constant 25 : index
    %c0_42 = arith.constant 0 : index
    %48 = vector.load %arg23[%c25, %c0_42] : memref<297x8xf32, #tpu.memory_space<vmem>>, vector<256x8xf32>
    %c2_43 = arith.constant 2 : index
    %c0_44 = arith.constant 0 : index
    %c0_45 = arith.constant 0 : index
    %49 = vector.load %arg6[%c2_43, %c0_44, %c0_45] : memref<3x256x1xf32, #tpu.memory_space<vmem>>, vector<1x256x1xf32>
    %50 = vector.shape_cast %49 : vector<1x256x1xf32> to vector<256x1xf32>
    %51 = vector.broadcast %50 : vector<256x1xf32> to vector<256x8xf32>
    %52 = arith.mulf %48, %51 : vector<256x8xf32>
    %c5 = arith.constant 5 : index
    %c0_46 = arith.constant 0 : index
    %c0_47 = arith.constant 0 : index
    %53 = vector.load %arg4[%c5, %c0_46, %c0_47] : memref<9x8x16xf32, #tpu.memory_space<vmem>>, vector<1x8x16xf32>
    %54 = vector.shape_cast %53 : vector<1x8x16xf32> to vector<8x16xf32>
    %cst_48 = arith.constant dense<0.000000e+00> : vector<256x16xf32>
    %55 = tpu.matmul %52, %54, %cst_48 {dimension_numbers = #tpu.dot_dimension_numbers<[1], [0], [0], [1], [0, 0, 1, 1], [], []>} : vector<256x8xf32>, vector<8x16xf32>, vector<256x16xf32> -> vector<256x16xf32>
    %56 = arith.addf %47, %55 : vector<256x16xf32>
    %c39 = arith.constant 39 : index
    %c0_49 = arith.constant 0 : index
    %57 = vector.load %arg23[%c39, %c0_49] : memref<297x8xf32, #tpu.memory_space<vmem>>, vector<256x8xf32>
    %c0_50 = arith.constant 0 : index
    %c0_51 = arith.constant 0 : index
    %c0_52 = arith.constant 0 : index
    %58 = vector.load %arg6[%c0_50, %c0_51, %c0_52] : memref<3x256x1xf32, #tpu.memory_space<vmem>>, vector<1x256x1xf32>
    %59 = vector.shape_cast %58 : vector<1x256x1xf32> to vector<256x1xf32>
    %60 = vector.broadcast %59 : vector<256x1xf32> to vector<256x8xf32>
    %61 = arith.mulf %57, %60 : vector<256x8xf32>
    %c6 = arith.constant 6 : index
    %c0_53 = arith.constant 0 : index
    %c0_54 = arith.constant 0 : index
    %62 = vector.load %arg4[%c6, %c0_53, %c0_54] : memref<9x8x16xf32, #tpu.memory_space<vmem>>, vector<1x8x16xf32>
    %63 = vector.shape_cast %62 : vector<1x8x16xf32> to vector<8x16xf32>
    %cst_55 = arith.constant dense<0.000000e+00> : vector<256x16xf32>
    %64 = tpu.matmul %61, %63, %cst_55 {dimension_numbers = #tpu.dot_dimension_numbers<[1], [0], [0], [1], [0, 0, 1, 1], [], []>} : vector<256x8xf32>, vector<8x16xf32>, vector<256x16xf32> -> vector<256x16xf32>
    %65 = arith.addf %56, %64 : vector<256x16xf32>
    %c40 = arith.constant 40 : index
    %c0_56 = arith.constant 0 : index
    %66 = vector.load %arg23[%c40, %c0_56] : memref<297x8xf32, #tpu.memory_space<vmem>>, vector<256x8xf32>
    %c7_57 = arith.constant 7 : index
    %c0_58 = arith.constant 0 : index
    %c0_59 = arith.constant 0 : index
    %67 = vector.load %arg4[%c7_57, %c0_58, %c0_59] : memref<9x8x16xf32, #tpu.memory_space<vmem>>, vector<1x8x16xf32>
    %68 = vector.shape_cast %67 : vector<1x8x16xf32> to vector<8x16xf32>
    %cst_60 = arith.constant dense<0.000000e+00> : vector<256x16xf32>
    %69 = tpu.matmul %66, %68, %cst_60 {dimension_numbers = #tpu.dot_dimension_numbers<[1], [0], [0], [1], [0, 0, 1, 1], [], []>} : vector<256x8xf32>, vector<8x16xf32>, vector<256x16xf32> -> vector<256x16xf32>
    %70 = arith.addf %65, %69 : vector<256x16xf32>
    %c41 = arith.constant 41 : index
    %c0_61 = arith.constant 0 : index
    %71 = vector.load %arg23[%c41, %c0_61] : memref<297x8xf32, #tpu.memory_space<vmem>>, vector<256x8xf32>
    %c2_62 = arith.constant 2 : index
    %c0_63 = arith.constant 0 : index
    %c0_64 = arith.constant 0 : index
    %72 = vector.load %arg6[%c2_62, %c0_63, %c0_64] : memref<3x256x1xf32, #tpu.memory_space<vmem>>, vector<1x256x1xf32>
    %73 = vector.shape_cast %72 : vector<1x256x1xf32> to vector<256x1xf32>
    %74 = vector.broadcast %73 : vector<256x1xf32> to vector<256x8xf32>
    %75 = arith.mulf %71, %74 : vector<256x8xf32>
    %c8_65 = arith.constant 8 : index
    %c0_66 = arith.constant 0 : index
    %c0_67 = arith.constant 0 : index
    %76 = vector.load %arg4[%c8_65, %c0_66, %c0_67] : memref<9x8x16xf32, #tpu.memory_space<vmem>>, vector<1x8x16xf32>
    %77 = vector.shape_cast %76 : vector<1x8x16xf32> to vector<8x16xf32>
    %cst_68 = arith.constant dense<0.000000e+00> : vector<256x16xf32>
    %78 = tpu.matmul %75, %77, %cst_68 {dimension_numbers = #tpu.dot_dimension_numbers<[1], [0], [0], [1], [0, 0, 1, 1], [], []>} : vector<256x8xf32>, vector<8x16xf32>, vector<256x16xf32> -> vector<256x16xf32>
    %79 = arith.addf %70, %78 : vector<256x16xf32>
    %c0_69 = arith.constant 0 : index
    %c0_70 = arith.constant 0 : index
    %80 = vector.load %arg5[%c0_69, %c0_70] : memref<1x16xf32, #tpu.memory_space<vmem>>, vector<1x16xf32>
    %81 = vector.broadcast %80 : vector<1x16xf32> to vector<256x16xf32>
    %82 = arith.addf %79, %81 : vector<256x16xf32>
    %cst_71 = arith.constant 2.000000e-01 : f32
    %83 = vector.broadcast %cst_71 : f32 to vector<256x16xf32>
    %84 = arith.mulf %83, %82 : vector<256x16xf32>
    %85 = arith.maximumf %82, %84 : vector<256x16xf32>
    %c0_72 = arith.constant 0 : index
    %c0_73 = arith.constant 0 : index
    %c0_74 = arith.constant 0 : index
    %86 = vector.load %arg7[%c0_72, %c0_73, %c0_74] : memref<4x64x256xf32, #tpu.memory_space<vmem>>, vector<1x64x256xf32>
    %87 = vector.shape_cast %86 : vector<1x64x256xf32> to vector<64x256xf32>
    %cst_75 = arith.constant dense<0.000000e+00> : vector<64x16xf32>
    %88 = tpu.matmul %87, %85, %cst_75 {dimension_numbers = #tpu.dot_dimension_numbers<[1], [0], [0], [1], [0, 0, 1, 1], [], []>} : vector<64x256xf32>, vector<256x16xf32>, vector<64x16xf32> -> vector<64x16xf32>
    %c1_76 = arith.constant 1 : index
    %c0_77 = arith.constant 0 : index
    %c0_78 = arith.constant 0 : index
    %89 = vector.load %arg7[%c1_76, %c0_77, %c0_78] : memref<4x64x256xf32, #tpu.memory_space<vmem>>, vector<1x64x256xf32>
    %90 = vector.shape_cast %89 : vector<1x64x256xf32> to vector<64x256xf32>
    %cst_79 = arith.constant dense<0.000000e+00> : vector<64x16xf32>
    %91 = tpu.matmul %90, %85, %cst_79 {dimension_numbers = #tpu.dot_dimension_numbers<[1], [0], [0], [1], [0, 0, 1, 1], [], []>} : vector<64x256xf32>, vector<256x16xf32>, vector<64x16xf32> -> vector<64x16xf32>
    %c2_80 = arith.constant 2 : index
    %c0_81 = arith.constant 0 : index
    %c0_82 = arith.constant 0 : index
    %92 = vector.load %arg7[%c2_80, %c0_81, %c0_82] : memref<4x64x256xf32, #tpu.memory_space<vmem>>, vector<1x64x256xf32>
    %93 = vector.shape_cast %92 : vector<1x64x256xf32> to vector<64x256xf32>
    %cst_83 = arith.constant dense<0.000000e+00> : vector<64x16xf32>
    %94 = tpu.matmul %93, %85, %cst_83 {dimension_numbers = #tpu.dot_dimension_numbers<[1], [0], [0], [1], [0, 0, 1, 1], [], []>} : vector<64x256xf32>, vector<256x16xf32>, vector<64x16xf32> -> vector<64x16xf32>
    %c3_84 = arith.constant 3 : index
    %c0_85 = arith.constant 0 : index
    %c0_86 = arith.constant 0 : index
    %95 = vector.load %arg7[%c3_84, %c0_85, %c0_86] : memref<4x64x256xf32, #tpu.memory_space<vmem>>, vector<1x64x256xf32>
    %96 = vector.shape_cast %95 : vector<1x64x256xf32> to vector<64x256xf32>
    %cst_87 = arith.constant dense<0.000000e+00> : vector<64x16xf32>
    %97 = tpu.matmul %96, %85, %cst_87 {dimension_numbers = #tpu.dot_dimension_numbers<[1], [0], [0], [1], [0, 0, 1, 1], [], []>} : vector<64x256xf32>, vector<256x16xf32>, vector<64x16xf32> -> vector<64x16xf32>
    %98 = arith.maximumf %88, %91 : vector<64x16xf32>
    %99 = arith.maximumf %94, %97 : vector<64x16xf32>
    %100 = arith.maximumf %98, %99 : vector<64x16xf32>
    %cst_88 = arith.constant 0.000000e+00 : f32
    %101 = vector.broadcast %cst_88 : f32 to vector<89x16xf32>
    %c0_89 = arith.constant 0 : index
    %c0_90 = arith.constant 0 : index
    %102 = vector.load %arg24[%c0_89, %c0_90] : memref<89x16xf32, #tpu.memory_space<vmem>>, vector<89x16xf32>
    tpu.vector_store %arg24[%c0_89, %c0_90], %101 {strides = array<i32>} : memref<89x16xf32, #tpu.memory_space<vmem>>, vector<89x16xf32>,
    %c16 = arith.constant 16 : index
    %c0_91 = arith.constant 0 : index
    %103 = vector.load %arg24[%c16, %c0_91] : memref<89x16xf32, #tpu.memory_space<vmem>>, vector<64x16xf32>
    tpu.vector_store %arg24[%c16, %c0_91], %100 {strides = array<i32>} : memref<89x16xf32, #tpu.memory_space<vmem>>, vector<64x16xf32>,
    %cst_92 = arith.constant 0.000000e+00 : f32
    %104 = vector.broadcast %cst_92 : f32 to vector<64x32xf32>
    %c7_93 = arith.constant 7 : index
    %c0_94 = arith.constant 0 : index
    %105 = vector.load %arg24[%c7_93, %c0_94] : memref<89x16xf32, #tpu.memory_space<vmem>>, vector<64x16xf32>
    %c0_95 = arith.constant 0 : index
    %c0_96 = arith.constant 0 : index
    %c0_97 = arith.constant 0 : index
    %106 = vector.load %arg10[%c0_95, %c0_96, %c0_97] : memref<3x64x1xf32, #tpu.memory_space<vmem>>, vector<1x64x1xf32>
    %107 = vector.shape_cast %106 : vector<1x64x1xf32> to vector<64x1xf32>
    %108 = vector.broadcast %107 : vector<64x1xf32> to vector<64x16xf32>
    %109 = arith.mulf %105, %108 : vector<64x16xf32>
    %c0_98 = arith.constant 0 : index
    %c0_99 = arith.constant 0 : index
    %c0_100 = arith.constant 0 : index
    %110 = vector.load %arg8[%c0_98, %c0_99, %c0_100] : memref<9x16x32xf32, #tpu.memory_space<vmem>>, vector<1x16x32xf32>
    %111 = vector.shape_cast %110 : vector<1x16x32xf32> to vector<16x32xf32>
    %cst_101 = arith.constant dense<0.000000e+00> : vector<64x32xf32>
    %112 = tpu.matmul %109, %111, %cst_101 {dimension_numbers = #tpu.dot_dimension_numbers<[1], [0], [0], [1], [0, 0, 1, 1], [], []>} : vector<64x16xf32>, vector<16x32xf32>, vector<64x32xf32> -> vector<64x32xf32>
    %113 = arith.addf %104, %112 : vector<64x32xf32>
    %c8_102 = arith.constant 8 : index
    %c0_103 = arith.constant 0 : index
    %114 = vector.load %arg24[%c8_102, %c0_103] : memref<89x16xf32, #tpu.memory_space<vmem>>, vector<64x16xf32>
    %c1_104 = arith.constant 1 : index
    %c0_105 = arith.constant 0 : index
    %c0_106 = arith.constant 0 : index
    %115 = vector.load %arg8[%c1_104, %c0_105, %c0_106] : memref<9x16x32xf32, #tpu.memory_space<vmem>>, vector<1x16x32xf32>
    %116 = vector.shape_cast %115 : vector<1x16x32xf32> to vector<16x32xf32>
    %cst_107 = arith.constant dense<0.000000e+00> : vector<64x32xf32>
    %117 = tpu.matmul %114, %116, %cst_107 {dimension_numbers = #tpu.dot_dimension_numbers<[1], [0], [0], [1], [0, 0, 1, 1], [], []>} : vector<64x16xf32>, vector<16x32xf32>, vector<64x32xf32> -> vector<64x32xf32>
    %118 = arith.addf %113, %117 : vector<64x32xf32>
    %c9_108 = arith.constant 9 : index
    %c0_109 = arith.constant 0 : index
    %119 = vector.load %arg24[%c9_108, %c0_109] : memref<89x16xf32, #tpu.memory_space<vmem>>, vector<64x16xf32>
    %c2_110 = arith.constant 2 : index
    %c0_111 = arith.constant 0 : index
    %c0_112 = arith.constant 0 : index
    %120 = vector.load %arg10[%c2_110, %c0_111, %c0_112] : memref<3x64x1xf32, #tpu.memory_space<vmem>>, vector<1x64x1xf32>
    %121 = vector.shape_cast %120 : vector<1x64x1xf32> to vector<64x1xf32>
    %122 = vector.broadcast %121 : vector<64x1xf32> to vector<64x16xf32>
    %123 = arith.mulf %119, %122 : vector<64x16xf32>
    %c2_113 = arith.constant 2 : index
    %c0_114 = arith.constant 0 : index
    %c0_115 = arith.constant 0 : index
    %124 = vector.load %arg8[%c2_113, %c0_114, %c0_115] : memref<9x16x32xf32, #tpu.memory_space<vmem>>, vector<1x16x32xf32>
    %125 = vector.shape_cast %124 : vector<1x16x32xf32> to vector<16x32xf32>
    %cst_116 = arith.constant dense<0.000000e+00> : vector<64x32xf32>
    %126 = tpu.matmul %123, %125, %cst_116 {dimension_numbers = #tpu.dot_dimension_numbers<[1], [0], [0], [1], [0, 0, 1, 1], [], []>} : vector<64x16xf32>, vector<16x32xf32>, vector<64x32xf32> -> vector<64x32xf32>
    %127 = arith.addf %118, %126 : vector<64x32xf32>
    %c15 = arith.constant 15 : index
    %c0_117 = arith.constant 0 : index
    %128 = vector.load %arg24[%c15, %c0_117] : memref<89x16xf32, #tpu.memory_space<vmem>>, vector<64x16xf32>
    %c0_118 = arith.constant 0 : index
    %c0_119 = arith.constant 0 : index
    %c0_120 = arith.constant 0 : index
    %129 = vector.load %arg10[%c0_118, %c0_119, %c0_120] : memref<3x64x1xf32, #tpu.memory_space<vmem>>, vector<1x64x1xf32>
    %130 = vector.shape_cast %129 : vector<1x64x1xf32> to vector<64x1xf32>
    %131 = vector.broadcast %130 : vector<64x1xf32> to vector<64x16xf32>
    %132 = arith.mulf %128, %131 : vector<64x16xf32>
    %c3_121 = arith.constant 3 : index
    %c0_122 = arith.constant 0 : index
    %c0_123 = arith.constant 0 : index
    %133 = vector.load %arg8[%c3_121, %c0_122, %c0_123] : memref<9x16x32xf32, #tpu.memory_space<vmem>>, vector<1x16x32xf32>
    %134 = vector.shape_cast %133 : vector<1x16x32xf32> to vector<16x32xf32>
    %cst_124 = arith.constant dense<0.000000e+00> : vector<64x32xf32>
    %135 = tpu.matmul %132, %134, %cst_124 {dimension_numbers = #tpu.dot_dimension_numbers<[1], [0], [0], [1], [0, 0, 1, 1], [], []>} : vector<64x16xf32>, vector<16x32xf32>, vector<64x32xf32> -> vector<64x32xf32>
    %136 = arith.addf %127, %135 : vector<64x32xf32>
    %c16_125 = arith.constant 16 : index
    %c0_126 = arith.constant 0 : index
    %137 = vector.load %arg24[%c16_125, %c0_126] : memref<89x16xf32, #tpu.memory_space<vmem>>, vector<64x16xf32>
    %c4_127 = arith.constant 4 : index
    %c0_128 = arith.constant 0 : index
    %c0_129 = arith.constant 0 : index
    %138 = vector.load %arg8[%c4_127, %c0_128, %c0_129] : memref<9x16x32xf32, #tpu.memory_space<vmem>>, vector<1x16x32xf32>
    %139 = vector.shape_cast %138 : vector<1x16x32xf32> to vector<16x32xf32>
    %cst_130 = arith.constant dense<0.000000e+00> : vector<64x32xf32>
    %140 = tpu.matmul %137, %139, %cst_130 {dimension_numbers = #tpu.dot_dimension_numbers<[1], [0], [0], [1], [0, 0, 1, 1], [], []>} : vector<64x16xf32>, vector<16x32xf32>, vector<64x32xf32> -> vector<64x32xf32>
    %141 = arith.addf %136, %140 : vector<64x32xf32>
    %c17 = arith.constant 17 : index
    %c0_131 = arith.constant 0 : index
    %142 = vector.load %arg24[%c17, %c0_131] : memref<89x16xf32, #tpu.memory_space<vmem>>, vector<64x16xf32>
    %c2_132 = arith.constant 2 : index
    %c0_133 = arith.constant 0 : index
    %c0_134 = arith.constant 0 : index
    %143 = vector.load %arg10[%c2_132, %c0_133, %c0_134] : memref<3x64x1xf32, #tpu.memory_space<vmem>>, vector<1x64x1xf32>
    %144 = vector.shape_cast %143 : vector<1x64x1xf32> to vector<64x1xf32>
    %145 = vector.broadcast %144 : vector<64x1xf32> to vector<64x16xf32>
    %146 = arith.mulf %142, %145 : vector<64x16xf32>
    %c5_135 = arith.constant 5 : index
    %c0_136 = arith.constant 0 : index
    %c0_137 = arith.constant 0 : index
    %147 = vector.load %arg8[%c5_135, %c0_136, %c0_137] : memref<9x16x32xf32, #tpu.memory_space<vmem>>, vector<1x16x32xf32>
    %148 = vector.shape_cast %147 : vector<1x16x32xf32> to vector<16x32xf32>
    %cst_138 = arith.constant dense<0.000000e+00> : vector<64x32xf32>
    %149 = tpu.matmul %146, %148, %cst_138 {dimension_numbers = #tpu.dot_dimension_numbers<[1], [0], [0], [1], [0, 0, 1, 1], [], []>} : vector<64x16xf32>, vector<16x32xf32>, vector<64x32xf32> -> vector<64x32xf32>
    %150 = arith.addf %141, %149 : vector<64x32xf32>
    %c23_139 = arith.constant 23 : index
    %c0_140 = arith.constant 0 : index
    %151 = vector.load %arg24[%c23_139, %c0_140] : memref<89x16xf32, #tpu.memory_space<vmem>>, vector<64x16xf32>
    %c0_141 = arith.constant 0 : index
    %c0_142 = arith.constant 0 : index
    %c0_143 = arith.constant 0 : index
    %152 = vector.load %arg10[%c0_141, %c0_142, %c0_143] : memref<3x64x1xf32, #tpu.memory_space<vmem>>, vector<1x64x1xf32>
    %153 = vector.shape_cast %152 : vector<1x64x1xf32> to vector<64x1xf32>
    %154 = vector.broadcast %153 : vector<64x1xf32> to vector<64x16xf32>
    %155 = arith.mulf %151, %154 : vector<64x16xf32>
    %c6_144 = arith.constant 6 : index
    %c0_145 = arith.constant 0 : index
    %c0_146 = arith.constant 0 : index
    %156 = vector.load %arg8[%c6_144, %c0_145, %c0_146] : memref<9x16x32xf32, #tpu.memory_space<vmem>>, vector<1x16x32xf32>
    %157 = vector.shape_cast %156 : vector<1x16x32xf32> to vector<16x32xf32>
    %cst_147 = arith.constant dense<0.000000e+00> : vector<64x32xf32>
    %158 = tpu.matmul %155, %157, %cst_147 {dimension_numbers = #tpu.dot_dimension_numbers<[1], [0], [0], [1], [0, 0, 1, 1], [], []>} : vector<64x16xf32>, vector<16x32xf32>, vector<64x32xf32> -> vector<64x32xf32>
    %159 = arith.addf %150, %158 : vector<64x32xf32>
    %c24_148 = arith.constant 24 : index
    %c0_149 = arith.constant 0 : index
    %160 = vector.load %arg24[%c24_148, %c0_149] : memref<89x16xf32, #tpu.memory_space<vmem>>, vector<64x16xf32>
    %c7_150 = arith.constant 7 : index
    %c0_151 = arith.constant 0 : index
    %c0_152 = arith.constant 0 : index
    %161 = vector.load %arg8[%c7_150, %c0_151, %c0_152] : memref<9x16x32xf32, #tpu.memory_space<vmem>>, vector<1x16x32xf32>
    %162 = vector.shape_cast %161 : vector<1x16x32xf32> to vector<16x32xf32>
    %cst_153 = arith.constant dense<0.000000e+00> : vector<64x32xf32>
    %163 = tpu.matmul %160, %162, %cst_153 {dimension_numbers = #tpu.dot_dimension_numbers<[1], [0], [0], [1], [0, 0, 1, 1], [], []>} : vector<64x16xf32>, vector<16x32xf32>, vector<64x32xf32> -> vector<64x32xf32>
    %164 = arith.addf %159, %163 : vector<64x32xf32>
    %c25_154 = arith.constant 25 : index
    %c0_155 = arith.constant 0 : index
    %165 = vector.load %arg24[%c25_154, %c0_155] : memref<89x16xf32, #tpu.memory_space<vmem>>, vector<64x16xf32>
    %c2_156 = arith.constant 2 : index
    %c0_157 = arith.constant 0 : index
    %c0_158 = arith.constant 0 : index
    %166 = vector.load %arg10[%c2_156, %c0_157, %c0_158] : memref<3x64x1xf32, #tpu.memory_space<vmem>>, vector<1x64x1xf32>
    %167 = vector.shape_cast %166 : vector<1x64x1xf32> to vector<64x1xf32>
    %168 = vector.broadcast %167 : vector<64x1xf32> to vector<64x16xf32>
    %169 = arith.mulf %165, %168 : vector<64x16xf32>
    %c8_159 = arith.constant 8 : index
    %c0_160 = arith.constant 0 : index
    %c0_161 = arith.constant 0 : index
    %170 = vector.load %arg8[%c8_159, %c0_160, %c0_161] : memref<9x16x32xf32, #tpu.memory_space<vmem>>, vector<1x16x32xf32>
    %171 = vector.shape_cast %170 : vector<1x16x32xf32> to vector<16x32xf32>
    %cst_162 = arith.constant dense<0.000000e+00> : vector<64x32xf32>
    %172 = tpu.matmul %169, %171, %cst_162 {dimension_numbers = #tpu.dot_dimension_numbers<[1], [0], [0], [1], [0, 0, 1, 1], [], []>} : vector<64x16xf32>, vector<16x32xf32>, vector<64x32xf32> -> vector<64x32xf32>
    %173 = arith.addf %164, %172 : vector<64x32xf32>
    %c0_163 = arith.constant 0 : index
    %c0_164 = arith.constant 0 : index
    %174 = vector.load %arg9[%c0_163, %c0_164] : memref<1x32xf32, #tpu.memory_space<vmem>>, vector<1x32xf32>
    %175 = vector.broadcast %174 : vector<1x32xf32> to vector<64x32xf32>
    %176 = arith.addf %173, %175 : vector<64x32xf32>
    %cst_165 = arith.constant dense<0.000000e+00> : vector<32xf32>
    %177 = vector.multi_reduction <add>, %176, %cst_165 [0] : vector<64x32xf32> to vector<32xf32>
    %178 = vector.shape_cast %177 : vector<32xf32> to vector<1x32xf32>
    %cst_166 = arith.constant 6.400000e+01 : f32
    %179 = vector.broadcast %cst_166 : f32 to vector<1x32xf32>
    %180 = arith.divf %178, %179 : vector<1x32xf32>
    %181 = vector.broadcast %180 : vector<1x32xf32> to vector<64x32xf32>
    %182 = arith.subf %176, %181 : vector<64x32xf32>
    %183 = arith.mulf %182, %182 : vector<64x32xf32>
    %cst_167 = arith.constant dense<0.000000e+00> : vector<32xf32>
    %184 = vector.multi_reduction <add>, %183, %cst_167 [0] : vector<64x32xf32> to vector<32xf32>
    %185 = vector.shape_cast %184 : vector<32xf32> to vector<1x32xf32>
    %cst_168 = arith.constant 6.400000e+01 : f32
    %186 = vector.broadcast %cst_168 : f32 to vector<1x32xf32>
    %187 = arith.divf %185, %186 : vector<1x32xf32>
    %188 = vector.broadcast %180 : vector<1x32xf32> to vector<64x32xf32>
    %189 = arith.subf %176, %188 : vector<64x32xf32>
    %cst_169 = arith.constant 9.99999974E-6 : f32
    %190 = vector.broadcast %cst_169 : f32 to vector<1x32xf32>
    %191 = arith.addf %187, %190 : vector<1x32xf32>
    %192 = math.rsqrt %191 : vector<1x32xf32>
    %193 = vector.broadcast %192 : vector<1x32xf32> to vector<64x32xf32>
    %194 = arith.mulf %189, %193 : vector<64x32xf32>
    %cst_170 = arith.constant 2.000000e-01 : f32
    %195 = vector.broadcast %cst_170 : f32 to vector<64x32xf32>
    %196 = arith.mulf %195, %194 : vector<64x32xf32>
    %197 = arith.maximumf %194, %196 : vector<64x32xf32>
    %c0_171 = arith.constant 0 : index
    %c0_172 = arith.constant 0 : index
    %c0_173 = arith.constant 0 : index
    %198 = vector.load %arg11[%c0_171, %c0_172, %c0_173] : memref<4x16x64xf32, #tpu.memory_space<vmem>>, vector<1x16x64xf32>
    %199 = vector.shape_cast %198 : vector<1x16x64xf32> to vector<16x64xf32>
    %cst_174 = arith.constant dense<0.000000e+00> : vector<16x32xf32>
    %200 = tpu.matmul %199, %197, %cst_174 {dimension_numbers = #tpu.dot_dimension_numbers<[1], [0], [0], [1], [0, 0, 1, 1], [], []>} : vector<16x64xf32>, vector<64x32xf32>, vector<16x32xf32> -> vector<16x32xf32>
    %c1_175 = arith.constant 1 : index
    %c0_176 = arith.constant 0 : index
    %c0_177 = arith.constant 0 : index
    %201 = vector.load %arg11[%c1_175, %c0_176, %c0_177] : memref<4x16x64xf32, #tpu.memory_space<vmem>>, vector<1x16x64xf32>
    %202 = vector.shape_cast %201 : vector<1x16x64xf32> to vector<16x64xf32>
    %cst_178 = arith.constant dense<0.000000e+00> : vector<16x32xf32>
    %203 = tpu.matmul %202, %197, %cst_178 {dimension_numbers = #tpu.dot_dimension_numbers<[1], [0], [0], [1], [0, 0, 1, 1], [], []>} : vector<16x64xf32>, vector<64x32xf32>, vector<16x32xf32> -> vector<16x32xf32>
    %c2_179 = arith.constant 2 : index
    %c0_180 = arith.constant 0 : index
    %c0_181 = arith.constant 0 : index
    %204 = vector.load %arg11[%c2_179, %c0_180, %c0_181] : memref<4x16x64xf32, #tpu.memory_space<vmem>>, vector<1x16x64xf32>
    %205 = vector.shape_cast %204 : vector<1x16x64xf32> to vector<16x64xf32>
    %cst_182 = arith.constant dense<0.000000e+00> : vector<16x32xf32>
    %206 = tpu.matmul %205, %197, %cst_182 {dimension_numbers = #tpu.dot_dimension_numbers<[1], [0], [0], [1], [0, 0, 1, 1], [], []>} : vector<16x64xf32>, vector<64x32xf32>, vector<16x32xf32> -> vector<16x32xf32>
    %c3_183 = arith.constant 3 : index
    %c0_184 = arith.constant 0 : index
    %c0_185 = arith.constant 0 : index
    %207 = vector.load %arg11[%c3_183, %c0_184, %c0_185] : memref<4x16x64xf32, #tpu.memory_space<vmem>>, vector<1x16x64xf32>
    %208 = vector.shape_cast %207 : vector<1x16x64xf32> to vector<16x64xf32>
    %cst_186 = arith.constant dense<0.000000e+00> : vector<16x32xf32>
    %209 = tpu.matmul %208, %197, %cst_186 {dimension_numbers = #tpu.dot_dimension_numbers<[1], [0], [0], [1], [0, 0, 1, 1], [], []>} : vector<16x64xf32>, vector<64x32xf32>, vector<16x32xf32> -> vector<16x32xf32>
    %210 = arith.maximumf %200, %203 : vector<16x32xf32>
    %211 = arith.maximumf %206, %209 : vector<16x32xf32>
    %212 = arith.maximumf %210, %211 : vector<16x32xf32>
    %cst_187 = arith.constant 0.000000e+00 : f32
    %213 = vector.broadcast %cst_187 : f32 to vector<29x32xf32>
    %c0_188 = arith.constant 0 : index
    %c0_189 = arith.constant 0 : index
    %214 = vector.load %arg25[%c0_188, %c0_189] : memref<29x32xf32, #tpu.memory_space<vmem>>, vector<29x32xf32>
    tpu.vector_store %arg25[%c0_188, %c0_189], %213 {strides = array<i32>} : memref<29x32xf32, #tpu.memory_space<vmem>>, vector<29x32xf32>,
    %c8_190 = arith.constant 8 : index
    %c0_191 = arith.constant 0 : index
    %215 = vector.load %arg25[%c8_190, %c0_191] : memref<29x32xf32, #tpu.memory_space<vmem>>, vector<16x32xf32>
    tpu.vector_store %arg25[%c8_190, %c0_191], %212 {strides = array<i32>} : memref<29x32xf32, #tpu.memory_space<vmem>>, vector<16x32xf32>,
    %cst_192 = arith.constant 0.000000e+00 : f32
    %216 = vector.broadcast %cst_192 : f32 to vector<16x64xf32>
    %c3_193 = arith.constant 3 : index
    %c0_194 = arith.constant 0 : index
    %217 = vector.load %arg25[%c3_193, %c0_194] : memref<29x32xf32, #tpu.memory_space<vmem>>, vector<16x32xf32>
    %c0_195 = arith.constant 0 : index
    %c0_196 = arith.constant 0 : index
    %c0_197 = arith.constant 0 : index
    %218 = vector.load %arg14[%c0_195, %c0_196, %c0_197] : memref<3x16x1xf32, #tpu.memory_space<vmem>>, vector<1x16x1xf32>
    %219 = vector.shape_cast %218 : vector<1x16x1xf32> to vector<16x1xf32>
    %220 = vector.broadcast %219 : vector<16x1xf32> to vector<16x32xf32>
    %221 = arith.mulf %217, %220 : vector<16x32xf32>
    %c0_198 = arith.constant 0 : index
    %c0_199 = arith.constant 0 : index
    %c0_200 = arith.constant 0 : index
    %222 = vector.load %arg12[%c0_198, %c0_199, %c0_200] : memref<9x32x64xf32, #tpu.memory_space<vmem>>, vector<1x32x64xf32>
    %223 = vector.shape_cast %222 : vector<1x32x64xf32> to vector<32x64xf32>
    %cst_201 = arith.constant dense<0.000000e+00> : vector<16x64xf32>
    %224 = tpu.matmul %221, %223, %cst_201 {dimension_numbers = #tpu.dot_dimension_numbers<[1], [0], [0], [1], [0, 0, 1, 1], [], []>} : vector<16x32xf32>, vector<32x64xf32>, vector<16x64xf32> -> vector<16x64xf32>
    %225 = arith.addf %216, %224 : vector<16x64xf32>
    %c4_202 = arith.constant 4 : index
    %c0_203 = arith.constant 0 : index
    %226 = vector.load %arg25[%c4_202, %c0_203] : memref<29x32xf32, #tpu.memory_space<vmem>>, vector<16x32xf32>
    %c1_204 = arith.constant 1 : index
    %c0_205 = arith.constant 0 : index
    %c0_206 = arith.constant 0 : index
    %227 = vector.load %arg12[%c1_204, %c0_205, %c0_206] : memref<9x32x64xf32, #tpu.memory_space<vmem>>, vector<1x32x64xf32>
    %228 = vector.shape_cast %227 : vector<1x32x64xf32> to vector<32x64xf32>
    %cst_207 = arith.constant dense<0.000000e+00> : vector<16x64xf32>
    %229 = tpu.matmul %226, %228, %cst_207 {dimension_numbers = #tpu.dot_dimension_numbers<[1], [0], [0], [1], [0, 0, 1, 1], [], []>} : vector<16x32xf32>, vector<32x64xf32>, vector<16x64xf32> -> vector<16x64xf32>
    %230 = arith.addf %225, %229 : vector<16x64xf32>
    %c5_208 = arith.constant 5 : index
    %c0_209 = arith.constant 0 : index
    %231 = vector.load %arg25[%c5_208, %c0_209] : memref<29x32xf32, #tpu.memory_space<vmem>>, vector<16x32xf32>
    %c2_210 = arith.constant 2 : index
    %c0_211 = arith.constant 0 : index
    %c0_212 = arith.constant 0 : index
    %232 = vector.load %arg14[%c2_210, %c0_211, %c0_212] : memref<3x16x1xf32, #tpu.memory_space<vmem>>, vector<1x16x1xf32>
    %233 = vector.shape_cast %232 : vector<1x16x1xf32> to vector<16x1xf32>
    %234 = vector.broadcast %233 : vector<16x1xf32> to vector<16x32xf32>
    %235 = arith.mulf %231, %234 : vector<16x32xf32>
    %c2_213 = arith.constant 2 : index
    %c0_214 = arith.constant 0 : index
    %c0_215 = arith.constant 0 : index
    %236 = vector.load %arg12[%c2_213, %c0_214, %c0_215] : memref<9x32x64xf32, #tpu.memory_space<vmem>>, vector<1x32x64xf32>
    %237 = vector.shape_cast %236 : vector<1x32x64xf32> to vector<32x64xf32>
    %cst_216 = arith.constant dense<0.000000e+00> : vector<16x64xf32>
    %238 = tpu.matmul %235, %237, %cst_216 {dimension_numbers = #tpu.dot_dimension_numbers<[1], [0], [0], [1], [0, 0, 1, 1], [], []>} : vector<16x32xf32>, vector<32x64xf32>, vector<16x64xf32> -> vector<16x64xf32>
    %239 = arith.addf %230, %238 : vector<16x64xf32>
    %c7_217 = arith.constant 7 : index
    %c0_218 = arith.constant 0 : index
    %240 = vector.load %arg25[%c7_217, %c0_218] : memref<29x32xf32, #tpu.memory_space<vmem>>, vector<16x32xf32>
    %c0_219 = arith.constant 0 : index
    %c0_220 = arith.constant 0 : index
    %c0_221 = arith.constant 0 : index
    %241 = vector.load %arg14[%c0_219, %c0_220, %c0_221] : memref<3x16x1xf32, #tpu.memory_space<vmem>>, vector<1x16x1xf32>
    %242 = vector.shape_cast %241 : vector<1x16x1xf32> to vector<16x1xf32>
    %243 = vector.broadcast %242 : vector<16x1xf32> to vector<16x32xf32>
    %244 = arith.mulf %240, %243 : vector<16x32xf32>
    %c3_222 = arith.constant 3 : index
    %c0_223 = arith.constant 0 : index
    %c0_224 = arith.constant 0 : index
    %245 = vector.load %arg12[%c3_222, %c0_223, %c0_224] : memref<9x32x64xf32, #tpu.memory_space<vmem>>, vector<1x32x64xf32>
    %246 = vector.shape_cast %245 : vector<1x32x64xf32> to vector<32x64xf32>
    %cst_225 = arith.constant dense<0.000000e+00> : vector<16x64xf32>
    %247 = tpu.matmul %244, %246, %cst_225 {dimension_numbers = #tpu.dot_dimension_numbers<[1], [0], [0], [1], [0, 0, 1, 1], [], []>} : vector<16x32xf32>, vector<32x64xf32>, vector<16x64xf32> -> vector<16x64xf32>
    %248 = arith.addf %239, %247 : vector<16x64xf32>
    %c8_226 = arith.constant 8 : index
    %c0_227 = arith.constant 0 : index
    %249 = vector.load %arg25[%c8_226, %c0_227] : memref<29x32xf32, #tpu.memory_space<vmem>>, vector<16x32xf32>
    %c4_228 = arith.constant 4 : index
    %c0_229 = arith.constant 0 : index
    %c0_230 = arith.constant 0 : index
    %250 = vector.load %arg12[%c4_228, %c0_229, %c0_230] : memref<9x32x64xf32, #tpu.memory_space<vmem>>, vector<1x32x64xf32>
    %251 = vector.shape_cast %250 : vector<1x32x64xf32> to vector<32x64xf32>
    %cst_231 = arith.constant dense<0.000000e+00> : vector<16x64xf32>
    %252 = tpu.matmul %249, %251, %cst_231 {dimension_numbers = #tpu.dot_dimension_numbers<[1], [0], [0], [1], [0, 0, 1, 1], [], []>} : vector<16x32xf32>, vector<32x64xf32>, vector<16x64xf32> -> vector<16x64xf32>
    %253 = arith.addf %248, %252 : vector<16x64xf32>
    %c9_232 = arith.constant 9 : index
    %c0_233 = arith.constant 0 : index
    %254 = vector.load %arg25[%c9_232, %c0_233] : memref<29x32xf32, #tpu.memory_space<vmem>>, vector<16x32xf32>
    %c2_234 = arith.constant 2 : index
    %c0_235 = arith.constant 0 : index
    %c0_236 = arith.constant 0 : index
    %255 = vector.load %arg14[%c2_234, %c0_235, %c0_236] : memref<3x16x1xf32, #tpu.memory_space<vmem>>, vector<1x16x1xf32>
    %256 = vector.shape_cast %255 : vector<1x16x1xf32> to vector<16x1xf32>
    %257 = vector.broadcast %256 : vector<16x1xf32> to vector<16x32xf32>
    %258 = arith.mulf %254, %257 : vector<16x32xf32>
    %c5_237 = arith.constant 5 : index
    %c0_238 = arith.constant 0 : index
    %c0_239 = arith.constant 0 : index
    %259 = vector.load %arg12[%c5_237, %c0_238, %c0_239] : memref<9x32x64xf32, #tpu.memory_space<vmem>>, vector<1x32x64xf32>
    %260 = vector.shape_cast %259 : vector<1x32x64xf32> to vector<32x64xf32>
    %cst_240 = arith.constant dense<0.000000e+00> : vector<16x64xf32>
    %261 = tpu.matmul %258, %260, %cst_240 {dimension_numbers = #tpu.dot_dimension_numbers<[1], [0], [0], [1], [0, 0, 1, 1], [], []>} : vector<16x32xf32>, vector<32x64xf32>, vector<16x64xf32> -> vector<16x64xf32>
    %262 = arith.addf %253, %261 : vector<16x64xf32>
    %c11 = arith.constant 11 : index
    %c0_241 = arith.constant 0 : index
    %263 = vector.load %arg25[%c11, %c0_241] : memref<29x32xf32, #tpu.memory_space<vmem>>, vector<16x32xf32>
    %c0_242 = arith.constant 0 : index
    %c0_243 = arith.constant 0 : index
    %c0_244 = arith.constant 0 : index
    %264 = vector.load %arg14[%c0_242, %c0_243, %c0_244] : memref<3x16x1xf32, #tpu.memory_space<vmem>>, vector<1x16x1xf32>
    %265 = vector.shape_cast %264 : vector<1x16x1xf32> to vector<16x1xf32>
    %266 = vector.broadcast %265 : vector<16x1xf32> to vector<16x32xf32>
    %267 = arith.mulf %263, %266 : vector<16x32xf32>
    %c6_245 = arith.constant 6 : index
    %c0_246 = arith.constant 0 : index
    %c0_247 = arith.constant 0 : index
    %268 = vector.load %arg12[%c6_245, %c0_246, %c0_247] : memref<9x32x64xf32, #tpu.memory_space<vmem>>, vector<1x32x64xf32>
    %269 = vector.shape_cast %268 : vector<1x32x64xf32> to vector<32x64xf32>
    %cst_248 = arith.constant dense<0.000000e+00> : vector<16x64xf32>
    %270 = tpu.matmul %267, %269, %cst_248 {dimension_numbers = #tpu.dot_dimension_numbers<[1], [0], [0], [1], [0, 0, 1, 1], [], []>} : vector<16x32xf32>, vector<32x64xf32>, vector<16x64xf32> -> vector<16x64xf32>
    %271 = arith.addf %262, %270 : vector<16x64xf32>
    %c12 = arith.constant 12 : index
    %c0_249 = arith.constant 0 : index
    %272 = vector.load %arg25[%c12, %c0_249] : memref<29x32xf32, #tpu.memory_space<vmem>>, vector<16x32xf32>
    %c7_250 = arith.constant 7 : index
    %c0_251 = arith.constant 0 : index
    %c0_252 = arith.constant 0 : index
    %273 = vector.load %arg12[%c7_250, %c0_251, %c0_252] : memref<9x32x64xf32, #tpu.memory_space<vmem>>, vector<1x32x64xf32>
    %274 = vector.shape_cast %273 : vector<1x32x64xf32> to vector<32x64xf32>
    %cst_253 = arith.constant dense<0.000000e+00> : vector<16x64xf32>
    %275 = tpu.matmul %272, %274, %cst_253 {dimension_numbers = #tpu.dot_dimension_numbers<[1], [0], [0], [1], [0, 0, 1, 1], [], []>} : vector<16x32xf32>, vector<32x64xf32>, vector<16x64xf32> -> vector<16x64xf32>
    %276 = arith.addf %271, %275 : vector<16x64xf32>
    %c13 = arith.constant 13 : index
    %c0_254 = arith.constant 0 : index
    %277 = vector.load %arg25[%c13, %c0_254] : memref<29x32xf32, #tpu.memory_space<vmem>>, vector<16x32xf32>
    %c2_255 = arith.constant 2 : index
    %c0_256 = arith.constant 0 : index
    %c0_257 = arith.constant 0 : index
    %278 = vector.load %arg14[%c2_255, %c0_256, %c0_257] : memref<3x16x1xf32, #tpu.memory_space<vmem>>, vector<1x16x1xf32>
    %279 = vector.shape_cast %278 : vector<1x16x1xf32> to vector<16x1xf32>
    %280 = vector.broadcast %279 : vector<16x1xf32> to vector<16x32xf32>
    %281 = arith.mulf %277, %280 : vector<16x32xf32>
    %c8_258 = arith.constant 8 : index
    %c0_259 = arith.constant 0 : index
    %c0_260 = arith.constant 0 : index
    %282 = vector.load %arg12[%c8_258, %c0_259, %c0_260] : memref<9x32x64xf32, #tpu.memory_space<vmem>>, vector<1x32x64xf32>
    %283 = vector.shape_cast %282 : vector<1x32x64xf32> to vector<32x64xf32>
    %cst_261 = arith.constant dense<0.000000e+00> : vector<16x64xf32>
    %284 = tpu.matmul %281, %283, %cst_261 {dimension_numbers = #tpu.dot_dimension_numbers<[1], [0], [0], [1], [0, 0, 1, 1], [], []>} : vector<16x32xf32>, vector<32x64xf32>, vector<16x64xf32> -> vector<16x64xf32>
    %285 = arith.addf %276, %284 : vector<16x64xf32>
    %c0_262 = arith.constant 0 : index
    %c0_263 = arith.constant 0 : index
    %286 = vector.load %arg13[%c0_262, %c0_263] : memref<1x64xf32, #tpu.memory_space<vmem>>, vector<1x64xf32>
    %287 = vector.broadcast %286 : vector<1x64xf32> to vector<16x64xf32>
    %288 = arith.addf %285, %287 : vector<16x64xf32>
    %cst_264 = arith.constant dense<0.000000e+00> : vector<64xf32>
    %289 = vector.multi_reduction <add>, %288, %cst_264 [0] : vector<16x64xf32> to vector<64xf32>
    %290 = vector.shape_cast %289 : vector<64xf32> to vector<1x64xf32>
    %cst_265 = arith.constant 1.600000e+01 : f32
    %291 = vector.broadcast %cst_265 : f32 to vector<1x64xf32>
    %292 = arith.divf %290, %291 : vector<1x64xf32>
    %293 = vector.broadcast %292 : vector<1x64xf32> to vector<16x64xf32>
    %294 = arith.subf %288, %293 : vector<16x64xf32>
    %295 = arith.mulf %294, %294 : vector<16x64xf32>
    %cst_266 = arith.constant dense<0.000000e+00> : vector<64xf32>
    %296 = vector.multi_reduction <add>, %295, %cst_266 [0] : vector<16x64xf32> to vector<64xf32>
    %297 = vector.shape_cast %296 : vector<64xf32> to vector<1x64xf32>
    %cst_267 = arith.constant 1.600000e+01 : f32
    %298 = vector.broadcast %cst_267 : f32 to vector<1x64xf32>
    %299 = arith.divf %297, %298 : vector<1x64xf32>
    %300 = vector.broadcast %292 : vector<1x64xf32> to vector<16x64xf32>
    %301 = arith.subf %288, %300 : vector<16x64xf32>
    %cst_268 = arith.constant 9.99999974E-6 : f32
    %302 = vector.broadcast %cst_268 : f32 to vector<1x64xf32>
    %303 = arith.addf %299, %302 : vector<1x64xf32>
    %304 = math.rsqrt %303 : vector<1x64xf32>
    %305 = vector.broadcast %304 : vector<1x64xf32> to vector<16x64xf32>
    %306 = arith.mulf %301, %305 : vector<16x64xf32>
    %cst_269 = arith.constant 2.000000e-01 : f32
    %307 = vector.broadcast %cst_269 : f32 to vector<16x64xf32>
    %308 = arith.mulf %307, %306 : vector<16x64xf32>
    %309 = arith.maximumf %306, %308 : vector<16x64xf32>
    %c0_270 = arith.constant 0 : index
    %c0_271 = arith.constant 0 : index
    %c0_272 = arith.constant 0 : index
    %310 = vector.load %arg15[%c0_270, %c0_271, %c0_272] : memref<4x4x16xf32, #tpu.memory_space<vmem>>, vector<1x4x16xf32>
    %311 = vector.shape_cast %310 : vector<1x4x16xf32> to vector<4x16xf32>
    %cst_273 = arith.constant dense<0.000000e+00> : vector<4x64xf32>
    %312 = tpu.matmul %311, %309, %cst_273 {dimension_numbers = #tpu.dot_dimension_numbers<[1], [0], [0], [1], [0, 0, 1, 1], [], []>} : vector<4x16xf32>, vector<16x64xf32>, vector<4x64xf32> -> vector<4x64xf32>
    %c1_274 = arith.constant 1 : index
    %c0_275 = arith.constant 0 : index
    %c0_276 = arith.constant 0 : index
    %313 = vector.load %arg15[%c1_274, %c0_275, %c0_276] : memref<4x4x16xf32, #tpu.memory_space<vmem>>, vector<1x4x16xf32>
    %314 = vector.shape_cast %313 : vector<1x4x16xf32> to vector<4x16xf32>
    %cst_277 = arith.constant dense<0.000000e+00> : vector<4x64xf32>
    %315 = tpu.matmul %314, %309, %cst_277 {dimension_numbers = #tpu.dot_dimension_numbers<[1], [0], [0], [1], [0, 0, 1, 1], [], []>} : vector<4x16xf32>, vector<16x64xf32>, vector<4x64xf32> -> vector<4x64xf32>
    %c2_278 = arith.constant 2 : index
    %c0_279 = arith.constant 0 : index
    %c0_280 = arith.constant 0 : index
    %316 = vector.load %arg15[%c2_278, %c0_279, %c0_280] : memref<4x4x16xf32, #tpu.memory_space<vmem>>, vector<1x4x16xf32>
    %317 = vector.shape_cast %316 : vector<1x4x16xf32> to vector<4x16xf32>
    %cst_281 = arith.constant dense<0.000000e+00> : vector<4x64xf32>
    %318 = tpu.matmul %317, %309, %cst_281 {dimension_numbers = #tpu.dot_dimension_numbers<[1], [0], [0], [1], [0, 0, 1, 1], [], []>} : vector<4x16xf32>, vector<16x64xf32>, vector<4x64xf32> -> vector<4x64xf32>
    %c3_282 = arith.constant 3 : index
    %c0_283 = arith.constant 0 : index
    %c0_284 = arith.constant 0 : index
    %319 = vector.load %arg15[%c3_282, %c0_283, %c0_284] : memref<4x4x16xf32, #tpu.memory_space<vmem>>, vector<1x4x16xf32>
    %320 = vector.shape_cast %319 : vector<1x4x16xf32> to vector<4x16xf32>
    %cst_285 = arith.constant dense<0.000000e+00> : vector<4x64xf32>
    %321 = tpu.matmul %320, %309, %cst_285 {dimension_numbers = #tpu.dot_dimension_numbers<[1], [0], [0], [1], [0, 0, 1, 1], [], []>} : vector<4x16xf32>, vector<16x64xf32>, vector<4x64xf32> -> vector<4x64xf32>
    %322 = arith.maximumf %312, %315 : vector<4x64xf32>
    %323 = arith.maximumf %318, %321 : vector<4x64xf32>
    %324 = arith.maximumf %322, %323 : vector<4x64xf32>
    %cst_286 = arith.constant 0.000000e+00 : f32
    %325 = vector.broadcast %cst_286 : f32 to vector<15x64xf32>
    %c0_287 = arith.constant 0 : index
    %c0_288 = arith.constant 0 : index
    %326 = vector.load %arg26[%c0_287, %c0_288] : memref<15x64xf32, #tpu.memory_space<vmem>>, vector<15x64xf32>
    tpu.vector_store %arg26[%c0_287, %c0_288], %325 {strides = array<i32>} : memref<15x64xf32, #tpu.memory_space<vmem>>, vector<15x64xf32>,
    %c8_289 = arith.constant 8 : index
    %c0_290 = arith.constant 0 : index
    %327 = vector.load %arg26[%c8_289, %c0_290] : memref<15x64xf32, #tpu.memory_space<vmem>>, vector<4x64xf32>
    tpu.vector_store %arg26[%c8_289, %c0_290], %324 {strides = array<i32>} : memref<15x64xf32, #tpu.memory_space<vmem>>, vector<4x64xf32>,
    %cst_291 = arith.constant 0.000000e+00 : f32
    %328 = vector.broadcast %cst_291 : f32 to vector<4x128xf32>
    %c5_292 = arith.constant 5 : index
    %c0_293 = arith.constant 0 : index
    %329 = vector.load %arg26[%c5_292, %c0_293] : memref<15x64xf32, #tpu.memory_space<vmem>>, vector<4x64xf32>
    %c0_294 = arith.constant 0 : index
    %c0_295 = arith.constant 0 : index
    %c0_296 = arith.constant 0 : index
    %330 = vector.load %arg18[%c0_294, %c0_295, %c0_296] : memref<3x4x1xf32, #tpu.memory_space<vmem>>, vector<1x4x1xf32>
    %331 = vector.shape_cast %330 : vector<1x4x1xf32> to vector<4x1xf32>
    %332 = vector.broadcast %331 : vector<4x1xf32> to vector<4x64xf32>
    %333 = arith.mulf %329, %332 : vector<4x64xf32>
    %c0_297 = arith.constant 0 : index
    %c0_298 = arith.constant 0 : index
    %c0_299 = arith.constant 0 : index
    %334 = vector.load %arg16[%c0_297, %c0_298, %c0_299] : memref<9x64x128xf32, #tpu.memory_space<vmem>>, vector<1x64x128xf32>
    %335 = vector.shape_cast %334 : vector<1x64x128xf32> to vector<64x128xf32>
    %cst_300 = arith.constant dense<0.000000e+00> : vector<4x128xf32>
    %336 = tpu.matmul %333, %335, %cst_300 {dimension_numbers = #tpu.dot_dimension_numbers<[1], [0], [0], [1], [0, 0, 1, 1], [], []>} : vector<4x64xf32>, vector<64x128xf32>, vector<4x128xf32> -> vector<4x128xf32>
    %337 = arith.addf %328, %336 : vector<4x128xf32>
    %c6_301 = arith.constant 6 : index
    %c0_302 = arith.constant 0 : index
    %338 = vector.load %arg26[%c6_301, %c0_302] : memref<15x64xf32, #tpu.memory_space<vmem>>, vector<4x64xf32>
    %c1_303 = arith.constant 1 : index
    %c0_304 = arith.constant 0 : index
    %c0_305 = arith.constant 0 : index
    %339 = vector.load %arg16[%c1_303, %c0_304, %c0_305] : memref<9x64x128xf32, #tpu.memory_space<vmem>>, vector<1x64x128xf32>
    %340 = vector.shape_cast %339 : vector<1x64x128xf32> to vector<64x128xf32>
    %cst_306 = arith.constant dense<0.000000e+00> : vector<4x128xf32>
    %341 = tpu.matmul %338, %340, %cst_306 {dimension_numbers = #tpu.dot_dimension_numbers<[1], [0], [0], [1], [0, 0, 1, 1], [], []>} : vector<4x64xf32>, vector<64x128xf32>, vector<4x128xf32> -> vector<4x128xf32>
    %342 = arith.addf %337, %341 : vector<4x128xf32>
    %c7_307 = arith.constant 7 : index
    %c0_308 = arith.constant 0 : index
    %343 = vector.load %arg26[%c7_307, %c0_308] : memref<15x64xf32, #tpu.memory_space<vmem>>, vector<4x64xf32>
    %c2_309 = arith.constant 2 : index
    %c0_310 = arith.constant 0 : index
    %c0_311 = arith.constant 0 : index
    %344 = vector.load %arg18[%c2_309, %c0_310, %c0_311] : memref<3x4x1xf32, #tpu.memory_space<vmem>>, vector<1x4x1xf32>
    %345 = vector.shape_cast %344 : vector<1x4x1xf32> to vector<4x1xf32>
    %346 = vector.broadcast %345 : vector<4x1xf32> to vector<4x64xf32>
    %347 = arith.mulf %343, %346 : vector<4x64xf32>
    %c2_312 = arith.constant 2 : index
    %c0_313 = arith.constant 0 : index
    %c0_314 = arith.constant 0 : index
    %348 = vector.load %arg16[%c2_312, %c0_313, %c0_314] : memref<9x64x128xf32, #tpu.memory_space<vmem>>, vector<1x64x128xf32>
    %349 = vector.shape_cast %348 : vector<1x64x128xf32> to vector<64x128xf32>
    %cst_315 = arith.constant dense<0.000000e+00> : vector<4x128xf32>
    %350 = tpu.matmul %347, %349, %cst_315 {dimension_numbers = #tpu.dot_dimension_numbers<[1], [0], [0], [1], [0, 0, 1, 1], [], []>} : vector<4x64xf32>, vector<64x128xf32>, vector<4x128xf32> -> vector<4x128xf32>
    %351 = arith.addf %342, %350 : vector<4x128xf32>
    %c7_316 = arith.constant 7 : index
    %c0_317 = arith.constant 0 : index
    %352 = vector.load %arg26[%c7_316, %c0_317] : memref<15x64xf32, #tpu.memory_space<vmem>>, vector<4x64xf32>
    %c0_318 = arith.constant 0 : index
    %c0_319 = arith.constant 0 : index
    %c0_320 = arith.constant 0 : index
    %353 = vector.load %arg18[%c0_318, %c0_319, %c0_320] : memref<3x4x1xf32, #tpu.memory_space<vmem>>, vector<1x4x1xf32>
    %354 = vector.shape_cast %353 : vector<1x4x1xf32> to vector<4x1xf32>
    %355 = vector.broadcast %354 : vector<4x1xf32> to vector<4x64xf32>
    %356 = arith.mulf %352, %355 : vector<4x64xf32>
    %c3_321 = arith.constant 3 : index
    %c0_322 = arith.constant 0 : index
    %c0_323 = arith.constant 0 : index
    %357 = vector.load %arg16[%c3_321, %c0_322, %c0_323] : memref<9x64x128xf32, #tpu.memory_space<vmem>>, vector<1x64x128xf32>
    %358 = vector.shape_cast %357 : vector<1x64x128xf32> to vector<64x128xf32>
    %cst_324 = arith.constant dense<0.000000e+00> : vector<4x128xf32>
    %359 = tpu.matmul %356, %358, %cst_324 {dimension_numbers = #tpu.dot_dimension_numbers<[1], [0], [0], [1], [0, 0, 1, 1], [], []>} : vector<4x64xf32>, vector<64x128xf32>, vector<4x128xf32> -> vector<4x128xf32>
    %360 = arith.addf %351, %359 : vector<4x128xf32>
    %c8_325 = arith.constant 8 : index
    %c0_326 = arith.constant 0 : index
    %361 = vector.load %arg26[%c8_325, %c0_326] : memref<15x64xf32, #tpu.memory_space<vmem>>, vector<4x64xf32>
    %c4_327 = arith.constant 4 : index
    %c0_328 = arith.constant 0 : index
    %c0_329 = arith.constant 0 : index
    %362 = vector.load %arg16[%c4_327, %c0_328, %c0_329] : memref<9x64x128xf32, #tpu.memory_space<vmem>>, vector<1x64x128xf32>
    %363 = vector.shape_cast %362 : vector<1x64x128xf32> to vector<64x128xf32>
    %cst_330 = arith.constant dense<0.000000e+00> : vector<4x128xf32>
    %364 = tpu.matmul %361, %363, %cst_330 {dimension_numbers = #tpu.dot_dimension_numbers<[1], [0], [0], [1], [0, 0, 1, 1], [], []>} : vector<4x64xf32>, vector<64x128xf32>, vector<4x128xf32> -> vector<4x128xf32>
    %365 = arith.addf %360, %364 : vector<4x128xf32>
    %c9_331 = arith.constant 9 : index
    %c0_332 = arith.constant 0 : index
    %366 = vector.load %arg26[%c9_331, %c0_332] : memref<15x64xf32, #tpu.memory_space<vmem>>, vector<4x64xf32>
    %c2_333 = arith.constant 2 : index
    %c0_334 = arith.constant 0 : index
    %c0_335 = arith.constant 0 : index
    %367 = vector.load %arg18[%c2_333, %c0_334, %c0_335] : memref<3x4x1xf32, #tpu.memory_space<vmem>>, vector<1x4x1xf32>
    %368 = vector.shape_cast %367 : vector<1x4x1xf32> to vector<4x1xf32>
    %369 = vector.broadcast %368 : vector<4x1xf32> to vector<4x64xf32>
    %370 = arith.mulf %366, %369 : vector<4x64xf32>
    %c5_336 = arith.constant 5 : index
    %c0_337 = arith.constant 0 : index
    %c0_338 = arith.constant 0 : index
    %371 = vector.load %arg16[%c5_336, %c0_337, %c0_338] : memref<9x64x128xf32, #tpu.memory_space<vmem>>, vector<1x64x128xf32>
    %372 = vector.shape_cast %371 : vector<1x64x128xf32> to vector<64x128xf32>
    %cst_339 = arith.constant dense<0.000000e+00> : vector<4x128xf32>
    %373 = tpu.matmul %370, %372, %cst_339 {dimension_numbers = #tpu.dot_dimension_numbers<[1], [0], [0], [1], [0, 0, 1, 1], [], []>} : vector<4x64xf32>, vector<64x128xf32>, vector<4x128xf32> -> vector<4x128xf32>
    %374 = arith.addf %365, %373 : vector<4x128xf32>
    %c9_340 = arith.constant 9 : index
    %c0_341 = arith.constant 0 : index
    %375 = vector.load %arg26[%c9_340, %c0_341] : memref<15x64xf32, #tpu.memory_space<vmem>>, vector<4x64xf32>
    %c0_342 = arith.constant 0 : index
    %c0_343 = arith.constant 0 : index
    %c0_344 = arith.constant 0 : index
    %376 = vector.load %arg18[%c0_342, %c0_343, %c0_344] : memref<3x4x1xf32, #tpu.memory_space<vmem>>, vector<1x4x1xf32>
    %377 = vector.shape_cast %376 : vector<1x4x1xf32> to vector<4x1xf32>
    %378 = vector.broadcast %377 : vector<4x1xf32> to vector<4x64xf32>
    %379 = arith.mulf %375, %378 : vector<4x64xf32>
    %c6_345 = arith.constant 6 : index
    %c0_346 = arith.constant 0 : index
    %c0_347 = arith.constant 0 : index
    %380 = vector.load %arg16[%c6_345, %c0_346, %c0_347] : memref<9x64x128xf32, #tpu.memory_space<vmem>>, vector<1x64x128xf32>
    %381 = vector.shape_cast %380 : vector<1x64x128xf32> to vector<64x128xf32>
    %cst_348 = arith.constant dense<0.000000e+00> : vector<4x128xf32>
    %382 = tpu.matmul %379, %381, %cst_348 {dimension_numbers = #tpu.dot_dimension_numbers<[1], [0], [0], [1], [0, 0, 1, 1], [], []>} : vector<4x64xf32>, vector<64x128xf32>, vector<4x128xf32> -> vector<4x128xf32>
    %383 = arith.addf %374, %382 : vector<4x128xf32>
    %c10 = arith.constant 10 : index
    %c0_349 = arith.constant 0 : index
    %384 = vector.load %arg26[%c10, %c0_349] : memref<15x64xf32, #tpu.memory_space<vmem>>, vector<4x64xf32>
    %c7_350 = arith.constant 7 : index
    %c0_351 = arith.constant 0 : index
    %c0_352 = arith.constant 0 : index
    %385 = vector.load %arg16[%c7_350, %c0_351, %c0_352] : memref<9x64x128xf32, #tpu.memory_space<vmem>>, vector<1x64x128xf32>
    %386 = vector.shape_cast %385 : vector<1x64x128xf32> to vector<64x128xf32>
    %cst_353 = arith.constant dense<0.000000e+00> : vector<4x128xf32>
    %387 = tpu.matmul %384, %386, %cst_353 {dimension_numbers = #tpu.dot_dimension_numbers<[1], [0], [0], [1], [0, 0, 1, 1], [], []>} : vector<4x64xf32>, vector<64x128xf32>, vector<4x128xf32> -> vector<4x128xf32>
    %388 = arith.addf %383, %387 : vector<4x128xf32>
    %c11_354 = arith.constant 11 : index
    %c0_355 = arith.constant 0 : index
    %389 = vector.load %arg26[%c11_354, %c0_355] : memref<15x64xf32, #tpu.memory_space<vmem>>, vector<4x64xf32>
    %c2_356 = arith.constant 2 : index
    %c0_357 = arith.constant 0 : index
    %c0_358 = arith.constant 0 : index
    %390 = vector.load %arg18[%c2_356, %c0_357, %c0_358] : memref<3x4x1xf32, #tpu.memory_space<vmem>>, vector<1x4x1xf32>
    %391 = vector.shape_cast %390 : vector<1x4x1xf32> to vector<4x1xf32>
    %392 = vector.broadcast %391 : vector<4x1xf32> to vector<4x64xf32>
    %393 = arith.mulf %389, %392 : vector<4x64xf32>
    %c8_359 = arith.constant 8 : index
    %c0_360 = arith.constant 0 : index
    %c0_361 = arith.constant 0 : index
    %394 = vector.load %arg16[%c8_359, %c0_360, %c0_361] : memref<9x64x128xf32, #tpu.memory_space<vmem>>, vector<1x64x128xf32>
    %395 = vector.shape_cast %394 : vector<1x64x128xf32> to vector<64x128xf32>
    %cst_362 = arith.constant dense<0.000000e+00> : vector<4x128xf32>
    %396 = tpu.matmul %393, %395, %cst_362 {dimension_numbers = #tpu.dot_dimension_numbers<[1], [0], [0], [1], [0, 0, 1, 1], [], []>} : vector<4x64xf32>, vector<64x128xf32>, vector<4x128xf32> -> vector<4x128xf32>
    %397 = arith.addf %388, %396 : vector<4x128xf32>
    %c0_363 = arith.constant 0 : index
    %c0_364 = arith.constant 0 : index
    %398 = vector.load %arg17[%c0_363, %c0_364] : memref<1x128xf32, #tpu.memory_space<vmem>>, vector<1x128xf32>
    %399 = vector.broadcast %398 : vector<1x128xf32> to vector<4x128xf32>
    %400 = arith.addf %397, %399 : vector<4x128xf32>
    %cst_365 = arith.constant dense<0.000000e+00> : vector<128xf32>
    %401 = vector.multi_reduction <add>, %400, %cst_365 [0] : vector<4x128xf32> to vector<128xf32>
    %402 = vector.shape_cast %401 : vector<128xf32> to vector<1x128xf32>
    %cst_366 = arith.constant 4.000000e+00 : f32
    %403 = vector.broadcast %cst_366 : f32 to vector<1x128xf32>
    %404 = arith.divf %402, %403 : vector<1x128xf32>
    %405 = vector.broadcast %404 : vector<1x128xf32> to vector<4x128xf32>
    %406 = arith.subf %400, %405 : vector<4x128xf32>
    %407 = arith.mulf %406, %406 : vector<4x128xf32>
    %cst_367 = arith.constant dense<0.000000e+00> : vector<128xf32>
    %408 = vector.multi_reduction <add>, %407, %cst_367 [0] : vector<4x128xf32> to vector<128xf32>
    %409 = vector.shape_cast %408 : vector<128xf32> to vector<1x128xf32>
    %cst_368 = arith.constant 4.000000e+00 : f32
    %410 = vector.broadcast %cst_368 : f32 to vector<1x128xf32>
    %411 = arith.divf %409, %410 : vector<1x128xf32>
    %412 = vector.broadcast %404 : vector<1x128xf32> to vector<4x128xf32>
    %413 = arith.subf %400, %412 : vector<4x128xf32>
    %cst_369 = arith.constant 9.99999974E-6 : f32
    %414 = vector.broadcast %cst_369 : f32 to vector<1x128xf32>
    %415 = arith.addf %411, %414 : vector<1x128xf32>
    %416 = math.rsqrt %415 : vector<1x128xf32>
    %417 = vector.broadcast %416 : vector<1x128xf32> to vector<4x128xf32>
    %418 = arith.mulf %413, %417 : vector<4x128xf32>
    %cst_370 = arith.constant 2.000000e-01 : f32
    %419 = vector.broadcast %cst_370 : f32 to vector<4x128xf32>
    %420 = arith.mulf %419, %418 : vector<4x128xf32>
    %421 = arith.maximumf %418, %420 : vector<4x128xf32>
    %c0_371 = arith.constant 0 : index
    %c0_372 = arith.constant 0 : index
    %c0_373 = arith.constant 0 : index
    %422 = vector.load %arg19[%c0_371, %c0_372, %c0_373] : memref<4x1x4xf32, #tpu.memory_space<vmem>>, vector<1x1x4xf32>
    %423 = vector.shape_cast %422 : vector<1x1x4xf32> to vector<1x4xf32>
    %cst_374 = arith.constant dense<0.000000e+00> : vector<1x128xf32>
    %424 = tpu.matmul %423, %421, %cst_374 {dimension_numbers = #tpu.dot_dimension_numbers<[1], [0], [0], [1], [0, 0, 1, 1], [], []>} : vector<1x4xf32>, vector<4x128xf32>, vector<1x128xf32> -> vector<1x128xf32>
    %c1_375 = arith.constant 1 : index
    %c0_376 = arith.constant 0 : index
    %c0_377 = arith.constant 0 : index
    %425 = vector.load %arg19[%c1_375, %c0_376, %c0_377] : memref<4x1x4xf32, #tpu.memory_space<vmem>>, vector<1x1x4xf32>
    %426 = vector.shape_cast %425 : vector<1x1x4xf32> to vector<1x4xf32>
    %cst_378 = arith.constant dense<0.000000e+00> : vector<1x128xf32>
    %427 = tpu.matmul %426, %421, %cst_378 {dimension_numbers = #tpu.dot_dimension_numbers<[1], [0], [0], [1], [0, 0, 1, 1], [], []>} : vector<1x4xf32>, vector<4x128xf32>, vector<1x128xf32> -> vector<1x128xf32>
    %c2_379 = arith.constant 2 : index
    %c0_380 = arith.constant 0 : index
    %c0_381 = arith.constant 0 : index
    %428 = vector.load %arg19[%c2_379, %c0_380, %c0_381] : memref<4x1x4xf32, #tpu.memory_space<vmem>>, vector<1x1x4xf32>
    %429 = vector.shape_cast %428 : vector<1x1x4xf32> to vector<1x4xf32>
    %cst_382 = arith.constant dense<0.000000e+00> : vector<1x128xf32>
    %430 = tpu.matmul %429, %421, %cst_382 {dimension_numbers = #tpu.dot_dimension_numbers<[1], [0], [0], [1], [0, 0, 1, 1], [], []>} : vector<1x4xf32>, vector<4x128xf32>, vector<1x128xf32> -> vector<1x128xf32>
    %c3_383 = arith.constant 3 : index
    %c0_384 = arith.constant 0 : index
    %c0_385 = arith.constant 0 : index
    %431 = vector.load %arg19[%c3_383, %c0_384, %c0_385] : memref<4x1x4xf32, #tpu.memory_space<vmem>>, vector<1x1x4xf32>
    %432 = vector.shape_cast %431 : vector<1x1x4xf32> to vector<1x4xf32>
    %cst_386 = arith.constant dense<0.000000e+00> : vector<1x128xf32>
    %433 = tpu.matmul %432, %421, %cst_386 {dimension_numbers = #tpu.dot_dimension_numbers<[1], [0], [0], [1], [0, 0, 1, 1], [], []>} : vector<1x4xf32>, vector<4x128xf32>, vector<1x128xf32> -> vector<1x128xf32>
    %434 = arith.maximumf %424, %427 : vector<1x128xf32>
    %435 = arith.maximumf %430, %433 : vector<1x128xf32>
    %436 = arith.maximumf %434, %435 : vector<1x128xf32>
    %c0_387 = arith.constant 0 : index
    %c0_388 = arith.constant 0 : index
    %437 = vector.load %arg20[%c0_387, %c0_388] : memref<1x128xf32, #tpu.memory_space<vmem>>, vector<1x128xf32>
    %438 = arith.mulf %436, %437 : vector<1x128xf32>
    %cst_389 = arith.constant dense<0.000000e+00> : vector<1xf32>
    %439 = vector.multi_reduction <add>, %438, %cst_389 [1] : vector<1x128xf32> to vector<1xf32>
    %440 = vector.shape_cast %439 : vector<1xf32> to vector<1x1xf32>
    %c0_390 = arith.constant 0 : index
    %c0_391 = arith.constant 0 : index
    %441 = vector.load %arg21[%c0_390, %c0_391] : memref<1x1xf32, #tpu.memory_space<vmem>>, vector<1x1xf32>
    %442 = arith.addf %440, %441 : vector<1x1xf32>
    %c0_392 = arith.constant 0 : index
    %c0_393 = arith.constant 0 : index
    %c0_394 = arith.constant 0 : index
    %443 = vector.load %arg22[%c0_392, %c0_393, %c0_394] : memref<1x1x1xf32, #tpu.memory_space<vmem>>, vector<1x1x1xf32>
    %444 = vector.shape_cast %443 : vector<1x1x1xf32> to vector<1x1xf32>
    %445 = vector.shape_cast %442 : vector<1x1xf32> to vector<1x1x1xf32>
    tpu.vector_store %arg22[%c0_392, %c0_393, %c0_394], %445 {strides = array<i32>} : memref<1x1x1xf32, #tpu.memory_space<vmem>>, vector<1x1x1xf32>,
    return
  }
  func.func @transform_0(%arg0: i32) -> (i32, i32, i32) {
    %c0_i32 = arith.constant 0 : i32
    %c0_i32_0 = arith.constant 0 : i32
    %c0_i32_1 = arith.constant 0 : i32
    return %arg0, %c0_i32, %c0_i32_0 : i32, i32, i32
  }
  func.func @transform_1(%arg0: i32) -> (i32, i32) {
    %c0_i32 = arith.constant 0 : i32
    %c0_i32_0 = arith.constant 0 : i32
    %c0_i32_1 = arith.constant 0 : i32
    return %c0_i32, %c0_i32_0 : i32, i32
  }
  func.func @transform_2(%arg0: i32) -> (i32, i32) {
    %c0_i32 = arith.constant 0 : i32
    %c0_i32_0 = arith.constant 0 : i32
    %c0_i32_1 = arith.constant 0 : i32
    return %c0_i32, %c0_i32_0 : i32, i32
  }
  func.func @transform_3(%arg0: i32) -> (i32, i32, i32) {
    %c0_i32 = arith.constant 0 : i32
    %c0_i32_0 = arith.constant 0 : i32
    %c0_i32_1 = arith.constant 0 : i32
    %c0_i32_2 = arith.constant 0 : i32
    return %c0_i32, %c0_i32_0, %c0_i32_1 : i32, i32, i32
  }
  func.func @transform_4(%arg0: i32) -> (i32, i32) {
    %c0_i32 = arith.constant 0 : i32
    %c0_i32_0 = arith.constant 0 : i32
    %c0_i32_1 = arith.constant 0 : i32
    return %c0_i32, %c0_i32_0 : i32, i32
  }
  func.func @transform_5(%arg0: i32) -> (i32, i32, i32) {
    %c0_i32 = arith.constant 0 : i32
    %c0_i32_0 = arith.constant 0 : i32
    %c0_i32_1 = arith.constant 0 : i32
    %c0_i32_2 = arith.constant 0 : i32
    return %c0_i32, %c0_i32_0, %c0_i32_1 : i32, i32, i32
  }
  func.func @transform_6(%arg0: i32) -> (i32, i32, i32) {
    %c0_i32 = arith.constant 0 : i32
    %c0_i32_0 = arith.constant 0 : i32
    %c0_i32_1 = arith.constant 0 : i32
    %c0_i32_2 = arith.constant 0 : i32
    return %c0_i32, %c0_i32_0, %c0_i32_1 : i32, i32, i32
  }
  func.func @transform_7(%arg0: i32) -> (i32, i32, i32) {
    %c0_i32 = arith.constant 0 : i32
    %c0_i32_0 = arith.constant 0 : i32
    %c0_i32_1 = arith.constant 0 : i32
    %c0_i32_2 = arith.constant 0 : i32
    return %c0_i32, %c0_i32_0, %c0_i32_1 : i32, i32, i32
  }
  func.func @transform_8(%arg0: i32) -> (i32, i32) {
    %c0_i32 = arith.constant 0 : i32
    %c0_i32_0 = arith.constant 0 : i32
    %c0_i32_1 = arith.constant 0 : i32
    return %c0_i32, %c0_i32_0 : i32, i32
  }
  func.func @transform_9(%arg0: i32) -> (i32, i32, i32) {
    %c0_i32 = arith.constant 0 : i32
    %c0_i32_0 = arith.constant 0 : i32
    %c0_i32_1 = arith.constant 0 : i32
    %c0_i32_2 = arith.constant 0 : i32
    return %c0_i32, %c0_i32_0, %c0_i32_1 : i32, i32, i32
  }
  func.func @transform_10(%arg0: i32) -> (i32, i32, i32) {
    %c0_i32 = arith.constant 0 : i32
    %c0_i32_0 = arith.constant 0 : i32
    %c0_i32_1 = arith.constant 0 : i32
    %c0_i32_2 = arith.constant 0 : i32
    return %c0_i32, %c0_i32_0, %c0_i32_1 : i32, i32, i32
  }
  func.func @transform_11(%arg0: i32) -> (i32, i32, i32) {
    %c0_i32 = arith.constant 0 : i32
    %c0_i32_0 = arith.constant 0 : i32
    %c0_i32_1 = arith.constant 0 : i32
    %c0_i32_2 = arith.constant 0 : i32
    return %c0_i32, %c0_i32_0, %c0_i32_1 : i32, i32, i32
  }
  func.func @transform_12(%arg0: i32) -> (i32, i32) {
    %c0_i32 = arith.constant 0 : i32
    %c0_i32_0 = arith.constant 0 : i32
    %c0_i32_1 = arith.constant 0 : i32
    return %c0_i32, %c0_i32_0 : i32, i32
  }
  func.func @transform_13(%arg0: i32) -> (i32, i32, i32) {
    %c0_i32 = arith.constant 0 : i32
    %c0_i32_0 = arith.constant 0 : i32
    %c0_i32_1 = arith.constant 0 : i32
    %c0_i32_2 = arith.constant 0 : i32
    return %c0_i32, %c0_i32_0, %c0_i32_1 : i32, i32, i32
  }
  func.func @transform_14(%arg0: i32) -> (i32, i32, i32) {
    %c0_i32 = arith.constant 0 : i32
    %c0_i32_0 = arith.constant 0 : i32
    %c0_i32_1 = arith.constant 0 : i32
    %c0_i32_2 = arith.constant 0 : i32
    return %c0_i32, %c0_i32_0, %c0_i32_1 : i32, i32, i32
  }
  func.func @transform_15(%arg0: i32) -> (i32, i32, i32) {
    %c0_i32 = arith.constant 0 : i32
    %c0_i32_0 = arith.constant 0 : i32
    %c0_i32_1 = arith.constant 0 : i32
    %c0_i32_2 = arith.constant 0 : i32
    return %c0_i32, %c0_i32_0, %c0_i32_1 : i32, i32, i32
  }
  func.func @transform_16(%arg0: i32) -> (i32, i32) {
    %c0_i32 = arith.constant 0 : i32
    %c0_i32_0 = arith.constant 0 : i32
    %c0_i32_1 = arith.constant 0 : i32
    return %c0_i32, %c0_i32_0 : i32, i32
  }
  func.func @transform_17(%arg0: i32) -> (i32, i32, i32) {
    %c0_i32 = arith.constant 0 : i32
    %c0_i32_0 = arith.constant 0 : i32
    %c0_i32_1 = arith.constant 0 : i32
    %c0_i32_2 = arith.constant 0 : i32
    return %c0_i32, %c0_i32_0, %c0_i32_1 : i32, i32, i32
  }
  func.func @transform_18(%arg0: i32) -> (i32, i32, i32) {
    %c0_i32 = arith.constant 0 : i32
    %c0_i32_0 = arith.constant 0 : i32
    %c0_i32_1 = arith.constant 0 : i32
    %c0_i32_2 = arith.constant 0 : i32
    return %c0_i32, %c0_i32_0, %c0_i32_1 : i32, i32, i32
  }
  func.func @transform_19(%arg0: i32) -> (i32, i32) {
    %c0_i32 = arith.constant 0 : i32
    %c0_i32_0 = arith.constant 0 : i32
    %c0_i32_1 = arith.constant 0 : i32
    return %c0_i32, %c0_i32_0 : i32, i32
  }
  func.func @transform_20(%arg0: i32) -> (i32, i32) {
    %c0_i32 = arith.constant 0 : i32
    %c0_i32_0 = arith.constant 0 : i32
    %c0_i32_1 = arith.constant 0 : i32
    return %c0_i32, %c0_i32_0 : i32, i32
  }
  func.func @transform_21(%arg0: i32) -> (i32, i32, i32) {
    %c0_i32 = arith.constant 0 : i32
    %c0_i32_0 = arith.constant 0 : i32
    %c0_i32_1 = arith.constant 0 : i32
    return %arg0, %c0_i32, %c0_i32_0 : i32, i32, i32
  }
}

</mosaic_0001>

<bundles_post_ra>
// kernel: discriminator_whole.1
= control target key start
LH: loop header
LB: loop body
LE: loop exit
PB: predicated region body
PF: predicated region fallthrough
CT: control target
= control target key end

     0   :  { %s16558_s0 = inlined_call_operand.vmem [shape: f32[2,256,4], index: 0, kind: input, shape index: {}]   ;;  %s16559_s1 = inlined_call_operand.vmem [shape: f32[4,8], index: 1, kind: input, shape index: {}]   ;;  %s16560_s2 = inlined_call_operand.vmem [shape: f32[1,8], index: 2, kind: input, shape index: {}]   ;;  %s16561_s3 = inlined_call_operand.hbm [shape: f32[9,8,16], index: 3, kind: input, shape index: {}]   ;;  %s16562_s4 = inlined_call_operand.hbm [shape: f32[1,16], index: 4, kind: input, shape index: {}]   ;;  %s16563_s5 = inlined_call_operand.vmem [shape: f32[3,256,1], index: 5, kind: input, shape index: {}]   ;;  %s16564_s6 = inlined_call_operand.hbm [shape: f32[4,64,256], index: 6, kind: input, shape index: {}]   ;;  %s16565_s7 = inlined_call_operand.vmem [shape: f32[9,16,32], index: 7, kind: input, shape index: {}]   ;;  %s16566_s8 = inlined_call_operand.hbm [shape: f32[1,32], index: 8, kind: input, shape index: {}]   ;;  %s16567_s9 = inlined_call_operand.hbm [shape: f32[3,64,1], index: 9, kind: input, shape index: {}]   ;;  %s16568_s10 = inlined_call_operand.hbm [shape: f32[4,16,64], index: 10, kind: input, shape index: {}]   ;;  %s16569_s11 = inlined_call_operand.hbm [shape: f32[9,32,64], index: 11, kind: input, shape index: {}]   ;;  %s16570_s12 = inlined_call_operand.hbm [shape: f32[1,64], index: 12, kind: input, shape index: {}]   ;;  %s16571_s13 = inlined_call_operand.hbm [shape: f32[3,16,1], index: 13, kind: input, shape index: {}]   ;;  %s16572_s14 = inlined_call_operand.vmem [shape: f32[4,4,16], index: 14, kind: input, shape index: {}]   ;;  %s16573_s15 = inlined_call_operand.hbm [shape: f32[9,64,128], index: 15, kind: input, shape index: {}]   ;;  %s16574_s16 = inlined_call_operand.hbm [shape: f32[1,128], index: 16, kind: input, shape index: {}]   ;;  %s16575_s17 = inlined_call_operand.vmem [shape: f32[3,4,1], index: 17, kind: input, shape index: {}]   ;;  %s16576_s18 = inlined_call_operand.vmem [shape: f32[4,1,4], index: 18, kind: input, shape index: {}]   ;;  %s16577_s19 = inlined_call_operand.hbm [shape: f32[1,128], index: 19, kind: input, shape index: {}]   ;;  %s16578_s20 = inlined_call_operand.<no memory space> [shape: f32[1,1], index: 20, kind: input, shape index: {}]   ;;  %s16579_s21 = inlined_call_operand.vmem [shape: f32[2,1,1], index: 21, kind: output, shape index: {}]  }
   0x1   :  { %16699 = sst [smem:[#allocation135_spill]] %s16558_s0  ;;  %v26_v0 = vstv %s16578_s20 }
   0x2   :  { %16700 = sst [smem:[#allocation136_spill]] %s16559_s1  ;;  %27 = vst [vmem:[#allocation6] sm:$0x1] %v26_v0 }
   0x3   :  { %16701 = sst [smem:[#allocation137_spill]] %s16560_s2 }
   0x4   :  { %16702 = sst [smem:[#allocation138_spill]] %s16561_s3 }
   0x5   :  { %16703 = sst [smem:[#allocation139_spill]] %s16562_s4 }
   0x6   :  { %16704 = sst [smem:[#allocation140_spill]] %s16563_s5 }
   0x7   :  { %16705 = sst [smem:[#allocation141_spill]] %s16566_s8 }
   0x8   :  { %28 = vsyncpa [#allocation8], 0 }
   0x9   :  { %29 = vsyncpa [#allocation10], 0 }
   0xa   :  { %30 = vsyncpa [#allocation13], 0 }
   0xb   :  { %31 = vsyncpa [#allocation16], 0 }
   0xc   :  { %32 = vsyncpa [#allocation19], 0 }
   0xd   :  { %33 = vsyncpa [#allocation22], 0 }
   0xe   :  { %34 = vsyncpa [#allocation25], 0  ;;  %s13308_s26 = smov 0  }
   0xf LB: > { %s13176_s27 = smov [#allocation9]   ;;  %s13314_s3 = sadd.s32 4294967295, %s13174_s26   ;;  %s13174_s26 = sphi %s13308_s26, %s40_s26  }
  0x10   : > { %s549_s20 = sshll.u32 %s13176_s27, 4  ;;  %p10275_p0 = scmp.ge.s32.totalorder %s13174_s26, 1  ;;  %s550_s20 = int_to_ptr.vmem [resolvable:$true] %s549_s20 }
  0x11   : > { %p517_p1 = scmp.lt.s32.totalorder %s13174_s26, 3  ;;  %p12769_p2 = scmp.eq.s32.totalorder %s13314_s3, 0 }
  0x12   : > { %s13177_s29 = smov [#allocation12]   ;;  %s13178_s30 = smov [#allocation15]  }
  0x13   : > { %p13319_p3 = pnand %p10275_p0, %p517_p1  ;;  %s579_s0 = sshll.u32 %s13177_s29, 4  ;;  %s13325_s0 = int_to_ptr.vmem [resolvable:$true] %s579_s0 }
  0x14   : > { %s602_s5 = sshll.u32 %s13178_s30, 4  ;;  %s13179_s22 = smov [#allocation18]   ;;  %s13333_s5 = int_to_ptr.vmem [resolvable:$true] %s602_s5 }
  0x15   : > { %p12732_p4 = pneg %p13319_p3  ;;  %s13335_s23 = sshll.u32 %s13179_s22, 4  ;;  %s630_s23 = int_to_ptr.vmem [resolvable:$true] %s13335_s23 }
  0x16   : > { %s12839_s24 = scalar_lea.vmem %s550_s20, 16  ;;  %s12846_s2 = scalar_lea.vmem %s550_s20, 32 }
  0x17   : > { %p13329_p5 = pnand %p12769_p2, %p12732_p4  ;;  %p12840_p7 = scmp.ne.s32.totalorder %s550_s20, %s12839_s24 }
  0x18   : > { %p12847_p10 = scmp.lt.s32.totalorder %s550_s20, %s550_s20  ;;  %p12848_p11 = scmp.lt.s32.totalorder %s12846_s2, %s12839_s24 }
  0x19   : > { %p13339_p6 = pneg %p13329_p5 }
  0x1a   : > { %p12849_p12 = por %p12848_p11, %p12847_p10 }
  0x1b   : > { %p12842_p8 = pnand %p12840_p7, %p13339_p6 }
  0x1d   : > { %p12843_p9 = pneg %p12842_p8 }
  0x1f   : > { %p12850_p13 = pnand %p12849_p12, %p12843_p9 }
  0x21   : > { %12853 = shalt.err (!%p12850_p13)
}
  0x22   : > { %s16709_s29 = sld [smem:[#allocation139_spill]]  ;;  %s12865_s30 = scalar_lea.vmem %s13325_s0, 16 }
  0x23   : > { %p12866_p0 = scmp.ne.s32.totalorder %s13325_s0, %s12865_s30  ;;  %s12872_s22 = scalar_lea.vmem %s13325_s0, 32 }
  0x24   : > { %p12873_p7 = scmp.lt.s32.totalorder %s13325_s0, %s13325_s0  ;;  %p12874_p8 = scmp.lt.s32.totalorder %s12872_s22, %s12865_s30 }
  0x25   : > { %p12868_p1 = pnand %p12866_p0, %p13339_p6 }
  0x26   : > { %p12875_p9 = por %p12874_p8, %p12873_p7 }
  0x27   : > { %p12869_p4 = pneg %p12868_p1 }
  0x28   : > { %12738 = dma.hbm_to_vmem [thread:$0]  (!%p13329_p5), %s16709_s29, 16, %s550_s20, [#allocation10]  }
  0x29   : > { %p12876_p10 = pnand %p12875_p9, %p12869_p4 }
  0x2b   : > { %12879 = shalt.err (!%p12876_p10)
}
  0x2c   : > { %s16710_s8 = sld [smem:[#allocation141_spill]]  ;;  %s12891_s20 = scalar_lea.vmem %s13333_s5, 1024 }
  0x2d   : > { %p12892_p11 = scmp.ne.s32.totalorder %s13333_s5, %s12891_s20  ;;  %p12899_p0 = scmp.lt.s32.totalorder %s13333_s5, %s13333_s5 }
  0x2e   : > { %p12900_p1 = scmp.lt.s32.totalorder %s12891_s20, %s12891_s20 }
  0x2f   : > { %p12894_p12 = pnand %p12892_p11, %p13339_p6 }
  0x30   : > { %p12901_p4 = por %p12900_p1, %p12899_p0 }
  0x31   : > { %p12895_p13 = pneg %p12894_p12 }
  0x32   : > { %12744 = dma.hbm_to_vmem [thread:$0]  (!%p13329_p5), %s16710_s8, 16, %s13325_s0, [#allocation13]  }
  0x33   : > { %p12902_p7 = pnand %p12901_p4, %p12895_p13 }
  0x35   : > { %12905 = shalt.err (!%p12902_p7)
}
  0x36   : > { %s16581_s25 = smov 128   ;;  %s16583_s27 = smov 8  }
  0x37   : > { %12750 = dma.hbm_to_vmem [thread:$0]  (!%p13329_p5), %s16568_s10, 1024, %s13333_s5, [#allocation16], %s16581_s25, %s16581_s25, %s16583_s27  }
  0x38   : > { %s12917_s30 = scalar_lea.vmem %s630_s23, 16  ;;  %s12924_s22 = scalar_lea.vmem %s630_s23, 32 }
  0x39   : > { %p12918_p8 = scmp.ne.s32.totalorder %s630_s23, %s12917_s30  ;;  %p12925_p11 = scmp.lt.s32.totalorder %s630_s23, %s630_s23 }
  0x3a   : > { %p12926_p12 = scmp.lt.s32.totalorder %s12924_s22, %s12917_s30 }
  0x3b   : > { %p12920_p9 = pnand %p12918_p8, %p13339_p6 }
  0x3c   : > { %p12927_p13 = por %p12926_p12, %p12925_p11 }
  0x3d   : > { %p12921_p10 = pneg %p12920_p9 }
  0x3f   : > { %p12928_p0 = pnand %p12927_p13, %p12921_p10 }
  0x41   : > { %12931 = shalt.err (!%p12928_p0)
}
  0x42   : > { %12756 = dma.hbm_to_vmem [thread:$0]  (!%p13329_p5), %s16570_s12, 16, %s630_s23, [#allocation19]  }
  0x43   : > { %s13182_s5 = smov [#allocation21]   ;;  %s13183_s0 = smov [#allocation7]  }
  0x44   : > { %s655_s20 = sshll.u32 %s13182_s5, 4  ;;  %s535_s29 = sshll.u32 %s13183_s0, 4  ;;  %s656_s20 = int_to_ptr.vmem [resolvable:$true] %s655_s20  ;;  %s536_s29 = int_to_ptr.vmem [resolvable:$true] %s535_s29 }
  0x45   : > { %s12943_s25 = scalar_lea.vmem %s656_s20, 9216  ;;  %p12951_p8 = scmp.lt.s32.totalorder %s656_s20, %s656_s20 }
  0x46   : > { %p12944_p1 = scmp.ne.s32.totalorder %s656_s20, %s12943_s25  ;;  %p12952_p9 = scmp.lt.s32.totalorder %s12943_s25, %s12943_s25 }
  0x48   : > { %p12946_p4 = pnand %p12944_p1, %p13339_p6  ;;  %p12953_p10 = por %p12952_p9, %p12951_p8 }
  0x4a   : > { %p12947_p7 = pneg %p12946_p4 }
  0x4c   : > { %p12954_p11 = pnand %p12953_p10, %p12947_p7 }
  0x4e   : > { %12957 = shalt.err (!%p12954_p11)
}
  0x4f   : > { %s16711_s30 = smov 128   ;;  %s12969_s24 = scalar_lea.vmem %s536_s29, 1152 }
  0x50   : > { %12762 = dma.hbm_to_vmem [thread:$0]  (!%p13329_p5), %s16573_s15, 9216, %s656_s20, [#allocation22], %s16711_s30, %s16711_s30, %s16583_s27  }
  0x51   : > { %p12970_p12 = scmp.ne.s32.totalorder %s536_s29, %s12969_s24  ;;  %p12977_p1 = scmp.lt.s32.totalorder %s536_s29, %s536_s29 }
  0x52   : > { %p12978_p4 = scmp.lt.s32.totalorder %s12969_s24, %s12969_s24 }
  0x53   : > { %p12972_p13 = pnand %p12970_p12, %p13339_p6 }
  0x54   : > { %p12979_p7 = por %p12978_p4, %p12977_p1 }
  0x55   : > { %p12973_p0 = pneg %p12972_p13 }
  0x57   : > { %p12980_p8 = pnand %p12979_p7, %p12973_p0 }
  0x59   : > { %12983 = shalt.err (!%p12980_p8)
}
  0x5a   : > { %s16712_s5 = sld [smem:[#allocation138_spill]]  ;;  %s13184_s20 = smov [#allocation11]  }
  0x5b   : > { %s562_s0 = sshll.u32 %s13184_s20, 4  ;;  %s563_s0 = int_to_ptr.vmem [resolvable:$true] %s562_s0 }
  0x5c   : > { %s12995_s23 = scalar_lea.vmem %s563_s0, 8192  ;;  %p13003_p12 = scmp.lt.s32.totalorder %s563_s0, %s563_s0 }
  0x5d   : > { %p12996_p9 = scmp.ne.s32.totalorder %s563_s0, %s12995_s23  ;;  %p13004_p13 = scmp.lt.s32.totalorder %s12995_s23, %s12995_s23 }
  0x5f   : > { %p12998_p10 = pnand %p12996_p9, %p13339_p6  ;;  %p13005_p0 = por %p13004_p13, %p13003_p12 }
  0x60   : > { %12735 = dma.hbm_to_vmem [thread:$0]  (!%p13329_p5), %s16712_s5, 1152, %s536_s29, [#allocation8], %s16711_s30, %s16711_s30, %s16583_s27  }
  0x61   : > { %p12999_p11 = pneg %p12998_p10 }
  0x63   : > { %p13006_p1 = pnand %p13005_p0, %p12999_p11 }
  0x65   : > { %13009 = shalt.err (!%p13006_p1)
}
  0x66   : > { %s13185_s22 = smov 256   ;;  %s13186_s24 = smov 16  }
  0x67   : > { %12741 = dma.hbm_to_vmem [thread:$0]  (!%p13329_p5), %s16564_s6, 8192, %s563_s0, [#allocation10], %s13185_s22, %s13185_s22, %s13186_s24  }
  0x68   : > { %s13187_s2 = smov [#allocation14]   ;;  %s13188_s20 = smov [#allocation17]  }
  0x69   : > { %s589_s5 = sshll.u32 %s13187_s2, 4  ;;  %s615_s27 = sshll.u32 %s13188_s20, 4  ;;  %s590_s5 = int_to_ptr.vmem [resolvable:$true] %s589_s5  ;;  %s616_s27 = int_to_ptr.vmem [resolvable:$true] %s615_s27 }
  0x6a   : > { %s13021_s8 = scalar_lea.vmem %s590_s5, 3072  ;;  %p13029_p9 = scmp.lt.s32.totalorder %s590_s5, %s590_s5 }
  0x6b   : > { %p13022_p4 = scmp.ne.s32.totalorder %s590_s5, %s13021_s8  ;;  %p13030_p10 = scmp.lt.s32.totalorder %s13021_s8, %s13021_s8 }
  0x6d   : > { %p13024_p7 = pnand %p13022_p4, %p13339_p6  ;;  %p13031_p11 = por %p13030_p10, %p13029_p9 }
  0x6f   : > { %p13025_p8 = pneg %p13024_p7 }
  0x71   : > { %p13032_p12 = pnand %p13031_p11, %p13025_p8 }
  0x73   : > { %13035 = shalt.err (!%p13032_p12)
}
  0x74   : > { %s16713_s23 = smov 8   ;;  %s13047_s24 = scalar_lea.vmem %s616_s27, 4608 }
  0x75   : > { %12747 = dma.hbm_to_vmem [thread:$0]  (!%p13329_p5), %s16567_s9, 3072, %s590_s5, [#allocation13], %s16711_s30, %s16711_s30, %s16713_s23  }
  0x76   : > { %p13048_p13 = scmp.ne.s32.totalorder %s616_s27, %s13047_s24  ;;  %p13055_p4 = scmp.lt.s32.totalorder %s616_s27, %s616_s27 }
  0x77   : > { %p13056_p7 = scmp.lt.s32.totalorder %s13047_s24, %s13047_s24 }
  0x78   : > { %p13050_p0 = pnand %p13048_p13, %p13339_p6 }
  0x79   : > { %p13057_p9 = por %p13056_p7, %p13055_p4 }
  0x7a   : > { %p13051_p1 = pneg %p13050_p0 }
  0x7c   : > { %p13058_p8 = pnand %p13057_p9, %p13051_p1 }
  0x7e   : > { %13061 = shalt.err (!%p13058_p8)
}
  0x7f   : > { %12753 = dma.hbm_to_vmem [thread:$0]  (!%p13329_p5), %s16569_s11, 4608, %s616_s27, [#allocation16], %s16711_s30, %s16711_s30, %s16713_s23  }
  0x80   : > { %s13189_s29 = smov [#allocation20]   ;;  %s13190_s5 = smov [#allocation23]  }
  0x81   : > { %s639_s2 = sshll.u32 %s13189_s29, 4  ;;  %s669_s20 = sshll.u32 %s13190_s5, 4  ;;  %s640_s2 = int_to_ptr.vmem [resolvable:$true] %s639_s2  ;;  %s670_s20 = int_to_ptr.vmem [resolvable:$true] %s669_s20 }
  0x82   : > { %s13073_s0 = scalar_lea.vmem %s640_s2, 768  ;;  %p13081_p13 = scmp.lt.s32.totalorder %s640_s2, %s640_s2 }
  0x83   : > { %p13074_p10 = scmp.ne.s32.totalorder %s640_s2, %s13073_s0  ;;  %p13082_p0 = scmp.lt.s32.totalorder %s13073_s0, %s13073_s0 }
  0x85   : > { %p13076_p11 = pnand %p13074_p10, %p13339_p6  ;;  %p13083_p1 = por %p13082_p0, %p13081_p13 }
  0x87   : > { %p13077_p12 = pneg %p13076_p11 }
  0x89   : > { %p13084_p4 = pnand %p13083_p1, %p13077_p12 }
  0x8b   : > { %13087 = shalt.err (!%p13084_p4)
}
  0x8c   : > { %12759 = dma.hbm_to_vmem [thread:$0]  (!%p13329_p5), %s16571_s13, 768, %s640_s2, [#allocation19], %s16711_s30, %s16711_s30, %s16713_s23  }
  0x8d   : > { %s13099_s24 = scalar_lea.vmem %s670_s20, 16  ;;  %s13106_s8 = scalar_lea.vmem %s670_s20, 32 }
  0x8e   : > { %p13100_p7 = scmp.ne.s32.totalorder %s670_s20, %s13099_s24  ;;  %p13107_p10 = scmp.lt.s32.totalorder %s670_s20, %s670_s20 }
  0x8f   : > { %p13108_p11 = scmp.lt.s32.totalorder %s13106_s8, %s13099_s24 }
  0x90   : > { %p13102_p9 = pnand %p13100_p7, %p13339_p6 }
  0x91   : > { %p13109_p12 = por %p13108_p11, %p13107_p10 }
  0x92   : > { %p13103_p8 = pneg %p13102_p9 }
  0x94   : > { %p13110_p13 = pnand %p13109_p12, %p13103_p8 }
  0x96   : > { %13113 = shalt.err (!%p13110_p13)
}
  0x97   : > { %12765 = dma.hbm_to_vmem [thread:$0]  (!%p13329_p5), %s16574_s16, 16, %s670_s20, [#allocation22]  }
  0x98   : > { %s13191_s5 = smov [#allocation24]  }
  0x99   : > { %s686_s30 = sshll.u32 %s13191_s5, 4  ;;  %s687_s30 = int_to_ptr.vmem [resolvable:$true] %s686_s30 }
  0x9a   : > { %s13125_s23 = scalar_lea.vmem %s687_s30, 16  ;;  %s13132_s2 = scalar_lea.vmem %s687_s30, 32 }
  0x9b   : > { %p13126_p0 = scmp.ne.s32.totalorder %s687_s30, %s13125_s23  ;;  %p13133_p7 = scmp.lt.s32.totalorder %s687_s30, %s687_s30 }
  0x9c   : > { %p13134_p9 = scmp.lt.s32.totalorder %s13132_s2, %s13125_s23 }
  0x9d   : > { %p13128_p1 = pnand %p13126_p0, %p13339_p6 }
  0x9e   : > { %p13135_p8 = por %p13134_p9, %p13133_p7 }
  0x9f   : > { %p13129_p4 = pneg %p13128_p1 }
  0xa1   : > { %p13136_p10 = pnand %p13135_p8, %p13129_p4 }
  0xa3   : > { %13139 = shalt.err (!%p13136_p10)
}
  0xa4   : > { %12768 = dma.hbm_to_vmem [thread:$0]  (!%p13329_p5), %s16577_s19, 16, %s687_s30, [#allocation25]  }
  0xa5   : > { %710 = sbr.rel (%p13319_p3) target bundleno = 3001 (0xbb9), region = 104 }
  0xaa   : > { %13145 = dma.done.wait (%p12769_p2), [#allocation8], 1152  }
  0xab   : > { %13147 = vsyncadd (%p12769_p2), [#allocation8], 4294966144 }
  0xac   : > { %13149 = dma.done.wait (%p12769_p2), [#allocation10], 8208  }
  0xad   : > { %13151 = vsyncadd (%p12769_p2), [#allocation10], 4294959088 }
  0xae   : > { %13153 = dma.done.wait (%p12769_p2), [#allocation13], 3088  }
  0xaf   : > { %13155 = vsyncadd (%p12769_p2), [#allocation13], 4294964208 }
  0xb0   : > { %13157 = dma.done.wait (%p12769_p2), [#allocation16], 5632  }
  0xb1   : > { %13159 = vsyncadd (%p12769_p2), [#allocation16], 4294961664 }
  0xb2   : > { %13161 = dma.done.wait (%p12769_p2), [#allocation19], 784  }
  0xb3   : > { %13163 = vsyncadd (%p12769_p2), [#allocation19], 4294966512 }
  0xb4   : > { %13165 = dma.done.wait (%p12769_p2), [#allocation22], 9232  }
  0xb5   : > { %13167 = vsyncadd (%p12769_p2), [#allocation22], 4294958064 }
  0xb6   : > { %13169 = dma.done.wait (%p12769_p2), [#allocation25], 16  }
  0xb7   : > { %13171 = vsyncadd (%p12769_p2), [#allocation25], 4294967280  ;;  %p812_p3 = scmp.lt.s32.totalorder %s13314_s3, 1  ;;  %v13192_v1 = vmov 0   ;;  %vm1186_vm0 = vcmask 64512   ;;  %v16585_v2 = vmov 0.0  }
  0xb8   : > { %12821 = vset.pattern.permute.xlu1 %v13192_v1  ;;  %12820 = vset.pattern.permute.xlu0 %v13192_v1  ;;  %1188 = vst.msk [vmem:[#allocation2 + $0x8] sm:$0xff] %vm1186_vm0, %v16585_v2  ;;  %1189 = vst.msk [vmem:[#allocation2 + $0x10] sm:$0xff] %vm1186_vm0, %v16585_v2  ;;  %s16714_s20 = sld [smem:[#allocation135_spill]]  ;;  %vm957_vm1 = vcmask 1043456   ;;  %vm860_vm2 = vcmask 31744   ;;  %vm1224_vm3 = vcmask 57344  }
  0xb9   : > { %s17153_s3 = smov (!%p812_p3, %s13314_s3), 1  ;;  %1187 = vst.msk [vmem:[#allocation2] sm:$0xff] %vm1186_vm0, %v16585_v2  ;;  %1190 = vst.msk [vmem:[#allocation2 + $0x18] sm:$0xff] %vm1186_vm0, %v16585_v2  ;;  %s16715_s25 = sld [smem:[#allocation140_spill]]  ;;  %vm5867_vm4 = vcmask 130048   ;;  %vm5879_vm5 = vcmask 122880  }
  0xba   : > { %1191 = vst.msk [vmem:[#allocation2 + $0x20] sm:$0xff] %vm1186_vm0, %v16585_v2  ;;  %1192 = vst.msk [vmem:[#allocation2 + $0x28] sm:$0xff] %vm1186_vm0, %v16585_v2  ;;  %s10806_s28 = sshll.u32 %s17153_s3, 8  ;;  %s16716_s2 = sld [smem:[#allocation136_spill]]  ;;  %vm7364_vm6 = vcmask 261120   ;;  %vm7454_vm7 = vcmask 523264  }
  0xbb   : > { %1193 = vst.msk [vmem:[#allocation2 + $0x30] sm:$0xff] %vm1186_vm0, %v16585_v2  ;;  %1194 = vst.msk [vmem:[#allocation2 + $0x38] sm:$0xff] %vm1186_vm0, %v16585_v2  ;;  %s16741_s29 = sld [smem:[#allocation137_spill]]  ;;  %vm7797_vm8 = vcmask 258048   ;;  %vm13194_vm9 = vmmov 0   ;;  %vm8988_vm10 = vcmask 522240   ;;  %s819_s8 = scalar_lea.vmem %s16579_s21, %s17153_s3 }
  0xbc   : > { %1195 = vst.msk [vmem:[#allocation2 + $0x40] sm:$0xff] %vm1186_vm0, %v16585_v2  ;;  %1196 = vst.msk [vmem:[#allocation2 + $0x48] sm:$0xff] %vm1186_vm0, %v16585_v2  ;;  %vm8990_vm11 = vcmask 519168   ;;  %vm10101_vm12 = vcmask 1040384   ;;  %vm10107_vm13 = vcmask 0  }
  0xbd   : > { %1197 = vst.msk [vmem:[#allocation2 + $0x50] sm:$0xff] %vm1186_vm0, %v16585_v2  ;;  %1198 = vst.msk [vmem:[#allocation2 + $0x58] sm:$0xff] %vm1186_vm0, %v16585_v2 }
  0xbe   : > { %1199 = vst.msk [vmem:[#allocation2 + $0x60] sm:$0xff] %vm1186_vm0, %v16585_v2  ;;  %1200 = vst.msk [vmem:[#allocation2 + $0x68] sm:$0xff] %vm1186_vm0, %v16585_v2  ;;  %s13569_s22 = scalar_lea.vmem %s16714_s20, %s10806_s28 }
  0xbf   : > { %1201 = vst.msk [vmem:[#allocation2 + $0x70] sm:$0xff] %vm1186_vm0, %v16585_v2  ;;  %1202 = vst.msk [vmem:[#allocation2 + $0x78] sm:$0xff] %vm1186_vm0, %v16585_v2  ;;  %v10402_v3 = vld [vmem:[%s16715_s25 + $0x200] sm:$0xff]  ;;  %v821_v7 = vld [vmem:[%s13569_s22 + $0x8] sm:$0xff] }
  0xc0   : > { %1203 = vst.msk [vmem:[#allocation2 + $0x80] sm:$0xff] %vm1186_vm0, %v16585_v2  ;;  %1204 = vst.msk [vmem:[#allocation2 + $0x88] sm:$0xff] %vm1186_vm0, %v16585_v2  ;;  %v1290_v4 = vld [vmem:[%s16715_s25] sm:$0xff]  ;;  %2258 = vperm.xlu1 %12821, %v10402_v3   ;;  %v10403_v8 = vld [vmem:[%s16715_s25 + $0x208] sm:$0xff] }
  0xc1   : > { %1205 = vst.msk [vmem:[#allocation2 + $0x90] sm:$0xff] %vm1186_vm0, %v16585_v2  ;;  %1206 = vst.msk [vmem:[#allocation2 + $0x98] sm:$0xff] %vm1186_vm0, %v16585_v2  ;;  %v852_v5 = vld [vmem:[%s16716_s2] sm:$0xf]  ;;  %1324 = vperm.xlu0 %12820, %v1290_v4   ;;  %v1291_v9 = vld [vmem:[%s16715_s25 + $0x8] sm:$0xff] }
  0xc2   : > { %1207 = vst.msk [vmem:[#allocation2 + $0xa0] sm:$0xff] %vm1186_vm0, %v16585_v2  ;;  %1208 = vst.msk [vmem:[#allocation2 + $0xa8] sm:$0xff] %vm1186_vm0, %v16585_v2  ;;  %v820_v6 = vld [vmem:[%s13569_s22] sm:$0xff]  ;;  %11646 = vmatprep.subr.msk.mxu0 %vm957_vm1, %v852_v5  ;;  %v822_v10 = vld [vmem:[%s13569_s22 + $0x10] sm:$0xff] }
  0xc3   : > { %1209 = vst.msk [vmem:[#allocation2 + $0xb0] sm:$0xff] %vm1186_vm0, %v16585_v2  ;;  %1210 = vst.msk [vmem:[#allocation2 + $0xb8] sm:$0xff] %vm1186_vm0, %v16585_v2  ;;  %11648 = vmatprep.mubr.msk.f32.mxu0 %vm860_vm2, %v820_v6  ;;  %11647 = vmatpush3.msk.msra.mxu0 %vm957_vm1, %v852_v5  ;;  %v823_v11 = vld [vmem:[%s13569_s22 + $0x18] sm:$0xff]  ;;  %v1292_v13 = vld [vmem:[%s16715_s25 + $0x10] sm:$0xff] }
  0xc4   : > { %1211 = vst.msk [vmem:[#allocation2 + $0xc0] sm:$0xff] %vm1186_vm0, %v16585_v2  ;;  %1212 = vst.msk [vmem:[#allocation2 + $0xc8] sm:$0xff] %vm1186_vm0, %v16585_v2  ;;  %11649 = vmatmul.mubr.msk.f32.vlgmr.msra.gmra.mxu0 %vm860_vm2, %v821_v7  ;;  %2263 = vperm.xlu1 %12821, %v10403_v8   ;;  %v1293_v12 = vld [vmem:[%s16715_s25 + $0x18] sm:$0xff]  ;;  %v824_v14 = vld [vmem:[%s13569_s22 + $0x20] sm:$0xff] }
  0xc5   : > { %1213 = vst.msk [vmem:[#allocation2 + $0xd0] sm:$0xff] %vm1186_vm0, %v16585_v2  ;;  %1214 = vst.msk [vmem:[#allocation2 + $0xd8] sm:$0xff] %vm1186_vm0, %v16585_v2  ;;  %1329 = vperm.xlu0 %12820, %v1291_v9   ;;  %11651 = vmatprep.mubr.msk.f32.mxu0 %vm860_vm2, %v822_v10  ;;  %v825_v15 = vld [vmem:[%s13569_s22 + $0x28] sm:$0xff]  ;;  %v10405_v16 = vld [vmem:[%s16715_s25 + $0x218] sm:$0xff] }
  0xc6   : > { %1215 = vst.msk [vmem:[#allocation2 + $0xe0] sm:$0xff] %vm1186_vm0, %v16585_v2  ;;  %1216 = vst.msk [vmem:[#allocation2 + $0xe8] sm:$0xff] %vm1186_vm0, %v16585_v2  ;;  %v10404_v17 = vld [vmem:[%s16715_s25 + $0x210] sm:$0xff]  ;;  %v827_v19 = vld [vmem:[%s13569_s22 + $0x38] sm:$0xff] }
  0xc7   : > { %1217 = vst.msk [vmem:[#allocation2 + $0xf0] sm:$0xff] %vm1186_vm0, %v16585_v2  ;;  %1218 = vst.msk [vmem:[#allocation2 + $0xf8] sm:$0xff] %vm1186_vm0, %v16585_v2  ;;  %v826_v18 = vld [vmem:[%s13569_s22 + $0x30] sm:$0xff]  ;;  %v1295_v20 = vld [vmem:[%s16715_s25 + $0x28] sm:$0xff] }
  0xc8   : > { %1219 = vst.msk [vmem:[#allocation2 + $0x100] sm:$0xff] %vm1186_vm0, %v16585_v2  ;;  %1220 = vst.msk [vmem:[#allocation2 + $0x108] sm:$0xff] %vm1186_vm0, %v16585_v2  ;;  %11652 = vmatmul.mubr.msk.f32.gmra.mxu0 %vm860_vm2, %v823_v11  ;;  %1339 = vperm.xlu1 %12821, %v1293_v12   ;;  %v1294_v21 = vld [vmem:[%s16715_s25 + $0x20] sm:$0xff]  ;;  %v829_v23 = vld [vmem:[%s13569_s22 + $0x48] sm:$0xff] }
  0xc9   : > { %1221 = vst.msk [vmem:[#allocation2 + $0x110] sm:$0xff] %vm1186_vm0, %v16585_v2  ;;  %1222 = vst.msk [vmem:[#allocation2 + $0x118] sm:$0xff] %vm1186_vm0, %v16585_v2  ;;  %1334 = vperm.xlu0 %12820, %v1292_v13   ;;  %11654 = vmatprep.mubr.msk.f32.mxu0 %vm860_vm2, %v824_v14  ;;  %v828_v22 = vld [vmem:[%s13569_s22 + $0x40] sm:$0xff]  ;;  %v10407_v24 = vld [vmem:[%s16715_s25 + $0x228] sm:$0xff] }
  0xca   : > { %1223 = vst.msk [vmem:[#allocation2 + $0x120] sm:$0xff] %vm1186_vm0, %v16585_v2  ;;  %v10406_v25 = vld [vmem:[%s16715_s25 + $0x220] sm:$0xff]  ;;  %v830_v26 = vld [vmem:[%s13569_s22 + $0x50] sm:$0xff]  ;;  %v831_v27 = vld [vmem:[%s13569_s22 + $0x58] sm:$0xff] }
  0xcb   : > { %v1297_v28 = vld [vmem:[%s16715_s25 + $0x38] sm:$0xff]  ;;  %v1296_v29 = vld [vmem:[%s16715_s25 + $0x30] sm:$0xff]  ;;  %v832_v30 = vld [vmem:[%s13569_s22 + $0x60] sm:$0xff]  ;;  %1225 = vst.msk [vmem:[#allocation2 + $0x128] sm:$0x1] %vm1224_vm3, %v16585_v2 }
  0xcc   : > { %11655 = vmatmul.mubr.msk.f32.gmra.mxu0 %vm860_vm2, %v825_v15  ;;  %2273 = vperm.xlu1 %12821, %v10405_v16   ;;  %v833_v31 = vld [vmem:[%s13569_s22 + $0x68] sm:$0xff]  ;;  %v10409_v32 = vld [vmem:[%s16715_s25 + $0x238] sm:$0xff]  ;;  %v10408_v33 = vld [vmem:[%s16715_s25 + $0x230] sm:$0xff]  ;;  %5868 = vst.msk [vmem:[#allocation3] sm:$0xff] %vm5867_vm4, %v16585_v2 }
  0xcd   : > { %2268 = vperm.xlu0 %12820, %v10404_v17   ;;  %11657 = vmatprep.mubr.msk.f32.mxu0 %vm860_vm2, %v826_v18  ;;  %v834_v34 = vld [vmem:[%s13569_s22 + $0x70] sm:$0xff]  ;;  %v835_v35 = vld [vmem:[%s13569_s22 + $0x78] sm:$0xff]  ;;  %v1299_v36 = vld [vmem:[%s16715_s25 + $0x48] sm:$0xff]  ;;  %5869 = vst.msk [vmem:[#allocation3 + $0x8] sm:$0xff] %vm5867_vm4, %v16585_v2 }
  0xce   : > { %v1298_v37 = vld [vmem:[%s16715_s25 + $0x40] sm:$0xff]  ;;  %v837_v39 = vld [vmem:[%s13569_s22 + $0x88] sm:$0xff]  ;;  %v838_v42 = vld [vmem:[%s13569_s22 + $0x90] sm:$0xff]  ;;  %5870 = vst.msk [vmem:[#allocation3 + $0x10] sm:$0xff] %vm5867_vm4, %v16585_v2 }
  0xcf   : > { %v836_v38 = vld [vmem:[%s13569_s22 + $0x80] sm:$0xff]  ;;  %v10411_v40 = vld [vmem:[%s16715_s25 + $0x248] sm:$0xff]  ;;  %v839_v43 = vld [vmem:[%s13569_s22 + $0x98] sm:$0xff]  ;;  %5871 = vst.msk [vmem:[#allocation3 + $0x18] sm:$0xff] %vm5867_vm4, %v16585_v2 }
  0xd0   : > { %11658 = vmatmul.mubr.msk.f32.gmra.mxu0 %vm860_vm2, %v827_v19  ;;  %1349 = vperm.xlu1 %12821, %v1295_v20   ;;  %v10410_v41 = vld [vmem:[%s16715_s25 + $0x240] sm:$0xff]  ;;  %v1301_v44 = vld [vmem:[%s16715_s25 + $0x58] sm:$0xff]  ;;  %v1300_v45 = vld [vmem:[%s16715_s25 + $0x50] sm:$0xff]  ;;  %5872 = vst.msk [vmem:[#allocation3 + $0x20] sm:$0xff] %vm5867_vm4, %v16585_v2 }
  0xd1   : > { %1344 = vperm.xlu0 %12820, %v1294_v21   ;;  %11660 = vmatprep.mubr.msk.f32.mxu0 %vm860_vm2, %v828_v22  ;;  %v840_v46 = vld [vmem:[%s13569_s22 + $0xa0] sm:$0xff]  ;;  %v841_v47 = vld [vmem:[%s13569_s22 + $0xa8] sm:$0xff]  ;;  %v10413_v48 = vld [vmem:[%s16715_s25 + $0x258] sm:$0xff]  ;;  %5873 = vst.msk [vmem:[#allocation3 + $0x28] sm:$0xff] %vm5867_vm4, %v16585_v2 }
  0xd2   : > { %v10412_v49 = vld [vmem:[%s16715_s25 + $0x250] sm:$0xff]  ;;  %v843_v51 = vld [vmem:[%s13569_s22 + $0xb8] sm:$0xff]  ;;  %v1303_v52 = vld [vmem:[%s16715_s25 + $0x68] sm:$0xff]  ;;  %5874 = vst.msk [vmem:[#allocation3 + $0x30] sm:$0xff] %vm5867_vm4, %v16585_v2 }
  0xd3   : > { %v842_v50 = vld [vmem:[%s13569_s22 + $0xb0] sm:$0xff]  ;;  %v1302_v53 = vld [vmem:[%s16715_s25 + $0x60] sm:$0xff]  ;;  %v845_v55 = vld [vmem:[%s13569_s22 + $0xc8] sm:$0xff]  ;;  %5875 = vst.msk [vmem:[#allocation3 + $0x38] sm:$0xff] %vm5867_vm4, %v16585_v2 }
  0xd4   : > { %11661 = vmatmul.mubr.msk.f32.gmra.mxu0 %vm860_vm2, %v829_v23  ;;  %2283 = vperm.xlu1 %12821, %v10407_v24   ;;  %v844_v54 = vld [vmem:[%s13569_s22 + $0xc0] sm:$0xff]  ;;  %v10415_v56 = vld [vmem:[%s16715_s25 + $0x268] sm:$0xff]  ;;  %v846_v58 = vld [vmem:[%s13569_s22 + $0xd0] sm:$0xff]  ;;  %5876 = vst.msk [vmem:[#allocation3 + $0x40] sm:$0xff] %vm5867_vm4, %v16585_v2 }
  0xd5   : > { %2278 = vperm.xlu0 %12820, %v10406_v25   ;;  %11663 = vmatprep.mubr.msk.f32.mxu0 %vm860_vm2, %v830_v26  ;;  %v10414_v57 = vld [vmem:[%s16715_s25 + $0x260] sm:$0xff]  ;;  %v847_v59 = vld [vmem:[%s13569_s22 + $0xd8] sm:$0xff]  ;;  %v1304_v61 = vld [vmem:[%s16715_s25 + $0x70] sm:$0xff]  ;;  %5877 = vst.msk [vmem:[#allocation3 + $0x48] sm:$0xff] %vm5867_vm4, %v16585_v2 }
  0xd6   : > { %v1305_v60 = vld [vmem:[%s16715_s25 + $0x78] sm:$0xff]  ;;  %v848_v62 = vld [vmem:[%s13569_s22 + $0xe0] sm:$0xff]  ;;  %v849_v63 = vld [vmem:[%s13569_s22 + $0xe8] sm:$0xff]  ;;  %5878 = vst.msk [vmem:[#allocation3 + $0x50] sm:$0xff] %vm5867_vm4, %v16585_v2 }
  0xd7   : > { %v10417_v0 = vld [vmem:[%s16715_s25 + $0x278] sm:$0xff]  ;;  %v10416_v1 = vld [vmem:[%s16715_s25 + $0x270] sm:$0xff]  ;;  %v1307_v5 = vld [vmem:[%s16715_s25 + $0x88] sm:$0xff]  ;;  %5880 = vst.msk [vmem:[#allocation3 + $0x58] sm:$0x1] %vm5879_vm5, %v16585_v2 }
  0xd8   : > { %11664 = vmatmul.mubr.msk.f32.gmra.mxu0 %vm860_vm2, %v831_v27  ;;  %1359 = vperm.xlu1 %12821, %v1297_v28   ;;  %v850_v3 = vld [vmem:[%s13569_s22 + $0xf0] sm:$0xff]  ;;  %v851_v4 = vld [vmem:[%s13569_s22 + $0xf8] sm:$0xff]  ;;  %v1306_v6 = vld [vmem:[%s16715_s25 + $0x80] sm:$0xff] }
  0xd9   : > { %1354 = vperm.xlu0 %12820, %v1296_v29   ;;  %11666 = vmatprep.mubr.msk.f32.mxu0 %vm860_vm2, %v832_v30  ;;  %v10419_v7 = vld [vmem:[%s16715_s25 + $0x288] sm:$0xff]  ;;  %v10418_v8 = vld [vmem:[%s16715_s25 + $0x280] sm:$0xff]  ;;  %v1309_v9 = vld [vmem:[%s16715_s25 + $0x98] sm:$0xff] }
  0xda   : > { %v1308_v10 = vld [vmem:[%s16715_s25 + $0x90] sm:$0xff]  ;;  %v1514_v12 = vld [vmem:[#allocation7] sm:$0xff]  ;;  %v10421_v14 = vld [vmem:[%s16715_s25 + $0x298] sm:$0xff] }
  0xdb   : > { %v1548_v11 = vld [vmem:[#allocation7 + $0x8] sm:$0xff]  ;;  %11746 = vmatprep.subr.mxu0 %v1514_v12  ;;  %v1310_v18 = vld [vmem:[%s16715_s25 + $0xa0] sm:$0xff]  ;;  %v1313_v21 = vld [vmem:[%s16715_s25 + $0xb8] sm:$0xff] }
  0xdc   : > { %11667 = vmatmul.mubr.msk.f32.gmra.mxu0 %vm860_vm2, %v833_v31  ;;  %2293 = vperm.xlu1 %12821, %v10409_v32   ;;  %v1515_v13 = vld [vmem:[#allocation2 + $0x8] sm:$0xff]  ;;  %v10420_v15 = vld [vmem:[%s16715_s25 + $0x290] sm:$0xff]  ;;  %v10422_v20 = vld [vmem:[%s16715_s25 + $0x2a0] sm:$0xff] }
  0xdd   : > { %2288 = vperm.xlu0 %12820, %v10408_v33   ;;  %11669 = vmatprep.mubr.msk.f32.mxu0 %vm860_vm2, %v834_v34  ;;  %v1516_v16 = vld [vmem:[#allocation2 + $0x10] sm:$0xff]  ;;  %v1311_v17 = vld [vmem:[%s16715_s25 + $0xa8] sm:$0xff]  ;;  %v10425_v23 = vld [vmem:[%s16715_s25 + $0x2b8] sm:$0xff] }
  0xde   : > { %11696 = vmatprep.subr.mxu1 %v1548_v11  ;;  %11698 = vmatprep.mubr.msk.f32.mxu1 %vm1186_vm0, %v1515_v13  ;;  %v10423_v19 = vld [vmem:[%s16715_s25 + $0x2a8] sm:$0xff]  ;;  %v1312_v22 = vld [vmem:[%s16715_s25 + $0xb0] sm:$0xff]  ;;  %v1314_v26 = vld [vmem:[%s16715_s25 + $0xc0] sm:$0xff] }
  0xdf   : > { %11697 = vmatpush3.msra.mxu1 %v1548_v11  ;;  %11747 = vmatpush3.msra.mxu0 %v1514_v12  ;;  %v10424_v24 = vld [vmem:[%s16715_s25 + $0x2b0] sm:$0xff]  ;;  %v1315_v25 = vld [vmem:[%s16715_s25 + $0xc8] sm:$0xff]  ;;  %v10426_v28 = vld [vmem:[%s16715_s25 + $0x2c0] sm:$0xff] }
  0xe0   : > { %11670 = vmatmul.mubr.msk.f32.gmra.mxu0 %vm860_vm2, %v835_v35  ;;  %1369 = vperm.xlu1 %12821, %v1299_v36   ;;  %v10427_v27 = vld [vmem:[%s16715_s25 + $0x2c8] sm:$0xff]  ;;  %v1317_v29 = vld [vmem:[%s16715_s25 + $0xd8] sm:$0xff]  ;;  %v1316_v30 = vld [vmem:[%s16715_s25 + $0xd0] sm:$0xff] }
  0xe1   : > { %1364 = vperm.xlu0 %12820, %v1298_v37   ;;  %11672 = vmatprep.mubr.msk.f32.mxu0 %vm860_vm2, %v836_v38  ;;  %v10429_v31 = vld [vmem:[%s16715_s25 + $0x2d8] sm:$0xff]  ;;  %v10428_v32 = vld [vmem:[%s16715_s25 + $0x2d0] sm:$0xff]  ;;  %v1319_v33 = vld [vmem:[%s16715_s25 + $0xe8] sm:$0xff] }
  0xe2   : > { %11699 = vmatmul.mubr.msk.f32.vlgmr.msra.gmra.mxu1 %vm1186_vm0, %v1516_v16  ;;  %v1318_v34 = vld [vmem:[%s16715_s25 + $0xe0] sm:$0xff]  ;;  %v2449_v35 = vld [vmem:[#allocation7 + $0x10] sm:$0xff]  ;;  %v10431_v36 = vld [vmem:[%s16715_s25 + $0x2e8] sm:$0xff] }
  0xe3   : > { %v10430_v37 = vld [vmem:[%s16715_s25 + $0x2e0] sm:$0xff]  ;;  %11796 = vmatprep.subr.mxu1 %v2449_v35  ;;  %v1321_v38 = vld [vmem:[%s16715_s25 + $0xf8] sm:$0xff] }
  0xe4   : > { %11673 = vmatmul.mubr.msk.f32.gmra.mxu0 %vm860_vm2, %v837_v39  ;;  %2303 = vperm.xlu1 %12821, %v10411_v40   ;;  %v1320_v39 = vld [vmem:[%s16715_s25 + $0xf0] sm:$0xff]  ;;  %v1258_v40 = vld [vmem:[#allocation2 + $0x7] sm:$0xff]  ;;  %v5903_v11 = vld [vmem:[#allocation14 + $0x30] sm:$0xff] }
  0xe5   : > { %2298 = vperm.xlu0 %12820, %v10410_v41   ;;  %11675 = vmatprep.mubr.msk.f32.mxu0 %vm860_vm2, %v838_v42  ;;  %v10433_v41 = vld [vmem:[%s16715_s25 + $0x2f8] sm:$0xff]  ;;  %v10432_v42 = vld [vmem:[%s16715_s25 + $0x2f0] sm:$0xff] }
  0xe6   : > { %11797 = vmatpush3.msra.mxu1 %v2449_v35 }
  0xe8   : > { %11676 = vmatmul.mubr.msk.f32.gmra.mxu0 %vm860_vm2, %v839_v43  ;;  %1379 = vperm.xlu1 %12821, %v1301_v44  }
  0xe9   : > { %1374 = vperm.xlu0 %12820, %v1300_v45   ;;  %11678 = vmatprep.mubr.msk.f32.mxu0 %vm860_vm2, %v840_v46  ;;  %v1259_v46 = vld [vmem:[#allocation2 + $0xf] sm:$0xff] }
  0xec   : > { %11679 = vmatmul.mubr.msk.f32.gmra.mxu0 %vm860_vm2, %v841_v47  ;;  %2313 = vperm.xlu1 %12821, %v10413_v48   ;;  %v5898_v47 = vld [vmem:[#allocation14 + $0x8] sm:$0xff]  ;;  %v5897_v48 = vld [vmem:[#allocation14] sm:$0xff] }
  0xed   : > { %2308 = vperm.xlu0 %12820, %v10412_v49   ;;  %11681 = vmatprep.mubr.msk.f32.mxu0 %vm860_vm2, %v842_v50 }
  0xf0   : > { %11682 = vmatmul.mubr.msk.f32.gmra.mxu0 %vm860_vm2, %v843_v51  ;;  %1389 = vperm.xlu1 %12821, %v1303_v52   ;;  %v6234_v52 = vld [vmem:[#allocation14 + $0x88] sm:$0xff] }
  0xf1   : > { %1384 = vperm.xlu0 %12820, %v1302_v53   ;;  %11684 = vmatprep.mubr.msk.f32.mxu0 %vm860_vm2, %v844_v54  ;;  %v6233_v53 = vld [vmem:[#allocation14 + $0x80] sm:$0xff] }
  0xf4   : > { %11685 = vmatmul.mubr.msk.f32.gmra.mxu0 %vm860_vm2, %v845_v55  ;;  %2323 = vperm.xlu1 %12821, %v10415_v56   ;;  %v5900_v56 = vld [vmem:[#allocation14 + $0x18] sm:$0xff] }
  0xf5   : > { %2318 = vperm.xlu0 %12820, %v10414_v57   ;;  %11687 = vmatprep.mubr.msk.f32.mxu0 %vm860_vm2, %v846_v58  ;;  %v5899_v57 = vld [vmem:[#allocation14 + $0x10] sm:$0xff] }
  0xf8   : > { %11688 = vmatmul.mubr.msk.f32.gmra.mxu0 %vm860_vm2, %v847_v59  ;;  %1399 = vperm.xlu1 %12821, %v1305_v60   ;;  %v6236_v60 = vld [vmem:[#allocation14 + $0x98] sm:$0xff] }
  0xf9   : > { %1394 = vperm.xlu0 %12820, %v1304_v61   ;;  %11690 = vmatprep.mubr.msk.f32.mxu0 %vm860_vm2, %v848_v62  ;;  %v6235_v61 = vld [vmem:[#allocation14 + $0x90] sm:$0xff] }
  0xfc   : > { %11691 = vmatmul.mubr.msk.f32.gmra.mxu0 %vm860_vm2, %v849_v63  ;;  %2333 = vperm.xlu1 %12821, %v10417_v0   ;;  %v5902_v0 = vld [vmem:[#allocation14 + $0x28] sm:$0xff] }
  0xfd   : > { %2328 = vperm.xlu0 %12820, %v10416_v1   ;;  %11693 = vmatprep.mubr.msk.f32.mxu0 %vm860_vm2, %v850_v3  ;;  %v5901_v1 = vld [vmem:[#allocation14 + $0x20] sm:$0xff]  ;;  %v2868_v3 = vld [vmem:[#allocation7 + $0x18] sm:$0xff] }
  0xfe   : > { %11846 = vmatprep.subr.mxu0 %v2868_v3 }
 0x100   : > { %11694 = vmatmul.mubr.msk.f32.gmra.mxu0 %vm860_vm2, %v851_v4  ;;  %1409 = vperm.xlu1 %12821, %v1307_v5  }
 0x101   : > { %1404 = vperm.xlu0 %12820, %v1306_v6   ;;  %v6238_v6 = vld [vmem:[#allocation14 + $0xa8] sm:$0xff] }
 0x104   : > { %2343 = vperm.xlu1 %12821, %v10419_v7   ;;  %v6237_v7 = vld [vmem:[#allocation14 + $0xa0] sm:$0xff] }
 0x105   : > { %2338 = vperm.xlu0 %12820, %v10418_v8  }
 0x108   : > { %1419 = vperm.xlu1 %12821, %v1309_v9  }
 0x109   : > { %1414 = vperm.xlu0 %12820, %v1308_v10   ;;  %v5904_v10 = vld [vmem:[#allocation14 + $0x38] sm:$0xff] }
 0x10c   : > { %2353 = vperm.xlu1 %12821, %v10421_v14   ;;  %v6240_v14 = vld [vmem:[#allocation14 + $0xb8] sm:$0xff] }
 0x10d   : > { %2348 = vperm.xlu0 %12820, %v10420_v15   ;;  %v6239_v15 = vld [vmem:[#allocation14 + $0xb0] sm:$0xff] }
 0x110   : > { %1429 = vperm.xlu1 %12821, %v1311_v17  }
 0x111   : > { %1424 = vperm.xlu0 %12820, %v1310_v18   ;;  %v7804_v18 = vld [vmem:[#allocation20 + $0x8] sm:$0xff] }
 0x114   : > { %2363 = vperm.xlu1 %12821, %v10423_v19   ;;  %v7803_v19 = vld [vmem:[#allocation20] sm:$0xff] }
 0x115   : > { %2358 = vperm.xlu0 %12820, %v10422_v20  }
 0x118   : > { %1439 = vperm.xlu1 %12821, %v1313_v21  }
 0x119   : > { %1434 = vperm.xlu0 %12820, %v1312_v22   ;;  %v7994_v22 = vld [vmem:[#allocation20 + $0x28] sm:$0xff] }
 0x11c   : > { %2373 = vperm.xlu1 %12821, %v10425_v23   ;;  %v7993_v23 = vld [vmem:[#allocation20 + $0x20] sm:$0xff] }
 0x11d   : > { %2368 = vperm.xlu0 %12820, %v10424_v24  }
 0x120   : > { %1449 = vperm.xlu1 %12821, %v1315_v25  }
 0x121   : > { %1444 = vperm.xlu0 %12820, %v1314_v26   ;;  %v10784_v26 = vld [vmem:[%s16575_s17 + $0x8] sm:$0xf] }
 0x124   : > { %2383 = vperm.xlu1 %12821, %v10427_v27   ;;  %v8993_v27 = vld [vmem:[%s16575_s17] sm:$0xf] }
 0x125   : > { %2378 = vperm.xlu0 %12820, %v10426_v28  }
 0x128   : > { %1459 = vperm.xlu1 %12821, %v1317_v29  }
 0x129   : > { %1454 = vperm.xlu0 %12820, %v1316_v30  }
 0x12c   : > { %2393 = vperm.xlu1 %12821, %v10429_v31  }
 0x12d   : > { %2388 = vperm.xlu0 %12820, %v10428_v32   ;;  %v13920_v32 = vld [vmem:[#allocation7 + $0x20] sm:$0xff] }
 0x12e   : > { %11896 = vmatprep.subr.mxu1 %v13920_v32 }
 0x130   : > { %1469 = vperm.xlu1 %12821, %v1319_v33  }
 0x131   : > { %1464 = vperm.xlu0 %12820, %v1318_v34  }
 0x134   : > { %2403 = vperm.xlu1 %12821, %v10431_v36  }
 0x135   : > { %2398 = vperm.xlu0 %12820, %v10430_v37  }
 0x138   : > { %1479 = vperm.xlu1 %12821, %v1321_v38  }
 0x139   : > { %1474 = vperm.xlu0 %12820, %v1320_v39  }
 0x13b   : > { %v13857_v43 = vpop.permute.xlu1 %2258 }
 0x13c   : > { %16717 = vst [vmem:[#allocation33_spill] sm:$0xff] %v13857_v43  ;;  %v13859_v44 = vpop.permute.xlu0 %1324  ;;  %2413 = vperm.xlu1 %12821, %v10433_v41  }
 0x13d   : > { %16718 = vst [vmem:[#allocation34_spill] sm:$0xff] %v13859_v44  ;;  %v1482_v45 = vmul.f32 %v13859_v44, %v1258_v40  ;;  %2408 = vperm.xlu0 %12820, %v10432_v42  }
 0x13f   : > { %11748 = vmatprep.mubr.msk.f32.mxu0 %vm1186_vm0, %v1482_v45  ;;  %v13863_v49 = vpop.permute.xlu1 %2263  ;;  %v13946_v45 = vld [vmem:[%s16741_s29] ss:$0 sm:$0xff] }
 0x140   : > { %v13865_v50 = vpop.permute.xlu0 %1329  ;;  %5912 = vperm.xlu1 %12821, %v5898_v47  }
 0x141   : > { %16719 = vst [vmem:[#allocation35_spill] sm:$0xff] %v13865_v50  ;;  %v1483_v51 = vmul.f32 %v13865_v50, %v1259_v46  ;;  %5907 = vperm.xlu0 %12820, %v5897_v48  }
 0x143   : > { %11749 = vmatmul.mubr.msk.f32.vlgmr.msra.gmra.mxu0 %vm1186_vm0, %v1483_v51  ;;  %v13869_v54 = vpop.permute.xlu1 %1339 }
 0x144   : > { %16720 = vst [vmem:[#allocation36_spill] sm:$0xff] %v13869_v54  ;;  %v13871_v55 = vpop.permute.xlu0 %1334  ;;  %6248 = vperm.xlu1 %12821, %v6234_v52   ;;  %11847 = vmatpush3.msra.mxu0 %v2868_v3 }
 0x145   : > { %16721 = vst [vmem:[#allocation37_spill] sm:$0xff] %v13871_v55  ;;  %6243 = vperm.xlu0 %12820, %v6233_v53  }
 0x147   : > { %v13873_v58 = vpop.permute.xlu1 %2273 }
 0x148   : > { %v13875_v59 = vpop.permute.xlu0 %2268  ;;  %5922 = vperm.xlu1 %12821, %v5900_v56  }
 0x149   : > { %5917 = vperm.xlu0 %12820, %v5899_v57  }
 0x14b   : > { %v13877_v62 = vpop.permute.xlu1 %1349 }
 0x14c   : > { %16722 = vst [vmem:[#allocation38_spill] sm:$0xff] %v13877_v62  ;;  %v13879_v63 = vpop.permute.xlu0 %1344  ;;  %6258 = vperm.xlu1 %12821, %v6236_v60  }
 0x14d   : > { %16723 = vst [vmem:[#allocation39_spill] sm:$0xff] %v13879_v63  ;;  %6253 = vperm.xlu0 %12820, %v6235_v61  }
 0x14f   : > { %v13881_v4 = vpop.permute.xlu1 %2283 }
 0x150   : > { %v13883_v5 = vpop.permute.xlu0 %2278  ;;  %5932 = vperm.xlu1 %12821, %v5902_v0  }
 0x151   : > { %5927 = vperm.xlu0 %12820, %v5901_v1  }
 0x153   : > { %v13886_v8 = vpop.permute.xlu1 %1359 }
 0x154   : > { %16724 = vst [vmem:[#allocation40_spill] sm:$0xff] %v13886_v8  ;;  %v13888_v9 = vpop.permute.xlu0 %1354  ;;  %6268 = vperm.xlu1 %12821, %v6238_v6  }
 0x155   : > { %16725 = vst [vmem:[#allocation41_spill] sm:$0xff] %v13888_v9  ;;  %6263 = vperm.xlu0 %12820, %v6237_v7  }
 0x157   : > { %v13890_v12 = vpop.permute.xlu1 %2293 }
 0x158   : > { %v13892_v13 = vpop.permute.xlu0 %2288  ;;  %5942 = vperm.xlu1 %12821, %v5904_v10  }
 0x159   : > { %5937 = vperm.xlu0 %12820, %v5903_v11  }
 0x15b   : > { %v13894_v16 = vpop.permute.xlu1 %1369 }
 0x15c   : > { %16726 = vst [vmem:[#allocation42_spill] sm:$0xff] %v13894_v16  ;;  %v13896_v17 = vpop.permute.xlu0 %1364  ;;  %6278 = vperm.xlu1 %12821, %v6240_v14   ;;  %v13969_v14 = vld [vmem:[#allocation7 + $0x28] sm:$0xff] }
 0x15d   : > { %16727 = vst [vmem:[#allocation43_spill] sm:$0xff] %v13896_v17  ;;  %6273 = vperm.xlu0 %12820, %v6239_v15   ;;  %11946 = vmatprep.subr.mxu0 %v13969_v14 }
 0x15f   : > { %v13898_v20 = vpop.permute.xlu1 %2303 }
 0x160   : > { %v13900_v21 = vpop.permute.xlu0 %2298  ;;  %7812 = vperm.xlu1 %12821, %v7804_v18  }
 0x161   : > { %7807 = vperm.xlu0 %12820, %v7803_v19  }
 0x163   : > { %v13902_v24 = vpop.permute.xlu1 %1379 }
 0x164   : > { %16728 = vst [vmem:[#allocation44_spill] sm:$0xff] %v13902_v24  ;;  %v13904_v25 = vpop.permute.xlu0 %1374  ;;  %8002 = vperm.xlu1 %12821, %v7994_v22  }
 0x165   : > { %16729 = vst [vmem:[#allocation45_spill] sm:$0xff] %v13904_v25  ;;  %7997 = vperm.xlu0 %12820, %v7993_v23  }
 0x167   : > { %v13912_v28 = vpop.permute.xlu1 %2313 }
 0x168   : > { %v13914_v29 = vpop.permute.xlu0 %2308  ;;  %9169 = vperm.xlu1 %12821, %v10784_v26  }
 0x169   : > { %8996 = vperm.xlu0 %12820, %v8993_v27  }
 0x16b   : > { %v13916_v30 = vpop.permute.xlu1 %1389 }
 0x16c   : > { %16730 = vst [vmem:[#allocation46_spill] sm:$0xff] %v13916_v30  ;;  %v13918_v31 = vpop.permute.xlu0 %1384 }
 0x16d   : > { %16731 = vst [vmem:[#allocation47_spill] sm:$0xff] %v13918_v31 }
 0x16f   : > { %v13923_v33 = vpop.permute.xlu1 %2323 }
 0x170   : > { %16732 = vst [vmem:[#allocation48_spill] sm:$0xff] %v13923_v33  ;;  %v13925_v34 = vpop.permute.xlu0 %2318 }
 0x173   : > { %v13927_v35 = vpop.permute.xlu1 %1399 }
 0x174   : > { %16733 = vst [vmem:[#allocation49_spill] sm:$0xff] %v13927_v35  ;;  %v13929_v36 = vpop.permute.xlu0 %1394 }
 0x175   : > { %16734 = vst [vmem:[#allocation50_spill] sm:$0xff] %v13929_v36 }
 0x177   : > { %v13931_v37 = vpop.permute.xlu1 %2333 }
 0x178   : > { %16735 = vst [vmem:[#allocation51_spill] sm:$0xff] %v13931_v37  ;;  %v13933_v38 = vpop.permute.xlu0 %2328 }
 0x179   : > { %16736 = vst [vmem:[#allocation52_spill] sm:$0xff] %v13933_v38 }
 0x17b   : > { %v13935_v39 = vpop.permute.xlu1 %1409 }
 0x17c   : > { %16737 = vst [vmem:[#allocation53_spill] sm:$0xff] %v13935_v39  ;;  %v13937_v40 = vpop.permute.xlu0 %1404 }
 0x17d   : > { %16738 = vst [vmem:[#allocation54_spill] sm:$0xff] %v13937_v40 }
 0x17f   : > { %v13939_v41 = vpop.permute.xlu1 %2343 }
 0x180   : > { %16739 = vst [vmem:[#allocation55_spill] sm:$0xff] %v13939_v41  ;;  %v13941_v42 = vpop.permute.xlu0 %2338 }
 0x181   : > { %16740 = vst [vmem:[#allocation56_spill] sm:$0xff] %v13941_v42 }
 0x183   : > { %v13948_v47 = vpop.permute.xlu1 %1419 }
 0x184   : > { %v11650_v46 = vpop.f32.mrf.mxu0  ;;  %16742 = vst [vmem:[#allocation57_spill] sm:$0xff] %v13948_v47  ;;  %v13951_v51 = vpop.permute.xlu0 %1414 }
 0x185   : > { %v1033_v48 = vadd.f32 %v11650_v46, %v13946_v45  ;;  %16743 = vst [vmem:[#allocation58_spill] sm:$0xff] %v13951_v51 }
 0x186   : > { %v1027_v52 = vpop.f32.mrf.mxu0 }
 0x187   : > { %1227 = vst.msk [vmem:[#allocation2 + $0x20] sm:$0xff] %vm1186_vm0, %v1033_v48  ;;  %v1028_v53 = vadd.f32 %v13946_v45, %v1027_v52  ;;  %v13955_v57 = vpop.permute.xlu1 %2353 }
 0x188   : > { %v11653_v56 = vpop.f32.mrf.mxu0  ;;  %16744 = vst [vmem:[#allocation59_spill] sm:$0xff] %v13955_v57  ;;  %v13959_v61 = vpop.permute.xlu0 %2348 }
 0x189   : > { %1226 = vst.msk [vmem:[#allocation2 + $0x18] sm:$0xff] %vm1186_vm0, %v1028_v53  ;;  %v1043_v60 = vadd.f32 %v11653_v56, %v13946_v45  ;;  %16745 = vst [vmem:[#allocation60_spill] sm:$0xff] %v13959_v61 }
 0x18a   : > { %v1037_v0 = vpop.f32.mrf.mxu0 }
 0x18b   : > { %1229 = vst.msk [vmem:[#allocation2 + $0x30] sm:$0xff] %vm1186_vm0, %v1043_v60  ;;  %v1038_v1 = vadd.f32 %v13946_v45, %v1037_v0  ;;  %v13963_v6 = vpop.permute.xlu1 %1429 }
 0x18c   : > { %v11656_v3 = vpop.f32.mrf.mxu0  ;;  %16746 = vst [vmem:[#allocation61_spill] sm:$0xff] %v13963_v6  ;;  %v13967_v10 = vpop.permute.xlu0 %1424 }
 0x18d   : > { %1228 = vst.msk [vmem:[#allocation2 + $0x28] sm:$0xff] %vm1186_vm0, %v1038_v1  ;;  %v1053_v7 = vadd.f32 %v11656_v3, %v13946_v45  ;;  %16747 = vst [vmem:[#allocation62_spill] sm:$0xff] %v13967_v10 }
 0x18e   : > { %v1047_v11 = vpop.f32.mrf.mxu0  ;;  %v13986_v46 = vld [vmem:[#allocation2 + $0x20] sm:$0xff] }
 0x18f   : > { %1231 = vst.msk [vmem:[#allocation2 + $0x40] sm:$0xff] %vm1186_vm0, %v1053_v7  ;;  %v1048_v15 = vadd.f32 %v13946_v45, %v1047_v11  ;;  %v13982_v27 = vpop.permute.xlu1 %2363  ;;  %16750 = vst [vmem:[#allocation65_spill] sm:$0xff] %v13986_v46 }
 0x190   : > { %v11659_v18 = vpop.f32.mrf.mxu0  ;;  %v13974_v19 = vld [vmem:[#allocation2 + $0x18] sm:$0xff]  ;;  %16749 = vst [vmem:[#allocation64_spill] sm:$0xff] %v13982_v27  ;;  %v13992_v53 = vpop.permute.xlu0 %2358 }
 0x191   : > { %16748 = vst [vmem:[#allocation63_spill] sm:$0xff] %v13974_v19  ;;  %v13976_v22 = vld [vmem:[#allocation2 + $0x17] sm:$0xff]  ;;  %v13978_v23 = vld [vmem:[#allocation2 + $0x1f] sm:$0xff]  ;;  %1230 = vst.msk [vmem:[#allocation2 + $0x38] sm:$0xff] %vm1186_vm0, %v1048_v15  ;;  %v1063_v26 = vadd.f32 %v11659_v18, %v13946_v45  ;;  %11701 = vmatprep.mubr.msk.f32.mxu1 %vm1186_vm0, %v13974_v19 }
 0x192   : > { %v1484_v48 = vmul.f32 %v13871_v55, %v13976_v22  ;;  %v1485_v52 = vmul.f32 %v13869_v54, %v13978_v23  ;;  %16751 = vst [vmem:[#allocation66_spill] sm:$0xff] %v13992_v53  ;;  %v1057_v56 = vpop.f32.mrf.mxu0  ;;  %11702 = vmatmul.mubr.msk.f32.gmra.mxu1 %vm1186_vm0, %v13986_v46  ;;  %v14010_v15 = vld [vmem:[#allocation2 + $0x30] sm:$0xff] }
 0x193   : > { %1233 = vst.msk [vmem:[#allocation2 + $0x50] sm:$0xff] %vm1186_vm0, %v1063_v26  ;;  %v1058_v60 = vadd.f32 %v13946_v45, %v1057_v56  ;;  %16753 = vst [vmem:[#allocation68_spill] sm:$0xff] %v14010_v15 }
 0x194   : > { %11751 = vmatprep.mubr.msk.f32.mxu0 %vm1186_vm0, %v1484_v48  ;;  %v11662_v0 = vpop.f32.mrf.mxu0  ;;  %v14000_v1 = vld [vmem:[#allocation2 + $0x28] sm:$0xff] }
 0x195   : > { %11752 = vmatmul.mubr.msk.f32.gmra.mxu0 %vm1186_vm0, %v1485_v52  ;;  %16752 = vst [vmem:[#allocation67_spill] sm:$0xff] %v14000_v1  ;;  %v14002_v3 = vld [vmem:[#allocation2 + $0x27] sm:$0xff]  ;;  %v14004_v7 = vld [vmem:[#allocation2 + $0x2f] sm:$0xff]  ;;  %1232 = vst.msk [vmem:[#allocation2 + $0x48] sm:$0xff] %vm1186_vm0, %v1058_v60  ;;  %v1073_v11 = vadd.f32 %v11662_v0, %v13946_v45  ;;  %11704 = vmatprep.mubr.msk.f32.mxu1 %vm1186_vm0, %v14000_v1  ;;  %v14019_v52 = vpop.permute.xlu1 %1439  ;;  %v14023_v60 = vpop.permute.xlu0 %1434 }
 0x196   : > { %v1486_v18 = vmul.f32 %v13879_v63, %v14002_v3  ;;  %v1487_v26 = vmul.f32 %v13877_v62, %v14004_v7  ;;  %v1067_v48 = vpop.f32.mrf.mxu0  ;;  %11705 = vmatmul.mubr.msk.f32.gmra.mxu1 %vm1186_vm0, %v14010_v15  ;;  %16754 = vst [vmem:[#allocation69_spill] sm:$0xff] %v14019_v52  ;;  %16755 = vst [vmem:[#allocation70_spill] sm:$0xff] %v14023_v60 }
 0x197   : > { %1235 = vst.msk [vmem:[#allocation2 + $0x60] sm:$0xff] %vm1186_vm0, %v1073_v11  ;;  %v1068_v56 = vadd.f32 %v13946_v45, %v1067_v48  ;;  %v14036_v48 = vld [vmem:[#allocation2 + $0x40] sm:$0xff] }
 0x198   : > { %11754 = vmatprep.mubr.msk.f32.mxu0 %vm1186_vm0, %v1486_v18  ;;  %v11665_v0 = vpop.f32.mrf.mxu0  ;;  %v14026_v2 = vld [vmem:[#allocation2 + $0x38] sm:$0xff]  ;;  %16757 = vst [vmem:[#allocation72_spill] sm:$0xff] %v14036_v48 }
 0x199   : > { %11755 = vmatmul.mubr.msk.f32.gmra.mxu0 %vm1186_vm0, %v1487_v26  ;;  %16756 = vst [vmem:[#allocation71_spill] sm:$0xff] %v14026_v2  ;;  %v14028_v1 = vld [vmem:[#allocation2 + $0x37] sm:$0xff]  ;;  %v14030_v46 = vld [vmem:[#allocation2 + $0x3f] sm:$0xff]  ;;  %1234 = vst.msk [vmem:[#allocation2 + $0x58] sm:$0xff] %vm1186_vm0, %v1068_v56  ;;  %v1083_v11 = vadd.f32 %v11665_v0, %v13946_v45  ;;  %11707 = vmatprep.mubr.msk.f32.mxu1 %vm1186_vm0, %v14026_v2  ;;  %v14054_v53 = vpop.permute.xlu1 %2373 }
 0x19a   : > { %v1488_v18 = vmul.f32 %v13888_v9, %v14028_v1  ;;  %v1489_v26 = vmul.f32 %v13886_v8, %v14030_v46  ;;  %v1077_v15 = vpop.f32.mrf.mxu0  ;;  %11708 = vmatmul.mubr.msk.f32.gmra.mxu1 %vm1186_vm0, %v14036_v48  ;;  %16759 = vst [vmem:[#allocation74_spill] sm:$0xff] %v14054_v53 }
 0x19b   : > { %1237 = vst.msk [vmem:[#allocation2 + $0x70] sm:$0xff] %vm1186_vm0, %v1083_v11  ;;  %v1078_v56 = vadd.f32 %v13946_v45, %v1077_v15  ;;  %v14060_v15 = vld [vmem:[#allocation2 + $0x50] sm:$0xff] }
 0x19c   : > { %11757 = vmatprep.mubr.msk.f32.mxu0 %vm1186_vm0, %v1488_v18  ;;  %v11668_v0 = vpop.f32.mrf.mxu0  ;;  %v14048_v2 = vld [vmem:[#allocation2 + $0x48] sm:$0xff]  ;;  %16760 = vst [vmem:[#allocation75_spill] sm:$0xff] %v14060_v15 }
 0x19d   : > { %11758 = vmatmul.mubr.msk.f32.gmra.mxu0 %vm1186_vm0, %v1489_v26  ;;  %16758 = vst [vmem:[#allocation73_spill] sm:$0xff] %v14048_v2  ;;  %v14050_v19 = vld [vmem:[#allocation2 + $0x47] sm:$0xff]  ;;  %v14052_v27 = vld [vmem:[#allocation2 + $0x4f] sm:$0xff]  ;;  %1236 = vst.msk [vmem:[#allocation2 + $0x68] sm:$0xff] %vm1186_vm0, %v1078_v56  ;;  %v1093_v48 = vadd.f32 %v11668_v0, %v13946_v45  ;;  %11710 = vmatprep.mubr.msk.f32.mxu1 %vm1186_vm0, %v14048_v2  ;;  %v14066_v26 = vpop.permute.xlu0 %2368 }
 0x19e   : > { %v1490_v11 = vmul.f32 %v13896_v17, %v14050_v19  ;;  %v1491_v18 = vmul.f32 %v13894_v16, %v14052_v27  ;;  %16761 = vst [vmem:[#allocation76_spill] sm:$0xff] %v14066_v26  ;;  %v1087_v57 = vpop.f32.mrf.mxu0  ;;  %11711 = vmatmul.mubr.msk.f32.gmra.mxu1 %vm1186_vm0, %v14060_v15  ;;  %v14092_v15 = vpop.permute.xlu1 %1449 }
 0x19f   : > { %1239 = vst.msk [vmem:[#allocation2 + $0x80] sm:$0xff] %vm1186_vm0, %v1093_v48  ;;  %v1088_v56 = vadd.f32 %v13946_v45, %v1087_v57  ;;  %v14084_v48 = vld [vmem:[#allocation2 + $0x60] sm:$0xff]  ;;  %16764 = vst [vmem:[#allocation79_spill] sm:$0xff] %v14092_v15 }
 0x1a0   : > { %11760 = vmatprep.mubr.msk.f32.mxu0 %vm1186_vm0, %v1490_v11  ;;  %v11671_v0 = vpop.f32.mrf.mxu0  ;;  %v14074_v2 = vld [vmem:[#allocation2 + $0x58] sm:$0xff]  ;;  %16763 = vst [vmem:[#allocation78_spill] sm:$0xff] %v14084_v48 }
 0x1a1   : > { %11761 = vmatmul.mubr.msk.f32.gmra.mxu0 %vm1186_vm0, %v1491_v18  ;;  %16762 = vst [vmem:[#allocation77_spill] sm:$0xff] %v14074_v2  ;;  %v14076_v53 = vld [vmem:[#allocation2 + $0x57] sm:$0xff]  ;;  %v14078_v61 = vld [vmem:[#allocation2 + $0x5f] sm:$0xff]  ;;  %1238 = vst.msk [vmem:[#allocation2 + $0x78] sm:$0xff] %vm1186_vm0, %v1088_v56  ;;  %v1103_v26 = vadd.f32 %v11671_v0, %v13946_v45  ;;  %11713 = vmatprep.mubr.msk.f32.mxu1 %vm1186_vm0, %v14074_v2  ;;  %v14097_v0 = vpop.permute.xlu0 %1444 }
 0x1a2   : > { %v1492_v57 = vmul.f32 %v13904_v25, %v14076_v53  ;;  %v1493_v11 = vmul.f32 %v13902_v24, %v14078_v61  ;;  %v1097_v18 = vpop.f32.mrf.mxu0  ;;  %11714 = vmatmul.mubr.msk.f32.gmra.mxu1 %vm1186_vm0, %v14084_v48  ;;  %16765 = vst [vmem:[#allocation80_spill] sm:$0xff] %v14097_v0 }
 0x1a3   : > { %1241 = vst.msk [vmem:[#allocation2 + $0x90] sm:$0xff] %vm1186_vm0, %v1103_v26  ;;  %v1098_v56 = vadd.f32 %v13946_v45, %v1097_v18  ;;  %v14110_v26 = vld [vmem:[#allocation2 + $0x70] sm:$0xff] }
 0x1a4   : > { %11763 = vmatprep.mubr.msk.f32.mxu0 %vm1186_vm0, %v1492_v57  ;;  %v11674_v2 = vpop.f32.mrf.mxu0  ;;  %v14100_v41 = vld [vmem:[#allocation2 + $0x68] sm:$0xff]  ;;  %16767 = vst [vmem:[#allocation82_spill] sm:$0xff] %v14110_v26 }
 0x1a5   : > { %11764 = vmatmul.mubr.msk.f32.gmra.mxu0 %vm1186_vm0, %v1493_v11  ;;  %16766 = vst [vmem:[#allocation81_spill] sm:$0xff] %v14100_v41  ;;  %v14102_v42 = vld [vmem:[#allocation2 + $0x67] sm:$0xff]  ;;  %v14104_v37 = vld [vmem:[#allocation2 + $0x6f] sm:$0xff]  ;;  %1240 = vst.msk [vmem:[#allocation2 + $0x88] sm:$0xff] %vm1186_vm0, %v1098_v56  ;;  %v1113_v48 = vadd.f32 %v11674_v2, %v13946_v45  ;;  %11716 = vmatprep.mubr.msk.f32.mxu1 %vm1186_vm0, %v14100_v41 }
 0x1a6   : > { %v1494_v57 = vmul.f32 %v13918_v31, %v14102_v42  ;;  %v1495_v11 = vmul.f32 %v13916_v30, %v14104_v37  ;;  %v1107_v18 = vpop.f32.mrf.mxu0  ;;  %11717 = vmatmul.mubr.msk.f32.gmra.mxu1 %vm1186_vm0, %v14110_v26  ;;  %v14128_v30 = vpop.permute.xlu1 %2383 }
 0x1a7   : > { %1243 = vst.msk [vmem:[#allocation2 + $0xa0] sm:$0xff] %vm1186_vm0, %v1113_v48  ;;  %v1108_v56 = vadd.f32 %v13946_v45, %v1107_v18  ;;  %16769 = vst [vmem:[#allocation84_spill] sm:$0xff] %v14128_v30  ;;  %v14134_v48 = vld [vmem:[#allocation2 + $0x80] sm:$0xff]  ;;  %v14140_v18 = vpop.permute.xlu0 %2378 }
 0x1a8   : > { %11766 = vmatprep.mubr.msk.f32.mxu0 %vm1186_vm0, %v1494_v57  ;;  %v11677_v2 = vpop.f32.mrf.mxu0  ;;  %v14122_v41 = vld [vmem:[#allocation2 + $0x78] sm:$0xff]  ;;  %16770 = vst [vmem:[#allocation85_spill] sm:$0xff] %v14134_v48  ;;  %16771 = vst [vmem:[#allocation86_spill] sm:$0xff] %v14140_v18 }
 0x1a9   : > { %11767 = vmatmul.mubr.msk.f32.gmra.mxu0 %vm1186_vm0, %v1495_v11  ;;  %16768 = vst [vmem:[#allocation83_spill] sm:$0xff] %v14122_v41  ;;  %v14124_v38 = vld [vmem:[#allocation2 + $0x77] sm:$0xff]  ;;  %v14126_v33 = vld [vmem:[#allocation2 + $0x7f] sm:$0xff]  ;;  %1242 = vst.msk [vmem:[#allocation2 + $0x98] sm:$0xff] %vm1186_vm0, %v1108_v56  ;;  %v1123_v26 = vadd.f32 %v11677_v2, %v13946_v45  ;;  %11719 = vmatprep.mubr.msk.f32.mxu1 %vm1186_vm0, %v14122_v41 }
 0x1aa   : > { %v1496_v57 = vmul.f32 %v13929_v36, %v14124_v38  ;;  %v1497_v11 = vmul.f32 %v13927_v35, %v14126_v33  ;;  %v1117_v31 = vpop.f32.mrf.mxu0  ;;  %11720 = vmatmul.mubr.msk.f32.gmra.mxu1 %vm1186_vm0, %v14134_v48  ;;  %v14166_v48 = vpop.permute.xlu1 %1459 }
 0x1ab   : > { %1245 = vst.msk [vmem:[#allocation2 + $0xb0] sm:$0xff] %vm1186_vm0, %v1123_v26  ;;  %v1118_v56 = vadd.f32 %v13946_v45, %v1117_v31  ;;  %v14158_v26 = vld [vmem:[#allocation2 + $0x90] sm:$0xff]  ;;  %16775 = vst [vmem:[#allocation90_spill] sm:$0xff] %v14166_v48 }
 0x1ac   : > { %11769 = vmatprep.mubr.msk.f32.mxu0 %vm1186_vm0, %v1496_v57  ;;  %v11680_v2 = vpop.f32.mrf.mxu0  ;;  %v14148_v41 = vld [vmem:[#allocation2 + $0x88] sm:$0xff]  ;;  %16774 = vst [vmem:[#allocation89_spill] sm:$0xff] %v14158_v26 }
 0x1ad   : > { %11770 = vmatmul.mubr.msk.f32.gmra.mxu0 %vm1186_vm0, %v1497_v11  ;;  %16772 = vst [vmem:[#allocation87_spill] sm:$0xff] %v14148_v41  ;;  %v14150_v30 = vld [vmem:[#allocation2 + $0x87] sm:$0xff]  ;;  %v14152_v35 = vld [vmem:[#allocation2 + $0x8f] sm:$0xff]  ;;  %1244 = vst.msk [vmem:[#allocation2 + $0xa8] sm:$0xff] %vm1186_vm0, %v1118_v56  ;;  %v1133_v18 = vadd.f32 %v11680_v2, %v13946_v45  ;;  %11722 = vmatprep.mubr.msk.f32.mxu1 %vm1186_vm0, %v14148_v41  ;;  %v14171_v2 = vpop.permute.xlu0 %1454 }
 0x1ae   : > { %16773 = vst [vmem:[#allocation88_spill] sm:$0xff] %v14152_v35  ;;  %v1498_v31 = vmul.f32 %v13937_v40, %v14150_v30  ;;  %v1499_v57 = vmul.f32 %v13935_v39, %v14152_v35  ;;  %v1127_v11 = vpop.f32.mrf.mxu0  ;;  %11723 = vmatmul.mubr.msk.f32.gmra.mxu1 %vm1186_vm0, %v14158_v26  ;;  %16776 = vst [vmem:[#allocation91_spill] sm:$0xff] %v14171_v2 }
 0x1af   : > { %1247 = vst.msk [vmem:[#allocation2 + $0xc0] sm:$0xff] %vm1186_vm0, %v1133_v18  ;;  %v1128_v56 = vadd.f32 %v13946_v45, %v1127_v11  ;;  %v14184_v18 = vld [vmem:[#allocation2 + $0xa0] sm:$0xff] }
 0x1b0   : > { %11772 = vmatprep.mubr.msk.f32.mxu0 %vm1186_vm0, %v1498_v31  ;;  %v11683_v41 = vpop.f32.mrf.mxu0  ;;  %v14174_v40 = vld [vmem:[#allocation2 + $0x98] sm:$0xff]  ;;  %16779 = vst [vmem:[#allocation94_spill] sm:$0xff] %v14184_v18 }
 0x1b1   : > { %11773 = vmatmul.mubr.msk.f32.gmra.mxu0 %vm1186_vm0, %v1499_v57  ;;  %16777 = vst [vmem:[#allocation92_spill] sm:$0xff] %v14174_v40  ;;  %v14176_v39 = vld [vmem:[#allocation2 + $0x97] sm:$0xff]  ;;  %v14178_v35 = vld [vmem:[#allocation2 + $0x9f] sm:$0xff]  ;;  %1246 = vst.msk [vmem:[#allocation2 + $0xb8] sm:$0xff] %vm1186_vm0, %v1128_v56  ;;  %v1143_v26 = vadd.f32 %v11683_v41, %v13946_v45  ;;  %11725 = vmatprep.mubr.msk.f32.mxu1 %vm1186_vm0, %v14174_v40 }
 0x1b2   : > { %16778 = vst [vmem:[#allocation93_spill] sm:$0xff] %v14178_v35  ;;  %v1500_v31 = vmul.f32 %v13951_v51, %v14176_v39  ;;  %v1501_v57 = vmul.f32 %v13948_v47, %v14178_v35  ;;  %v1137_v11 = vpop.f32.mrf.mxu0  ;;  %11726 = vmatmul.mubr.msk.f32.gmra.mxu1 %vm1186_vm0, %v14184_v18  ;;  %v14202_v47 = vpop.permute.xlu1 %2393 }
 0x1b3   : > { %1249 = vst.msk [vmem:[#allocation2 + $0xd0] sm:$0xff] %vm1186_vm0, %v1143_v26  ;;  %v1138_v56 = vadd.f32 %v13946_v45, %v1137_v11  ;;  %16781 = vst [vmem:[#allocation96_spill] sm:$0xff] %v14202_v47  ;;  %v14208_v26 = vld [vmem:[#allocation2 + $0xb0] sm:$0xff]  ;;  %v14214_v11 = vpop.permute.xlu0 %2388 }
 0x1b4   : > { %11775 = vmatprep.mubr.msk.f32.mxu0 %vm1186_vm0, %v1500_v31  ;;  %v11686_v41 = vpop.f32.mrf.mxu0  ;;  %v14196_v40 = vld [vmem:[#allocation2 + $0xa8] sm:$0xff]  ;;  %16782 = vst [vmem:[#allocation97_spill] sm:$0xff] %v14208_v26  ;;  %16783 = vst [vmem:[#allocation98_spill] sm:$0xff] %v14214_v11 }
 0x1b5   : > { %11776 = vmatmul.mubr.msk.f32.gmra.mxu0 %vm1186_vm0, %v1501_v57  ;;  %16780 = vst [vmem:[#allocation95_spill] sm:$0xff] %v14196_v40  ;;  %v14198_v36 = vld [vmem:[#allocation2 + $0xa7] sm:$0xff]  ;;  %v14200_v51 = vld [vmem:[#allocation2 + $0xaf] sm:$0xff]  ;;  %1248 = vst.msk [vmem:[#allocation2 + $0xc8] sm:$0xff] %vm1186_vm0, %v1138_v56  ;;  %v1153_v18 = vadd.f32 %v11686_v41, %v13946_v45  ;;  %11728 = vmatprep.mubr.msk.f32.mxu1 %vm1186_vm0, %v14196_v40 }
 0x1b6   : > { %v1502_v31 = vmul.f32 %v13967_v10, %v14198_v36  ;;  %v1503_v57 = vmul.f32 %v13963_v6, %v14200_v51  ;;  %v1147_v35 = vpop.f32.mrf.mxu0  ;;  %11729 = vmatmul.mubr.msk.f32.gmra.mxu1 %vm1186_vm0, %v14208_v26  ;;  %v14240_v26 = vpop.permute.xlu1 %1469 }
 0x1b7   : > { %1251 = vst.msk [vmem:[#allocation2 + $0xe0] sm:$0xff] %vm1186_vm0, %v1153_v18  ;;  %v1148_v56 = vadd.f32 %v13946_v45, %v1147_v35  ;;  %v14232_v18 = vld [vmem:[#allocation2 + $0xc0] sm:$0xff] }
 0x1b8   : > { %11778 = vmatprep.mubr.msk.f32.mxu0 %vm1186_vm0, %v1502_v31  ;;  %v11689_v41 = vpop.f32.mrf.mxu0  ;;  %v14222_v40 = vld [vmem:[#allocation2 + $0xb8] sm:$0xff]  ;;  %16786 = vst [vmem:[#allocation101_spill] sm:$0xff] %v14232_v18 }
 0x1b9   : > { %11779 = vmatmul.mubr.msk.f32.gmra.mxu0 %vm1186_vm0, %v1503_v57  ;;  %16784 = vst [vmem:[#allocation99_spill] sm:$0xff] %v14222_v40  ;;  %v14224_v47 = vld [vmem:[#allocation2 + $0xb7] sm:$0xff]  ;;  %v14226_v6 = vld [vmem:[#allocation2 + $0xbf] sm:$0xff]  ;;  %1250 = vst.msk [vmem:[#allocation2 + $0xd8] sm:$0xff] %vm1186_vm0, %v1148_v56  ;;  %v1163_v11 = vadd.f32 %v11689_v41, %v13946_v45  ;;  %11731 = vmatprep.mubr.msk.f32.mxu1 %vm1186_vm0, %v14222_v40  ;;  %v14245_v41 = vpop.permute.xlu0 %1464 }
 0x1ba   : > { %16785 = vst [vmem:[#allocation100_spill] sm:$0xff] %v14226_v6  ;;  %v1504_v35 = vmul.f32 %v14023_v60, %v14224_v47  ;;  %v1505_v31 = vmul.f32 %v14019_v52, %v14226_v6  ;;  %v1157_v57 = vpop.f32.mrf.mxu0  ;;  %11732 = vmatmul.mubr.msk.f32.gmra.mxu1 %vm1186_vm0, %v14232_v18 }
 0x1bb   : > { %1253 = vst.msk [vmem:[#allocation2 + $0xf0] sm:$0xff] %vm1186_vm0, %v1163_v11  ;;  %v1158_v56 = vadd.f32 %v13946_v45, %v1157_v57  ;;  %v14258_v11 = vld [vmem:[#allocation2 + $0xd0] sm:$0xff] }
 0x1bc   : > { %11781 = vmatprep.mubr.msk.f32.mxu0 %vm1186_vm0, %v1504_v35  ;;  %v11692_v40 = vpop.f32.mrf.mxu0  ;;  %v14248_v60 = vld [vmem:[#allocation2 + $0xc8] sm:$0xff]  ;;  %16789 = vst [vmem:[#allocation104_spill] sm:$0xff] %v14258_v11 }
 0x1bd   : > { %11782 = vmatmul.mubr.msk.f32.gmra.mxu0 %vm1186_vm0, %v1505_v31  ;;  %16787 = vst [vmem:[#allocation102_spill] sm:$0xff] %v14248_v60  ;;  %v14250_v52 = vld [vmem:[#allocation2 + $0xc7] sm:$0xff]  ;;  %v14252_v6 = vld [vmem:[#allocation2 + $0xcf] sm:$0xff]  ;;  %1252 = vst.msk [vmem:[#allocation2 + $0xe8] sm:$0xff] %vm1186_vm0, %v1158_v56  ;;  %v1173_v18 = vadd.f32 %v11692_v40, %v13946_v45  ;;  %11734 = vmatprep.mubr.msk.f32.mxu1 %vm1186_vm0, %v14248_v60 }
 0x1be   : > { %16788 = vst [vmem:[#allocation103_spill] sm:$0xff] %v14252_v6  ;;  %v1506_v35 = vmul.f32 %v14097_v0, %v14250_v52  ;;  %v1507_v31 = vmul.f32 %v14092_v15, %v14252_v6  ;;  %v1167_v57 = vpop.f32.mrf.mxu0  ;;  %11735 = vmatmul.mubr.msk.f32.gmra.mxu1 %vm1186_vm0, %v14258_v11  ;;  %v14276_v15 = vpop.permute.xlu1 %2403 }
 0x1bf   : > { %1255 = vst.msk [vmem:[#allocation2 + $0x100] sm:$0xff] %vm1186_vm0, %v1173_v18  ;;  %v1168_v56 = vadd.f32 %v13946_v45, %v1167_v57  ;;  %v14282_v18 = vld [vmem:[#allocation2 + $0xe0] sm:$0xff]  ;;  %v14288_v57 = vpop.permute.xlu0 %2398 }
 0x1c0   : > { %11784 = vmatprep.mubr.msk.f32.mxu0 %vm1186_vm0, %v1506_v35  ;;  %v11695_v40 = vpop.f32.mrf.mxu0  ;;  %v14270_v60 = vld [vmem:[#allocation2 + $0xd8] sm:$0xff]  ;;  %16793 = vst [vmem:[#allocation108_spill] sm:$0xff] %v14282_v18  ;;  %16794 = vst [vmem:[#allocation109_spill] sm:$0xff] %v14288_v57 }
 0x1c1   : > { %11785 = vmatmul.mubr.msk.f32.gmra.mxu0 %vm1186_vm0, %v1507_v31  ;;  %16790 = vst [vmem:[#allocation105_spill] sm:$0xff] %v14270_v60  ;;  %v14272_v10 = vld [vmem:[#allocation2 + $0xd7] sm:$0xff]  ;;  %v14274_v0 = vld [vmem:[#allocation2 + $0xdf] sm:$0xff]  ;;  %1254 = vst.msk [vmem:[#allocation2 + $0xf8] sm:$0xff] %vm1186_vm0, %v1168_v56  ;;  %v1183_v11 = vadd.f32 %v11695_v40, %v13946_v45  ;;  %11737 = vmatprep.mubr.msk.f32.mxu1 %vm1186_vm0, %v14270_v60 }
 0x1c2   : > { %16791 = vst [vmem:[#allocation106_spill] sm:$0xff] %v14272_v10  ;;  %16792 = vst [vmem:[#allocation107_spill] sm:$0xff] %v14274_v0  ;;  %v1508_v35 = vmul.f32 %v14171_v2, %v14272_v10  ;;  %v1509_v31 = vmul.f32 %v14166_v48, %v14274_v0  ;;  %v1177_v6 = vpop.f32.mrf.mxu0  ;;  %11738 = vmatmul.mubr.msk.f32.gmra.mxu1 %vm1186_vm0, %v14282_v18  ;;  %v14305_v18 = vld [vmem:[#allocation2 + $0xf0] sm:$0xff]  ;;  %v14336_v0 = vld [vmem:[#allocation2 + $0x19] sm:$0xff] }
 0x1c3   : > { %1257 = vst.msk [vmem:[#allocation2 + $0x110] sm:$0xff] %vm1186_vm0, %v1183_v11  ;;  %v1178_v56 = vadd.f32 %v13946_v45, %v1177_v6  ;;  %16798 = vst [vmem:[#allocation113_spill] sm:$0xff] %v14305_v18  ;;  %v2191_v11 = vld [vmem:[#allocation2 + $0x9] sm:$0xff] }
 0x1c4   : > { %11787 = vmatprep.mubr.msk.f32.mxu0 %vm1186_vm0, %v1508_v35  ;;  %v14296_v40 = vld [vmem:[#allocation2 + $0xe8] sm:$0xff]  ;;  %v14314_v35 = vpop.permute.xlu1 %1479 }
 0x1c5   : > { %11788 = vmatmul.mubr.msk.f32.gmra.mxu0 %vm1186_vm0, %v1509_v31  ;;  %16795 = vst [vmem:[#allocation110_spill] sm:$0xff] %v14296_v40  ;;  %v14298_v60 = vld [vmem:[#allocation2 + $0xe7] sm:$0xff]  ;;  %v14300_v2 = vld [vmem:[#allocation2 + $0xef] sm:$0xff]  ;;  %1256 = vst.msk [vmem:[#allocation2 + $0x108] sm:$0xff] %vm1186_vm0, %v1178_v56  ;;  %11740 = vmatprep.mubr.msk.f32.mxu1 %vm1186_vm0, %v14296_v40  ;;  %v14316_v31 = vpop.permute.xlu0 %1474 }
 0x1c6   : > { %16796 = vst [vmem:[#allocation111_spill] sm:$0xff] %v14298_v60  ;;  %16797 = vst [vmem:[#allocation112_spill] sm:$0xff] %v14300_v2  ;;  %v1510_v45 = vmul.f32 %v14245_v41, %v14298_v60  ;;  %v1511_v6 = vmul.f32 %v14240_v26, %v14300_v2  ;;  %11741 = vmatmul.mubr.msk.f32.gmra.mxu1 %vm1186_vm0, %v14305_v18  ;;  %v2416_v2 = vmul.f32 %v13857_v43, %v2191_v11  ;;  %v14328_v18 = vld [vmem:[#allocation2 + $0x100] sm:$0xff] }
 0x1c7   : > { %16799 = vst [vmem:[#allocation114_spill] sm:$0xff] %v14314_v35  ;;  %16801 = vst [vmem:[#allocation116_spill] sm:$0xff] %v14328_v18  ;;  %v2835_v11 = vmul.f32 %v13859_v44, %v13976_v22  ;;  %v14359_v22 = vld [vmem:[#allocation7 + $0x30] sm:$0xff] }
 0x1c8   : > { %11790 = vmatprep.mubr.msk.f32.mxu0 %vm1186_vm0, %v1510_v45  ;;  %v14319_v56 = vld [vmem:[#allocation2 + $0xf8] sm:$0xff] }
 0x1c9   : > { %11791 = vmatmul.mubr.msk.f32.gmra.mxu0 %vm1186_vm0, %v1511_v6  ;;  %16800 = vst [vmem:[#allocation115_spill] sm:$0xff] %v14319_v56  ;;  %v14321_v40 = vld [vmem:[#allocation2 + $0xf7] sm:$0xff]  ;;  %v14323_v48 = vld [vmem:[#allocation2 + $0xff] sm:$0xff]  ;;  %11743 = vmatprep.mubr.msk.f32.mxu1 %vm1186_vm0, %v14319_v56 }
 0x1ca   : > { %v1512_v45 = vmul.f32 %v14316_v31, %v14321_v40  ;;  %v1513_v60 = vmul.f32 %v14314_v35, %v14323_v48  ;;  %v2192_v6 = vld [vmem:[#allocation2 + $0x11] sm:$0xff]  ;;  %11744 = vmatmul.mubr.msk.f32.gmra.mxu1 %vm1186_vm0, %v14328_v18 }
 0x1cb   : > { %v14338_v10 = vld [vmem:[#allocation2 + $0x111] sm:$0xff]  ;;  %11798 = vmatprep.mubr.msk.f32.mxu1 %vm1186_vm0, %v2416_v2  ;;  %v2417_v43 = vmul.f32 %v13863_v49, %v2192_v6  ;;  %v2418_v2 = vmul.f32 %v13875_v59, %v14336_v0  ;;  %v14366_v6 = vld [vmem:[#allocation2 + $0x29] sm:$0xff] }
 0x1cc   : > { %16802 = vst [vmem:[#allocation117_spill] sm:$0xff] %v14338_v10  ;;  %11793 = vmatprep.mubr.msk.f32.mxu0 %vm1186_vm0, %v1512_v45  ;;  %v14346_v56 = vmul.f32 %v14338_v10, %v14276_v15  ;;  %v14350_v18 = vld [vmem:[#allocation2 + $0x107] sm:$0xff]  ;;  %v14352_v35 = vld [vmem:[#allocation2 + $0x10f] sm:$0xff]  ;;  %v2837_v10 = vmul.f32 %v13871_v55, %v14002_v3  ;;  %v2420_v3 = vmul.f32 %v13883_v5, %v14366_v6 }
 0x1cd   : > { %11794 = vmatmul.mubr.msk.f32.gmra.mxu0 %vm1186_vm0, %v1513_v60  ;;  %v14357_v45 = vld [vmem:[#allocation2 + $0x21] sm:$0xff]  ;;  %v14361_v44 = vld [vmem:[#allocation2 + $0x109] sm:$0xff]  ;;  %v2836_v60 = vmul.f32 %v13865_v50, %v13978_v23  ;;  %v14523_v50 = vld [vmem:[#allocation2 + $0xb1] sm:$0xff] }
 0x1ce   : > { %16803 = vst [vmem:[#allocation118_spill] sm:$0xff] %v14346_v56  ;;  %11848 = vmatprep.mubr.msk.f32.mxu0 %vm1186_vm0, %v2835_v11  ;;  %16804 = vst [vmem:[#allocation119_spill] sm:$0xff] %v14361_v44  ;;  %11799 = vmatmul.mubr.msk.f32.vlgmr.msra.gmra.mxu1 %vm1186_vm0, %v2417_v43  ;;  %v14370_v56 = vmul.f32 %v14350_v18, %v14245_v41  ;;  %v14374_v11 = vmul.f32 %v14352_v35, %v14240_v26  ;;  %v14380_v43 = vld [vmem:[#allocation7 + $0x38] sm:$0xff]  ;;  %v16824_v55 = vld [vmem:[#allocation66_spill] sm:$0xff] }
 0x1cf   : > { %11801 = vmatprep.mubr.msk.f32.mxu1 %vm1186_vm0, %v2418_v2  ;;  %11897 = vmatpush3.msra.mxu1 %v13920_v32  ;;  %v14384_v23 = vmul.f32 %v14361_v44, %v14288_v57  ;;  %v14393_v2 = vld [vmem:[#allocation2 + $0x31] sm:$0xff]  ;;  %v2838_v32 = vmul.f32 %v13869_v54, %v14004_v7  ;;  %v14411_v7 = vld [vmem:[#allocation2 + $0x41] sm:$0xff]  ;;  %v14512_v54 = vld [vmem:[#allocation2 + $0xa9] sm:$0xff] }
 0x1d0   : > { %16805 = vst [vmem:[#allocation120_spill] sm:$0xff] %v14370_v56  ;;  %16806 = vst [vmem:[#allocation121_spill] sm:$0xff] %v14374_v11  ;;  %v2419_v56 = vmul.f32 %v13873_v58, %v14357_v45  ;;  %11996 = vmatprep.subr.mxu1 %v14359_v22  ;;  %v16829_v44 = vld [vmem:[#allocation76_spill] sm:$0xff] }
 0x1d1   : > { %16807 = vst [vmem:[#allocation122_spill] sm:$0xff] %v14384_v23  ;;  %11849 = vmatmul.mubr.msk.f32.vlgmr.msra.gmra.mxu0 %vm1186_vm0, %v2836_v60  ;;  %v14399_v60 = vld [vmem:[#allocation2 + $0x39] sm:$0xff]  ;;  %v2421_v23 = vmul.f32 %v13881_v4, %v14393_v2 }
 0x1d2   : > { %11851 = vmatprep.mubr.msk.f32.mxu0 %vm1186_vm0, %v2837_v10  ;;  %11947 = vmatpush3.msra.mxu0 %v13969_v14  ;;  %v2839_v10 = vmul.f32 %v13879_v63, %v14028_v1  ;;  %v2422_v14 = vmul.f32 %v13892_v13, %v14399_v60  ;;  %v2841_v1 = vmul.f32 %v13888_v9, %v14050_v19  ;;  %v14496_v9 = vld [vmem:[#allocation2 + $0x99] sm:$0xff]  ;;  %v14507_v63 = vld [vmem:[#allocation2 + $0xa1] sm:$0xff] }
 0x1d3   : > { %11802 = vmatmul.mubr.msk.f32.gmra.mxu1 %vm1186_vm0, %v2419_v56  ;;  %12046 = vmatprep.subr.mxu0 %v14380_v43  ;;  %v2840_v56 = vmul.f32 %v13877_v62, %v14030_v46  ;;  %v2842_v46 = vmul.f32 %v13886_v8, %v14052_v27  ;;  %v2843_v19 = vmul.f32 %v13896_v17, %v14076_v53  ;;  %v16814_v17 = vld [vmem:[#allocation56_spill] sm:$0xff]  ;;  %v14491_v8 = vld [vmem:[#allocation2 + $0x91] sm:$0xff] }
 0x1d4   : > { %11804 = vmatprep.mubr.msk.f32.mxu1 %vm1186_vm0, %v2420_v3  ;;  %v14416_v3 = vld [vmem:[#allocation2 + $0x49] sm:$0xff]  ;;  %v2844_v27 = vmul.f32 %v13894_v16, %v14078_v61  ;;  %v2845_v53 = vmul.f32 %v13904_v25, %v14102_v42  ;;  %v2846_v61 = vmul.f32 %v13902_v24, %v14104_v37  ;;  %v16808_v42 = vld [vmem:[#allocation47_spill] sm:$0xff]  ;;  %v16810_v25 = vld [vmem:[#allocation52_spill] sm:$0xff] }
 0x1d5   : > { %11852 = vmatmul.mubr.msk.f32.gmra.mxu0 %vm1186_vm0, %v2838_v32  ;;  %v2423_v32 = vmul.f32 %v13890_v12, %v14411_v7  ;;  %v14475_v16 = vld [vmem:[#allocation2 + $0x81] sm:$0xff]  ;;  %v16811_v37 = vld [vmem:[#allocation46_spill] sm:$0xff] }
 0x1d6   : > { %11854 = vmatprep.mubr.msk.f32.mxu0 %vm1186_vm0, %v2839_v10  ;;  %v14427_v10 = vld [vmem:[#allocation2 + $0x51] sm:$0xff]  ;;  %v14480_v24 = vld [vmem:[#allocation2 + $0x89] sm:$0xff]  ;;  %v16819_v62 = vld [vmem:[#allocation60_spill] sm:$0xff] }
 0x1d7   : > { %11805 = vmatmul.mubr.msk.f32.gmra.mxu1 %vm1186_vm0, %v2421_v23  ;;  %v2424_v23 = vmul.f32 %v13900_v21, %v14416_v3 }
 0x1d8   : > { %11807 = vmatprep.mubr.msk.f32.mxu1 %vm1186_vm0, %v2422_v14  ;;  %v14432_v14 = vld [vmem:[#allocation2 + $0x59] sm:$0xff] }
 0x1d9   : > { %11855 = vmatmul.mubr.msk.f32.gmra.mxu0 %vm1186_vm0, %v2840_v56  ;;  %v2425_v56 = vmul.f32 %v13898_v20, %v14427_v10 }
 0x1da   : > { %11857 = vmatprep.mubr.msk.f32.mxu0 %vm1186_vm0, %v2841_v1  ;;  %v2426_v1 = vmul.f32 %v13914_v29, %v14432_v14 }
 0x1db   : > { %11808 = vmatmul.mubr.msk.f32.gmra.mxu1 %vm1186_vm0, %v2423_v32  ;;  %v14443_v32 = vld [vmem:[#allocation2 + $0x61] sm:$0xff] }
 0x1dc   : > { %11810 = vmatprep.mubr.msk.f32.mxu1 %vm1186_vm0, %v2424_v23  ;;  %v14448_v23 = vld [vmem:[#allocation2 + $0x69] sm:$0xff] }
 0x1dd   : > { %11858 = vmatmul.mubr.msk.f32.gmra.mxu0 %vm1186_vm0, %v2842_v46  ;;  %v2427_v46 = vmul.f32 %v13912_v28, %v14443_v32 }
 0x1de   : > { %11860 = vmatprep.mubr.msk.f32.mxu0 %vm1186_vm0, %v2843_v19  ;;  %v2428_v19 = vmul.f32 %v13925_v34, %v14448_v23 }
 0x1df   : > { %11811 = vmatmul.mubr.msk.f32.gmra.mxu1 %vm1186_vm0, %v2425_v56  ;;  %v14459_v56 = vld [vmem:[#allocation2 + $0x71] sm:$0xff] }
 0x1e0   : > { %11813 = vmatprep.mubr.msk.f32.mxu1 %vm1186_vm0, %v2426_v1  ;;  %v14464_v1 = vld [vmem:[#allocation2 + $0x79] sm:$0xff] }
 0x1e1   : > { %11861 = vmatmul.mubr.msk.f32.gmra.mxu0 %vm1186_vm0, %v2844_v27  ;;  %v2847_v27 = vmul.f32 %v16808_v42, %v14124_v38  ;;  %v16812_v38 = vld [vmem:[#allocation50_spill] sm:$0xff] }
 0x1e2   : > { %11863 = vmatprep.mubr.msk.f32.mxu0 %vm1186_vm0, %v2845_v53  ;;  %v16809_v53 = vld [vmem:[#allocation48_spill] sm:$0xff] }
 0x1e3   : > { %11814 = vmatmul.mubr.msk.f32.gmra.mxu1 %vm1186_vm0, %v2427_v46  ;;  %v2429_v11 = vmul.f32 %v16809_v53, %v14459_v56  ;;  %v2430_v46 = vmul.f32 %v16810_v25, %v14464_v1 }
 0x1e4   : > { %11816 = vmatprep.mubr.msk.f32.mxu1 %vm1186_vm0, %v2428_v19  ;;  %v2848_v19 = vmul.f32 %v16811_v37, %v14126_v33  ;;  %v16815_v33 = vld [vmem:[#allocation88_spill] sm:$0xff]  ;;  %v16816_v37 = vld [vmem:[#allocation49_spill] sm:$0xff] }
 0x1e5   : > { %11864 = vmatmul.mubr.msk.f32.gmra.mxu0 %vm1186_vm0, %v2846_v61  ;;  %v2849_v61 = vmul.f32 %v16812_v38, %v14150_v30  ;;  %v16817_v30 = vld [vmem:[#allocation54_spill] sm:$0xff] }
 0x1e6   : > { %11866 = vmatprep.mubr.msk.f32.mxu0 %vm1186_vm0, %v2847_v27  ;;  %v16813_v27 = vld [vmem:[#allocation51_spill] sm:$0xff] }
 0x1e7   : > { %11817 = vmatmul.mubr.msk.f32.gmra.mxu1 %vm1186_vm0, %v2429_v11  ;;  %v2431_v42 = vmul.f32 %v16813_v27, %v14475_v16  ;;  %v2432_v11 = vmul.f32 %v16814_v17, %v14480_v24 }
 0x1e8   : > { %11819 = vmatprep.mubr.msk.f32.mxu1 %vm1186_vm0, %v2430_v46  ;;  %v2850_v46 = vmul.f32 %v16816_v37, %v16815_v33  ;;  %v16820_v33 = vld [vmem:[#allocation93_spill] sm:$0xff] }
 0x1e9   : > { %11867 = vmatmul.mubr.msk.f32.gmra.mxu0 %vm1186_vm0, %v2848_v19  ;;  %v2851_v19 = vmul.f32 %v16817_v30, %v14176_v39  ;;  %v16821_v37 = vld [vmem:[#allocation53_spill] sm:$0xff]  ;;  %v16822_v39 = vld [vmem:[#allocation58_spill] sm:$0xff] }
 0x1ea   : > { %11869 = vmatprep.mubr.msk.f32.mxu0 %vm1186_vm0, %v2849_v61  ;;  %v16818_v61 = vld [vmem:[#allocation55_spill] sm:$0xff] }
 0x1eb   : > { %11820 = vmatmul.mubr.msk.f32.gmra.mxu1 %vm1186_vm0, %v2431_v42  ;;  %v2433_v38 = vmul.f32 %v16818_v61, %v14491_v8  ;;  %v2434_v42 = vmul.f32 %v16819_v62, %v14496_v9 }
 0x1ec   : > { %11822 = vmatprep.mubr.msk.f32.mxu1 %vm1186_vm0, %v2432_v11  ;;  %v2852_v11 = vmul.f32 %v16821_v37, %v16820_v33  ;;  %v16825_v33 = vld [vmem:[#allocation57_spill] sm:$0xff]  ;;  %v14528_v37 = vld [vmem:[#allocation2 + $0xb9] sm:$0xff] }
 0x1ed   : > { %11870 = vmatmul.mubr.msk.f32.gmra.mxu0 %vm1186_vm0, %v2850_v46  ;;  %v2853_v46 = vmul.f32 %v16822_v39, %v14198_v36  ;;  %16826 = vst [vmem:[#allocation48_spill] sm:$0xff] %v14528_v37  ;;  %v16827_v36 = vld [vmem:[#allocation62_spill] sm:$0xff] }
 0x1ee   : > { %11872 = vmatprep.mubr.msk.f32.mxu0 %vm1186_vm0, %v2851_v19  ;;  %v16823_v19 = vld [vmem:[#allocation59_spill] sm:$0xff] }
 0x1ef   : > { %11823 = vmatmul.mubr.msk.f32.gmra.mxu1 %vm1186_vm0, %v2433_v38  ;;  %v2435_v30 = vmul.f32 %v16823_v19, %v14507_v63  ;;  %v2436_v38 = vmul.f32 %v16824_v55, %v14512_v54  ;;  %v14539_v55 = vld [vmem:[#allocation2 + $0xc1] sm:$0xff]  ;;  %v14544_v19 = vld [vmem:[#allocation2 + $0xc9] sm:$0xff] }
 0x1f0   : > { %11825 = vmatprep.mubr.msk.f32.mxu1 %vm1186_vm0, %v2434_v42  ;;  %v2854_v42 = vmul.f32 %v16825_v33, %v14200_v51  ;;  %16830 = vst [vmem:[#allocation52_spill] sm:$0xff] %v14539_v55  ;;  %v16831_v51 = vld [vmem:[#allocation100_spill] sm:$0xff]  ;;  %v16832_v33 = vld [vmem:[#allocation61_spill] sm:$0xff]  ;;  %16833 = vst [vmem:[#allocation51_spill] sm:$0xff] %v14544_v19 }
 0x1f1   : > { %11873 = vmatmul.mubr.msk.f32.gmra.mxu0 %vm1186_vm0, %v2852_v11  ;;  %v2855_v11 = vmul.f32 %v16827_v36, %v14224_v47  ;;  %v16834_v47 = vld [vmem:[#allocation70_spill] sm:$0xff] }
 0x1f2   : > { %11875 = vmatprep.mubr.msk.f32.mxu0 %vm1186_vm0, %v2853_v46  ;;  %v16828_v46 = vld [vmem:[#allocation64_spill] sm:$0xff] }
 0x1f3   : > { %11826 = vmatmul.mubr.msk.f32.gmra.mxu1 %vm1186_vm0, %v2435_v30  ;;  %v2437_v39 = vmul.f32 %v16828_v46, %v14523_v50  ;;  %v2438_v30 = vmul.f32 %v16829_v44, %v14528_v37  ;;  %v16836_v44 = vld [vmem:[#allocation86_spill] sm:$0xff]  ;;  %v14560_v37 = vld [vmem:[#allocation2 + $0xd9] sm:$0xff] }
 0x1f4   : > { %11828 = vmatprep.mubr.msk.f32.mxu1 %vm1186_vm0, %v2436_v38  ;;  %v2856_v38 = vmul.f32 %v16832_v33, %v16831_v51  ;;  %v14555_v46 = vld [vmem:[#allocation2 + $0xd1] sm:$0xff]  ;;  %v16838_v33 = vld [vmem:[#allocation69_spill] sm:$0xff]  ;;  %16839 = vst [vmem:[#allocation56_spill] sm:$0xff] %v14560_v37 }
 0x1f5   : > { %11876 = vmatmul.mubr.msk.f32.gmra.mxu0 %vm1186_vm0, %v2854_v42  ;;  %v2857_v42 = vmul.f32 %v16834_v47, %v14250_v52  ;;  %v16837_v51 = vld [vmem:[#allocation103_spill] sm:$0xff]  ;;  %v16840_v52 = vld [vmem:[#allocation106_spill] sm:$0xff] }
 0x1f6   : > { %11878 = vmatprep.mubr.msk.f32.mxu0 %vm1186_vm0, %v2855_v11  ;;  %v16835_v11 = vld [vmem:[#allocation74_spill] sm:$0xff] }
 0x1f7   : > { %11829 = vmatmul.mubr.msk.f32.gmra.mxu1 %vm1186_vm0, %v2437_v39  ;;  %v2439_v36 = vmul.f32 %v16835_v11, %v14539_v55  ;;  %v2440_v39 = vmul.f32 %v16836_v44, %v14544_v19  ;;  %v16843_v44 = vld [vmem:[#allocation98_spill] sm:$0xff]  ;;  %v14571_v19 = vld [vmem:[#allocation2 + $0xe1] sm:$0xff] }
 0x1f8   : > { %11831 = vmatprep.mubr.msk.f32.mxu1 %vm1186_vm0, %v2438_v30  ;;  %v2858_v30 = vmul.f32 %v16838_v33, %v16837_v51  ;;  %v16844_v51 = vld [vmem:[#allocation107_spill] sm:$0xff]  ;;  %v14576_v55 = vld [vmem:[#allocation2 + $0xe9] sm:$0xff] }
 0x1f9   : > { %11879 = vmatmul.mubr.msk.f32.gmra.mxu0 %vm1186_vm0, %v2856_v38  ;;  %v16841_v38 = vld [vmem:[#allocation80_spill] sm:$0xff]  ;;  %v16845_v33 = vld [vmem:[#allocation79_spill] sm:$0xff] }
 0x1fa   : > { %11881 = vmatprep.mubr.msk.f32.mxu0 %vm1186_vm0, %v2857_v42  ;;  %v2859_v47 = vmul.f32 %v16841_v38, %v16840_v52  ;;  %v16842_v42 = vld [vmem:[#allocation84_spill] sm:$0xff]  ;;  %v16847_v52 = vld [vmem:[#allocation91_spill] sm:$0xff] }
 0x1fb   : > { %11832 = vmatmul.mubr.msk.f32.gmra.mxu1 %vm1186_vm0, %v2439_v36  ;;  %v2441_v11 = vmul.f32 %v16842_v42, %v14555_v46  ;;  %v2442_v36 = vmul.f32 %v16843_v44, %v14560_v37  ;;  %v14587_v44 = vld [vmem:[#allocation2 + $0xf1] sm:$0xff]  ;;  %v14592_v37 = vld [vmem:[#allocation2 + $0xf9] sm:$0xff] }
 0x1fc   : > { %11834 = vmatprep.mubr.msk.f32.mxu1 %vm1186_vm0, %v2440_v39  ;;  %v2860_v39 = vmul.f32 %v16845_v33, %v16844_v51  ;;  %v16849_v51 = vld [vmem:[#allocation112_spill] sm:$0xff]  ;;  %v16850_v33 = vld [vmem:[#allocation90_spill] sm:$0xff] }
 0x1fd   : > { %11882 = vmatmul.mubr.msk.f32.gmra.mxu0 %vm1186_vm0, %v2858_v30  ;;  %v16846_v30 = vld [vmem:[#allocation111_spill] sm:$0xff] }
 0x1fe   : > { %11884 = vmatprep.mubr.msk.f32.mxu0 %vm1186_vm0, %v2859_v47  ;;  %v2861_v38 = vmul.f32 %v16847_v52, %v16846_v30  ;;  %v16848_v47 = vld [vmem:[#allocation96_spill] sm:$0xff]  ;;  %v11700_v30 = vpop.f32.mrf.mxu1 }
 0x1ff   : > { %11835 = vmatmul.mubr.msk.f32.gmra.mxu1 %vm1186_vm0, %v2441_v11  ;;  %v2443_v42 = vmul.f32 %v16848_v47, %v14571_v19  ;;  %v2444_v11 = vmul.f32 %v14288_v57, %v14576_v55  ;;  %v2445_v57 = vmul.f32 %v14276_v15, %v14587_v44 }
 0x200   : > { %11837 = vmatprep.mubr.msk.f32.mxu1 %vm1186_vm0, %v2442_v36  ;;  %v2862_v36 = vmul.f32 %v16850_v33, %v16849_v51 }
 0x201   : > { %11885 = vmatmul.mubr.msk.f32.gmra.mxu0 %vm1186_vm0, %v2860_v39  ;;  %v2863_v39 = vmul.f32 %v14245_v41, %v14321_v40  ;;  %v2864_v41 = vmul.f32 %v14240_v26, %v14323_v48  ;;  %v14612_v40 = vpop.permute.xlu1 %2413  ;;  %v16854_v48 = vld [vmem:[#allocation63_spill] sm:$0xff]  ;;  %v16855_v26 = vld [vmem:[#allocation33_spill] sm:$0xff] }
 0x202   : > { %11887 = vmatprep.mubr.msk.f32.mxu0 %vm1186_vm0, %v2861_v38  ;;  %v14597_v38 = vpop.permute.xlu0 %2408  ;;  %16852 = vst [vmem:[#allocation55_spill] sm:$0xff] %v14612_v40 }
 0x203   : > { %11838 = vmatmul.mubr.msk.f32.gmra.mxu1 %vm1186_vm0, %v2443_v42  ;;  %v11750_v52 = vpop.f32.mrf.mxu0  ;;  %16851 = vst [vmem:[#allocation88_spill] sm:$0xff] %v14597_v38  ;;  %v2446_v51 = vmul.f32 %v14597_v38, %v14592_v37 }
 0x204   : > { %11840 = vmatprep.mubr.msk.f32.mxu1 %vm1186_vm0, %v2444_v11  ;;  %v14602_v42 = vadd.f32 %v11750_v52, %v11700_v30  ;;  %v14607_v11 = vld [vmem:[#allocation2 + $0x101] sm:$0xff]  ;;  %v2865_v52 = vmul.f32 %v14350_v18, %v14316_v31  ;;  %v3641_v30 = vmul.f32 %v16855_v26, %v14336_v0 }
 0x205   : > { %11888 = vmatmul.mubr.msk.f32.gmra.mxu0 %vm1186_vm0, %v2862_v36  ;;  %v2447_v36 = vmul.f32 %v14612_v40, %v14607_v11  ;;  %v14630_v18 = vld [vmem:[#allocation7 + $0x40] sm:$0xff] }
 0x206   : > { %11890 = vmatprep.mubr.msk.f32.mxu0 %vm1186_vm0, %v2863_v39  ;;  %v16858_v0 = vld [vmem:[#allocation68_spill] sm:$0xff] }
 0x207   : > { %11841 = vmatmul.mubr.msk.f32.gmra.mxu1 %vm1186_vm0, %v2445_v57  ;;  %v16853_v57 = vld [vmem:[#allocation114_spill] sm:$0xff] }
 0x208   : > { %11843 = vmatprep.mubr.msk.f32.mxu1 %vm1186_vm0, %v2446_v51  ;;  %v2866_v39 = vmul.f32 %v14352_v35, %v16853_v57  ;;  %v16856_v51 = vld [vmem:[#allocation65_spill] sm:$0xff]  ;;  %v3643_v35 = vmul.f32 %v13875_v59, %v14366_v6  ;;  %v16860_v6 = vld [vmem:[#allocation72_spill] sm:$0xff] }
 0x209   : > { %11891 = vmatmul.mubr.msk.f32.gmra.mxu0 %vm1186_vm0, %v2864_v41  ;;  %v3642_v41 = vmul.f32 %v13863_v49, %v14357_v45  ;;  %v3644_v45 = vmul.f32 %v13873_v58, %v14393_v2  ;;  %v3647_v2 = vmul.f32 %v13892_v13, %v14416_v3  ;;  %v16864_v3 = vld [vmem:[#allocation78_spill] sm:$0xff] }
 0x20a   : > { %11893 = vmatprep.mubr.msk.f32.mxu0 %vm1186_vm0, %v2865_v52  ;;  %v16857_v52 = vld [vmem:[#allocation67_spill] sm:$0xff] }
 0x20b   : > { %11844 = vmatmul.mubr.msk.f32.gmra.mxu1 %vm1186_vm0, %v2447_v36  ;;  %v16859_v36 = vld [vmem:[#allocation71_spill] sm:$0xff] }
 0x20c   : > { %11898 = vmatprep.mubr.msk.f32.mxu1 %vm1186_vm0, %v16854_v48  ;;  %v3648_v48 = vmul.f32 %v13890_v12, %v14427_v10  ;;  %v3651_v10 = vmul.f32 %v13914_v29, %v14448_v23  ;;  %v16868_v23 = vld [vmem:[#allocation85_spill] sm:$0xff] }
 0x20d   : > { %11894 = vmatmul.mubr.msk.f32.gmra.mxu0 %vm1186_vm0, %v2866_v39  ;;  %v16861_v39 = vld [vmem:[#allocation73_spill] sm:$0xff] }
 0x20e   : > { %11948 = vmatprep.mubr.msk.f32.mxu0 %vm1186_vm0, %v3641_v30  ;;  %v16863_v30 = vld [vmem:[#allocation77_spill] sm:$0xff] }
 0x20f   : > { %11899 = vmatmul.mubr.msk.f32.vlgmr.msra.gmra.mxu1 %vm1186_vm0, %v16856_v51  ;;  %v3650_v51 = vmul.f32 %v13898_v20, %v14443_v32  ;;  %v3653_v32 = vmul.f32 %v13925_v34, %v14464_v1  ;;  %v16870_v1 = vld [vmem:[#allocation89_spill] sm:$0xff] }
 0x210   : > { %11901 = vmatprep.mubr.msk.f32.mxu1 %vm1186_vm0, %v16857_v52  ;;  %11997 = vmatpush3.msra.mxu1 %v14359_v22  ;;  %v3645_v22 = vmul.f32 %v13883_v5, %v14399_v60  ;;  %v16862_v60 = vld [vmem:[#allocation75_spill] sm:$0xff]  ;;  %v3652_v52 = vmul.f32 %v13912_v28, %v14459_v56  ;;  %v3655_v56 = vmul.f32 %v16810_v25, %v14480_v24  ;;  %v16872_v24 = vld [vmem:[#allocation94_spill] sm:$0xff] }
 0x211   : > { %11949 = vmatmul.mubr.msk.f32.vlgmr.msra.gmra.mxu0 %vm1186_vm0, %v3642_v41  ;;  %12096 = vmatprep.subr.mxu1 %v14630_v18  ;;  %v16865_v41 = vld [vmem:[#allocation81_spill] sm:$0xff] }
 0x212   : > { %11951 = vmatprep.mubr.msk.f32.mxu0 %vm1186_vm0, %v3643_v35  ;;  %12047 = vmatpush3.msra.mxu0 %v14380_v43  ;;  %v3646_v43 = vmul.f32 %v13881_v4, %v14411_v7  ;;  %v3649_v7 = vmul.f32 %v13900_v21, %v14432_v14  ;;  %v16866_v14 = vld [vmem:[#allocation82_spill] sm:$0xff]  ;;  %v16867_v35 = vld [vmem:[#allocation83_spill] sm:$0xff] }
 0x213   : > { %11902 = vmatmul.mubr.msk.f32.gmra.mxu1 %vm1186_vm0, %v16858_v0  ;;  %v3654_v0 = vmul.f32 %v16809_v53, %v14475_v16  ;;  %v3657_v16 = vmul.f32 %v16814_v17, %v14496_v9  ;;  %v16874_v9 = vld [vmem:[#allocation97_spill] sm:$0xff] }
 0x214   : > { %11904 = vmatprep.mubr.msk.f32.mxu1 %vm1186_vm0, %v16859_v36  ;;  %v3656_v36 = vmul.f32 %v16813_v27, %v14491_v8  ;;  %v3659_v8 = vmul.f32 %v16819_v62, %v14512_v54  ;;  %v16879_v54 = vld [vmem:[#allocation101_spill] sm:$0xff] }
 0x215   : > { %11952 = vmatmul.mubr.msk.f32.gmra.mxu0 %vm1186_vm0, %v3644_v45  ;;  %v16869_v45 = vld [vmem:[#allocation87_spill] sm:$0xff] }
 0x216   : > { %11954 = vmatprep.mubr.msk.f32.mxu0 %vm1186_vm0, %v3645_v22  ;;  %v16871_v22 = vld [vmem:[#allocation92_spill] sm:$0xff] }
 0x217   : > { %11905 = vmatmul.mubr.msk.f32.gmra.mxu1 %vm1186_vm0, %v16860_v6  ;;  %v3658_v6 = vmul.f32 %v16818_v61, %v14507_v63  ;;  %v16877_v63 = vld [vmem:[#allocation48_spill] sm:$0xff] }
 0x218   : > { %11907 = vmatprep.mubr.msk.f32.mxu1 %vm1186_vm0, %v16861_v39  ;;  %v16875_v39 = vld [vmem:[#allocation59_spill] sm:$0xff] }
 0x219   : > { %11955 = vmatmul.mubr.msk.f32.gmra.mxu0 %vm1186_vm0, %v3646_v43  ;;  %v16873_v43 = vld [vmem:[#allocation95_spill] sm:$0xff] }
 0x21a   : > { %11957 = vmatprep.mubr.msk.f32.mxu0 %vm1186_vm0, %v3647_v2  ;;  %v3660_v2 = vmul.f32 %v16875_v39, %v14523_v50  ;;  %v16883_v50 = vld [vmem:[#allocation51_spill] sm:$0xff] }
 0x21b   : > { %11908 = vmatmul.mubr.msk.f32.gmra.mxu1 %vm1186_vm0, %v16862_v60  ;;  %v16876_v60 = vld [vmem:[#allocation99_spill] sm:$0xff] }
 0x21c   : > { %11910 = vmatprep.mubr.msk.f32.mxu1 %vm1186_vm0, %v16863_v30 }
 0x21d   : > { %11958 = vmatmul.mubr.msk.f32.gmra.mxu0 %vm1186_vm0, %v3648_v48  ;;  %v16878_v48 = vld [vmem:[#allocation66_spill] sm:$0xff] }
 0x21e   : > { %11960 = vmatprep.mubr.msk.f32.mxu0 %vm1186_vm0, %v3649_v7  ;;  %v3661_v30 = vmul.f32 %v16878_v48, %v16877_v63  ;;  %v16880_v7 = vld [vmem:[#allocation52_spill] sm:$0xff]  ;;  %v4028_v63 = vld [vmem:[#allocation2 + $0x27] sm:$0xff] }
 0x21f   : > { %11911 = vmatmul.mubr.msk.f32.gmra.mxu1 %vm1186_vm0, %v16864_v3  ;;  %v16881_v3 = vld [vmem:[#allocation64_spill] sm:$0xff] }
 0x220   : > { %11913 = vmatprep.mubr.msk.f32.mxu1 %vm1186_vm0, %v16865_v41  ;;  %v16882_v41 = vld [vmem:[#allocation102_spill] sm:$0xff] }
 0x221   : > { %11961 = vmatmul.mubr.msk.f32.gmra.mxu0 %vm1186_vm0, %v3650_v51  ;;  %v3662_v51 = vmul.f32 %v16881_v3, %v16880_v7 }
 0x222   : > { %11963 = vmatprep.mubr.msk.f32.mxu0 %vm1186_vm0, %v3651_v10  ;;  %v16884_v10 = vld [vmem:[#allocation76_spill] sm:$0xff] }
 0x223   : > { %11914 = vmatmul.mubr.msk.f32.gmra.mxu1 %vm1186_vm0, %v16866_v14  ;;  %v3663_v14 = vmul.f32 %v16884_v10, %v16883_v50  ;;  %v4447_v50 = vld [vmem:[#allocation2 + $0x28] sm:$0xff] }
 0x224   : > { %11916 = vmatprep.mubr.msk.f32.mxu1 %vm1186_vm0, %v16867_v35  ;;  %v16886_v35 = vld [vmem:[#allocation74_spill] sm:$0xff] }
 0x225   : > { %11964 = vmatmul.mubr.msk.f32.gmra.mxu0 %vm1186_vm0, %v3652_v52  ;;  %v16885_v52 = vld [vmem:[#allocation104_spill] sm:$0xff] }
 0x226   : > { %11966 = vmatprep.mubr.msk.f32.mxu0 %vm1186_vm0, %v3653_v32  ;;  %v3664_v32 = vmul.f32 %v16886_v35, %v14555_v46  ;;  %v16893_v46 = vld [vmem:[#allocation98_spill] sm:$0xff] }
 0x227   : > { %11917 = vmatmul.mubr.msk.f32.gmra.mxu1 %vm1186_vm0, %v16868_v23  ;;  %v16887_v23 = vld [vmem:[#allocation105_spill] sm:$0xff] }
 0x228   : > { %11919 = vmatprep.mubr.msk.f32.mxu1 %vm1186_vm0, %v16869_v45  ;;  %v16889_v45 = vld [vmem:[#allocation86_spill] sm:$0xff] }
 0x229   : > { %11967 = vmatmul.mubr.msk.f32.gmra.mxu0 %vm1186_vm0, %v3654_v0  ;;  %v16888_v0 = vld [vmem:[#allocation56_spill] sm:$0xff] }
 0x22a   : > { %11969 = vmatprep.mubr.msk.f32.mxu0 %vm1186_vm0, %v3655_v56  ;;  %v3665_v56 = vmul.f32 %v16889_v45, %v16888_v0  ;;  %v4031_v0 = vld [vmem:[#allocation2 + $0x3f] sm:$0xff] }
 0x22b   : > { %11920 = vmatmul.mubr.msk.f32.gmra.mxu1 %vm1186_vm0, %v16870_v1  ;;  %v16890_v1 = vld [vmem:[#allocation108_spill] sm:$0xff] }
 0x22c   : > { %11922 = vmatprep.mubr.msk.f32.mxu1 %vm1186_vm0, %v16871_v22 }
 0x22d   : > { %11970 = vmatmul.mubr.msk.f32.gmra.mxu0 %vm1186_vm0, %v3656_v36  ;;  %v16891_v36 = vld [vmem:[#allocation84_spill] sm:$0xff] }
 0x22e   : > { %11972 = vmatprep.mubr.msk.f32.mxu0 %vm1186_vm0, %v3657_v16  ;;  %v3666_v22 = vmul.f32 %v16891_v36, %v14571_v19  ;;  %v16892_v16 = vld [vmem:[#allocation110_spill] sm:$0xff]  ;;  %v16896_v19 = vld [vmem:[#allocation109_spill] sm:$0xff] }
 0x22f   : > { %11923 = vmatmul.mubr.msk.f32.gmra.mxu1 %vm1186_vm0, %v16872_v24  ;;  %v3667_v24 = vmul.f32 %v16893_v46, %v14576_v55  ;;  %v16897_v55 = vld [vmem:[#allocation116_spill] sm:$0xff] }
 0x230   : > { %11925 = vmatprep.mubr.msk.f32.mxu1 %vm1186_vm0, %v16873_v43  ;;  %v3668_v43 = vmul.f32 %v16848_v47, %v14587_v44  ;;  %v16898_v44 = vld [vmem:[#allocation119_spill] sm:$0xff] }
 0x231   : > { %11973 = vmatmul.mubr.msk.f32.gmra.mxu0 %vm1186_vm0, %v3658_v6  ;;  %v16894_v6 = vld [vmem:[#allocation113_spill] sm:$0xff] }
 0x232   : > { %11975 = vmatprep.mubr.msk.f32.mxu0 %vm1186_vm0, %v3659_v8  ;;  %v16895_v8 = vld [vmem:[#allocation115_spill] sm:$0xff] }
 0x233   : > { %11926 = vmatmul.mubr.msk.f32.gmra.mxu1 %vm1186_vm0, %v16874_v9  ;;  %v3669_v9 = vmul.f32 %v16896_v19, %v14592_v37  ;;  %v14787_v37 = vld [vmem:[#allocation2 + $0x110] sm:$0xff] }
 0x234   : > { %11928 = vmatprep.mubr.msk.f32.mxu1 %vm1186_vm0, %v16876_v60  ;;  %v3670_v60 = vmul.f32 %v14276_v15, %v14607_v11  ;;  %v16900_v15 = vld [vmem:[#allocation117_spill] sm:$0xff]  ;;  %v4033_v19 = vld [vmem:[#allocation2 + $0x4f] sm:$0xff] }
 0x235   : > { %11976 = vmatmul.mubr.msk.f32.gmra.mxu0 %vm1186_vm0, %v3660_v2  ;;  %v14777_v2 = vld [vmem:[#allocation2 + $0x108] sm:$0xff]  ;;  %v3672_v11 = vmul.f32 %v16900_v15, %v14612_v40 }
 0x236   : > { %11978 = vmatprep.mubr.msk.f32.mxu0 %vm1186_vm0, %v3661_v30  ;;  %v3671_v30 = vmul.f32 %v16898_v44, %v14597_v38  ;;  %v16908_v15 = vld [vmem:[#allocation41_spill] sm:$0xff] }
 0x237   : > { %11929 = vmatmul.mubr.msk.f32.gmra.mxu1 %vm1186_vm0, %v16879_v54  ;;  %v16899_v54 = vld [vmem:[#allocation34_spill] sm:$0xff] }
 0x238   : > { %11931 = vmatprep.mubr.msk.f32.mxu1 %vm1186_vm0, %v16882_v41  ;;  %v4060_v7 = vmul.f32 %v4028_v63, %v16899_v54  ;;  %v4030_v41 = vld [vmem:[#allocation2 + $0x37] sm:$0xff]  ;;  %v16907_v54 = vld [vmem:[#allocation38_spill] sm:$0xff] }
 0x239   : > { %11979 = vmatmul.mubr.msk.f32.gmra.mxu0 %vm1186_vm0, %v3662_v51  ;;  %v4029_v51 = vld [vmem:[#allocation2 + $0x2f] sm:$0xff] }
 0x23a   : > { %11981 = vmatprep.mubr.msk.f32.mxu0 %vm1186_vm0, %v3663_v14  ;;  %v16901_v14 = vld [vmem:[#allocation35_spill] sm:$0xff] }
 0x23b   : > { %11932 = vmatmul.mubr.msk.f32.gmra.mxu1 %vm1186_vm0, %v16885_v52  ;;  %v4061_v52 = vmul.f32 %v4029_v51, %v16901_v14 }
 0x23c   : > { %11934 = vmatprep.mubr.msk.f32.mxu1 %vm1186_vm0, %v16887_v23 }
 0x23d   : > { %11982 = vmatmul.mubr.msk.f32.gmra.mxu0 %vm1186_vm0, %v3664_v32  ;;  %v16902_v32 = vld [vmem:[#allocation37_spill] sm:$0xff] }
 0x23e   : > { %11984 = vmatprep.mubr.msk.f32.mxu0 %vm1186_vm0, %v3665_v56  ;;  %v4062_v23 = vmul.f32 %v4030_v41, %v16902_v32  ;;  %v4032_v56 = vld [vmem:[#allocation2 + $0x47] sm:$0xff]  ;;  %v4035_v41 = vld [vmem:[#allocation2 + $0x5f] sm:$0xff] }
 0x23f   : > { %11935 = vmatmul.mubr.msk.f32.gmra.mxu1 %vm1186_vm0, %v16890_v1  ;;  %v4448_v1 = vld [vmem:[#allocation2 + $0x30] sm:$0xff] }
 0x240   : > { %11937 = vmatprep.mubr.msk.f32.mxu1 %vm1186_vm0, %v16892_v16  ;;  %v4449_v16 = vld [vmem:[#allocation2 + $0x38] sm:$0xff] }
 0x241   : > { %11985 = vmatmul.mubr.msk.f32.gmra.mxu0 %vm1186_vm0, %v3666_v22  ;;  %v14802_v22 = vpop.f32.mrf.mxu1 }
 0x242   : > { %11987 = vmatprep.mubr.msk.f32.mxu0 %vm1186_vm0, %v3667_v24  ;;  %16903 = vst [vmem:[#allocation60_spill] sm:$0xff] %v14802_v22  ;;  %v16904_v24 = vld [vmem:[#allocation36_spill] sm:$0xff] }
 0x243   : > { %11938 = vmatmul.mubr.msk.f32.gmra.mxu1 %vm1186_vm0, %v16894_v6  ;;  %v4063_v6 = vmul.f32 %v4031_v0, %v16904_v24 }
 0x244   : > { %11940 = vmatprep.mubr.msk.f32.mxu1 %vm1186_vm0, %v16895_v8 }
 0x245   : > { %11988 = vmatmul.mubr.msk.f32.gmra.mxu0 %vm1186_vm0, %v3668_v43  ;;  %v16905_v43 = vld [vmem:[#allocation39_spill] sm:$0xff] }
 0x246   : > { %11990 = vmatprep.mubr.msk.f32.mxu0 %vm1186_vm0, %v3669_v9  ;;  %v4064_v8 = vmul.f32 %v4032_v56, %v16905_v43  ;;  %v14808_v9 = vpop.f32.mrf.mxu0  ;;  %v16910_v43 = vld [vmem:[#allocation43_spill] sm:$0xff] }
 0x247   : > { %11941 = vmatmul.mubr.msk.f32.gmra.mxu1 %vm1186_vm0, %v16897_v55  ;;  %16906 = vst [vmem:[#allocation93_spill] sm:$0xff] %v14808_v9 }
 0x248   : > { %11943 = vmatprep.mubr.msk.f32.mxu1 %vm1186_vm0, %v14777_v2 }
 0x249   : > { %11991 = vmatmul.mubr.msk.f32.gmra.mxu0 %vm1186_vm0, %v3670_v60  ;;  %v4034_v60 = vld [vmem:[#allocation2 + $0x57] sm:$0xff] }
 0x24a   : > { %11993 = vmatprep.mubr.msk.f32.mxu0 %vm1186_vm0, %v3671_v30  ;;  %v4451_v30 = vld [vmem:[#allocation2 + $0x48] sm:$0xff] }
 0x24b   : > { %11944 = vmatmul.mubr.msk.f32.gmra.mxu1 %vm1186_vm0, %v14787_v37 }
 0x24c   : > { %11998 = vmatprep.mubr.msk.f32.mxu1 %vm1186_vm0, %v4060_v7  ;;  %v4065_v7 = vmul.f32 %v4033_v19, %v16907_v54  ;;  %v4037_v19 = vld [vmem:[#allocation2 + $0x6f] sm:$0xff] }
 0x24d   : > { %11994 = vmatmul.mubr.msk.f32.gmra.mxu0 %vm1186_vm0, %v3672_v11  ;;  %v4066_v11 = vmul.f32 %v4034_v60, %v16908_v15  ;;  %v16911_v15 = vld [vmem:[#allocation42_spill] sm:$0xff] }
 0x24e   : > { %12048 = vmatprep.mubr.msk.f32.mxu0 %vm1186_vm0, %v4447_v50 }
 0x24f   : > { %11999 = vmatmul.mubr.msk.f32.vlgmr.msra.gmra.mxu1 %vm1186_vm0, %v4061_v52  ;;  %v4036_v52 = vld [vmem:[#allocation2 + $0x67] sm:$0xff] }
 0x250   : > { %12001 = vmatprep.mubr.msk.f32.mxu1 %vm1186_vm0, %v4062_v23  ;;  %12097 = vmatpush3.msra.mxu1 %v14630_v18  ;;  %v4450_v18 = vld [vmem:[#allocation2 + $0x40] sm:$0xff]  ;;  %v4452_v23 = vld [vmem:[#allocation2 + $0x50] sm:$0xff] }
 0x251   : > { %12049 = vmatmul.mubr.msk.f32.vlgmr.msra.gmra.mxu0 %vm1186_vm0, %v4448_v1  ;;  %v4453_v1 = vld [vmem:[#allocation2 + $0x58] sm:$0xff] }
 0x252   : > { %12051 = vmatprep.mubr.msk.f32.mxu0 %vm1186_vm0, %v4449_v16  ;;  %v11703_v55 = vpop.f32.mrf.mxu1  ;;  %v16909_v16 = vld [vmem:[#allocation40_spill] sm:$0xff] }
 0x253   : > { %12002 = vmatmul.mubr.msk.f32.gmra.mxu1 %vm1186_vm0, %v4063_v6  ;;  %v4067_v24 = vmul.f32 %v4035_v41, %v16909_v16  ;;  %v4456_v16 = vld [vmem:[#allocation2 + $0x70] sm:$0xff] }
 0x254   : > { %12004 = vmatprep.mubr.msk.f32.mxu1 %vm1186_vm0, %v4064_v8  ;;  %v1721_v63 = vpop.f32.mrf.mxu1  ;;  %v4068_v8 = vmul.f32 %v4036_v52, %v16910_v43  ;;  %v4039_v52 = vld [vmem:[#allocation2 + $0x7f] sm:$0xff] }
 0x255   : > { %v11753_v44 = vpop.f32.mrf.mxu0  ;;  %12052 = vmatmul.mubr.msk.f32.gmra.mxu0 %vm1186_vm0, %v4450_v18  ;;  %v4038_v18 = vld [vmem:[#allocation2 + $0x77] sm:$0xff] }
 0x256   : > { %v14814_v51 = vadd.f32 %v11753_v44, %v11703_v55  ;;  %12054 = vmatprep.mubr.msk.f32.mxu0 %vm1186_vm0, %v4451_v30  ;;  %v11706_v50 = vpop.f32.mrf.mxu1  ;;  %v4454_v44 = vld [vmem:[#allocation2 + $0x60] sm:$0xff] }
 0x257   : > { %v2042_v14 = vpop.f32.mrf.mxu0  ;;  %12005 = vmatmul.mubr.msk.f32.gmra.mxu1 %vm1186_vm0, %v4065_v7  ;;  %v4455_v7 = vld [vmem:[#allocation2 + $0x68] sm:$0xff] }
 0x258   : > { %v14819_v32 = vadd.f32 %v2042_v14, %v1721_v63  ;;  %12007 = vmatprep.mubr.msk.f32.mxu1 %vm1186_vm0, %v4066_v11  ;;  %v1731_v0 = vpop.f32.mrf.mxu1  ;;  %v4069_v11 = vmul.f32 %v4037_v19, %v16911_v15  ;;  %v16913_v19 = vld [vmem:[#allocation44_spill] sm:$0xff] }
 0x259   : > { %v11756_v56 = vpop.f32.mrf.mxu0  ;;  %12055 = vmatmul.mubr.msk.f32.gmra.mxu0 %vm1186_vm0, %v4452_v23  ;;  %v4042_v15 = vld [vmem:[#allocation2 + $0x97] sm:$0xff] }
 0x25a   : > { %v14824_v6 = vadd.f32 %v11756_v56, %v11706_v50  ;;  %12057 = vmatprep.mubr.msk.f32.mxu0 %vm1186_vm0, %v4453_v1  ;;  %v11709_v55 = vpop.f32.mrf.mxu1  ;;  %v16912_v50 = vld [vmem:[#allocation45_spill] sm:$0xff] }
 0x25b   : > { %v2052_v60 = vpop.f32.mrf.mxu0  ;;  %12008 = vmatmul.mubr.msk.f32.gmra.mxu1 %vm1186_vm0, %v4067_v24  ;;  %v4070_v14 = vmul.f32 %v4038_v18, %v16912_v50  ;;  %v4040_v56 = vld [vmem:[#allocation2 + $0x87] sm:$0xff]  ;;  %v16914_v18 = vld [vmem:[#allocation47_spill] sm:$0xff] }
 0x25c   : > { %v14829_v63 = vadd.f32 %v2052_v60, %v1731_v0  ;;  %12010 = vmatprep.mubr.msk.f32.mxu1 %vm1186_vm0, %v4068_v8  ;;  %v1741_v30 = vpop.f32.mrf.mxu1  ;;  %v4457_v8 = vld [vmem:[#allocation2 + $0x78] sm:$0xff]  ;;  %v4458_v50 = vld [vmem:[#allocation2 + $0x80] sm:$0xff] }
 0x25d   : > { %v11759_v54 = vpop.f32.mrf.mxu0  ;;  %12058 = vmatmul.mubr.msk.f32.gmra.mxu0 %vm1186_vm0, %v4454_v44  ;;  %v4072_v44 = vmul.f32 %v4040_v56, %v16914_v18  ;;  %v16916_v56 = vld [vmem:[#allocation50_spill] sm:$0xff] }
 0x25e   : > { %v14834_v41 = vadd.f32 %v11759_v54, %v11709_v55  ;;  %12060 = vmatprep.mubr.msk.f32.mxu0 %vm1186_vm0, %v4455_v7  ;;  %v11712_v23 = vpop.f32.mrf.mxu1  ;;  %v4071_v55 = vmul.f32 %v4039_v52, %v16913_v19  ;;  %v4041_v54 = vld [vmem:[#allocation2 + $0x8f] sm:$0xff]  ;;  %v4043_v19 = vld [vmem:[#allocation2 + $0x9f] sm:$0xff]  ;;  %v4044_v18 = vld [vmem:[#allocation2 + $0xa7] sm:$0xff] }
 0x25f   : > { %v2062_v0 = vpop.f32.mrf.mxu0  ;;  %12011 = vmatmul.mubr.msk.f32.gmra.mxu1 %vm1186_vm0, %v4069_v11  ;;  %v4459_v52 = vld [vmem:[#allocation2 + $0x88] sm:$0xff] }
 0x260   : > { %v14839_v1 = vadd.f32 %v2062_v0, %v1741_v30  ;;  %12013 = vmatprep.mubr.msk.f32.mxu1 %vm1186_vm0, %v4070_v14  ;;  %v1751_v24 = vpop.f32.mrf.mxu1 }
 0x261   : > { %v11762_v43 = vpop.f32.mrf.mxu0  ;;  %12061 = vmatmul.mubr.msk.f32.gmra.mxu0 %vm1186_vm0, %v4456_v16 }
 0x262   : > { %v14844_v60 = vadd.f32 %v11762_v43, %v11712_v23  ;;  %12063 = vmatprep.mubr.msk.f32.mxu0 %vm1186_vm0, %v4457_v8  ;;  %v11715_v7 = vpop.f32.mrf.mxu1  ;;  %v16915_v23 = vld [vmem:[#allocation46_spill] sm:$0xff]  ;;  %v4074_v8 = vmul.f32 %v4042_v15, %v16916_v56 }
 0x263   : > { %v2072_v30 = vpop.f32.mrf.mxu0  ;;  %12014 = vmatmul.mubr.msk.f32.gmra.mxu1 %vm1186_vm0, %v4071_v55  ;;  %v4073_v16 = vmul.f32 %v4041_v54, %v16915_v23  ;;  %v4461_v54 = vld [vmem:[#allocation2 + $0x98] sm:$0xff]  ;;  %v16918_v15 = vld [vmem:[#allocation54_spill] sm:$0xff] }
 0x264   : > { %v14849_v11 = vadd.f32 %v2072_v30, %v1751_v24  ;;  %12016 = vmatprep.mubr.msk.f32.mxu1 %vm1186_vm0, %v4072_v44  ;;  %v1761_v14 = vpop.f32.mrf.mxu1  ;;  %v4460_v30 = vld [vmem:[#allocation2 + $0x90] sm:$0xff]  ;;  %v4076_v23 = vmul.f32 %v4044_v18, %v16918_v15 }
 0x265   : > { %v11765_v0 = vpop.f32.mrf.mxu0  ;;  %12064 = vmatmul.mubr.msk.f32.gmra.mxu0 %vm1186_vm0, %v4458_v50  ;;  %v16920_v18 = vld [vmem:[#allocation58_spill] sm:$0xff] }
 0x266   : > { %v14854_v43 = vadd.f32 %v11765_v0, %v11715_v7  ;;  %12066 = vmatprep.mubr.msk.f32.mxu0 %vm1186_vm0, %v4459_v52  ;;  %v11718_v55 = vpop.f32.mrf.mxu1  ;;  %v16917_v7 = vld [vmem:[#allocation49_spill] sm:$0xff] }
 0x267   : > { %v2082_v24 = vpop.f32.mrf.mxu0  ;;  %12017 = vmatmul.mubr.msk.f32.gmra.mxu1 %vm1186_vm0, %v4073_v16  ;;  %v4075_v0 = vmul.f32 %v4043_v19, %v16917_v7  ;;  %v4045_v16 = vld [vmem:[#allocation2 + $0xaf] sm:$0xff]  ;;  %v16919_v19 = vld [vmem:[#allocation53_spill] sm:$0xff] }
 0x268   : > { %v14859_v44 = vadd.f32 %v2082_v24, %v1761_v14  ;;  %12019 = vmatprep.mubr.msk.f32.mxu1 %vm1186_vm0, %v4074_v8  ;;  %v1771_v50 = vpop.f32.mrf.mxu1  ;;  %v4046_v8 = vld [vmem:[#allocation2 + $0xb7] sm:$0xff] }
 0x269   : > { %v11768_v9 = vpop.f32.mrf.mxu0  ;;  %12067 = vmatmul.mubr.msk.f32.gmra.mxu0 %vm1186_vm0, %v4460_v30  ;;  %v4462_v30 = vld [vmem:[#allocation2 + $0xa0] sm:$0xff]  ;;  %v4078_v7 = vmul.f32 %v4046_v8, %v16920_v18  ;;  %v4049_v18 = vld [vmem:[#allocation2 + $0xcf] sm:$0xff] }
 0x26a   : > { %v14864_v52 = vadd.f32 %v11768_v9, %v11718_v55  ;;  %12069 = vmatprep.mubr.msk.f32.mxu0 %vm1186_vm0, %v4461_v54  ;;  %v11721_v56 = vpop.f32.mrf.mxu1  ;;  %v4463_v9 = vld [vmem:[#allocation2 + $0xa8] sm:$0xff]  ;;  %v4077_v55 = vmul.f32 %v4045_v16, %v16919_v19 }
 0x26b   : > { %v2092_v14 = vpop.f32.mrf.mxu0  ;;  %12020 = vmatmul.mubr.msk.f32.gmra.mxu1 %vm1186_vm0, %v4075_v0  ;;  %v4047_v0 = vld [vmem:[#allocation2 + $0xbf] sm:$0xff]  ;;  %v16923_v19 = vld [vmem:[#allocation62_spill] sm:$0xff] }
 0x26c   : > { %v14869_v24 = vadd.f32 %v2092_v14, %v1771_v50  ;;  %12022 = vmatprep.mubr.msk.f32.mxu1 %vm1186_vm0, %v4076_v23  ;;  %v1781_v22 = vpop.f32.mrf.mxu1  ;;  %v4048_v23 = vld [vmem:[#allocation2 + $0xc7] sm:$0xff] }
 0x26d   : > { %v11771_v40 = vpop.f32.mrf.mxu0  ;;  %12070 = vmatmul.mubr.msk.f32.gmra.mxu0 %vm1186_vm0, %v4462_v30  ;;  %v4464_v30 = vld [vmem:[#allocation2 + $0xb0] sm:$0xff] }
 0x26e   : > { %v14874_v54 = vadd.f32 %v11771_v40, %v11721_v56  ;;  %12072 = vmatprep.mubr.msk.f32.mxu0 %vm1186_vm0, %v4463_v9  ;;  %v11724_v15 = vpop.f32.mrf.mxu1  ;;  %v4465_v40 = vld [vmem:[#allocation2 + $0xb8] sm:$0xff]  ;;  %v16922_v56 = vld [vmem:[#allocation57_spill] sm:$0xff] }
 0x26f   : > { %v2102_v50 = vpop.f32.mrf.mxu0  ;;  %12023 = vmatmul.mubr.msk.f32.gmra.mxu1 %vm1186_vm0, %v4077_v55  ;;  %v4079_v9 = vmul.f32 %v4047_v0, %v16922_v56  ;;  %v4080_v55 = vmul.f32 %v4048_v23, %v16923_v19  ;;  %v4467_v0 = vld [vmem:[#allocation2 + $0xc8] sm:$0xff]  ;;  %v4051_v19 = vld [vmem:[#allocation2 + $0xdf] sm:$0xff] }
 0x270   : > { %v14879_v14 = vadd.f32 %v2102_v50, %v1781_v22  ;;  %12025 = vmatprep.mubr.msk.f32.mxu1 %vm1186_vm0, %v4078_v7  ;;  %v14882_v38 = vpop.f32.mrf.mxu1  ;;  %v4050_v7 = vld [vmem:[#allocation2 + $0xd7] sm:$0xff]  ;;  %v16927_v23 = vld [vmem:[#allocation70_spill] sm:$0xff] }
 0x271   : > { %16921 = vst [vmem:[#allocation100_spill] sm:$0xff] %v14882_v38  ;;  %v11774_v16 = vpop.f32.mrf.mxu0  ;;  %12073 = vmatmul.mubr.msk.f32.gmra.mxu0 %vm1186_vm0, %v4464_v30  ;;  %v4466_v38 = vld [vmem:[#allocation2 + $0xc0] sm:$0xff]  ;;  %v4082_v56 = vmul.f32 %v4050_v7, %v16927_v23  ;;  %v4053_v23 = vld [vmem:[#allocation2 + $0xef] sm:$0xff] }
 0x272   : > { %v14886_v8 = vadd.f32 %v11774_v16, %v11724_v15  ;;  %12075 = vmatprep.mubr.msk.f32.mxu0 %vm1186_vm0, %v4465_v40  ;;  %v11727_v22 = vpop.f32.mrf.mxu1  ;;  %v16926_v15 = vld [vmem:[#allocation61_spill] sm:$0xff]  ;;  %v16931_v7 = vld [vmem:[#allocation80_spill] sm:$0xff] }
 0x273   : > { %v14890_v50 = vpop.f32.mrf.mxu0  ;;  %12026 = vmatmul.mubr.msk.f32.gmra.mxu1 %vm1186_vm0, %v4079_v9  ;;  %v4081_v16 = vmul.f32 %v4049_v18, %v16926_v15  ;;  %v16930_v18 = vld [vmem:[#allocation69_spill] sm:$0xff] }
 0x274   : > { %16924 = vst [vmem:[#allocation103_spill] sm:$0xff] %v14890_v50  ;;  %12028 = vmatprep.mubr.msk.f32.mxu1 %vm1186_vm0, %v4080_v55  ;;  %v14894_v30 = vpop.f32.mrf.mxu1  ;;  %v4052_v55 = vld [vmem:[#allocation2 + $0xe7] sm:$0xff] }
 0x275   : > { %16925 = vst [vmem:[#allocation106_spill] sm:$0xff] %v14894_v30  ;;  %v11777_v47 = vpop.f32.mrf.mxu0  ;;  %12076 = vmatmul.mubr.msk.f32.gmra.mxu0 %vm1186_vm0, %v4466_v38  ;;  %v4468_v30 = vld [vmem:[#allocation2 + $0xd0] sm:$0xff]  ;;  %v4084_v15 = vmul.f32 %v4052_v55, %v16931_v7  ;;  %v4055_v7 = vld [vmem:[#allocation2 + $0xff] sm:$0xff] }
 0x276   : > { %v14898_v40 = vadd.f32 %v11777_v47, %v11727_v22  ;;  %12078 = vmatprep.mubr.msk.f32.mxu0 %vm1186_vm0, %v4467_v0  ;;  %v11730_v9 = vpop.f32.mrf.mxu1  ;;  %v4469_v47 = vld [vmem:[#allocation2 + $0xd8] sm:$0xff]  ;;  %v4083_v22 = vmul.f32 %v4051_v19, %v16930_v18 }
 0x277   : > { %v14902_v50 = vpop.f32.mrf.mxu0  ;;  %12029 = vmatmul.mubr.msk.f32.gmra.mxu1 %vm1186_vm0, %v4081_v16  ;;  %v16934_v19 = vld [vmem:[#allocation79_spill] sm:$0xff] }
 0x278   : > { %16928 = vst [vmem:[#allocation107_spill] sm:$0xff] %v14902_v50  ;;  %12031 = vmatprep.mubr.msk.f32.mxu1 %vm1186_vm0, %v4082_v56  ;;  %v14906_v38 = vpop.f32.mrf.mxu1  ;;  %v4054_v56 = vld [vmem:[#allocation2 + $0xf7] sm:$0xff] }
 0x279   : > { %16929 = vst [vmem:[#allocation111_spill] sm:$0xff] %v14906_v38  ;;  %v11780_v46 = vpop.f32.mrf.mxu0  ;;  %12079 = vmatmul.mubr.msk.f32.gmra.mxu0 %vm1186_vm0, %v4468_v30  ;;  %v4470_v38 = vld [vmem:[#allocation2 + $0xe0] sm:$0xff]  ;;  %v16935_v55 = vld [vmem:[#allocation91_spill] sm:$0xff] }
 0x27a   : > { %v14910_v0 = vadd.f32 %v11780_v46, %v11730_v9  ;;  %12081 = vmatprep.mubr.msk.f32.mxu0 %vm1186_vm0, %v4469_v47  ;;  %v11733_v16 = vpop.f32.mrf.mxu1  ;;  %v4471_v46 = vld [vmem:[#allocation2 + $0xe8] sm:$0xff]  ;;  %v4085_v9 = vmul.f32 %v4053_v23, %v16934_v19  ;;  %v4086_v18 = vmul.f32 %v4054_v56, %v16935_v55  ;;  %v4087_v23 = vmul.f32 %v4055_v7, %v16850_v33  ;;  %v4058_v19 = vld [vmem:[#allocation2 + $0x117] sm:$0xff]  ;;  %v4474_v55 = vld [vmem:[#allocation2 + $0x100] sm:$0xff] }
 0x27b   : > { %v14914_v50 = vpop.f32.mrf.mxu0  ;;  %12032 = vmatmul.mubr.msk.f32.gmra.mxu1 %vm1186_vm0, %v4083_v22  ;;  %v4059_v33 = vld [vmem:[#allocation2 + $0x11f] sm:$0xff] }
 0x27c   : > { %16932 = vst [vmem:[#allocation112_spill] sm:$0xff] %v14914_v50  ;;  %12034 = vmatprep.mubr.msk.f32.mxu1 %vm1186_vm0, %v4084_v15  ;;  %v14918_v30 = vpop.f32.mrf.mxu1  ;;  %v4472_v15 = vld [vmem:[#allocation2 + $0xf0] sm:$0xff] }
 0x27d   : > { %16933 = vst [vmem:[#allocation90_spill] sm:$0xff] %v14918_v30  ;;  %v11783_v36 = vpop.f32.mrf.mxu0  ;;  %12082 = vmatmul.mubr.msk.f32.gmra.mxu0 %vm1186_vm0, %v4470_v38 }
 0x27e   : > { %v14922_v47 = vadd.f32 %v11783_v36, %v11733_v16  ;;  %12084 = vmatprep.mubr.msk.f32.mxu0 %vm1186_vm0, %v4471_v46  ;;  %v11736_v22 = vpop.f32.mrf.mxu1  ;;  %v4473_v36 = vld [vmem:[#allocation2 + $0xf8] sm:$0xff] }
 0x27f   : > { %v14926_v50 = vpop.f32.mrf.mxu0  ;;  %12035 = vmatmul.mubr.msk.f32.gmra.mxu1 %vm1186_vm0, %v4085_v9  ;;  %v16937_v9 = vld [vmem:[#allocation120_spill] sm:$0xff] }
 0x280   : > { %12037 = vmatprep.mubr.msk.f32.mxu1 %vm1186_vm0, %v4086_v18  ;;  %v14930_v30 = vpop.f32.mrf.mxu1 }
 0x281   : > { %v11786_v38 = vpop.f32.mrf.mxu0  ;;  %12085 = vmatmul.mubr.msk.f32.gmra.mxu0 %vm1186_vm0, %v4472_v15 }
 0x282   : > { %v14934_v16 = vadd.f32 %v11786_v38, %v11736_v22  ;;  %12087 = vmatprep.mubr.msk.f32.mxu0 %vm1186_vm0, %v4473_v36  ;;  %v11739_v56 = vpop.f32.mrf.mxu1  ;;  %v4090_v22 = vmul.f32 %v4058_v19, %v14316_v31  ;;  %v4478_v19 = vld [vmem:[#allocation2 + $0x120] sm:$0xff] }
 0x283   : > { %v14937_v46 = vpop.f32.mrf.mxu0  ;;  %12038 = vmatmul.mubr.msk.f32.gmra.mxu1 %vm1186_vm0, %v4087_v23  ;;  %v16940_v23 = vld [vmem:[#allocation121_spill] sm:$0xff] }
 0x284   : > { %16936 = vst [vmem:[#allocation114_spill] sm:$0xff] %v14937_v46  ;;  %12040 = vmatprep.mubr.msk.f32.mxu1 %vm1186_vm0, %v16937_v9  ;;  %v14942_v18 = vpop.f32.mrf.mxu1  ;;  %v4477_v9 = vld [vmem:[#allocation2 + $0x118] sm:$0xff]  ;;  %v4834_v46 = vld [vmem:[#allocation2 + $0x29] sm:$0xff] }
 0x285   : > { %16938 = vst [vmem:[#allocation63_spill] sm:$0xff] %v14942_v18  ;;  %v11789_v15 = vpop.f32.mrf.mxu0  ;;  %12088 = vmatmul.mubr.msk.f32.gmra.mxu0 %vm1186_vm0, %v4474_v55  ;;  %v4091_v55 = vmul.f32 %v4059_v33, %v16853_v57  ;;  %v4866_v31 = vmul.f32 %v4834_v46, %v16855_v26  ;;  %v4836_v57 = vld [vmem:[#allocation2 + $0x39] sm:$0xff]  ;;  %v4837_v46 = vld [vmem:[#allocation2 + $0x41] sm:$0xff] }
 0x286   : > { %v14945_v7 = vadd.f32 %v11789_v15, %v11739_v56  ;;  %12090 = vmatprep.mubr.msk.f32.mxu0 %vm1186_vm0, %v14777_v2  ;;  %v11742_v38 = vpop.f32.mrf.mxu1  ;;  %v4835_v15 = vld [vmem:[#allocation2 + $0x31] sm:$0xff]  ;;  %v4868_v26 = vmul.f32 %v4836_v57, %v13875_v59 }
 0x287   : > { %v14950_v36 = vpop.f32.mrf.mxu0  ;;  %12041 = vmatmul.mubr.msk.f32.gmra.mxu1 %vm1186_vm0, %v16940_v23 }
 0x288   : > { %16939 = vst [vmem:[#allocation33_spill] sm:$0xff] %v14950_v36  ;;  %12043 = vmatprep.mubr.msk.f32.mxu1 %vm1186_vm0, %v4090_v22  ;;  %v14956_v18 = vpop.f32.mrf.mxu1 }
 0x289   : > { %v11792_v56 = vpop.f32.mrf.mxu0  ;;  %12091 = vmatmul.mubr.msk.f32.gmra.mxu0 %vm1186_vm0, %v14787_v37  ;;  %v4867_v37 = vmul.f32 %v4835_v15, %v13863_v49  ;;  %v4869_v49 = vmul.f32 %v4837_v46, %v13873_v58 }
 0x28a   : > { %v14960_v2 = vadd.f32 %v11792_v56, %v11742_v38  ;;  %12093 = vmatprep.mubr.msk.f32.mxu0 %vm1186_vm0, %v4477_v9  ;;  %v11745_v23 = vpop.f32.mrf.mxu1 }
 0x28b   : > { %v14964_v36 = vpop.f32.mrf.mxu0  ;;  %12044 = vmatmul.mubr.msk.f32.gmra.mxu1 %vm1186_vm0, %v4091_v55  ;;  %v4838_v55 = vld [vmem:[#allocation2 + $0x49] sm:$0xff] }
 0x28c   : > { %12098 = vmatprep.mubr.msk.f32.mxu1 %vm1186_vm0, %v4866_v31  ;;  %v14968_v33 = vpop.f32.mrf.mxu1  ;;  %v4870_v59 = vmul.f32 %v4838_v55, %v13883_v5  ;;  %v4841_v55 = vld [vmem:[#allocation2 + $0x61] sm:$0xff] }
 0x28d   : > { %16941 = vst [vmem:[#allocation65_spill] sm:$0xff] %v14968_v33  ;;  %v11795_v22 = vpop.f32.mrf.mxu0  ;;  %12094 = vmatmul.mubr.msk.f32.gmra.mxu0 %vm1186_vm0, %v4478_v19 }
 0x28e   : > { %v14972_v38 = vadd.f32 %v11795_v22, %v11745_v23  ;;  %v11800_v56 = vpop.f32.mrf.mxu1  ;;  %v4839_v23 = vld [vmem:[#allocation2 + $0x51] sm:$0xff] }
 0x28f   : > { %v14975_v9 = vpop.f32.mrf.mxu0  ;;  %12099 = vmatmul.mubr.msk.f32.vlgmr.msra.gmra.mxu1 %vm1186_vm0, %v4867_v37  ;;  %v2772_v31 = vadd.f32 %v11800_v56, %v14602_v42  ;;  %v4840_v37 = vld [vmem:[#allocation2 + $0x59] sm:$0xff] }
 0x290   : > { %16942 = vst [vmem:[#allocation67_spill] sm:$0xff] %v14975_v9  ;;  %12101 = vmatprep.mubr.msk.f32.mxu1 %vm1186_vm0, %v4868_v26  ;;  %v14980_v33 = vpop.f32.mrf.mxu1  ;;  %v4871_v9 = vmul.f32 %v4839_v23, %v13881_v4  ;;  %v4872_v5 = vmul.f32 %v4840_v37, %v13892_v13  ;;  %v4843_v37 = vld [vmem:[#allocation2 + $0x71] sm:$0xff] }
 0x291   : > { %v11850_v19 = vpop.f32.mrf.mxu0 }
 0x292   : > { %v14983_v15 = vadd.f32 %v11850_v19, %v2772_v31 }
 0x293   : > { %v11803_v57 = vpop.f32.mrf.mxu1  ;;  %v14986_v22 = vpop.f32.mrf.mxu0  ;;  %12102 = vmatmul.mubr.msk.f32.gmra.mxu1 %vm1186_vm0, %v4869_v49 }
 0x294   : > { %v2774_v42 = vadd.f32 %v11803_v57, %v14814_v51  ;;  %12104 = vmatprep.mubr.msk.f32.mxu1 %vm1186_vm0, %v4870_v59  ;;  %v4842_v51 = vld [vmem:[#allocation2 + $0x69] sm:$0xff] }
 0x295   : > { %v2622_v26 = vpop.f32.mrf.mxu1  ;;  %v11853_v56 = vpop.f32.mrf.mxu0  ;;  %v4874_v13 = vmul.f32 %v4842_v51, %v13900_v21 }
 0x296   : > { %v14993_v58 = vadd.f32 %v2622_v26, %v14819_v32  ;;  %v14995_v46 = vadd.f32 %v11853_v56, %v2774_v42  ;;  %v4873_v32 = vmul.f32 %v4841_v55, %v13890_v12 }
 0x297   : > { %v11806_v31 = vpop.f32.mrf.mxu1  ;;  %v14998_v19 = vpop.f32.mrf.mxu0  ;;  %12105 = vmatmul.mubr.msk.f32.gmra.mxu1 %vm1186_vm0, %v4871_v9 }
 0x298   : > { %v2776_v49 = vadd.f32 %v11806_v31, %v14824_v6  ;;  %12107 = vmatprep.mubr.msk.f32.mxu1 %vm1186_vm0, %v4872_v5  ;;  %v4844_v6 = vld [vmem:[#allocation2 + $0x79] sm:$0xff]  ;;  %v4845_v31 = vld [vmem:[#allocation2 + $0x81] sm:$0xff] }
 0x299   : > { %v2632_v59 = vpop.f32.mrf.mxu1  ;;  %v11856_v4 = vpop.f32.mrf.mxu0  ;;  %v4876_v21 = vmul.f32 %v4844_v6, %v13914_v29 }
 0x29a   : > { %v15005_v23 = vadd.f32 %v2632_v59, %v14829_v63  ;;  %v15007_v57 = vadd.f32 %v11856_v4, %v2776_v49  ;;  %v4875_v63 = vmul.f32 %v4843_v37, %v13898_v20  ;;  %v4847_v37 = vld [vmem:[#allocation2 + $0x91] sm:$0xff] }
 0x29b   : > { %v11809_v42 = vpop.f32.mrf.mxu1  ;;  %v15010_v26 = vpop.f32.mrf.mxu0  ;;  %12108 = vmatmul.mubr.msk.f32.gmra.mxu1 %vm1186_vm0, %v4873_v32 }
 0x29c   : > { %v2778_v9 = vadd.f32 %v11809_v42, %v14834_v41  ;;  %12110 = vmatprep.mubr.msk.f32.mxu1 %vm1186_vm0, %v4874_v13  ;;  %v4846_v41 = vld [vmem:[#allocation2 + $0x89] sm:$0xff] }
 0x29d   : > { %v2642_v56 = vpop.f32.mrf.mxu1  ;;  %v11859_v12 = vpop.f32.mrf.mxu0  ;;  %v4878_v29 = vmul.f32 %v4846_v41, %v13925_v34 }
 0x29e   : > { %v15017_v5 = vadd.f32 %v2642_v56, %v14839_v1  ;;  %v15019_v55 = vadd.f32 %v11859_v12, %v2778_v9  ;;  %v4877_v1 = vmul.f32 %v4845_v31, %v13912_v28 }
 0x29f   : > { %v11812_v51 = vpop.f32.mrf.mxu1  ;;  %v15022_v49 = vpop.f32.mrf.mxu0  ;;  %12111 = vmatmul.mubr.msk.f32.gmra.mxu1 %vm1186_vm0, %v4875_v63 }
 0x2a0   : > { %v2780_v59 = vadd.f32 %v11812_v51, %v14844_v60  ;;  %12113 = vmatprep.mubr.msk.f32.mxu1 %vm1186_vm0, %v4876_v21  ;;  %v4848_v60 = vld [vmem:[#allocation2 + $0x99] sm:$0xff]  ;;  %v4849_v21 = vld [vmem:[#allocation2 + $0xa1] sm:$0xff] }
 0x2a1   : > { %v2652_v4 = vpop.f32.mrf.mxu1  ;;  %v11862_v20 = vpop.f32.mrf.mxu0  ;;  %v4880_v34 = vmul.f32 %v4848_v60, %v16810_v25 }
 0x2a2   : > { %v15029_v32 = vadd.f32 %v2652_v4, %v14849_v11  ;;  %v15031_v13 = vadd.f32 %v11862_v20, %v2780_v59  ;;  %v4879_v11 = vmul.f32 %v4847_v37, %v16809_v53 }
 0x2a3   : > { %v11815_v42 = vpop.f32.mrf.mxu1  ;;  %v15034_v6 = vpop.f32.mrf.mxu0  ;;  %12114 = vmatmul.mubr.msk.f32.gmra.mxu1 %vm1186_vm0, %v4877_v1  ;;  %v4851_v1 = vld [vmem:[#allocation2 + $0xb1] sm:$0xff] }
 0x2a4   : > { %v2782_v9 = vadd.f32 %v11815_v42, %v14854_v43  ;;  %12116 = vmatprep.mubr.msk.f32.mxu1 %vm1186_vm0, %v4878_v29  ;;  %v4850_v43 = vld [vmem:[#allocation2 + $0xa9] sm:$0xff] }
 0x2a5   : > { %v2662_v56 = vpop.f32.mrf.mxu1  ;;  %v11865_v28 = vpop.f32.mrf.mxu0  ;;  %v4882_v25 = vmul.f32 %v4850_v43, %v16814_v17 }
 0x2a6   : > { %v15041_v12 = vadd.f32 %v2662_v56, %v14859_v44  ;;  %v15043_v63 = vadd.f32 %v11865_v28, %v2782_v9  ;;  %v4881_v44 = vmul.f32 %v4849_v21, %v16813_v27  ;;  %v4853_v28 = vld [vmem:[#allocation2 + $0xc1] sm:$0xff] }
 0x2a7   : > { %v11818_v31 = vpop.f32.mrf.mxu1  ;;  %v15046_v51 = vpop.f32.mrf.mxu0  ;;  %12117 = vmatmul.mubr.msk.f32.gmra.mxu1 %vm1186_vm0, %v4879_v11 }
 0x2a8   : > { %v2784_v41 = vadd.f32 %v11818_v31, %v14864_v52  ;;  %12119 = vmatprep.mubr.msk.f32.mxu1 %vm1186_vm0, %v4880_v34  ;;  %v4852_v52 = vld [vmem:[#allocation2 + $0xb9] sm:$0xff] }
 0x2a9   : > { %v2672_v59 = vpop.f32.mrf.mxu1  ;;  %v11868_v53 = vpop.f32.mrf.mxu0  ;;  %v4884_v17 = vmul.f32 %v4852_v52, %v16819_v62  ;;  %v4857_v52 = vld [vmem:[#allocation2 + $0xe1] sm:$0xff] }
 0x2aa   : > { %v15053_v4 = vadd.f32 %v2672_v59, %v14869_v24  ;;  %v15055_v20 = vadd.f32 %v11868_v53, %v2784_v41  ;;  %v4883_v24 = vmul.f32 %v4851_v1, %v16818_v61  ;;  %v4855_v41 = vld [vmem:[#allocation2 + $0xd1] sm:$0xff] }
 0x2ab   : > { %v11821_v29 = vpop.f32.mrf.mxu1  ;;  %v15058_v37 = vpop.f32.mrf.mxu0  ;;  %12120 = vmatmul.mubr.msk.f32.gmra.mxu1 %vm1186_vm0, %v4881_v44  ;;  %v4856_v44 = vld [vmem:[#allocation2 + $0xd9] sm:$0xff] }
 0x2ac   : > { %v2786_v42 = vadd.f32 %v11821_v29, %v14874_v54  ;;  %12122 = vmatprep.mubr.msk.f32.mxu1 %vm1186_vm0, %v4882_v25  ;;  %v4854_v54 = vld [vmem:[#allocation2 + $0xc9] sm:$0xff] }
 0x2ad   : > { %v2682_v60 = vpop.f32.mrf.mxu1  ;;  %v11871_v27 = vpop.f32.mrf.mxu0  ;;  %v4886_v62 = vmul.f32 %v4854_v54, %v16878_v48  ;;  %v4888_v48 = vmul.f32 %v4856_v44, %v16884_v10  ;;  %v16945_v44 = vld [vmem:[#allocation98_spill] sm:$0xff] }
 0x2ae   : > { %v15065_v9 = vadd.f32 %v2682_v60, %v14879_v14  ;;  %v15067_v56 = vadd.f32 %v11871_v27, %v2786_v42  ;;  %v4885_v14 = vmul.f32 %v4853_v28, %v16875_v39  ;;  %v4887_v39 = vmul.f32 %v4855_v41, %v16881_v3  ;;  %v4858_v27 = vld [vmem:[#allocation2 + $0xe9] sm:$0xff]  ;;  %v16944_v41 = vld [vmem:[#allocation84_spill] sm:$0xff] }
 0x2af   : > { %v11824_v11 = vpop.f32.mrf.mxu1  ;;  %v15070_v34 = vpop.f32.mrf.mxu0  ;;  %12123 = vmatmul.mubr.msk.f32.gmra.mxu1 %vm1186_vm0, %v4883_v24  ;;  %v4889_v3 = vmul.f32 %v4857_v52, %v16886_v35  ;;  %v4890_v10 = vmul.f32 %v4858_v27, %v16889_v45 }
 0x2b0   : > { %v2788_v21 = vadd.f32 %v11824_v11, %v14886_v8  ;;  %12125 = vmatprep.mubr.msk.f32.mxu1 %vm1186_vm0, %v4884_v17  ;;  %v4859_v11 = vld [vmem:[#allocation2 + $0xf1] sm:$0xff] }
 0x2b1   : > { %v15075_v31 = vpop.f32.mrf.mxu1  ;;  %v11874_v61 = vpop.f32.mrf.mxu0  ;;  %v4891_v35 = vmul.f32 %v4859_v11, %v16944_v41 }
 0x2b2   : > { %v15078_v43 = vadd.f32 %v11874_v61, %v2788_v21  ;;  %v4860_v61 = vld [vmem:[#allocation2 + $0xf9] sm:$0xff] }
 0x2b3   : > { %v11827_v59 = vpop.f32.mrf.mxu1  ;;  %v15081_v53 = vpop.f32.mrf.mxu0  ;;  %12126 = vmatmul.mubr.msk.f32.gmra.mxu1 %vm1186_vm0, %v4885_v14  ;;  %v4892_v45 = vmul.f32 %v4860_v61, %v16945_v44 }
 0x2b4   : > { %v2790_v8 = vadd.f32 %v11827_v59, %v14898_v40  ;;  %12128 = vmatprep.mubr.msk.f32.mxu1 %vm1186_vm0, %v4886_v62 }
 0x2b5   : > { %v15086_v25 = vpop.f32.mrf.mxu1  ;;  %v11877_v1 = vpop.f32.mrf.mxu0 }
 0x2b6   : > { %v15089_v29 = vadd.f32 %v11877_v1, %v2790_v8  ;;  %v4861_v8 = vld [vmem:[#allocation2 + $0x101] sm:$0xff] }
 0x2b7   : > { %v11830_v42 = vpop.f32.mrf.mxu1  ;;  %v15092_v60 = vpop.f32.mrf.mxu0  ;;  %12129 = vmatmul.mubr.msk.f32.gmra.mxu1 %vm1186_vm0, %v4887_v39 }
 0x2b8   : > { %v2792_v40 = vadd.f32 %v11830_v42, %v14910_v0  ;;  %12131 = vmatprep.mubr.msk.f32.mxu1 %vm1186_vm0, %v4888_v48  ;;  %v16947_v42 = vld [vmem:[#allocation96_spill] sm:$0xff] }
 0x2b9   : > { %v15097_v24 = vpop.f32.mrf.mxu1  ;;  %v11880_v17 = vpop.f32.mrf.mxu0  ;;  %v4893_v27 = vmul.f32 %v4861_v8, %v16947_v42  ;;  %v16952_v8 = vld [vmem:[#allocation118_spill] sm:$0xff] }
 0x2ba   : > { %v15100_v28 = vadd.f32 %v11880_v17, %v2792_v40  ;;  %v4864_v17 = vld [vmem:[#allocation2 + $0x119] sm:$0xff] }
 0x2bb   : > { %v11833_v54 = vpop.f32.mrf.mxu1  ;;  %v15103_v21 = vpop.f32.mrf.mxu0  ;;  %12132 = vmatmul.mubr.msk.f32.gmra.mxu1 %vm1186_vm0, %v4889_v3 }
 0x2bc   : > { %16943 = vst [vmem:[#allocation68_spill] sm:$0xff] %v15103_v21  ;;  %v2794_v0 = vadd.f32 %v11833_v54, %v14922_v47  ;;  %12134 = vmatprep.mubr.msk.f32.mxu1 %vm1186_vm0, %v4890_v10  ;;  %v16949_v54 = vld [vmem:[#allocation122_spill] sm:$0xff] }
 0x2bd   : > { %v15108_v14 = vpop.f32.mrf.mxu1  ;;  %v11883_v62 = vpop.f32.mrf.mxu0 }
 0x2be   : > { %v15111_v59 = vadd.f32 %v11883_v62, %v2794_v0  ;;  %v4865_v0 = vld [vmem:[#allocation2 + $0x121] sm:$0xff] }
 0x2bf   : > { %v11836_v1 = vpop.f32.mrf.mxu1  ;;  %v15114_v39 = vpop.f32.mrf.mxu0  ;;  %12135 = vmatmul.mubr.msk.f32.gmra.mxu1 %vm1186_vm0, %v4891_v35  ;;  %v16950_v62 = vld [vmem:[#allocation88_spill] sm:$0xff] }
 0x2c0   : > { %16946 = vst [vmem:[#allocation71_spill] sm:$0xff] %v15114_v39  ;;  %v2796_v48 = vadd.f32 %v11836_v1, %v14934_v16  ;;  %12137 = vmatprep.mubr.msk.f32.mxu1 %vm1186_vm0, %v4892_v45  ;;  %v4896_v41 = vmul.f32 %v4864_v17, %v16950_v62 }
 0x2c1   : > { %v15119_v47 = vpop.f32.mrf.mxu1  ;;  %v11886_v52 = vpop.f32.mrf.mxu0 }
 0x2c2   : > { %v15122_v40 = vadd.f32 %v11886_v52, %v2796_v48 }
 0x2c3   : > { %v11839_v3 = vpop.f32.mrf.mxu1  ;;  %v15124_v10 = vpop.f32.mrf.mxu0  ;;  %12138 = vmatmul.mubr.msk.f32.gmra.mxu1 %vm1186_vm0, %v4893_v27 }
 0x2c4   : > { %16948 = vst [vmem:[#allocation72_spill] sm:$0xff] %v15124_v10  ;;  %v2798_v11 = vadd.f32 %v11839_v3, %v14945_v7  ;;  %12140 = vmatprep.mubr.msk.f32.mxu1 %vm1186_vm0, %v16949_v54  ;;  %v16953_v7 = vld [vmem:[#allocation55_spill] sm:$0xff] }
 0x2c5   : > { %v15130_v16 = vpop.f32.mrf.mxu1  ;;  %v11889_v61 = vpop.f32.mrf.mxu0  ;;  %v4897_v48 = vmul.f32 %v4865_v0, %v16953_v7 }
 0x2c6   : > { %v15133_v35 = vadd.f32 %v11889_v61, %v2798_v11 }
 0x2c7   : > { %v11842_v44 = vpop.f32.mrf.mxu1  ;;  %v15135_v45 = vpop.f32.mrf.mxu0  ;;  %12141 = vmatmul.mubr.msk.f32.gmra.mxu1 %vm1186_vm0, %v16952_v8 }
 0x2c8   : > { %16951 = vst [vmem:[#allocation73_spill] sm:$0xff] %v15135_v45  ;;  %v2800_v1 = vadd.f32 %v11842_v44, %v14960_v2  ;;  %12143 = vmatprep.mubr.msk.f32.mxu1 %vm1186_vm0, %v4896_v41 }
 0x2c9   : > { %v15142_v52 = vpop.f32.mrf.mxu1  ;;  %v11892_v42 = vpop.f32.mrf.mxu0 }
 0x2ca   : > { %v15144_v27 = vadd.f32 %v11892_v42, %v2800_v1 }
 0x2cb   : > { %v11845_v17 = vpop.f32.mrf.mxu1  ;;  %v15146_v3 = vpop.f32.mrf.mxu0  ;;  %12144 = vmatmul.mubr.msk.f32.gmra.mxu1 %vm1186_vm0, %v4897_v48 }
 0x2cc   : > { %16954 = vst [vmem:[#allocation75_spill] sm:$0xff] %v15146_v3  ;;  %v2802_v11 = vadd.f32 %v11845_v17, %v14972_v38 }
 0x2cd   : > { %v15150_v54 = vpop.f32.mrf.mxu1  ;;  %v11895_v61 = vpop.f32.mrf.mxu0 }
 0x2ce   : > { %v15152_v2 = vadd.f32 %v11895_v61, %v2802_v11 }
 0x2cf   : > { %v15154_v62 = vpop.f32.mrf.mxu0  ;;  %v11900_v0 = vpop.f32.mrf.mxu1 }
 0x2d0   : > { %16955 = vst [vmem:[#allocation77_spill] sm:$0xff] %v15154_v62  ;;  %v3578_v41 = vadd.f32 %v11900_v0, %v14983_v15 }
 0x2d1   : > { %v15157_v44 = vpop.f32.mrf.mxu1  ;;  %v11950_v8 = vpop.f32.mrf.mxu0 }
 0x2d2   : > { %v15159_v1 = vadd.f32 %v11950_v8, %v3578_v41 }
 0x2d3   : > { %v11903_v7 = vpop.f32.mrf.mxu1  ;;  %v15161_v42 = vpop.f32.mrf.mxu0 }
 0x2d4   : > { %16956 = vst [vmem:[#allocation78_spill] sm:$0xff] %v15161_v42  ;;  %v3580_v38 = vadd.f32 %v11903_v7, %v14995_v46 }
 0x2d5   : > { %v15164_v48 = vpop.f32.mrf.mxu1  ;;  %v11953_v17 = vpop.f32.mrf.mxu0 }
 0x2d6   : > { %v15166_v11 = vadd.f32 %v11953_v17, %v3580_v38 }
 0x2d7   : > { %v11906_v61 = vpop.f32.mrf.mxu1  ;;  %v15168_v62 = vpop.f32.mrf.mxu0 }
 0x2d8   : > { %16957 = vst [vmem:[#allocation81_spill] sm:$0xff] %v15168_v62  ;;  %v3582_v15 = vadd.f32 %v11906_v61, %v15007_v57 }
 0x2d9   : > { %v15171_v0 = vpop.f32.mrf.mxu1  ;;  %v11956_v3 = vpop.f32.mrf.mxu0 }
 0x2da   : > { %v15173_v41 = vadd.f32 %v11956_v3, %v3582_v15 }
 0x2db   : > { %v11909_v8 = vpop.f32.mrf.mxu1  ;;  %v15175_v45 = vpop.f32.mrf.mxu0 }
 0x2dc   : > { %16958 = vst [vmem:[#allocation82_spill] sm:$0xff] %v15175_v45  ;;  %v3584_v46 = vadd.f32 %v11909_v8, %v15019_v55 }
 0x2dd   : > { %v15178_v7 = vpop.f32.mrf.mxu1  ;;  %v11959_v42 = vpop.f32.mrf.mxu0 }
 0x2de   : > { %v15180_v38 = vadd.f32 %v11959_v42, %v3584_v46 }
 0x2df   : > { %v11912_v17 = vpop.f32.mrf.mxu1  ;;  %v15182_v10 = vpop.f32.mrf.mxu0 }
 0x2e0   : > { %16959 = vst [vmem:[#allocation83_spill] sm:$0xff] %v15182_v10  ;;  %v3586_v57 = vadd.f32 %v11912_v17, %v15031_v13 }
 0x2e1   : > { %v15185_v61 = vpop.f32.mrf.mxu1  ;;  %v11962_v62 = vpop.f32.mrf.mxu0 }
 0x2e2   : > { %16960 = vst [vmem:[#allocation85_spill] sm:$0xff] %v15185_v61  ;;  %v15187_v3 = vadd.f32 %v11962_v62, %v3586_v57 }
 0x2e3   : > { %v11915_v15 = vpop.f32.mrf.mxu1  ;;  %v15189_v39 = vpop.f32.mrf.mxu0 }
 0x2e4   : > { %16961 = vst [vmem:[#allocation87_spill] sm:$0xff] %v15189_v39  ;;  %v3588_v55 = vadd.f32 %v11915_v15, %v15043_v63 }
 0x2e5   : > { %v15192_v8 = vpop.f32.mrf.mxu1  ;;  %v11965_v45 = vpop.f32.mrf.mxu0 }
 0x2e6   : > { %16962 = vst [vmem:[#allocation89_spill] sm:$0xff] %v15192_v8  ;;  %v15194_v42 = vadd.f32 %v11965_v45, %v3588_v55 }
 0x2e7   : > { %v11918_v46 = vpop.f32.mrf.mxu1  ;;  %v15196_v21 = vpop.f32.mrf.mxu0 }
 0x2e8   : > { %16963 = vst [vmem:[#allocation92_spill] sm:$0xff] %v15196_v21  ;;  %v3590_v13 = vadd.f32 %v11918_v46, %v15055_v20 }
 0x2e9   : > { %v15199_v17 = vpop.f32.mrf.mxu1  ;;  %v11968_v10 = vpop.f32.mrf.mxu0 }
 0x2ea   : > { %16964 = vst [vmem:[#allocation94_spill] sm:$0xff] %v15199_v17  ;;  %v15201_v62 = vadd.f32 %v11968_v10, %v3590_v13 }
 0x2eb   : > { %v11921_v57 = vpop.f32.mrf.mxu1  ;;  %v15203_v61 = vpop.f32.mrf.mxu0 }
 0x2ec   : > { %16965 = vst [vmem:[#allocation95_spill] sm:$0xff] %v15203_v61  ;;  %v3592_v63 = vadd.f32 %v11921_v57, %v15067_v56 }
 0x2ed   : > { %v15206_v15 = vpop.f32.mrf.mxu1  ;;  %v11971_v39 = vpop.f32.mrf.mxu0 }
 0x2ee   : > { %16966 = vst [vmem:[#allocation97_spill] sm:$0xff] %v15206_v15  ;;  %v15208_v45 = vadd.f32 %v11971_v39, %v3592_v63 }
 0x2ef   : > { %v11924_v55 = vpop.f32.mrf.mxu1  ;;  %v15210_v8 = vpop.f32.mrf.mxu0 }
 0x2f0   : > { %16967 = vst [vmem:[#allocation59_spill] sm:$0xff] %v15210_v8  ;;  %v3594_v20 = vadd.f32 %v11924_v55, %v15078_v43 }
 0x2f1   : > { %v15213_v46 = vpop.f32.mrf.mxu1  ;;  %v11974_v21 = vpop.f32.mrf.mxu0 }
 0x2f2   : > { %16968 = vst [vmem:[#allocation99_spill] sm:$0xff] %v15213_v46  ;;  %v15215_v10 = vadd.f32 %v11974_v21, %v3594_v20 }
 0x2f3   : > { %v11927_v13 = vpop.f32.mrf.mxu1  ;;  %v15217_v17 = vpop.f32.mrf.mxu0 }
 0x2f4   : > { %16969 = vst [vmem:[#allocation48_spill] sm:$0xff] %v15217_v17  ;;  %v3596_v56 = vadd.f32 %v11927_v13, %v15089_v29 }
 0x2f5   : > { %v15220_v57 = vpop.f32.mrf.mxu1  ;;  %v11977_v61 = vpop.f32.mrf.mxu0 }
 0x2f6   : > { %16970 = vst [vmem:[#allocation66_spill] sm:$0xff] %v15220_v57  ;;  %v15222_v39 = vadd.f32 %v11977_v61, %v3596_v56 }
 0x2f7   : > { %v11930_v63 = vpop.f32.mrf.mxu1  ;;  %v15224_v15 = vpop.f32.mrf.mxu0 }
 0x2f8   : > { %16971 = vst [vmem:[#allocation101_spill] sm:$0xff] %v15224_v15  ;;  %v3598_v43 = vadd.f32 %v11930_v63, %v15100_v28 }
 0x2f9   : > { %v15227_v55 = vpop.f32.mrf.mxu1  ;;  %v11980_v8 = vpop.f32.mrf.mxu0 }
 0x2fa   : > { %16972 = vst [vmem:[#allocation52_spill] sm:$0xff] %v15227_v55  ;;  %v15229_v21 = vadd.f32 %v11980_v8, %v3598_v43 }
 0x2fb   : > { %v11933_v20 = vpop.f32.mrf.mxu1  ;;  %v15231_v46 = vpop.f32.mrf.mxu0 }
 0x2fc   : > { %16973 = vst [vmem:[#allocation64_spill] sm:$0xff] %v15231_v46  ;;  %v3600_v29 = vadd.f32 %v11933_v20, %v15111_v59 }
 0x2fd   : > { %v15234_v13 = vpop.f32.mrf.mxu1  ;;  %v11983_v17 = vpop.f32.mrf.mxu0 }
 0x2fe   : > { %16974 = vst [vmem:[#allocation102_spill] sm:$0xff] %v15234_v13  ;;  %v15236_v61 = vadd.f32 %v11983_v17, %v3600_v29 }
 0x2ff   : > { %v11936_v56 = vpop.f32.mrf.mxu1  ;;  %v15238_v57 = vpop.f32.mrf.mxu0 }
 0x300   : > { %16975 = vst [vmem:[#allocation51_spill] sm:$0xff] %v15238_v57  ;;  %v3602_v28 = vadd.f32 %v11936_v56, %v15122_v40 }
 0x301   : > { %v15241_v63 = vpop.f32.mrf.mxu1  ;;  %v11986_v15 = vpop.f32.mrf.mxu0 }
 0x302   : > { %16976 = vst [vmem:[#allocation76_spill] sm:$0xff] %v15241_v63  ;;  %v15243_v8 = vadd.f32 %v11986_v15, %v3602_v28 }
 0x303   : > { %v11939_v43 = vpop.f32.mrf.mxu1  ;;  %v15245_v55 = vpop.f32.mrf.mxu0 }
 0x304   : > { %16977 = vst [vmem:[#allocation104_spill] sm:$0xff] %v15245_v55  ;;  %v3604_v59 = vadd.f32 %v11939_v43, %v15133_v35 }
 0x305   : > { %v15248_v20 = vpop.f32.mrf.mxu1  ;;  %v11989_v46 = vpop.f32.mrf.mxu0 }
 0x306   : > { %v15250_v17 = vadd.f32 %v11989_v46, %v3604_v59 }
 0x307   : > { %v11942_v29 = vpop.f32.mrf.mxu1  ;;  %v15252_v13 = vpop.f32.mrf.mxu0 }
 0x308   : > { %16978 = vst [vmem:[#allocation74_spill] sm:$0xff] %v15252_v13  ;;  %v3606_v40 = vadd.f32 %v11942_v29, %v15144_v27 }
 0x309   : > { %v15255_v56 = vpop.f32.mrf.mxu1  ;;  %v11992_v57 = vpop.f32.mrf.mxu0 }
 0x30a   : > { %16979 = vst [vmem:[#allocation105_spill] sm:$0xff] %v15255_v56  ;;  %v15257_v15 = vadd.f32 %v11992_v57, %v3606_v40 }
 0x30b   : > { %v11945_v28 = vpop.f32.mrf.mxu1  ;;  %v15259_v63 = vpop.f32.mrf.mxu0 }
 0x30c   : > { %16980 = vst [vmem:[#allocation56_spill] sm:$0xff] %v15259_v63  ;;  %v15262_v35 = vadd.f32 %v11945_v28, %v15152_v2 }
 0x30d   : > { %v15264_v43 = vpop.f32.mrf.mxu1  ;;  %v15266_v46 = vpop.f32.mrf.mxu0 }
 0x30e   : > { %16981 = vst [vmem:[#allocation86_spill] sm:$0xff] %v15262_v35  ;;  %16982 = vst [vmem:[#allocation108_spill] sm:$0xff] %v15264_v43 }
 0x30f   : > { %16983 = vst [vmem:[#allocation110_spill] sm:$0xff] %v15266_v46  ;;  %v15268_v59 = vpop.f32.mrf.mxu0  ;;  %v12000_v13 = vpop.f32.mrf.mxu1 }
 0x310   : > { %16984 = vst [vmem:[#allocation113_spill] sm:$0xff] %v15268_v59  ;;  %v4416_v27 = vadd.f32 %v12000_v13, %v15159_v1 }
 0x311   : > { %v15271_v29 = vpop.f32.mrf.mxu1  ;;  %v12050_v55 = vpop.f32.mrf.mxu0 }
 0x312   : > { %16985 = vst [vmem:[#allocation115_spill] sm:$0xff] %v15271_v29  ;;  %v15273_v57 = vadd.f32 %v12050_v55, %v4416_v27 }
 0x313   : > { %v12003_v40 = vpop.f32.mrf.mxu1  ;;  %v15275_v56 = vpop.f32.mrf.mxu0 }
 0x314   : > { %16986 = vst [vmem:[#allocation109_spill] sm:$0xff] %v15275_v56  ;;  %v4418_v2 = vadd.f32 %v12003_v40, %v15166_v11 }
 0x315   : > { %v15278_v28 = vpop.f32.mrf.mxu1  ;;  %v12053_v35 = vpop.f32.mrf.mxu0 }
 0x316   : > { %v15280_v63 = vadd.f32 %v12053_v35, %v4418_v2 }
 0x317   : > { %v12006_v46 = vpop.f32.mrf.mxu1  ;;  %v15282_v59 = vpop.f32.mrf.mxu0 }
 0x318   : > { %16987 = vst [vmem:[#allocation116_spill] sm:$0xff] %v15282_v59  ;;  %v4420_v1 = vadd.f32 %v12006_v46, %v15173_v41 }
 0x319   : > { %v15285_v13 = vpop.f32.mrf.mxu1  ;;  %v12056_v29 = vpop.f32.mrf.mxu0 }
 0x31a   : > { %v15287_v55 = vadd.f32 %v12056_v29, %v4420_v1 }
 0x31b   : > { %v12009_v27 = vpop.f32.mrf.mxu1  ;;  %v15289_v43 = vpop.f32.mrf.mxu0 }
 0x31c   : > { %16988 = vst [vmem:[#allocation119_spill] sm:$0xff] %v15289_v43  ;;  %v4422_v11 = vadd.f32 %v12009_v27, %v15180_v38 }
 0x31d   : > { %v15292_v40 = vpop.f32.mrf.mxu1  ;;  %v12059_v56 = vpop.f32.mrf.mxu0 }
 0x31e   : > { %v15294_v35 = vadd.f32 %v12059_v56, %v4422_v11 }
 0x31f   : > { %v12012_v2 = vpop.f32.mrf.mxu1  ;;  %v15309_v27 = vpop.f32.mrf.mxu0 }
 0x320   : > { %v15297_v59 = vadd.f32 %v12012_v2, %v15187_v3  ;;  %16992 = vst [vmem:[#allocation37_spill] sm:$0xff] %v15309_v27  ;;  %v5479_v27 = vld [vmem:[#allocation11 + $0x88] sm:$0xff] }
 0x321   : > { %v15299_v41 = vpop.f32.mrf.mxu1  ;;  %v15316_v2 = vpop.f32.mrf.mxu0  ;;  %5558 = vmatprep.mubr.f32.mxu1 %v5479_v27 }
 0x322   : > { %16989 = vst [vmem:[#allocation34_spill] sm:$0xff] %v15297_v59 }
 0x323   : > { %v12015_v46 = vpop.f32.mrf.mxu1 }
 0x324   : > { %v15302_v29 = vadd.f32 %v12015_v46, %v15194_v42 }
 0x325   : > { %v15304_v1 = vpop.f32.mrf.mxu1 }
 0x326   : > { %16990 = vst [vmem:[#allocation117_spill] sm:$0xff] %v15302_v29  ;;  %v15323_v29 = vpop.f32.mrf.mxu0 }
 0x327   : > { %v12018_v43 = vpop.f32.mrf.mxu1  ;;  %16996 = vst [vmem:[#allocation41_spill] sm:$0xff] %v15323_v29 }
 0x328   : > { %v15307_v38 = vadd.f32 %v12018_v43, %v15201_v62 }
 0x329   : > { %v15311_v56 = vpop.f32.mrf.mxu1 }
 0x32a   : > { %16991 = vst [vmem:[#allocation35_spill] sm:$0xff] %v15307_v38  ;;  %16993 = vst [vmem:[#allocation36_spill] sm:$0xff] %v15311_v56  ;;  %v5357_v38 = vld [vmem:[#allocation11 + $0x8] sm:$0xff] }
 0x32b   : > { %v12021_v11 = vpop.f32.mrf.mxu1  ;;  %5436 = vmatprep.mubr.f32.mxu0 %v5357_v38 }
 0x32c   : > { %v15314_v3 = vadd.f32 %v12021_v11, %v15208_v45  ;;  %v15330_v45 = vpop.f32.mrf.mxu0 }
 0x32d   : > { %v15318_v59 = vpop.f32.mrf.mxu1 }
 0x32e   : > { %16994 = vst [vmem:[#allocation39_spill] sm:$0xff] %v15314_v3 }
 0x32f   : > { %v12024_v42 = vpop.f32.mrf.mxu1 }
 0x330   : > { %v15321_v46 = vadd.f32 %v12024_v42, %v15215_v10  ;;  %v15337_v42 = vpop.f32.mrf.mxu0 }
 0x331   : > { %v15325_v62 = vpop.f32.mrf.mxu1 }
 0x332   : > { %16995 = vst [vmem:[#allocation38_spill] sm:$0xff] %v15321_v46  ;;  %16997 = vst [vmem:[#allocation40_spill] sm:$0xff] %v15325_v62 }
 0x333   : > { %v12027_v43 = vpop.f32.mrf.mxu1 }
 0x334   : > { %v15328_v56 = vadd.f32 %v12027_v43, %v15222_v39  ;;  %v15344_v39 = vpop.f32.mrf.mxu0 }
 0x335   : > { %v15332_v11 = vpop.f32.mrf.mxu1 }
 0x336   : > { %16998 = vst [vmem:[#allocation43_spill] sm:$0xff] %v15328_v56  ;;  %16999 = vst [vmem:[#allocation42_spill] sm:$0xff] %v15332_v11  ;;  %v15351_v56 = vpop.f32.mrf.mxu0 }
 0x337   : > { %v12030_v3 = vpop.f32.mrf.mxu1  ;;  %17005 = vst [vmem:[#allocation49_spill] sm:$0xff] %v15351_v56 }
 0x338   : > { %v15335_v10 = vadd.f32 %v12030_v3, %v15229_v21 }
 0x339   : > { %v15339_v46 = vpop.f32.mrf.mxu1 }
 0x33a   : > { %17000 = vst [vmem:[#allocation45_spill] sm:$0xff] %v15335_v10  ;;  %17001 = vst [vmem:[#allocation44_spill] sm:$0xff] %v15339_v46  ;;  %v15358_v46 = vpop.f32.mrf.mxu0 }
 0x33b   : > { %v12033_v62 = vpop.f32.mrf.mxu1 }
 0x33c   : > { %v15342_v29 = vadd.f32 %v12033_v62, %v15236_v61  ;;  %v15365_v11 = vpop.f32.mrf.mxu0 }
 0x33d   : > { %v15346_v38 = vpop.f32.mrf.mxu1  ;;  %17010 = vst [vmem:[#allocation62_spill] sm:$0xff] %v15365_v11  ;;  %v17053_v11 = vld [vmem:[#allocation33_spill] sm:$0xff] }
 0x33e   : > { %17002 = vst [vmem:[#allocation47_spill] sm:$0xff] %v15342_v29  ;;  %17003 = vst [vmem:[#allocation46_spill] sm:$0xff] %v15346_v38 }
 0x33f   : > { %v12036_v27 = vpop.f32.mrf.mxu1 }
 0x340   : > { %v15349_v43 = vadd.f32 %v12036_v27, %v15243_v8 }
 0x341   : > { %v15353_v21 = vpop.f32.mrf.mxu1 }
 0x342   : > { %17004 = vst [vmem:[#allocation50_spill] sm:$0xff] %v15349_v43  ;;  %17006 = vst [vmem:[#allocation54_spill] sm:$0xff] %v15353_v21  ;;  %v15371_v43 = vpop.f32.mrf.mxu0 }
 0x343   : > { %v12039_v3 = vpop.f32.mrf.mxu1  ;;  %17013 = vst [vmem:[#allocation69_spill] sm:$0xff] %v15371_v43 }
 0x344   : > { %v15356_v10 = vadd.f32 %v12039_v3, %v15250_v17 }
 0x345   : > { %v15360_v61 = vpop.f32.mrf.mxu1 }
 0x346   : > { %17007 = vst [vmem:[#allocation53_spill] sm:$0xff] %v15356_v10  ;;  %17008 = vst [vmem:[#allocation58_spill] sm:$0xff] %v15360_v61  ;;  %v15378_v10 = vpop.f32.mrf.mxu0 }
 0x347   : > { %v12042_v62 = vpop.f32.mrf.mxu1  ;;  %17016 = vst [vmem:[#allocation91_spill] sm:$0xff] %v15378_v10 }
 0x348   : > { %v15363_v29 = vadd.f32 %v12042_v62, %v15257_v15 }
 0x349   : > { %v15367_v8 = vpop.f32.mrf.mxu1 }
 0x34a   : > { %17009 = vst [vmem:[#allocation57_spill] sm:$0xff] %v15363_v29  ;;  %17011 = vst [vmem:[#allocation61_spill] sm:$0xff] %v15367_v8  ;;  %v15385_v29 = vpop.f32.mrf.mxu0  ;;  %v17048_v8 = vld [vmem:[#allocation111_spill] sm:$0xff] }
 0x34b   : > { %v15369_v27 = vpop.f32.mrf.mxu1  ;;  %17019 = vst [vmem:[#allocation84_spill] sm:$0xff] %v15385_v29 }
 0x34c   : > { %17012 = vst [vmem:[#allocation70_spill] sm:$0xff] %v15369_v27 }
 0x34d   : > { %v15373_v21 = vpop.f32.mrf.mxu1 }
 0x34e   : > { %17014 = vst [vmem:[#allocation80_spill] sm:$0xff] %v15373_v21  ;;  %v15392_v21 = vpop.f32.mrf.mxu0 }
 0x34f   : > { %v12100_v17 = vpop.f32.mrf.mxu1  ;;  %17022 = vst [vmem:[#allocation122_spill] sm:$0xff] %v15392_v21  ;;  %v17038_v21 = vld [vmem:[#allocation93_spill] sm:$0xff] }
 0x350   : > { %v15376_v3 = vadd.f32 %v12100_v17, %v15273_v57 }
 0x351   : > { %v15380_v61 = vpop.f32.mrf.mxu1 }
 0x352   : > { %17015 = vst [vmem:[#allocation79_spill] sm:$0xff] %v15376_v3  ;;  %17017 = vst [vmem:[#allocation120_spill] sm:$0xff] %v15380_v61  ;;  %v15399_v61 = vpop.f32.mrf.mxu0 }
 0x353   : > { %v12103_v15 = vpop.f32.mrf.mxu1  ;;  %17025 = vst [vmem:[#allocation55_spill] sm:$0xff] %v15399_v61  ;;  %v17044_v61 = vld [vmem:[#allocation106_spill] sm:$0xff] }
 0x354   : > { %v15383_v62 = vadd.f32 %v12103_v15, %v15280_v63 }
 0x355   : > { %v15387_v38 = vpop.f32.mrf.mxu1 }
 0x356   : > { %17018 = vst [vmem:[#allocation121_spill] sm:$0xff] %v15383_v62  ;;  %17020 = vst [vmem:[#allocation98_spill] sm:$0xff] %v15387_v38  ;;  %v15405_v62 = vpop.f32.mrf.mxu0 }
 0x357   : > { %v12106_v27 = vpop.f32.mrf.mxu1  ;;  %17028 = vst [vmem:[#allocation125_spill] sm:$0xff] %v15405_v62 }
 0x358   : > { %v15390_v43 = vadd.f32 %v12106_v27, %v15287_v55  ;;  %v15411_v27 = vpop.f32.mrf.mxu0 }
 0x359   : > { %v15394_v57 = vpop.f32.mrf.mxu1  ;;  %17031 = vst [vmem:[#allocation128_spill] sm:$0xff] %v15411_v27  ;;  %v17043_v27 = vld [vmem:[#allocation103_spill] sm:$0xff] }
 0x35a   : > { %17021 = vst [vmem:[#allocation96_spill] sm:$0xff] %v15390_v43  ;;  %17023 = vst [vmem:[#allocation88_spill] sm:$0xff] %v15394_v57 }
 0x35b   : > { %v12109_v17 = vpop.f32.mrf.mxu1 }
 0x35c   : > { %v15397_v3 = vadd.f32 %v12109_v17, %v15294_v35  ;;  %v15417_v35 = vpop.f32.mrf.mxu0 }
 0x35d   : > { %v15401_v63 = vpop.f32.mrf.mxu1  ;;  %17034 = vst [vmem:[#allocation131_spill] sm:$0xff] %v15417_v35  ;;  %v17045_v35 = vld [vmem:[#allocation107_spill] sm:$0xff] }
 0x35e   : > { %17024 = vst [vmem:[#allocation118_spill] sm:$0xff] %v15397_v3  ;;  %17026 = vst [vmem:[#allocation123_spill] sm:$0xff] %v15401_v63  ;;  %v17037_v3 = vld [vmem:[#allocation60_spill] sm:$0xff]  ;;  %v15425_v62 = vpop.f32.mrf.mxu0  ;;  %v2123_v29 = vadd.f32 %v17045_v35, %v17044_v61  ;;  %v17054_v61 = vld [vmem:[#allocation65_spill] sm:$0xff] }
 0x35f   : > { %v15403_v15 = vpop.f32.mrf.mxu1  ;;  %v2033_v63 = vadd.f32 %v17038_v21, %v17037_v3  ;;  %17039 = vst [vmem:[#allocation60_spill] sm:$0xff] %v15425_v62  ;;  %v17049_v21 = vld [vmem:[#allocation112_spill] sm:$0xff]  ;;  %v17050_v62 = vld [vmem:[#allocation90_spill] sm:$0xff] }
 0x360   : > { %17027 = vst [vmem:[#allocation124_spill] sm:$0xff] %v15403_v15  ;;  %v2133_v3 = vadd.f32 %v17049_v21, %v17048_v8  ;;  %v17065_v21 = vld [vmem:[#allocation78_spill] sm:$0xff] }
 0x361   : > { %v15407_v38 = vpop.f32.mrf.mxu1  ;;  %v2771_v15 = vadd.f32 %v14980_v33, %v2033_v63  ;;  %v17051_v33 = vld [vmem:[#allocation114_spill] sm:$0xff] }
 0x362   : > { %17029 = vst [vmem:[#allocation126_spill] sm:$0xff] %v15407_v38  ;;  %v2153_v63 = vadd.f32 %v17051_v33, %v14930_v30  ;;  %v3194_v30 = vadd.f32 %v15010_v26, %v15005_v23  ;;  %v3202_v23 = vadd.f32 %v15058_v37, %v15053_v4  ;;  %v17066_v33 = vld [vmem:[#allocation97_spill] sm:$0xff] }
 0x363   : > { %v15409_v55 = vpop.f32.mrf.mxu1 }
 0x364   : > { %17030 = vst [vmem:[#allocation127_spill] sm:$0xff] %v15409_v55  ;;  %v3581_v4 = vadd.f32 %v15171_v0, %v3194_v30  ;;  %v17069_v30 = vld [vmem:[#allocation82_spill] sm:$0xff] }
 0x365   : > { %v15413_v43 = vpop.f32.mrf.mxu1 }
 0x366   : > { %17032 = vst [vmem:[#allocation129_spill] sm:$0xff] %v15413_v43  ;;  %v17042_v43 = vld [vmem:[#allocation100_spill] sm:$0xff] }
 0x367   : > { %v15415_v10 = vpop.f32.mrf.mxu1 }
 0x368   : > { %17033 = vst [vmem:[#allocation130_spill] sm:$0xff] %v15415_v10  ;;  %v2113_v10 = vadd.f32 %v17043_v27, %v17042_v43  ;;  %v2173_v43 = vadd.f32 %v14964_v36, %v14956_v18  ;;  %v17055_v27 = vld [vmem:[#allocation67_spill] sm:$0xff]  ;;  %v2789_v18 = vadd.f32 %v15086_v25, %v2123_v29  ;;  %v3198_v36 = vadd.f32 %v15034_v6, %v15029_v32 }
 0x369   : > { %v15419_v17 = vpop.f32.mrf.mxu1  ;;  %v2183_v35 = vadd.f32 %v17055_v27, %v17054_v61 }
 0x36a   : > { %17035 = vst [vmem:[#allocation132_spill] sm:$0xff] %v15419_v17  ;;  %v15436_v17 = vpop.f32.mrf.mxu0 }
 0x36b   : > { %v15421_v57 = vpop.f32.mrf.mxu1  ;;  %17046 = vst [vmem:[#allocation100_spill] sm:$0xff] %v15436_v17  ;;  %v2787_v17 = vadd.f32 %v15075_v31, %v2113_v10  ;;  %v2795_v10 = vadd.f32 %v15119_v47, %v2153_v63  ;;  %v2801_v6 = vadd.f32 %v15150_v54, %v2183_v35  ;;  %v17068_v35 = vld [vmem:[#allocation81_spill] sm:$0xff] }
 0x36c   : > { %17036 = vst [vmem:[#allocation133_spill] sm:$0xff] %v15421_v57 }
 0x36d   : > { %v15427_v38 = vpop.f32.mrf.mxu1  ;;  %v3206_v32 = vadd.f32 %v15081_v53, %v2787_v17 }
 0x36e   : > { %17040 = vst [vmem:[#allocation93_spill] sm:$0xff] %v15427_v38  ;;  %v2143_v38 = vadd.f32 %v14926_v50, %v17050_v62  ;;  %v3192_v50 = vadd.f32 %v14998_v19, %v14993_v58  ;;  %v15468_v62 = vpop.f32.mrf.mxu0  ;;  %v3200_v19 = vadd.f32 %v15046_v51, %v15041_v12  ;;  %v3208_v12 = vadd.f32 %v15092_v60, %v2789_v18  ;;  %v17070_v18 = vld [vmem:[#allocation83_spill] sm:$0xff] }
 0x36f   : > { %v15430_v55 = vpop.f32.mrf.mxu1 }
 0x370   : > { %17041 = vst [vmem:[#allocation134_spill] sm:$0xff] %v15430_v55  ;;  %v17052_v55 = vld [vmem:[#allocation63_spill] sm:$0xff]  ;;  %v2793_v31 = vadd.f32 %v15108_v14, %v2143_v38  ;;  %v3579_v51 = vadd.f32 %v15164_v48, %v3192_v50  ;;  %v17056_v14 = vld [vmem:[#allocation68_spill] sm:$0xff]  ;;  %v15493_v29 = vpop.f32.mrf.mxu0 }
 0x371   : > { %v15438_v57 = vpop.f32.mrf.mxu1  ;;  %v2163_v56 = vadd.f32 %v17053_v11, %v17052_v55  ;;  %v3196_v11 = vadd.f32 %v15022_v49, %v15017_v5  ;;  %v2799_v5 = vadd.f32 %v15142_v52, %v2173_v43  ;;  %v3204_v49 = vadd.f32 %v15070_v34, %v15065_v9  ;;  %v17058_v34 = vld [vmem:[#allocation72_spill] sm:$0xff]  ;;  %v17059_v52 = vld [vmem:[#allocation85_spill] sm:$0xff]  ;;  %v17061_v38 = vld [vmem:[#allocation75_spill] sm:$0xff] }
 0x372   : > { %17047 = vst [vmem:[#allocation103_spill] sm:$0xff] %v15438_v57  ;;  %v3190_v57 = vadd.f32 %v14986_v22, %v2771_v15  ;;  %v2791_v22 = vadd.f32 %v15097_v24, %v2133_v3  ;;  %v3214_v53 = vadd.f32 %v17058_v34, %v2795_v10  ;;  %v3585_v54 = vadd.f32 %v17059_v52, %v3198_v36  ;;  %v17063_v15 = vld [vmem:[#allocation94_spill] sm:$0xff]  ;;  %v17064_v55 = vld [vmem:[#allocation77_spill] sm:$0xff]  ;;  %v17067_v43 = vld [vmem:[#allocation99_spill] sm:$0xff] }
 0x373   : > { %v15454_v8 = vpop.f32.mrf.mxu1  ;;  %v2797_v26 = vadd.f32 %v15130_v16, %v2163_v56  ;;  %v3583_v37 = vadd.f32 %v15178_v7, %v3196_v11  ;;  %v17057_v16 = vld [vmem:[#allocation71_spill] sm:$0xff]  ;;  %v17060_v56 = vld [vmem:[#allocation73_spill] sm:$0xff]  ;;  %v3218_v48 = vadd.f32 %v17061_v38, %v2799_v5  ;;  %v3589_v7 = vadd.f32 %v17063_v15, %v3202_v23  ;;  %v17073_v23 = vld [vmem:[#allocation52_spill] sm:$0xff] }
 0x374   : > { %v3577_v25 = vadd.f32 %v15157_v44, %v3190_v57  ;;  %v3210_v47 = vadd.f32 %v17056_v14, %v2791_v22  ;;  %v3212_v9 = vadd.f32 %v17057_v16, %v2793_v31  ;;  %v17062_v57 = vld [vmem:[#allocation89_spill] sm:$0xff]  ;;  %v3220_v17 = vadd.f32 %v17064_v55, %v2801_v6  ;;  %v17071_v22 = vld [vmem:[#allocation66_spill] sm:$0xff]  ;;  %v17072_v10 = vld [vmem:[#allocation87_spill] sm:$0xff]  ;;  %v12092_v14 = vpop.f32.mrf.mxu0 }
 0x375   : > { %v15470_v58 = vpop.f32.mrf.mxu1  ;;  %v3216_v60 = vadd.f32 %v17060_v56, %v2797_v26  ;;  %v3587_v0 = vadd.f32 %v17062_v57, %v3200_v19  ;;  %v3591_v63 = vadd.f32 %v17066_v33, %v3204_v49  ;;  %v3593_v61 = vadd.f32 %v17067_v43, %v3206_v32  ;;  %v17074_v5 = vld [vmem:[#allocation102_spill] sm:$0xff]  ;;  %v17076_v16 = vld [vmem:[#allocation92_spill] sm:$0xff]  ;;  %v17082_v55 = vld [vmem:[#allocation101_spill] sm:$0xff] }
 0x376   : > { %v3996_v3 = vadd.f32 %v17065_v21, %v3577_v25  ;;  %v3998_v50 = vadd.f32 %v17068_v35, %v3579_v51  ;;  %v4000_v11 = vadd.f32 %v17069_v30, %v3581_v4  ;;  %v4002_v36 = vadd.f32 %v17070_v18, %v3583_v37  ;;  %v17075_v25 = vld [vmem:[#allocation76_spill] sm:$0xff]  ;;  %v17077_v51 = vld [vmem:[#allocation95_spill] sm:$0xff]  ;;  %v17078_v37 = vld [vmem:[#allocation105_spill] sm:$0xff]  ;;  %v4783_v35 = vpop.f32.mrf.mxu0 }
 0x377   : > { %v15483_v24 = vpop.f32.mrf.mxu1  ;;  %v3595_v31 = vadd.f32 %v17071_v22, %v3208_v12  ;;  %v4004_v19 = vadd.f32 %v17072_v10, %v3585_v54  ;;  %v3597_v26 = vadd.f32 %v17073_v23, %v3210_v47  ;;  %v3599_v6 = vadd.f32 %v17074_v5, %v3212_v9  ;;  %v17079_v12 = vld [vmem:[#allocation59_spill] sm:$0xff]  ;;  %v17080_v54 = vld [vmem:[#allocation48_spill] sm:$0xff]  ;;  %v17091_v10 = vld [vmem:[#allocation113_spill] sm:$0xff] }
 0x378   : > { %v3601_v49 = vadd.f32 %v17075_v25, %v3214_v53  ;;  %v4006_v34 = vadd.f32 %v17076_v16, %v3587_v0  ;;  %v4008_v52 = vadd.f32 %v17077_v51, %v3589_v7  ;;  %v3603_v4 = vadd.f32 %v15248_v20, %v3216_v60  ;;  %v17081_v47 = vld [vmem:[#allocation108_spill] sm:$0xff]  ;;  %v17084_v33 = vld [vmem:[#allocation51_spill] sm:$0xff]  ;;  %v17095_v16 = vld [vmem:[#allocation37_spill] sm:$0xff] }
 0x379   : > { %v15495_v44 = vpop.f32.mrf.mxu1  ;;  %v3605_v56 = vadd.f32 %v17078_v37, %v3218_v48  ;;  %v4010_v38 = vadd.f32 %v17079_v12, %v3591_v63  ;;  %v4012_v57 = vadd.f32 %v17080_v54, %v3593_v61  ;;  %v3607_v15 = vadd.f32 %v17081_v47, %v3220_v17  ;;  %v17083_v60 = vld [vmem:[#allocation64_spill] sm:$0xff]  ;;  %v17092_v23 = vld [vmem:[#allocation115_spill] sm:$0xff]  ;;  %v17096_v51 = vld [vmem:[#allocation34_spill] sm:$0xff] }
 0x37a   : > { %v4417_v9 = vadd.f32 %v15278_v28, %v3998_v50  ;;  %v4014_v21 = vadd.f32 %v17082_v55, %v3595_v31  ;;  %v4419_v0 = vadd.f32 %v15285_v13, %v4000_v11  ;;  %v4421_v7 = vadd.f32 %v15292_v40, %v4002_v36  ;;  %v17085_v43 = vld [vmem:[#allocation104_spill] sm:$0xff]  ;;  %v17086_v50 = vld [vmem:[#allocation74_spill] sm:$0xff]  ;;  %v17094_v25 = vld [vmem:[#allocation119_spill] sm:$0xff] }
 0x37b   : > { %v15505_v27 = vpop.f32.mrf.mxu1  ;;  %v4423_v20 = vadd.f32 %v15299_v41, %v4004_v19  ;;  %v4016_v48 = vadd.f32 %v17083_v60, %v3597_v26  ;;  %v4018_v63 = vadd.f32 %v17084_v33, %v3599_v6  ;;  %v4020_v61 = vadd.f32 %v17085_v43, %v3601_v49  ;;  %v17087_v18 = vld [vmem:[#allocation56_spill] sm:$0xff]  ;;  %v17089_v41 = vld [vmem:[#allocation86_spill] sm:$0xff]  ;;  %v17098_v37 = vld [vmem:[#allocation117_spill] sm:$0xff] }
 0x37c   : > { %v4425_v17 = vadd.f32 %v15304_v1, %v4006_v34  ;;  %v4022_v30 = vadd.f32 %v17086_v50, %v3603_v4  ;;  %v4024_v22 = vadd.f32 %v17087_v18, %v3605_v56  ;;  %v17088_v13 = vld [vmem:[#allocation36_spill] sm:$0xff]  ;;  %v4429_v40 = vadd.f32 %v15318_v59, %v4010_v38  ;;  %v17090_v36 = vld [vmem:[#allocation110_spill] sm:$0xff]  ;;  %v17099_v12 = vld [vmem:[#allocation35_spill] sm:$0xff] }
 0x37d   : > { %v15515_v32 = vpop.f32.mrf.mxu1  ;;  %v4427_v11 = vadd.f32 %v17088_v13, %v4008_v52  ;;  %v4027_v31 = vadd.f32 %v17090_v36, %v17089_v41  ;;  %v4026_v19 = vadd.f32 %v17091_v10, %v3607_v15  ;;  %v15545_v26 = vadd.f32 %v17092_v23, %v3996_v3  ;;  %v17093_v1 = vld [vmem:[#allocation116_spill] sm:$0xff]  ;;  %v17097_v52 = vld [vmem:[#allocation41_spill] sm:$0xff]  ;;  %v17100_v54 = vld [vmem:[#allocation39_spill] sm:$0xff]  ;;  %v12095_v15 = vpop.f32.mrf.mxu0 }
 0x37e   : > { %v15548_v5 = vadd.f32 %v17093_v1, %v4417_v9  ;;  %v15551_v49 = vadd.f32 %v17094_v25, %v4419_v0  ;;  %v15554_v34 = vadd.f32 %v17095_v16, %v4421_v7  ;;  %v15558_v59 = vadd.f32 %v15316_v2, %v17096_v51  ;;  %v17101_v55 = vld [vmem:[#allocation49_spill] sm:$0xff]  ;;  %v17102_v2 = vld [vmem:[#allocation62_spill] sm:$0xff]  ;;  %v17105_v50 = vld [vmem:[#allocation40_spill] sm:$0xff] }
 0x37f   : > { %v15525_v53 = vpop.f32.mrf.mxu1  ;;  %v15561_v4 = vadd.f32 %v17097_v52, %v4423_v20  ;;  %v4813_v3 = vadd.f32 %v15330_v45, %v17098_v37  ;;  %v4812_v56 = vadd.f32 %v15337_v42, %v4425_v17  ;;  %v4815_v38 = vadd.f32 %v15344_v39, %v17099_v12  ;;  %v17103_v60 = vld [vmem:[#allocation61_spill] sm:$0xff]  ;;  %v17104_v33 = vld [vmem:[#allocation70_spill] sm:$0xff]  ;;  %v17112_v23 = vld [vmem:[#allocation84_spill] sm:$0xff] }
 0x380   : > { %v4817_v47 = vadd.f32 %v15358_v46, %v17100_v54  ;;  %v4814_v0 = vadd.f32 %v17101_v55, %v4427_v11  ;;  %v4816_v7 = vadd.f32 %v17102_v2, %v4429_v40  ;;  %v4443_v20 = vadd.f32 %v17103_v60, %v4024_v22  ;;  %v17106_v42 = vld [vmem:[#allocation38_spill] sm:$0xff]  ;;  %v17107_v17 = vld [vmem:[#allocation69_spill] sm:$0xff]  ;;  %v17111_v40 = vld [vmem:[#allocation43_spill] sm:$0xff] }
 0x381   : > { %v15535_v28 = vpop.f32.mrf.mxu1  ;;  %v4446_v43 = vadd.f32 %v17104_v33, %v4027_v31  ;;  %v15575_v45 = vadd.f32 %v17105_v50, %v4012_v57  ;;  %v15579_v18 = vadd.f32 %v17107_v17, %v17106_v42  ;;  %v17108_v39 = vld [vmem:[#allocation46_spill] sm:$0xff]  ;;  %v17109_v46 = vld [vmem:[#allocation133_spill] sm:$0xff]  ;;  %v15588_v22 = vadd.f32 %v17112_v23, %v17111_v40  ;;  %v17114_v57 = vld [vmem:[#allocation80_spill] sm:$0xff] }
 0x382   : > { %v4437_v13 = vadd.f32 %v17108_v39, %v4018_v63  ;;  %v5236_v41 = vadd.f32 %v17109_v46, %v4817_v47  ;;  %v17110_v10 = vld [vmem:[#allocation42_spill] sm:$0xff]  ;;  %v17113_v31 = vld [vmem:[#allocation57_spill] sm:$0xff]  ;;  %v4445_v25 = vadd.f32 %v17114_v57, %v4026_v19  ;;  %v17115_v16 = vld [vmem:[#allocation44_spill] sm:$0xff]  ;;  %v4793_v47 = vpop.f32.mrf.mxu0  ;;  %v4830_v42 = vadd.f32 %v4783_v35, %v4443_v20 }
 0x383   : > { %v12139_v6 = vpop.f32.mrf.mxu1  ;;  %v15584_v11 = vadd.f32 %v17110_v10, %v4014_v21  ;;  %v4831_v1 = vadd.f32 %v12092_v14, %v17113_v31  ;;  %v15593_v51 = vadd.f32 %v17115_v16, %v4016_v48  ;;  %v17116_v52 = vld [vmem:[#allocation45_spill] sm:$0xff]  ;;  %v17117_v37 = vld [vmem:[#allocation55_spill] sm:$0xff]  ;;  %v17118_v12 = vld [vmem:[#allocation58_spill] sm:$0xff]  ;;  %v4833_v14 = vadd.f32 %v12095_v15, %v4446_v43 }
 0x384   : > { %v15597_v63 = vadd.f32 %v17117_v37, %v17116_v52  ;;  %v4441_v54 = vadd.f32 %v17118_v12, %v4022_v30  ;;  %v17119_v21 = vld [vmem:[#allocation93_spill] sm:$0xff]  ;;  %v17120_v60 = vld [vmem:[#allocation47_spill] sm:$0xff]  ;;  %v17121_v33 = vld [vmem:[#allocation128_spill] sm:$0xff]  ;;  %v4832_v16 = vadd.f32 %v4793_v47, %v4445_v25 }
 0x385   : > { %v5192_v9 = vpop.f32.mrf.mxu1  ;;  %v5235_v55 = vadd.f32 %v17119_v21, %v4816_v7  ;;  %v4825_v50 = vadd.f32 %v17121_v33, %v17120_v60  ;;  %v15603_v17 = vld [vmem:[#allocation9] ss:$0 sm:$0xff]  ;;  %v17122_v48 = vld [vmem:[#allocation131_spill] sm:$0xff]  ;;  %v17123_v46 = vld [vmem:[#allocation54_spill] sm:$0xff] }
 0x386   : > { %v4824_v39 = vadd.f32 %v17122_v48, %v4437_v13  ;;  %v4439_v10 = vadd.f32 %v17123_v46, %v4020_v61  ;;  %v17124_v40 = vld [vmem:[#allocation130_spill] sm:$0xff]  ;;  %v5275_v30 = vadd.f32 %v15603_v17, %v5236_v41  ;;  %v17125_v57 = vld [vmem:[#allocation53_spill] sm:$0xff]  ;;  %v17127_v15 = vld [vmem:[#allocation60_spill] sm:$0xff]  ;;  %v4828_v43 = vadd.f32 %v15493_v29, %v4441_v54 }
 0x387   : > { %v12142_v36 = vpop.f32.mrf.mxu1  ;;  %v5234_v23 = vadd.f32 %v17124_v40, %v4815_v38  ;;  %v4829_v7 = vadd.f32 %v15468_v62, %v17125_v57  ;;  %v17126_v35 = vld [vmem:[#allocation50_spill] sm:$0xff]  ;;  %v5274_v61 = vadd.f32 %v15603_v17, %v5235_v55  ;;  %v17129_v62 = vld [vmem:[#allocation100_spill] sm:$0xff]  ;;  %v17130_v47 = vld [vmem:[#allocation127_spill] sm:$0xff] }
 0x388   : > { %v5250_v19 = vadd.f32 %v12142_v36, %v4831_v1  ;;  %v4827_v20 = vadd.f32 %v17127_v15, %v17126_v35  ;;  %v17128_v36 = vld [vmem:[#allocation132_spill] sm:$0xff]  ;;  %v4826_v25 = vadd.f32 %v17129_v62, %v4439_v10  ;;  %v5307_v33 = vmul.f32 0.2, %v5275_v30  ;;  %v17131_v55 = vld [vmem:[#allocation129_spill] sm:$0xff] }
 0x389   : > { %v5202_v2 = vpop.f32.mrf.mxu1  ;;  %v5233_v13 = vadd.f32 %v17128_v36, %v4814_v0  ;;  %v5248_v38 = vadd.f32 %v12139_v6, %v4829_v7  ;;  %v5273_v60 = vadd.f32 %v15603_v17, %v5234_v23  ;;  %v5231_v6 = vadd.f32 %v17131_v55, %v4812_v56 }
 0x38a   : > { %v5249_v52 = vadd.f32 %v5202_v2, %v4830_v42  ;;  %v5289_v41 = vadd.f32 %v15603_v17, %v5250_v19  ;;  %v5232_v2 = vadd.f32 %v17130_v47, %v4813_v3  ;;  %v5247_v42 = vadd.f32 %v5192_v9, %v4828_v43  ;;  %v17132_v9 = vld [vmem:[#allocation124_spill] sm:$0xff] }
 0x38b   : > { %v12145_v31 = vpop.f32.mrf.mxu1  ;;  %v5306_v19 = vmul.f32 0.2, %v5274_v61  ;;  %v5246_v48 = vadd.f32 %v15525_v53, %v4827_v20  ;;  %v5287_v46 = vadd.f32 %v15603_v17, %v5248_v38  ;;  %v5230_v23 = vadd.f32 %v17132_v9, %v15558_v59 }
 0x38c   : > { %v5252_v37 = vadd.f32 %v12145_v31, %v4833_v14  ;;  %v5288_v29 = vadd.f32 %v15603_v17, %v5249_v52  ;;  %v5272_v14 = vadd.f32 %v15603_v17, %v5233_v13  ;;  %v5321_v10 = vmul.f32 0.2, %v5289_v41 }
 0x38d   : > { %v5212_v1 = vpop.f32.mrf.mxu1  ;;  %v5271_v31 = vadd.f32 %v15603_v17, %v5232_v2  ;;  %v5305_v57 = vmul.f32 0.2, %v5273_v60  ;;  %v15632_v7 = vmax.f32 %v5275_v30, %v5307_v33  ;;  %v5245_v56 = vadd.f32 %v15535_v28, %v4826_v25 }
 0x38e   : > { %v5291_v12 = vadd.f32 %v15603_v17, %v5252_v37  ;;  %v5251_v21 = vadd.f32 %v5212_v1, %v4832_v16  ;;  %v5286_v16 = vadd.f32 %v15603_v17, %v5247_v42  ;;  %v5320_v52 = vmul.f32 0.2, %v5288_v29  ;;  %v17133_v37 = vld [vmem:[#allocation126_spill] sm:$0xff] }
 0x38f   : > { %v5229_v35 = vadd.f32 %v17133_v37, %v15561_v4  ;;  %v5270_v59 = vadd.f32 %v15603_v17, %v5231_v6  ;;  %v5304_v15 = vmul.f32 0.2, %v5272_v14  ;;  %v15643_v20 = vmax.f32 %v5274_v61, %v5306_v19  ;;  %v17134_v4 = vld [vmem:[#allocation125_spill] sm:$0xff]  ;;  %v17137_v42 = vld [vmem:[#allocation118_spill] sm:$0xff] }
 0x390   : > { %v5323_v0 = vmul.f32 0.2, %v5291_v12  ;;  %v5290_v54 = vadd.f32 %v15603_v17, %v5251_v21  ;;  %v5244_v28 = vadd.f32 %v15505_v27, %v4825_v50  ;;  %v5285_v30 = vadd.f32 %v15603_v17, %v5246_v48 }
 0x391   : > { %v5319_v43 = vmul.f32 0.2, %v5287_v46  ;;  %v15649_v36 = vmax.f32 %v5289_v41, %v5321_v10  ;;  %v4822_v13 = vadd.f32 %v17134_v4, %v15593_v51  ;;  %v5269_v61 = vadd.f32 %v15603_v17, %v5230_v23  ;;  %v17135_v51 = vld [vmem:[#allocation123_spill] sm:$0xff] }
 0x392   : > { %v15627_v3 = vmax.f32 %v5291_v12, %v5323_v0  ;;  %v5322_v40 = vmul.f32 0.2, %v5290_v54  ;;  %v5303_v1 = vmul.f32 0.2, %v5271_v31  ;;  %v15656_v38 = vmax.f32 %v5273_v60, %v5305_v57 }
 0x393   : > { %v5243_v27 = vadd.f32 %v15515_v32, %v4824_v39  ;;  %v5284_v50 = vadd.f32 %v15603_v17, %v5245_v56  ;;  %v5318_v41 = vmul.f32 0.2, %v5286_v16  ;;  %v15662_v12 = vmax.f32 %v5288_v29, %v5320_v52 }
 0x394   : > { %v15636_v53 = vmax.f32 %v5290_v54, %v5322_v40  ;;  %11137 = vmatprep.subr.mxu0 %v15627_v3  ;;  %11193 = vmatprep.subr.mxu1 %v15627_v3  ;;  %v5227_v21 = vadd.f32 %v17135_v51, %v15554_v34  ;;  %v5268_v62 = vadd.f32 %v15603_v17, %v5229_v35  ;;  %v5302_v25 = vmul.f32 0.2, %v5270_v59  ;;  %v17136_v34 = vld [vmem:[#allocation122_spill] sm:$0xff] }
 0x395   : > { %11138 = vmatpush3.msra.mxu0 %v15632_v7  ;;  %11194 = vmatpush3.msra.mxu1 %v15632_v7  ;;  %v15669_v47 = vmax.f32 %v5272_v14, %v5304_v15  ;;  %v5242_v32 = vadd.f32 %v15483_v24, %v15597_v63  ;;  %v5283_v39 = vadd.f32 %v15603_v17, %v5244_v28  ;;  %v5317_v2 = vmul.f32 0.2, %v5285_v30 }
 0x396   : > { %11139 = vmatprep.subr.mxu0 %v15636_v53  ;;  %11195 = vmatprep.subr.mxu1 %v15636_v53  ;;  %v15676_v60 = vmax.f32 %v5287_v46, %v5319_v43  ;;  %v4820_v33 = vadd.f32 %v17136_v34, %v15584_v11  ;;  %v5267_v29 = vadd.f32 %v15603_v17, %v17137_v42  ;;  %v5301_v0 = vmul.f32 0.2, %v5269_v61  ;;  %v17138_v11 = vld [vmem:[#allocation88_spill] sm:$0xff] }
 0x397   : > { %11140 = vmatpush3.msra.mxu0 %v15643_v20  ;;  %11196 = vmatpush3.msra.mxu1 %v15643_v20  ;;  %v15684_v54 = vmax.f32 %v5271_v31, %v5303_v1  ;;  %v5241_v24 = vadd.f32 %v15495_v44, %v4822_v13  ;;  %v5282_v63 = vadd.f32 %v15603_v17, %v5243_v27  ;;  %v5316_v55 = vmul.f32 0.2, %v5284_v50  ;;  %v17140_v31 = vld [vmem:[#allocation96_spill] sm:$0xff]  ;;  %v17144_v1 = vld [vmem:[#allocation121_spill] sm:$0xff] }
 0x398   : > { %11141 = vmatprep.subr.mxu0 %v15649_v36  ;;  %11197 = vmatprep.subr.mxu1 %v15649_v36  ;;  %v15690_v6 = vmax.f32 %v5286_v16, %v5318_v41  ;;  %v5225_v14 = vadd.f32 %v17138_v11, %v15551_v49  ;;  %v5266_v19 = vadd.f32 %v15603_v17, %v5227_v21  ;;  %v5300_v48 = vmul.f32 0.2, %v5268_v62  ;;  %v17139_v49 = vld [vmem:[#allocation91_spill] sm:$0xff] }
 0x399   : > { %11142 = vmatpush3.msra.mxu0 %v15656_v38  ;;  %11198 = vmatpush3.msra.mxu1 %v15656_v38  ;;  %v15697_v46 = vmax.f32 %v5270_v59, %v5302_v25  ;;  %v5240_v44 = vadd.f32 %v15454_v8, %v15588_v22  ;;  %v5281_v10 = vadd.f32 %v15603_v17, %v5242_v32  ;;  %v5315_v40 = vmul.f32 0.2, %v5283_v39 }
 0x39a   : > { %11143 = vmatprep.subr.mxu0 %v15662_v12  ;;  %11199 = vmatprep.subr.mxu1 %v15662_v12  ;;  %v15704_v9 = vmax.f32 %v5285_v30, %v5317_v2  ;;  %v4818_v23 = vadd.f32 %v17139_v49, %v15575_v45  ;;  %v5265_v57 = vadd.f32 %v15603_v17, %v17140_v31  ;;  %v5299_v56 = vmul.f32 0.2, %v5267_v29  ;;  %v17141_v45 = vld [vmem:[#allocation98_spill] sm:$0xff] }
 0x39b   : > { %11144 = vmatpush3.msra.mxu0 %v15669_v47  ;;  %11200 = vmatpush3.msra.mxu1 %v15669_v47  ;;  %v15712_v16 = vmax.f32 %v5269_v61, %v5301_v0  ;;  %v5239_v8 = vadd.f32 %v15470_v58, %v4820_v33  ;;  %v5280_v22 = vadd.f32 %v15603_v17, %v5241_v24  ;;  %v5314_v52 = vmul.f32 0.2, %v5282_v63  ;;  %v17142_v58 = vld [vmem:[#allocation134_spill] sm:$0xff]  ;;  %v17147_v0 = vld [vmem:[#allocation79_spill] sm:$0xff] }
 0x39c   : > { %11145 = vmatprep.subr.mxu0 %v15676_v60  ;;  %11201 = vmatprep.subr.mxu1 %v15676_v60  ;;  %v15718_v37 = vmax.f32 %v5284_v50, %v5316_v55  ;;  %v5223_v35 = vadd.f32 %v17141_v45, %v15548_v5  ;;  %v5264_v59 = vadd.f32 %v15603_v17, %v5225_v14  ;;  %v5298_v15 = vmul.f32 0.2, %v5266_v19  ;;  %v17143_v5 = vld [vmem:[#allocation109_spill] sm:$0xff] }
 0x39d   : > { %11146 = vmatpush3.msra.mxu0 %v15684_v54  ;;  %11202 = vmatpush3.msra.mxu1 %v15684_v54  ;;  %v15725_v28 = vmax.f32 %v5268_v62, %v5300_v48  ;;  %v5238_v30 = vadd.f32 %v17142_v58, %v15579_v18  ;;  %v5279_v43 = vadd.f32 %v15603_v17, %v5240_v44  ;;  %v5313_v4 = vmul.f32 0.2, %v5281_v10  ;;  %v17145_v18 = vld [vmem:[#allocation103_spill] sm:$0xff]  ;;  %v5359_v58 = vld [vmem:[#allocation11 + $0x18] sm:$0xff] }
 0x39e   : > { %11147 = vmatprep.subr.mxu0 %v15690_v6  ;;  %11203 = vmatprep.subr.mxu1 %v15690_v6  ;;  %v15732_v13 = vmax.f32 %v5283_v39, %v5315_v40  ;;  %v4802_v61 = vadd.f32 %v17143_v5, %v15545_v26  ;;  %v5263_v27 = vadd.f32 %v15603_v17, %v17144_v1  ;;  %v5297_v50 = vmul.f32 0.2, %v5265_v57  ;;  %v17146_v26 = vld [vmem:[#allocation120_spill] sm:$0xff]  ;;  %v5482_v5 = vld [vmem:[#allocation11 + $0xa0] sm:$0xff] }
 0x39f   : > { %11148 = vmatpush3.msra.mxu0 %v15697_v46  ;;  %11204 = vmatpush3.msra.mxu1 %v15697_v46  ;;  %v15740_v41 = vmax.f32 %v5267_v29, %v5299_v56  ;;  %v5237_v51 = vadd.f32 %v17145_v18, %v4818_v23  ;;  %v5278_v21 = vadd.f32 %v15603_v17, %v5239_v8  ;;  %v5312_v62 = vmul.f32 0.2, %v5280_v22  ;;  %v5490_v1 = vld [vmem:[#allocation11 + $0xe0] sm:$0xff]  ;;  %v5492_v18 = vld [vmem:[#allocation11 + $0xf0] sm:$0xff] }
 0x3a0   : > { %11149 = vmatprep.subr.mxu0 %v15704_v9  ;;  %11205 = vmatprep.subr.mxu1 %v15704_v9  ;;  %v15746_v25 = vmax.f32 %v5282_v63, %v5314_v52  ;;  %v5221_v32 = vadd.f32 %v17146_v26, %v4802_v61  ;;  %v5262_v39 = vadd.f32 %v15603_v17, %v5223_v35  ;;  %v5296_v2 = vmul.f32 0.2, %v5264_v59  ;;  %v5368_v61 = vld [vmem:[#allocation11 + $0x60] sm:$0xff]  ;;  %v5603_v26 = vld [vmem:[#allocation11 + $0x118] sm:$0xff] }
 0x3a1   : > { %11150 = vmatpush3.msra.mxu0 %v15712_v16  ;;  %11206 = vmatpush3.msra.mxu1 %v15712_v16  ;;  %v15752_v34 = vmax.f32 %v5266_v19, %v5298_v15  ;;  %v5277_v33 = vadd.f32 %v15603_v17, %v5238_v30  ;;  %v5311_v42 = vmul.f32 0.2, %v5279_v43  ;;  %v15757_v29 = vmax.f32 %v5281_v10, %v5313_v4  ;;  %v5478_v15 = vld [vmem:[#allocation11 + $0x80] sm:$0xff]  ;;  %v5481_v30 = vld [vmem:[#allocation11 + $0x98] sm:$0xff]  ;;  %v5480_v4 = vld [vmem:[#allocation11 + $0x90] sm:$0xff] }
 0x3a2   : > { %11151 = vmatprep.subr.mxu0 %v15718_v37  ;;  %11207 = vmatprep.subr.mxu1 %v15718_v37  ;;  %v5261_v24 = vadd.f32 %v15603_v17, %v17147_v0  ;;  %v5295_v63 = vmul.f32 0.2, %v5263_v27  ;;  %v15763_v55 = vmax.f32 %v5265_v57, %v5297_v50  ;;  %v5276_v11 = vadd.f32 %v15603_v17, %v5237_v51  ;;  %v5493_v50 = vld [vmem:[#allocation11 + $0xf8] sm:$0xff]  ;;  %v5601_v51 = vld [vmem:[#allocation11 + $0x108] sm:$0xff] }
 0x3a3   : > { %11152 = vmatpush3.msra.mxu0 %v15725_v28  ;;  %11208 = vmatpush3.msra.mxu1 %v15725_v28  ;;  %v5310_v14 = vmul.f32 0.2, %v5278_v21  ;;  %v15768_v19 = vmax.f32 %v5280_v22, %v5312_v62  ;;  %v5260_v48 = vadd.f32 %v15603_v17, %v5221_v32  ;;  %v5294_v44 = vmul.f32 0.2, %v5262_v39  ;;  %v5600_v62 = vld [vmem:[#allocation11 + $0x100] sm:$0xff]  ;;  %v5725_v32 = vld [vmem:[#allocation11 + $0x198] sm:$0xff] }
 0x3a4   : > { %11153 = vmatprep.subr.mxu0 %v15732_v13  ;;  %11209 = vmatprep.subr.mxu1 %v15732_v13  ;;  %v15773_v10 = vmax.f32 %v5264_v59, %v5296_v2  ;;  %v5309_v40 = vmul.f32 0.2, %v5277_v33  ;;  %v15777_v49 = vmax.f32 %v5279_v43, %v5311_v42  ;;  %v5293_v23 = vmul.f32 0.2, %v5261_v24  ;;  %v5356_v59 = vld [vmem:[#allocation11] sm:$0xff]  ;;  %v5358_v43 = vld [vmem:[#allocation11 + $0x10] sm:$0xff] }
 0x3a5   : > { %11154 = vmatpush3.msra.mxu0 %v15740_v41  ;;  %11210 = vmatpush3.msra.mxu1 %v15740_v41  ;;  %v15781_v31 = vmax.f32 %v5263_v27, %v5295_v63  ;;  %v5308_v17 = vmul.f32 0.2, %v5276_v11  ;;  %v15785_v57 = vmax.f32 %v5278_v21, %v5310_v14  ;;  %v5292_v56 = vmul.f32 0.2, %v5260_v48  ;;  %v5371_v27 = vld [vmem:[#allocation11 + $0x78] sm:$0xff]  ;;  %v5723_v21 = vld [vmem:[#allocation11 + $0x188] sm:$0xff] }
 0x3a6   : > { %11155 = vmatprep.subr.mxu0 %v15746_v25  ;;  %11211 = vmatprep.subr.mxu1 %v15746_v25  ;;  %v15789_v8 = vmax.f32 %v5262_v39, %v5294_v44  ;;  %v15793_v22 = vmax.f32 %v5277_v33, %v5309_v40  ;;  %v15797_v52 = vmax.f32 %v5261_v24, %v5293_v23  ;;  %v5602_v39 = vld [vmem:[#allocation11 + $0x110] sm:$0xff]  ;;  %v5727_v33 = vld [vmem:[#allocation11 + $0x1a8] sm:$0xff]  ;;  %v5604_v42 = vld [vmem:[#allocation11 + $0x120] sm:$0xff] }
 0x3a7   : > { %11156 = vmatpush3.msra.mxu0 %v15752_v34  ;;  %11212 = vmatpush3.msra.mxu1 %v15752_v34  ;;  %v15801_v45 = vmax.f32 %v5276_v11, %v5308_v17  ;;  %v15805_v35 = vmax.f32 %v5260_v48, %v5292_v56  ;;  %v5724_v2 = vld [vmem:[#allocation11 + $0x190] sm:$0xff]  ;;  %v5607_v0 = vld [vmem:[#allocation11 + $0x138] sm:$0xff]  ;;  %v5609_v11 = vld [vmem:[#allocation11 + $0x148] sm:$0xff] }
 0x3a8   : > { %11157 = vmatprep.subr.mxu0 %v15757_v29  ;;  %11213 = vmatprep.subr.mxu1 %v15757_v29  ;;  %v5729_v24 = vld [vmem:[#allocation11 + $0x1b8] sm:$0xff]  ;;  %v5606_v63 = vld [vmem:[#allocation11 + $0x130] sm:$0xff]  ;;  %v5731_v14 = vld [vmem:[#allocation11 + $0x1c8] sm:$0xff] }
 0x3a9   : > { %11158 = vmatpush3.msra.mxu0 %v15763_v55  ;;  %11214 = vmatpush3.msra.mxu1 %v15763_v55  ;;  %v5730_v48 = vld [vmem:[#allocation11 + $0x1c0] sm:$0xff]  ;;  %v5611_v44 = vld [vmem:[#allocation11 + $0x158] sm:$0xff]  ;;  %v5610_v40 = vld [vmem:[#allocation11 + $0x150] sm:$0xff] }
 0x3aa   : > { %11159 = vmatprep.subr.mxu0 %v15768_v19  ;;  %11215 = vmatprep.subr.mxu1 %v15768_v19  ;;  %v5613_v23 = vld [vmem:[#allocation11 + $0x168] sm:$0xff]  ;;  %v5612_v17 = vld [vmem:[#allocation11 + $0x160] sm:$0xff]  ;;  %v5615_v56 = vld [vmem:[#allocation11 + $0x178] sm:$0xff] }
 0x3ab   : > { %11160 = vmatpush3.msra.mxu0 %v15773_v10  ;;  %11216 = vmatpush3.msra.mxu1 %v15773_v10 }
 0x3ac   : > { %11161 = vmatprep.subr.mxu0 %v15777_v49  ;;  %11217 = vmatprep.subr.mxu1 %v15777_v49 }
 0x3ad   : > { %11162 = vmatpush3.msra.mxu0 %v15781_v31  ;;  %11218 = vmatpush3.msra.mxu1 %v15781_v31 }
 0x3ae   : > { %11163 = vmatprep.subr.mxu0 %v15785_v57  ;;  %11219 = vmatprep.subr.mxu1 %v15785_v57 }
 0x3af   : > { %11164 = vmatpush3.msra.mxu0 %v15789_v8  ;;  %11220 = vmatpush3.msra.mxu1 %v15789_v8 }
 0x3b0   : > { %11165 = vmatprep.subr.mxu0 %v15793_v22  ;;  %11221 = vmatprep.subr.mxu1 %v15793_v22 }
 0x3b1   : > { %11166 = vmatpush3.msra.mxu0 %v15797_v52  ;;  %11222 = vmatpush3.msra.mxu1 %v15797_v52 }
 0x3b2   : > { %11167 = vmatprep.subr.mxu0 %v15801_v45  ;;  %11223 = vmatprep.subr.mxu1 %v15801_v45 }
 0x3b3   : > { %11168 = vmatpush3.msra.mxu0 %v15805_v35  ;;  %11224 = vmatpush3.msra.mxu1 %v15805_v35 }
 0x3b4   : > { %5437 = vmatmul.mubr.f32.vlgmr.msra.gmra.mxu0 %v5356_v59  ;;  %5559 = vmatmul.mubr.f32.vlgmr.msra.gmra.mxu1 %v5478_v15  ;;  %v10660_v15 = vld [vmem:[%s16565_s7 + $0x18] sm:$0xff] }
 0x3b5   : > { %11249 = vmatprep.subr.mxu0 %v15627_v3  ;;  %11305 = vmatprep.subr.mxu1 %v15627_v3  ;;  %v5361_v3 = vld [vmem:[#allocation11 + $0x28] sm:$0xff] }
 0x3b6   : > { %11250 = vmatpush3.msra.mxu0 %v15632_v7  ;;  %11306 = vmatpush3.msra.mxu1 %v15632_v7  ;;  %v5483_v7 = vld [vmem:[#allocation11 + $0xa8] sm:$0xff] }
 0x3b7   : > { %11251 = vmatprep.subr.mxu0 %v15636_v53  ;;  %11307 = vmatprep.subr.mxu1 %v15636_v53  ;;  %v5360_v53 = vld [vmem:[#allocation11 + $0x20] sm:$0xff] }
 0x3b8   : > { %5441 = vmatprep.mubr.f32.mxu0 %v5359_v58  ;;  %5563 = vmatprep.mubr.f32.mxu1 %v5481_v30  ;;  %v10659_v58 = vld [vmem:[%s16565_s7 + $0x10] sm:$0xff]  ;;  %v5954_v30 = vld [vmem:[%s16565_s7 + $0x8] sm:$0xff] }
 0x3b9   : > { %11252 = vmatpush3.msra.mxu0 %v15643_v20  ;;  %11308 = vmatpush3.msra.mxu1 %v15643_v20  ;;  %v5363_v20 = vld [vmem:[#allocation11 + $0x38] sm:$0xff] }
 0x3ba   : > { %5442 = vmatmul.mubr.f32.gmra.mxu0 %v5358_v43  ;;  %5564 = vmatmul.mubr.f32.gmra.mxu1 %v5480_v4  ;;  %v5955_v43 = vld [vmem:[#allocation3 + $0x8] sm:$0xff]  ;;  %v5953_v4 = vld [vmem:[%s16565_s7] sm:$0xff] }
 0x3bb   : > { %11253 = vmatprep.subr.mxu0 %v15649_v36  ;;  %11309 = vmatprep.subr.mxu1 %v15649_v36  ;;  %v5485_v36 = vld [vmem:[#allocation11 + $0xb8] sm:$0xff] }
 0x3bc   : > { %11254 = vmatpush3.msra.mxu0 %v15656_v38  ;;  %11310 = vmatpush3.msra.mxu1 %v15656_v38  ;;  %v5362_v38 = vld [vmem:[#allocation11 + $0x30] sm:$0xff] }
 0x3bd   : > { %11255 = vmatprep.subr.mxu0 %v15662_v12  ;;  %11311 = vmatprep.subr.mxu1 %v15662_v12  ;;  %v5484_v12 = vld [vmem:[#allocation11 + $0xb0] sm:$0xff] }
 0x3be   : > { %5446 = vmatprep.mubr.f32.mxu0 %v5361_v3  ;;  %5568 = vmatprep.mubr.f32.mxu1 %v5483_v7  ;;  %v15897_v3 = vld [vmem:[%s16565_s7 + $0x28] sm:$0xff]  ;;  %v15903_v7 = vld [vmem:[%s16565_s7 + $0x38] sm:$0xff] }
 0x3bf   : > { %11256 = vmatpush3.msra.mxu0 %v15669_v47  ;;  %11312 = vmatpush3.msra.mxu1 %v15669_v47  ;;  %v5365_v47 = vld [vmem:[#allocation11 + $0x48] sm:$0xff] }
 0x3c0   : > { %5447 = vmatmul.mubr.f32.gmra.mxu0 %v5360_v53  ;;  %5569 = vmatmul.mubr.f32.gmra.mxu1 %v5482_v5 }
 0x3c1   : > { %11257 = vmatprep.subr.mxu0 %v15676_v60  ;;  %11313 = vmatprep.subr.mxu1 %v15676_v60  ;;  %v5487_v60 = vld [vmem:[#allocation11 + $0xc8] sm:$0xff] }
 0x3c2   : > { %11258 = vmatpush3.msra.mxu0 %v15684_v54  ;;  %11314 = vmatpush3.msra.mxu1 %v15684_v54  ;;  %v5364_v54 = vld [vmem:[#allocation11 + $0x40] sm:$0xff] }
 0x3c3   : > { %11259 = vmatprep.subr.mxu0 %v15690_v6  ;;  %11315 = vmatprep.subr.mxu1 %v15690_v6  ;;  %v5486_v6 = vld [vmem:[#allocation11 + $0xc0] sm:$0xff] }
 0x3c4   : > { %5451 = vmatprep.mubr.f32.mxu0 %v5363_v20  ;;  %5573 = vmatprep.mubr.f32.mxu1 %v5485_v36 }
 0x3c5   : > { %11260 = vmatpush3.msra.mxu0 %v15697_v46  ;;  %11316 = vmatpush3.msra.mxu1 %v15697_v46  ;;  %v5367_v46 = vld [vmem:[#allocation11 + $0x58] sm:$0xff] }
 0x3c6   : > { %5452 = vmatmul.mubr.f32.gmra.mxu0 %v5362_v38  ;;  %5574 = vmatmul.mubr.f32.gmra.mxu1 %v5484_v12 }
 0x3c7   : > { %11261 = vmatprep.subr.mxu0 %v15704_v9  ;;  %11317 = vmatprep.subr.mxu1 %v15704_v9  ;;  %v5489_v9 = vld [vmem:[#allocation11 + $0xd8] sm:$0xff] }
 0x3c8   : > { %11262 = vmatpush3.msra.mxu0 %v15712_v16  ;;  %11318 = vmatpush3.msra.mxu1 %v15712_v16  ;;  %v5366_v16 = vld [vmem:[#allocation11 + $0x50] sm:$0xff] }
 0x3c9   : > { %11263 = vmatprep.subr.mxu0 %v15718_v37  ;;  %11319 = vmatprep.subr.mxu1 %v15718_v37  ;;  %v5488_v37 = vld [vmem:[#allocation11 + $0xd0] sm:$0xff] }
 0x3ca   : > { %5456 = vmatprep.mubr.f32.mxu0 %v5365_v47  ;;  %5578 = vmatprep.mubr.f32.mxu1 %v5487_v60 }
 0x3cb   : > { %11264 = vmatpush3.msra.mxu0 %v15725_v28  ;;  %11320 = vmatpush3.msra.mxu1 %v15725_v28  ;;  %v5369_v28 = vld [vmem:[#allocation11 + $0x68] sm:$0xff] }
 0x3cc   : > { %5457 = vmatmul.mubr.f32.gmra.mxu0 %v5364_v54  ;;  %5579 = vmatmul.mubr.f32.gmra.mxu1 %v5486_v6 }
 0x3cd   : > { %11265 = vmatprep.subr.mxu0 %v15732_v13  ;;  %11321 = vmatprep.subr.mxu1 %v15732_v13  ;;  %v5491_v13 = vld [vmem:[#allocation11 + $0xe8] sm:$0xff] }
 0x3ce   : > { %11266 = vmatpush3.msra.mxu0 %v15740_v41  ;;  %11322 = vmatpush3.msra.mxu1 %v15740_v41  ;;  %v5370_v41 = vld [vmem:[#allocation11 + $0x70] sm:$0xff] }
 0x3cf   : > { %11267 = vmatprep.subr.mxu0 %v15746_v25  ;;  %11323 = vmatprep.subr.mxu1 %v15746_v25  ;;  %v5722_v25 = vld [vmem:[#allocation11 + $0x180] sm:$0xff] }
 0x3d0   : > { %5461 = vmatprep.mubr.f32.mxu0 %v5367_v46  ;;  %5583 = vmatprep.mubr.f32.mxu1 %v5489_v9 }
 0x3d1   : > { %11268 = vmatpush3.msra.mxu0 %v15752_v34  ;;  %11324 = vmatpush3.msra.mxu1 %v15752_v34  ;;  %v5605_v34 = vld [vmem:[#allocation11 + $0x128] sm:$0xff] }
 0x3d2   : > { %5462 = vmatmul.mubr.f32.gmra.mxu0 %v5366_v16  ;;  %5584 = vmatmul.mubr.f32.gmra.mxu1 %v5488_v37 }
 0x3d3   : > { %11269 = vmatprep.subr.mxu0 %v15757_v29  ;;  %11325 = vmatprep.subr.mxu1 %v15757_v29  ;;  %v5726_v29 = vld [vmem:[#allocation11 + $0x1a0] sm:$0xff] }
 0x3d4   : > { %11270 = vmatpush3.msra.mxu0 %v15763_v55  ;;  %11326 = vmatpush3.msra.mxu1 %v15763_v55  ;;  %v5728_v55 = vld [vmem:[#allocation11 + $0x1b0] sm:$0xff] }
 0x3d5   : > { %11271 = vmatprep.subr.mxu0 %v15768_v19  ;;  %11327 = vmatprep.subr.mxu1 %v15768_v19  ;;  %v5608_v19 = vld [vmem:[#allocation11 + $0x140] sm:$0xff] }
 0x3d6   : > { %5466 = vmatprep.mubr.f32.mxu0 %v5369_v28  ;;  %5588 = vmatprep.mubr.f32.mxu1 %v5491_v13 }
 0x3d7   : > { %11272 = vmatpush3.msra.mxu0 %v15773_v10  ;;  %11328 = vmatpush3.msra.mxu1 %v15773_v10  ;;  %v5733_v10 = vld [vmem:[#allocation11 + $0x1d8] sm:$0xff] }
 0x3d8   : > { %5467 = vmatmul.mubr.f32.gmra.mxu0 %v5368_v61  ;;  %5589 = vmatmul.mubr.f32.gmra.mxu1 %v5490_v1 }
 0x3d9   : > { %11273 = vmatprep.subr.mxu0 %v15777_v49  ;;  %11329 = vmatprep.subr.mxu1 %v15777_v49  ;;  %v5732_v49 = vld [vmem:[#allocation11 + $0x1d0] sm:$0xff] }
 0x3da   : > { %11274 = vmatpush3.msra.mxu0 %v15781_v31  ;;  %11330 = vmatpush3.msra.mxu1 %v15781_v31  ;;  %v5735_v31 = vld [vmem:[#allocation11 + $0x1e8] sm:$0xff] }
 0x3db   : > { %11275 = vmatprep.subr.mxu0 %v15785_v57  ;;  %11331 = vmatprep.subr.mxu1 %v15785_v57  ;;  %v5734_v57 = vld [vmem:[#allocation11 + $0x1e0] sm:$0xff] }
 0x3dc   : > { %5471 = vmatprep.mubr.f32.mxu0 %v5371_v27  ;;  %5593 = vmatprep.mubr.f32.mxu1 %v5493_v50 }
 0x3dd   : > { %11276 = vmatpush3.msra.mxu0 %v15789_v8  ;;  %11332 = vmatpush3.msra.mxu1 %v15789_v8  ;;  %v5737_v8 = vld [vmem:[#allocation11 + $0x1f8] sm:$0xff] }
 0x3de   : > { %5472 = vmatmul.mubr.f32.gmra.mxu0 %v5370_v41  ;;  %5594 = vmatmul.mubr.f32.gmra.mxu1 %v5492_v18 }
 0x3df   : > { %11277 = vmatprep.subr.mxu0 %v15793_v22  ;;  %11333 = vmatprep.subr.mxu1 %v15793_v22  ;;  %v5889_v22 = vld [vmem:[#allocation3 + $0x7] sm:$0xff] }
 0x3e0   : > { %11278 = vmatpush3.msra.mxu0 %v15797_v52  ;;  %11334 = vmatpush3.msra.mxu1 %v15797_v52  ;;  %v15877_v52 = vpop.permute.xlu0 %5907 }
 0x3e1   : > { %11279 = vmatprep.subr.mxu0 %v15801_v45  ;;  %11335 = vmatprep.subr.mxu1 %v15801_v45  ;;  %v5614_v45 = vld [vmem:[#allocation11 + $0x170] sm:$0xff]  ;;  %v5945_v59 = vmul.f32 %v15877_v52, %v5889_v22 }
 0x3e2   : > { %11280 = vmatpush3.msra.mxu0 %v15805_v35  ;;  %5680 = vmatprep.mubr.f32.mxu0 %v5601_v51 }
 0x3e3   : > { %11336 = vmatpush3.msra.mxu1 %v15805_v35  ;;  %5802 = vmatprep.mubr.f32.mxu1 %v5723_v21  ;;  %v5736_v35 = vld [vmem:[#allocation11 + $0x1f0] sm:$0xff] }
 0x3e4   : > { %5681 = vmatmul.mubr.f32.vlgmr.msra.gmra.mxu0 %v5600_v62  ;;  %5803 = vmatmul.mubr.f32.vlgmr.msra.gmra.mxu1 %v5722_v25 }
 0x3e5   : > { %5685 = vmatprep.mubr.f32.mxu0 %v5603_v26  ;;  %5807 = vmatprep.mubr.f32.mxu1 %v5725_v32 }
 0x3e6   : > { %12146 = vmatprep.subr.mxu0 %v10660_v15  ;;  %12162 = vmatprep.subr.mxu1 %v5954_v30 }
 0x3e7   : > { %12147 = vmatpush3.msra.mxu0 %v10660_v15  ;;  %12163 = vmatpush3.msra.mxu1 %v5954_v30 }
 0x3e8   : > { %5686 = vmatmul.mubr.f32.gmra.mxu0 %v5602_v39  ;;  %5808 = vmatmul.mubr.f32.gmra.mxu1 %v5724_v2 }
 0x3e9   : > { %5690 = vmatprep.mubr.f32.mxu0 %v5605_v34  ;;  %5812 = vmatprep.mubr.f32.mxu1 %v5727_v33 }
 0x3ea   : > { %12148 = vmatprep.subr.mxu0 %v10659_v58  ;;  %12164 = vmatprep.subr.mxu1 %v5953_v4 }
 0x3eb   : > { %12149 = vmatpush3.msra.mxu0 %v10659_v58  ;;  %12165 = vmatpush3.msra.mxu1 %v5953_v4 }
 0x3ec   : > { %5691 = vmatmul.mubr.f32.gmra.mxu0 %v5604_v42  ;;  %5813 = vmatmul.mubr.f32.gmra.mxu1 %v5726_v29 }
 0x3ed   : > { %5695 = vmatprep.mubr.f32.mxu0 %v5607_v0  ;;  %5817 = vmatprep.mubr.f32.mxu1 %v5729_v24 }
 0x3ee   : > { %12178 = vmatprep.subr.mxu0 %v15897_v3  ;;  %12194 = vmatprep.subr.mxu1 %v15903_v7 }
 0x3f0   : > { %5696 = vmatmul.mubr.f32.gmra.mxu0 %v5606_v63  ;;  %5818 = vmatmul.mubr.f32.gmra.mxu1 %v5728_v55 }
 0x3f1   : > { %5700 = vmatprep.mubr.f32.mxu0 %v5609_v11  ;;  %5822 = vmatprep.mubr.f32.mxu1 %v5731_v14  ;;  %v15934_v11 = vpop.permute.xlu1 %5912 }
 0x3f4   : > { %5701 = vmatmul.mubr.f32.gmra.mxu0 %v5608_v19  ;;  %5823 = vmatmul.mubr.f32.gmra.mxu1 %v5730_v48 }
 0x3f5   : > { %5705 = vmatprep.mubr.f32.mxu0 %v5611_v44  ;;  %5827 = vmatprep.mubr.f32.mxu1 %v5733_v10  ;;  %v15936_v10 = vpop.permute.xlu0 %6243 }
 0x3f8   : > { %5706 = vmatmul.mubr.f32.gmra.mxu0 %v5610_v40  ;;  %5828 = vmatmul.mubr.f32.gmra.mxu1 %v5732_v49 }
 0x3f9   : > { %5710 = vmatprep.mubr.f32.mxu0 %v5613_v23  ;;  %5832 = vmatprep.mubr.f32.mxu1 %v5735_v31 }
 0x3fc   : > { %5711 = vmatmul.mubr.f32.gmra.mxu0 %v5612_v17  ;;  %5833 = vmatmul.mubr.f32.gmra.mxu1 %v5734_v57 }
 0x3fd   : > { %5715 = vmatprep.mubr.f32.mxu0 %v5615_v56  ;;  %5837 = vmatprep.mubr.f32.mxu1 %v5737_v8 }
 0x400   : > { %5716 = vmatmul.mubr.f32.gmra.mxu0 %v5614_v45  ;;  %5838 = vmatmul.mubr.f32.gmra.mxu1 %v5736_v35 }
 0x401   : > { %12166 = vmatprep.mubr.msk.f32.mxu1 %vm5867_vm4, %v5945_v59  ;;  %12150 = vmatprep.mubr.msk.f32.mxu0 %vm5867_vm4, %v5955_v43  ;;  %v15938_v59 = vpop.permute.xlu1 %6248 }
 0x474   : > { %v11169_v53 = vpop.f32.mrf.mxu0  ;;  %v11225_v5 = vpop.f32.mrf.mxu1 }
 0x476   : > { %v11170_v20 = vpop.f32.mrf.mxu0  ;;  %v11226_v36 = vpop.f32.mrf.mxu1 }
 0x477   : > { %v11171_v0 = vadd.f32 %v11170_v20, %v11169_v53  ;;  %v11227_v24 = vadd.f32 %v11226_v36, %v11225_v5  ;;  %v15941_v5 = vpop.permute.xlu0 %5917 }
 0x479   : > { %v5843_v40 = vmax.f32 %v11171_v0, %v11227_v24 }
 0x47a   : > { %v11172_v38 = vpop.f32.mrf.mxu0  ;;  %v11228_v12 = vpop.f32.mrf.mxu1 }
 0x47c   : > { %v11173_v47 = vpop.f32.mrf.mxu0  ;;  %v11229_v60 = vpop.f32.mrf.mxu1 }
 0x47d   : > { %v11174_v49 = vadd.f32 %v11173_v47, %v11172_v38  ;;  %v11230_v23 = vadd.f32 %v11229_v60, %v11228_v12 }
 0x47f   : > { %v5844_v15 = vmax.f32 %v11174_v49, %v11230_v23 }
 0x480   : > { %v11175_v54 = vpop.f32.mrf.mxu0  ;;  %v11231_v6 = vpop.f32.mrf.mxu1 }
 0x482   : > { %v11176_v46 = vpop.f32.mrf.mxu0  ;;  %v11232_v9 = vpop.f32.mrf.mxu1 }
 0x483   : > { %v11177_v58 = vadd.f32 %v11176_v46, %v11175_v54  ;;  %v11233_v30 = vadd.f32 %v11232_v9, %v11231_v6  ;;  %v15944_v46 = vpop.permute.xlu1 %5922 }
 0x485   : > { %v5845_v60 = vmax.f32 %v11177_v58, %v11233_v30 }
 0x486   : > { %v11178_v16 = vpop.f32.mrf.mxu0  ;;  %v11234_v37 = vpop.f32.mrf.mxu1 }
 0x488   : > { %v11179_v28 = vpop.f32.mrf.mxu0  ;;  %v11235_v13 = vpop.f32.mrf.mxu1 }
 0x48c   : > { %v15906_v61 = vpop.f32.mrf.mxu0  ;;  %v15908_v1 = vpop.f32.mrf.mxu1 }
 0x48e   : > { %v11182_v27 = vpop.f32.mrf.mxu0  ;;  %v11238_v50 = vpop.f32.mrf.mxu1 }
 0x492   : > { %v15910_v41 = vpop.f32.mrf.mxu0  ;;  %v15912_v18 = vpop.f32.mrf.mxu1 }
 0x494   : > { %v15914_v51 = vpop.f32.mrf.mxu0  ;;  %v15916_v21 = vpop.f32.mrf.mxu1 }
 0x495   : > { %v11242_v58 = vadd.f32 %v15916_v21, %v15912_v18 }
 0x498   : > { %v15918_v62 = vpop.f32.mrf.mxu0  ;;  %v15920_v25 = vpop.f32.mrf.mxu1 }
 0x49a   : > { %v15922_v26 = vpop.f32.mrf.mxu0  ;;  %v15924_v32 = vpop.f32.mrf.mxu1 }
 0x49b   : > { %v11189_v21 = vadd.f32 %v15922_v26, %v15918_v62 }
 0x49e   : > { %v15926_v39 = vpop.f32.mrf.mxu0  ;;  %v15928_v2 = vpop.f32.mrf.mxu1 }
 0x4a0   : > { %v15930_v34 = vpop.f32.mrf.mxu0  ;;  %v15932_v33 = vpop.f32.mrf.mxu1 }
 0x4a4   : > { %v11281_v42 = vpop.f32.mrf.mxu0  ;;  %v11337_v29 = vpop.f32.mrf.mxu1 }
 0x4a6   : > { %v11282_v63 = vpop.f32.mrf.mxu0  ;;  %v11338_v55 = vpop.f32.mrf.mxu1 }
 0x4a7   : > { %v11283_v14 = vadd.f32 %v11282_v63, %v11281_v42  ;;  %v11339_v19 = vadd.f32 %v11338_v55, %v11337_v29  ;;  %v11180_v42 = vadd.f32 %v11179_v28, %v11178_v16  ;;  %v11236_v29 = vadd.f32 %v11235_v13, %v11234_v37  ;;  %v10677_v37 = vld [vmem:[%s16565_s7 + $0x20] sm:$0xff]  ;;  %v15955_v28 = vpop.permute.xlu0 %6253 }
 0x4a8   : > { %v11284_v48 = vpop.f32.mrf.mxu0  ;;  %v11340_v44 = vpop.f32.mrf.mxu1  ;;  %v11183_v55 = vadd.f32 %v11182_v27, %v15906_v61 }
 0x4a9   : > { %v5851_v31 = vmax.f32 %v11283_v14, %v11339_v19  ;;  %v11239_v14 = vadd.f32 %v11238_v50, %v15908_v1  ;;  %v5846_v13 = vmax.f32 %v11180_v42, %v11236_v29  ;;  %v10687_v50 = vld [vmem:[%s16565_s7 + $0x30] sm:$0xff] }
 0x4aa   : > { %v11285_v17 = vpop.f32.mrf.mxu0  ;;  %v11341_v57 = vpop.f32.mrf.mxu1 }
 0x4ab   : > { %v5859_v56 = vmax.f32 %v5843_v40, %v5851_v31  ;;  %v11286_v8 = vadd.f32 %v11285_v17, %v11284_v48  ;;  %v11342_v22 = vadd.f32 %v11341_v57, %v11340_v44  ;;  %v15970_v17 = vld [vmem:[%s16565_s7 + $0x48] sm:$0xff]  ;;  %v5847_v57 = vmax.f32 %v11183_v55, %v11239_v14 }
 0x4ac   : > { %v11287_v45 = vpop.f32.mrf.mxu0  ;;  %v11343_v35 = vpop.f32.mrf.mxu1 }
 0x4ad   : > { %5881 = vst.msk [vmem:[#allocation3 + $0x10] sm:$0xff] %vm5867_vm4, %v5859_v56  ;;  %v5852_v43 = vmax.f32 %v11286_v8, %v11342_v22  ;;  %v11186_v56 = vadd.f32 %v15914_v51, %v15910_v41 }
 0x4ae   : > { %v11288_v4 = vpop.f32.mrf.mxu0  ;;  %v11344_v53 = vpop.f32.mrf.mxu1 }
 0x4af   : > { %v5860_v20 = vmax.f32 %v5844_v15, %v5852_v43  ;;  %v11289_v36 = vadd.f32 %v11288_v4, %v11287_v45  ;;  %v11345_v38 = vadd.f32 %v11344_v53, %v11343_v35  ;;  %v15982_v35 = vld [vmem:[%s16565_s7 + $0x58] sm:$0xff]  ;;  %v15984_v15 = vpop.permute.xlu1 %6258  ;;  %v15994_v43 = vpop.permute.xlu0 %5927 }
 0x4b0   : > { %v11290_v12 = vpop.f32.mrf.mxu0  ;;  %v11346_v47 = vpop.f32.mrf.mxu1 }
 0x4b1   : > { %5882 = vst.msk [vmem:[#allocation3 + $0x18] sm:$0xff] %vm5867_vm4, %v5860_v20  ;;  %v5853_v0 = vmax.f32 %v11289_v36, %v11345_v38  ;;  %v11245_v20 = vadd.f32 %v15924_v32, %v15920_v25 }
 0x4b2   : > { %v11291_v54 = vpop.f32.mrf.mxu0  ;;  %v11347_v6 = vpop.f32.mrf.mxu1 }
 0x4b3   : > { %v5861_v9 = vmax.f32 %v5845_v60, %v5853_v0  ;;  %v11292_v24 = vadd.f32 %v11291_v54, %v11290_v12  ;;  %v11348_v63 = vadd.f32 %v11347_v6, %v11346_v47  ;;  %v5848_v60 = vmax.f32 %v11186_v56, %v11242_v58  ;;  %v16011_v0 = vpop.permute.xlu1 %5932  ;;  %v16018_v14 = vpop.permute.xlu0 %6263 }
 0x4b4   : > { %v11293_v19 = vpop.f32.mrf.mxu0  ;;  %v11349_v48 = vpop.f32.mrf.mxu1  ;;  %v15948_v44 = vld [vmem:[#allocation3 + $0x10] sm:$0xff]  ;;  %v5849_v6 = vmax.f32 %v11189_v21, %v11245_v20 }
 0x4b5   : > { %v15950_v16 = vld [vmem:[#allocation3 + $0xf] sm:$0xff]  ;;  %5883 = vst.msk [vmem:[#allocation3 + $0x20] sm:$0xff] %vm5867_vm4, %v5861_v9  ;;  %v5854_v40 = vmax.f32 %v11292_v24, %v11348_v63  ;;  %12151 = vmatmul.mubr.msk.f32.vlgmr.msra.gmra.mxu0 %vm5867_vm4, %v15948_v44 }
 0x4b6   : > { %v5946_v61 = vmul.f32 %v15934_v11, %v15950_v16  ;;  %v11294_v1 = vpop.f32.mrf.mxu0  ;;  %v11350_v27 = vpop.f32.mrf.mxu1  ;;  %12179 = vmatpush3.msra.mxu0 %v15897_v3  ;;  %v6224_v58 = vld [vmem:[#allocation3 + $0x9] sm:$0xff]  ;;  %v6437_v21 = vmul.f32 %v15877_v52, %v15950_v16 }
 0x4b7   : > { %v5862_v49 = vmax.f32 %v5846_v13, %v5854_v40  ;;  %v11295_v23 = vadd.f32 %v11294_v1, %v11293_v19  ;;  %v11351_v31 = vadd.f32 %v11350_v27, %v11349_v48  ;;  %12180 = vmatprep.subr.mxu0 %v10677_v37  ;;  %v11192_v19 = vadd.f32 %v15930_v34, %v15926_v39 }
 0x4b8   : > { %12167 = vmatmul.mubr.msk.f32.vlgmr.msra.gmra.mxu1 %vm5867_vm4, %v5946_v61  ;;  %v11296_v3 = vpop.f32.mrf.mxu0  ;;  %v11352_v8 = vpop.f32.mrf.mxu1  ;;  %v15974_v22 = vld [vmem:[#allocation3 + $0x18] sm:$0xff]  ;;  %12181 = vmatpush3.msra.mxu0 %v10677_v37  ;;  %v11248_v48 = vadd.f32 %v15932_v33, %v15928_v2 }
 0x4b9   : > { %v15976_v45 = vld [vmem:[#allocation3 + $0x17] sm:$0xff]  ;;  %12195 = vmatpush3.msra.mxu1 %v15903_v7  ;;  %5884 = vst.msk [vmem:[#allocation3 + $0x28] sm:$0xff] %vm5867_vm4, %v5862_v49  ;;  %v5855_v41 = vmax.f32 %v11295_v23, %v11351_v31  ;;  %12153 = vmatprep.mubr.msk.f32.mxu0 %vm5867_vm4, %v15974_v22  ;;  %v16039_v23 = vpop.permute.xlu1 %6268 }
 0x4ba   : > { %v5947_v51 = vmul.f32 %v15941_v5, %v15976_v45  ;;  %12196 = vmatprep.subr.mxu1 %v10687_v50  ;;  %v11297_v7 = vpop.f32.mrf.mxu0  ;;  %v11353_v30 = vpop.f32.mrf.mxu1  ;;  %12210 = vmatprep.subr.mxu0 %v15970_v17  ;;  %v5850_v2 = vmax.f32 %v11192_v19, %v11248_v48  ;;  %v6438_v16 = vmul.f32 %v15934_v11, %v15976_v45 }
 0x4bb   : > { %12197 = vmatpush3.msra.mxu1 %v10687_v50  ;;  %v5863_v4 = vmax.f32 %v5847_v57, %v5855_v41  ;;  %v11298_v53 = vadd.f32 %v11297_v7, %v11296_v3  ;;  %v11354_v18 = vadd.f32 %v11353_v30, %v11352_v8  ;;  %v16042_v57 = vpop.permute.xlu0 %5937  ;;  %v6281_v7 = vmul.f32 %v15936_v10, %v6224_v58 }
 0x4bc   : > { %12169 = vmatprep.mubr.msk.f32.mxu1 %vm5867_vm4, %v5947_v51  ;;  %12226 = vmatprep.subr.mxu1 %v15982_v35  ;;  %v11299_v36 = vpop.f32.mrf.mxu0  ;;  %v11355_v38 = vpop.f32.mrf.mxu1  ;;  %v16002_v12 = vld [vmem:[#allocation3 + $0x20] sm:$0xff] }
 0x4bd   : > { %v16004_v47 = vld [vmem:[#allocation3 + $0x1f] sm:$0xff]  ;;  %5885 = vst.msk [vmem:[#allocation3 + $0x30] sm:$0xff] %vm5867_vm4, %v5863_v4  ;;  %v5856_v42 = vmax.f32 %v11298_v53, %v11354_v18  ;;  %12154 = vmatmul.mubr.msk.f32.gmra.mxu0 %vm5867_vm4, %v16002_v12  ;;  %v16054_v41 = vpop.permute.xlu1 %5942  ;;  %v6225_v4 = vld [vmem:[#allocation3 + $0x11] sm:$0xff] }
 0x4be   : > { %v5948_v29 = vmul.f32 %v15944_v46, %v16004_v47  ;;  %v11300_v62 = vpop.f32.mrf.mxu0  ;;  %v11356_v26 = vpop.f32.mrf.mxu1  ;;  %v16065_v18 = vld [vmem:[#allocation3 + $0x19] sm:$0xff]  ;;  %v6282_v20 = vmul.f32 %v15938_v59, %v6225_v4 }
 0x4bf   : > { %v5864_v25 = vmax.f32 %v5848_v60, %v5856_v42  ;;  %v11301_v32 = vadd.f32 %v11300_v62, %v11299_v36  ;;  %v11357_v54 = vadd.f32 %v11356_v26, %v11355_v38  ;;  %v6283_v36 = vmul.f32 %v15955_v28, %v16065_v18  ;;  %v10697_v60 = vld [vmem:[%s16565_s7 + $0x40] sm:$0xff]  ;;  %v10707_v26 = vld [vmem:[%s16565_s7 + $0x50] sm:$0xff]  ;;  %v16115_v19 = vpop.permute.xlu0 %6273 }
 0x4c0   : > { %12170 = vmatmul.mubr.msk.f32.gmra.mxu1 %vm5867_vm4, %v5948_v29  ;;  %v11302_v9 = vpop.f32.mrf.mxu0  ;;  %v11358_v24 = vpop.f32.mrf.mxu1  ;;  %v16014_v63 = vld [vmem:[#allocation3 + $0x28] sm:$0xff]  ;;  %v6439_v29 = vmul.f32 %v15941_v5, %v16004_v47 }
 0x4c1   : > { %v16016_v55 = vld [vmem:[#allocation3 + $0x27] sm:$0xff]  ;;  %5886 = vst.msk [vmem:[#allocation3 + $0x38] sm:$0xff] %vm5867_vm4, %v5864_v25  ;;  %v5857_v37 = vmax.f32 %v11301_v32, %v11357_v54  ;;  %12156 = vmatprep.mubr.msk.f32.mxu0 %vm5867_vm4, %v16014_v63 }
 0x4c2   : > { %v5949_v13 = vmul.f32 %v15994_v43, %v16016_v55  ;;  %v11303_v40 = vpop.f32.mrf.mxu0  ;;  %v11359_v61 = vpop.f32.mrf.mxu1  ;;  %v16075_v38 = vld [vmem:[#allocation3 + $0x21] sm:$0xff]  ;;  %v6440_v54 = vmul.f32 %v15944_v46, %v16016_v55 }
 0x4c3   : > { %v5865_v1 = vmax.f32 %v5849_v6, %v5857_v37  ;;  %v11304_v27 = vadd.f32 %v11303_v40, %v11302_v9  ;;  %v11360_v50 = vadd.f32 %v11359_v61, %v11358_v24  ;;  %v6284_v62 = vmul.f32 %v15984_v15, %v16075_v38  ;;  %v10728_v24 = vld [vmem:[%s16565_s7 + $0x78] sm:$0xff]  ;;  %v16128_v40 = vpop.permute.xlu1 %6278 }
 0x4c4   : > { %12172 = vmatprep.mubr.msk.f32.mxu1 %vm5867_vm4, %v5949_v13  ;;  %v16030_v39 = vld [vmem:[#allocation3 + $0x30] sm:$0xff] }
 0x4c5   : > { %v16032_v34 = vld [vmem:[#allocation3 + $0x2f] sm:$0xff]  ;;  %5887 = vst.msk [vmem:[#allocation3 + $0x40] sm:$0xff] %vm5867_vm4, %v5865_v1  ;;  %v5858_v33 = vmax.f32 %v11304_v27, %v11360_v50  ;;  %12157 = vmatmul.mubr.msk.f32.gmra.mxu0 %vm5867_vm4, %v16030_v39 }
 0x4c6   : > { %v5950_v49 = vmul.f32 %v16011_v0, %v16032_v34  ;;  %v16083_v42 = vld [vmem:[#allocation3 + $0x29] sm:$0xff]  ;;  %v6441_v9 = vmul.f32 %v15994_v43, %v16032_v34 }
 0x4c7   : > { %v5866_v31 = vmax.f32 %v5850_v2, %v5858_v33  ;;  %v6285_v25 = vmul.f32 %v16018_v14, %v16083_v42  ;;  %v6741_v2 = vmul.f32 %v15936_v10, %v6225_v4  ;;  %v10717_v33 = vld [vmem:[%s16565_s7 + $0x60] sm:$0xff]  ;;  %v6744_v58 = vmul.f32 %v15984_v15, %v16083_v42 }
 0x4c8   : > { %12173 = vmatmul.mubr.msk.f32.gmra.mxu1 %vm5867_vm4, %v5950_v49  ;;  %v16044_v56 = vld [vmem:[#allocation3 + $0x38] sm:$0xff]  ;;  %v6742_v49 = vmul.f32 %v15938_v59, %v16065_v18 }
 0x4c9   : > { %v16046_v3 = vld [vmem:[#allocation3 + $0x37] sm:$0xff]  ;;  %5888 = vst.msk [vmem:[#allocation3 + $0x48] sm:$0xff] %vm5867_vm4, %v5866_v31  ;;  %12159 = vmatprep.mubr.msk.f32.mxu0 %vm5867_vm4, %v16044_v56  ;;  %v10727_v31 = vld [vmem:[%s16565_s7 + $0x70] sm:$0xff] }
 0x4ca   : > { %v5951_v8 = vmul.f32 %v16042_v57, %v16046_v3  ;;  %v16098_v32 = vld [vmem:[#allocation3 + $0x31] sm:$0xff]  ;;  %v6442_v13 = vmul.f32 %v16011_v0, %v16046_v3 }
 0x4cb   : > { %v6286_v48 = vmul.f32 %v16039_v23, %v16098_v32 }
 0x4cc   : > { %12175 = vmatprep.mubr.msk.f32.mxu1 %vm5867_vm4, %v5951_v8  ;;  %v16056_v51 = vld [vmem:[#allocation3 + $0x40] sm:$0xff]  ;;  %v10738_v8 = vld [vmem:[%s16565_s7 + $0x88] sm:$0xff] }
 0x4cd   : > { %v16059_v30 = vld [vmem:[#allocation3 + $0x3f] sm:$0xff]  ;;  %12160 = vmatmul.mubr.msk.f32.gmra.mxu0 %vm5867_vm4, %v16056_v51 }
 0x4ce   : > { %v5952_v53 = vmul.f32 %v16054_v41, %v16059_v30  ;;  %12182 = vmatprep.mubr.msk.f32.mxu0 %vm5867_vm4, %v6281_v7  ;;  %v16106_v6 = vld [vmem:[#allocation3 + $0x39] sm:$0xff]  ;;  %v6443_v61 = vmul.f32 %v16042_v57, %v16059_v30  ;;  %v6745_v7 = vmul.f32 %v16018_v14, %v16098_v32 }
 0x4cf   : > { %v6746_v4 = vmul.f32 %v16039_v23, %v16106_v6 }
 0x4d0   : > { %12176 = vmatmul.mubr.msk.f32.gmra.mxu1 %vm5867_vm4, %v5952_v53  ;;  %v16123_v37 = vld [vmem:[#allocation3 + $0x41] sm:$0xff] }
 0x4d1   : > { %12198 = vmatprep.mubr.msk.f32.mxu1 %vm5867_vm4, %v6437_v21  ;;  %12183 = vmatmul.mubr.msk.f32.vlgmr.msra.gmra.mxu0 %vm5867_vm4, %v6282_v20  ;;  %v16133_v1 = vld [vmem:[#allocation3 + $0x47] sm:$0xff]  ;;  %v6288_v27 = vmul.f32 %v16128_v40, %v16123_v37  ;;  %v6747_v53 = vmul.f32 %v16115_v19, %v16123_v37 }
 0x4d2   : > { %12185 = vmatprep.mubr.msk.f32.mxu0 %vm5867_vm4, %v6283_v36  ;;  %12211 = vmatpush3.msra.mxu0 %v15970_v17  ;;  %v10718_v17 = vld [vmem:[%s16565_s7 + $0x68] sm:$0xff]  ;;  %v6444_v50 = vmul.f32 %v16133_v1, %v16054_v41  ;;  %v6740_v21 = vld [vmem:[#allocation3 + $0x49] sm:$0xff]  ;;  %v6897_v36 = vmul.f32 %v15877_v52, %v15976_v45 }
 0x4d3   : > { %12212 = vmatprep.subr.mxu0 %v10697_v60  ;;  %v6592_v20 = vld [vmem:[#allocation3 + $0x48] sm:$0xff]  ;;  %v10737_v52 = vld [vmem:[%s16565_s7 + $0x80] sm:$0xff] }
 0x4d4   : > { %12199 = vmatmul.mubr.msk.f32.vlgmr.msra.gmra.mxu1 %vm5867_vm4, %v6438_v16  ;;  %12213 = vmatpush3.msra.mxu0 %v10697_v60  ;;  %v6748_v60 = vmul.f32 %v6740_v21, %v16128_v40  ;;  %v6898_v16 = vmul.f32 %v15934_v11, %v16004_v47  ;;  %v6900_v11 = vmul.f32 %v15944_v46, %v16032_v34  ;;  %v6896_v45 = vld [vmem:[#allocation3 + $0x4f] sm:$0xff] }
 0x4d5   : > { %12201 = vmatprep.mubr.msk.f32.mxu1 %vm5867_vm4, %v6439_v29  ;;  %12186 = vmatmul.mubr.msk.f32.gmra.mxu0 %vm5867_vm4, %v6284_v62  ;;  %v6899_v29 = vmul.f32 %v15941_v5, %v16016_v55  ;;  %v6901_v5 = vmul.f32 %v15994_v43, %v16046_v3  ;;  %v6903_v46 = vmul.f32 %v16133_v1, %v16042_v57  ;;  %v7052_v47 = vld [vmem:[#allocation3 + $0x50] sm:$0xff] }
 0x4d6   : > { %12227 = vmatpush3.msra.mxu1 %v15982_v35  ;;  %12188 = vmatprep.mubr.msk.f32.mxu0 %vm5867_vm4, %v6285_v25  ;;  %v6287_v35 = vmul.f32 %v16115_v19, %v16106_v6  ;;  %v6904_v43 = vmul.f32 %v6896_v45, %v16054_v41  ;;  %v7205_v55 = vmul.f32 %v16018_v14, %v16106_v6 }
 0x4d7   : > { %12228 = vmatprep.subr.mxu1 %v10707_v26  ;;  %12242 = vmatprep.subr.mxu0 %v10718_v17 }
 0x4d8   : > { %12202 = vmatmul.mubr.msk.f32.gmra.mxu1 %vm5867_vm4, %v6440_v54 }
 0x4d9   : > { %12204 = vmatprep.mubr.msk.f32.mxu1 %vm5867_vm4, %v6441_v9  ;;  %12229 = vmatpush3.msra.mxu1 %v10707_v26 }
 0x4da   : > { %12189 = vmatmul.mubr.msk.f32.gmra.mxu0 %vm5867_vm4, %v6286_v48  ;;  %12258 = vmatprep.subr.mxu1 %v10728_v24 }
 0x4db   : > { %12191 = vmatprep.mubr.msk.f32.mxu0 %vm5867_vm4, %v6287_v35 }
 0x4dc   : > { %12205 = vmatmul.mubr.msk.f32.gmra.mxu1 %vm5867_vm4, %v6442_v13 }
 0x4dd   : > { %12207 = vmatprep.mubr.msk.f32.mxu1 %vm5867_vm4, %v6443_v61 }
 0x4de   : > { %12192 = vmatmul.mubr.msk.f32.gmra.mxu0 %vm5867_vm4, %v6288_v27 }
 0x4df   : > { %12214 = vmatprep.mubr.msk.f32.mxu0 %vm5867_vm4, %v15948_v44  ;;  %v6743_v44 = vmul.f32 %v15955_v28, %v16075_v38 }
 0x4e0   : > { %12208 = vmatmul.mubr.msk.f32.gmra.mxu1 %vm5867_vm4, %v6444_v50 }
 0x4e1   : > { %12230 = vmatprep.mubr.msk.f32.mxu1 %vm5867_vm4, %v6741_v2 }
 0x4e2   : > { %12215 = vmatmul.mubr.msk.f32.vlgmr.msra.gmra.mxu0 %vm5867_vm4, %v15974_v22 }
 0x4e3   : > { %12217 = vmatprep.mubr.msk.f32.mxu0 %vm5867_vm4, %v16002_v12  ;;  %12243 = vmatpush3.msra.mxu0 %v10718_v17 }
 0x4e4   : > { %12231 = vmatmul.mubr.msk.f32.vlgmr.msra.gmra.mxu1 %vm5867_vm4, %v6742_v49  ;;  %12244 = vmatprep.subr.mxu0 %v10717_v33 }
 0x4e5   : > { %12233 = vmatprep.mubr.msk.f32.mxu1 %vm5867_vm4, %v6743_v44  ;;  %12245 = vmatpush3.msra.mxu0 %v10717_v33 }
 0x4e6   : > { %12218 = vmatmul.mubr.msk.f32.gmra.mxu0 %vm5867_vm4, %v16014_v63  ;;  %12259 = vmatpush3.msra.mxu1 %v10728_v24 }
 0x4e7   : > { %12220 = vmatprep.mubr.msk.f32.mxu0 %vm5867_vm4, %v16030_v39  ;;  %12260 = vmatprep.subr.mxu1 %v10727_v31 }
 0x4e8   : > { %12234 = vmatmul.mubr.msk.f32.gmra.mxu1 %vm5867_vm4, %v6744_v58  ;;  %12274 = vmatprep.subr.mxu0 %v10738_v8 }
 0x4e9   : > { %12236 = vmatprep.mubr.msk.f32.mxu1 %vm5867_vm4, %v6745_v7  ;;  %12261 = vmatpush3.msra.mxu1 %v10727_v31 }
 0x4ea   : > { %12221 = vmatmul.mubr.msk.f32.gmra.mxu0 %vm5867_vm4, %v16044_v56 }
 0x4eb   : > { %12223 = vmatprep.mubr.msk.f32.mxu0 %vm5867_vm4, %v16056_v51 }
 0x4ec   : > { %12237 = vmatmul.mubr.msk.f32.gmra.mxu1 %vm5867_vm4, %v6746_v4 }
 0x4ed   : > { %12239 = vmatprep.mubr.msk.f32.mxu1 %vm5867_vm4, %v6747_v53 }
 0x4ee   : > { %12224 = vmatmul.mubr.msk.f32.gmra.mxu0 %vm5867_vm4, %v6592_v20 }
 0x4ef   : > { %12246 = vmatprep.mubr.msk.f32.mxu0 %vm5867_vm4, %v6897_v36 }
 0x4f0   : > { %12240 = vmatmul.mubr.msk.f32.gmra.mxu1 %vm5867_vm4, %v6748_v60 }
 0x4f1   : > { %12262 = vmatprep.mubr.msk.f32.mxu1 %vm5867_vm4, %v15974_v22  ;;  %v6902_v22 = vmul.f32 %v16011_v0, %v16059_v30  ;;  %v7202_v0 = vmul.f32 %v15938_v59, %v16075_v38  ;;  %v7206_v59 = vmul.f32 %v16039_v23, %v16123_v37 }
 0x4f2   : > { %12247 = vmatmul.mubr.msk.f32.vlgmr.msra.gmra.mxu0 %vm5867_vm4, %v6898_v16 }
 0x4f3   : > { %12249 = vmatprep.mubr.msk.f32.mxu0 %vm5867_vm4, %v6899_v29  ;;  %12275 = vmatpush3.msra.mxu0 %v10738_v8 }
 0x4f4   : > { %12263 = vmatmul.mubr.msk.f32.vlgmr.msra.gmra.mxu1 %vm5867_vm4, %v16002_v12  ;;  %12276 = vmatprep.subr.mxu0 %v10737_v52  ;;  %v7201_v12 = vmul.f32 %v15936_v10, %v16065_v18  ;;  %v7204_v10 = vmul.f32 %v15984_v15, %v16098_v32  ;;  %v17148_v15 = vmov 0.0  }
 0x4f5   : > { %12265 = vmatprep.mubr.msk.f32.mxu1 %vm5867_vm4, %v16014_v63  ;;  %12277 = vmatpush3.msra.mxu0 %v10737_v52  ;;  %v7203_v63 = vmul.f32 %v15955_v28, %v16083_v42  ;;  %v7207_v28 = vmul.f32 %v6740_v21, %v16115_v19  ;;  %7794 = vst.msk [vmem:[#allocation4] sm:$0xff] %vm7364_vm6, %v17148_v15  ;;  %7795 = vst.msk [vmem:[#allocation4 + $0x8] sm:$0xff] %vm7364_vm6, %v17148_v15  ;;  %v7452_v52 = vld [vmem:[#allocation15] sm:$0xff] }
 0x4f6   : > { %12250 = vmatmul.mubr.msk.f32.gmra.mxu0 %vm5867_vm4, %v6900_v11  ;;  %7796 = vst.msk [vmem:[#allocation4 + $0x10] sm:$0xff] %vm7364_vm6, %v17148_v15  ;;  %v7537_v11 = vld [vmem:[#allocation15 + $0x10] sm:$0xff] }
 0x4f7   : > { %12252 = vmatprep.mubr.msk.f32.mxu0 %vm5867_vm4, %v6901_v5  ;;  %8987 = vst.msk [vmem:[#allocation5] sm:$0xff] %vm7454_vm7, %v17148_v15 }
 0x4f8   : > { %12266 = vmatmul.mubr.msk.f32.gmra.mxu1 %vm5867_vm4, %v16030_v39  ;;  %v7200_v39 = vld [vmem:[#allocation3 + $0x51] sm:$0xff] }
 0x4f9   : > { %12268 = vmatprep.mubr.msk.f32.mxu1 %vm5867_vm4, %v16044_v56  ;;  %v7208_v34 = vmul.f32 %v7200_v39, %v16128_v40 }
 0x4fa   : > { %12253 = vmatmul.mubr.msk.f32.gmra.mxu0 %vm5867_vm4, %v6902_v22 }
 0x4fb   : > { %12255 = vmatprep.mubr.msk.f32.mxu0 %vm5867_vm4, %v6903_v46 }
 0x4fc   : > { %12269 = vmatmul.mubr.msk.f32.gmra.mxu1 %vm5867_vm4, %v16056_v51 }
 0x4fd   : > { %12271 = vmatprep.mubr.msk.f32.mxu1 %vm5867_vm4, %v6592_v20 }
 0x4fe   : > { %12256 = vmatmul.mubr.msk.f32.gmra.mxu0 %vm5867_vm4, %v6904_v43 }
 0x4ff   : > { %12278 = vmatprep.mubr.msk.f32.mxu0 %vm5867_vm4, %v7201_v12 }
 0x500   : > { %12272 = vmatmul.mubr.msk.f32.gmra.mxu1 %vm5867_vm4, %v7052_v47 }
 0x501   : > { %12306 = vmatprep.mubr.msk.f32.mxu1 %vm7454_vm7, %v7452_v52 }
 0x502   : > { %12279 = vmatmul.mubr.msk.f32.vlgmr.msra.gmra.mxu0 %vm5867_vm4, %v7202_v0 }
 0x503   : > { %12281 = vmatprep.mubr.msk.f32.mxu0 %vm5867_vm4, %v7203_v63 }
 0x506   : > { %12282 = vmatmul.mubr.msk.f32.gmra.mxu0 %vm5867_vm4, %v7204_v10 }
 0x507   : > { %12284 = vmatprep.mubr.msk.f32.mxu0 %vm5867_vm4, %v7205_v55 }
 0x50a   : > { %12285 = vmatmul.mubr.msk.f32.gmra.mxu0 %vm5867_vm4, %v7206_v59 }
 0x50b   : > { %12287 = vmatprep.mubr.msk.f32.mxu0 %vm5867_vm4, %v7207_v28 }
 0x50e   : > { %12288 = vmatmul.mubr.msk.f32.gmra.mxu0 %vm5867_vm4, %v7208_v34 }
 0x50f   : > { %12325 = vmatprep.mubr.msk.f32.mxu0 %vm7454_vm7, %v7537_v11 }
 0x575   : > { %v12152_v14 = vpop.f32.mrf.mxu0 }
 0x577   : > { %v6056_v57 = vpop.f32.mrf.mxu0 }
 0x578   : > { %v12168_v23 = vpop.f32.mrf.mxu1 }
 0x579   : > { %v6191_v29 = vadd.f32 %v12168_v23, %v12152_v14 }
 0x57a   : > { %v6185_v56 = vpop.f32.mrf.mxu1 }
 0x57b   : > { %v6186_v46 = vadd.f32 %v6185_v56, %v6056_v57 }
 0x57d   : > { %v12155_v3 = vpop.f32.mrf.mxu0 }
 0x57f   : > { %v6066_v51 = vpop.f32.mrf.mxu0 }
 0x580   : > { %v12171_v41 = vpop.f32.mrf.mxu1 }
 0x581   : > { %v6201_v47 = vadd.f32 %v12171_v41, %v12155_v3 }
 0x582   : > { %v6195_v30 = vpop.f32.mrf.mxu1 }
 0x583   : > { %v6196_v55 = vadd.f32 %v6195_v30, %v6066_v51 }
 0x585   : > { %v12158_v18 = vpop.f32.mrf.mxu0 }
 0x587   : > { %v6076_v42 = vpop.f32.mrf.mxu0 }
 0x588   : > { %v12174_v38 = vpop.f32.mrf.mxu1 }
 0x589   : > { %v6211_v14 = vadd.f32 %v12174_v38, %v12158_v18 }
 0x58a   : > { %v6205_v62 = vpop.f32.mrf.mxu1 }
 0x58d   : > { %v16257_v26 = vpop.f32.mrf.mxu0 }
 0x58f   : > { %v16259_v25 = vpop.f32.mrf.mxu0 }
 0x590   : > { %v16261_v32 = vpop.f32.mrf.mxu1 }
 0x591   : > { %v12184_v54 = vpop.f32.mrf.mxu0  ;;  %v6221_v3 = vadd.f32 %v16261_v32, %v16257_v26 }
 0x592   : > { %v16263_v17 = vpop.f32.mrf.mxu1  ;;  %v6422_v45 = vadd.f32 %v12184_v54, %v6191_v29 }
 0x593   : > { %v6382_v6 = vpop.f32.mrf.mxu0  ;;  %v6216_v18 = vadd.f32 %v16263_v17, %v16259_v25 }
 0x594   : > { %v12200_v9 = vpop.f32.mrf.mxu1  ;;  %v6421_v0 = vadd.f32 %v6382_v6, %v6186_v46 }
 0x595   : > { %v12187_v24 = vpop.f32.mrf.mxu0  ;;  %v6578_v59 = vadd.f32 %v12200_v9, %v6422_v45 }
 0x596   : > { %v6538_v19 = vpop.f32.mrf.mxu1  ;;  %v6424_v39 = vadd.f32 %v12187_v24, %v6201_v47 }
 0x597   : > { %v6392_v48 = vpop.f32.mrf.mxu0  ;;  %v6577_v23 = vadd.f32 %v6538_v19, %v6421_v0 }
 0x598   : > { %v12203_v35 = vpop.f32.mrf.mxu1  ;;  %v6423_v52 = vadd.f32 %v6392_v48, %v6196_v55 }
 0x599   : > { %v6580_v56 = vadd.f32 %v12203_v35, %v6424_v39 }
 0x59a   : > { %v12190_v37 = vpop.f32.mrf.mxu0  ;;  %v6548_v13 = vpop.f32.mrf.mxu1 }
 0x59b   : > { %v6426_v54 = vadd.f32 %v12190_v37, %v6211_v14  ;;  %v6579_v51 = vadd.f32 %v6548_v13, %v6423_v52 }
 0x59c   : > { %v6402_v40 = vpop.f32.mrf.mxu0  ;;  %v12206_v61 = vpop.f32.mrf.mxu1 }
 0x59e   : > { %v12193_v1 = vpop.f32.mrf.mxu0  ;;  %v16265_v27 = vpop.f32.mrf.mxu1 }
 0x59f   : > { %v6428_v38 = vadd.f32 %v12193_v1, %v6221_v3 }
 0x5a0   : > { %v16267_v50 = vpop.f32.mrf.mxu0  ;;  %v16269_v2 = vpop.f32.mrf.mxu1 }
 0x5a2   : > { %v16271_v33 = vpop.f32.mrf.mxu1  ;;  %v12216_v49 = vpop.f32.mrf.mxu0 }
 0x5a3   : > { %v6726_v15 = vadd.f32 %v12216_v49, %v6578_v59  ;;  %v6427_v49 = vadd.f32 %v16267_v50, %v6216_v18 }
 0x5a4   : > { %v6686_v44 = vpop.f32.mrf.mxu0  ;;  %v12232_v31 = vpop.f32.mrf.mxu1 }
 0x5a5   : > { %v6725_v29 = vadd.f32 %v6686_v44, %v6577_v23  ;;  %v6882_v30 = vadd.f32 %v12232_v31, %v6726_v15  ;;  %v6584_v44 = vadd.f32 %v16269_v2, %v6428_v38  ;;  %v10747_v2 = vld [vmem:[#allocation12] ss:$0 sm:$0xff] }
 0x5a6   : > { %v12219_v8 = vpop.f32.mrf.mxu0  ;;  %v6842_v58 = vpop.f32.mrf.mxu1 }
 0x5a7   : > { %v6728_v9 = vadd.f32 %v12219_v8, %v6580_v56 }
 0x5a8   : > { %v6696_v7 = vpop.f32.mrf.mxu0  ;;  %v12235_v4 = vpop.f32.mrf.mxu1 }
 0x5a9   : > { %v6727_v48 = vadd.f32 %v6696_v7, %v6579_v51  ;;  %v6884_v32 = vadd.f32 %v12235_v4, %v6728_v9 }
 0x5aa   : > { %v12222_v53 = vpop.f32.mrf.mxu0  ;;  %v6852_v21 = vpop.f32.mrf.mxu1 }
 0x5ab   : > { %v6883_v25 = vadd.f32 %v6852_v21, %v6727_v48 }
 0x5ac   : > { %v6706_v20 = vpop.f32.mrf.mxu0  ;;  %v16273_v36 = vpop.f32.mrf.mxu1 }
 0x5ae   : > { %v12225_v60 = vpop.f32.mrf.mxu0  ;;  %v16275_v16 = vpop.f32.mrf.mxu1 }
 0x5b0   : > { %v16277_v5 = vpop.f32.mrf.mxu0  ;;  %v16279_v22 = vpop.f32.mrf.mxu1 }
 0x5b1   : > { %17149 = vst [vmem:[#allocation106_spill] sm:$0xff] %v16279_v22  ;;  %v6206_v22 = vadd.f32 %v6205_v62, %v6076_v42  ;;  %v6582_v42 = vadd.f32 %v12206_v61, %v6426_v54  ;;  %v6881_v62 = vadd.f32 %v6842_v58, %v6725_v29  ;;  %v6583_v61 = vadd.f32 %v16271_v33, %v6427_v49 }
 0x5b2   : > { %v16285_v43 = vpop.f32.mrf.mxu1  ;;  %v12248_v12 = vpop.f32.mrf.mxu0  ;;  %v6732_v58 = vadd.f32 %v12225_v60, %v6584_v44 }
 0x5b3   : > { %v6425_v41 = vadd.f32 %v6402_v40, %v6206_v22  ;;  %v7038_v35 = vadd.f32 %v12248_v12, %v6882_v30  ;;  %v6730_v40 = vadd.f32 %v12222_v53, %v6582_v42  ;;  %v6731_v45 = vadd.f32 %v16277_v5, %v6583_v61 }
 0x5b4   : > { %v6998_v63 = vpop.f32.mrf.mxu0  ;;  %v12264_v10 = vpop.f32.mrf.mxu1 }
 0x5b5   : > { %v6581_v37 = vadd.f32 %v16265_v27, %v6425_v41  ;;  %v7037_v13 = vadd.f32 %v6998_v63, %v6881_v62  ;;  %v7186_v17 = vadd.f32 %v12264_v10, %v7038_v35  ;;  %v6886_v27 = vadd.f32 %v16273_v36, %v6730_v40 }
 0x5b6   : > { %v12251_v28 = vpop.f32.mrf.mxu0  ;;  %v7146_v34 = vpop.f32.mrf.mxu1 }
 0x5b7   : > { %v6729_v31 = vadd.f32 %v6706_v20, %v6581_v37  ;;  %v7040_v1 = vadd.f32 %v12251_v28, %v6884_v32  ;;  %v7185_v22 = vadd.f32 %v7146_v34, %v7037_v13  ;;  %v6887_v28 = vadd.f32 %v16285_v43, %v6731_v45 }
 0x5b8   : > { %v7008_v11 = vpop.f32.mrf.mxu0  ;;  %v12267_v57 = vpop.f32.mrf.mxu1  ;;  %v17150_v0 = vld [vmem:[#allocation106_spill] sm:$0xff] }
 0x5b9   : > { %v7039_v50 = vadd.f32 %v7008_v11, %v6883_v25  ;;  %v6885_v53 = vadd.f32 %v16275_v16, %v6729_v31  ;;  %v7188_v12 = vadd.f32 %v12267_v57, %v7040_v1  ;;  %v6888_v63 = vadd.f32 %v17150_v0, %v6732_v58 }
 0x5ba   : > { %v12254_v6 = vpop.f32.mrf.mxu0  ;;  %v7156_v24 = vpop.f32.mrf.mxu1 }
 0x5bb   : > { %v7042_v21 = vadd.f32 %v12254_v6, %v6886_v27  ;;  %v7187_v10 = vadd.f32 %v7156_v24, %v7039_v50 }
 0x5bc   : > { %v7018_v19 = vpop.f32.mrf.mxu0  ;;  %v12270_v15 = vpop.f32.mrf.mxu1 }
 0x5bd   : > { %v7041_v33 = vadd.f32 %v7018_v19, %v6885_v53  ;;  %v7190_v16 = vadd.f32 %v12270_v15, %v7042_v21 }
 0x5be   : > { %v12257_v26 = vpop.f32.mrf.mxu0  ;;  %v7166_v46 = vpop.f32.mrf.mxu1 }
 0x5bf   : > { %v7044_v14 = vadd.f32 %v12257_v26, %v6888_v63  ;;  %v7189_v52 = vadd.f32 %v7166_v46, %v7041_v33 }
 0x5c0   : > { %v7028_v8 = vpop.f32.mrf.mxu0  ;;  %v12273_v55 = vpop.f32.mrf.mxu1 }
 0x5c1   : > { %v7043_v11 = vadd.f32 %v7028_v8, %v6887_v28  ;;  %v7192_v30 = vadd.f32 %v12273_v55, %v7044_v14 }
 0x5c2   : > { %v12280_v7 = vpop.f32.mrf.mxu0  ;;  %v7176_v56 = vpop.f32.mrf.mxu1 }
 0x5c3   : > { %v7342_v4 = vadd.f32 %v12280_v7, %v7186_v17  ;;  %v7191_v24 = vadd.f32 %v7176_v56, %v7043_v11 }
 0x5c4   : > { %v7302_v20 = vpop.f32.mrf.mxu0 }
 0x5c5   : > { %v7341_v47 = vadd.f32 %v7302_v20, %v7185_v22  ;;  %v7357_v36 = vadd.f32 %v10747_v2, %v7342_v4 }
 0x5c6   : > { %v12283_v60 = vpop.f32.mrf.mxu0 }
 0x5c7   : > { %v7356_v59 = vadd.f32 %v10747_v2, %v7341_v47  ;;  %v7344_v39 = vadd.f32 %v12283_v60, %v7188_v12  ;;  %v7366_v54 = vsel %vm7364_vm6, %v7357_v36, 0.0 }
 0x5c8   : > { %v7312_v34 = vpop.f32.mrf.mxu0 }
 0x5c9   : > { %v7365_v5 = vsel %vm7364_vm6, %v7356_v59, 0.0  ;;  %v7343_v23 = vadd.f32 %v7312_v34, %v7187_v10  ;;  %v7359_v29 = vadd.f32 %v10747_v2, %v7344_v39 }
 0x5ca   : > { %v12286_v57 = vpop.f32.mrf.mxu0  ;;  %v7367_v6 = vadd.f32 %v7366_v54, %v7365_v5 }
 0x5cb   : > { %v7358_v3 = vadd.f32 %v10747_v2, %v7343_v23  ;;  %v7346_v41 = vadd.f32 %v12286_v57, %v7190_v16  ;;  %v7370_v19 = vsel %vm7364_vm6, %v7359_v29, 0.0 }
 0x5cc   : > { %v7322_v51 = vpop.f32.mrf.mxu0 }
 0x5cd   : > { %v7368_v43 = vsel %vm7364_vm6, %v7358_v3, 0.0  ;;  %v7345_v9 = vadd.f32 %v7322_v51, %v7189_v52  ;;  %v7361_v42 = vadd.f32 %v10747_v2, %v7346_v41 }
 0x5ce   : > { %v7369_v18 = vadd.f32 %v7368_v43, %v7367_v6  ;;  %v12289_v38 = vpop.f32.mrf.mxu0 }
 0x5cf   : > { %v7360_v62 = vadd.f32 %v10747_v2, %v7345_v9  ;;  %v7348_v48 = vadd.f32 %v12289_v38, %v7192_v30  ;;  %v7374_v40 = vsel %vm7364_vm6, %v7361_v42, 0.0 }
 0x5d0   : > { %v7371_v35 = vadd.f32 %v7370_v19, %v7369_v18  ;;  %v7332_v37 = vpop.f32.mrf.mxu0 }
 0x5d1   : > { %v7372_v49 = vsel %vm7364_vm6, %v7360_v62, 0.0  ;;  %v7347_v26 = vadd.f32 %v7332_v37, %v7191_v24  ;;  %v7363_v13 = vadd.f32 %v10747_v2, %v7348_v48 }
 0x5d2   : > { %v7373_v32 = vadd.f32 %v7372_v49, %v7371_v35 }
 0x5d3   : > { %v7362_v15 = vadd.f32 %v10747_v2, %v7347_v26  ;;  %v7378_v25 = vsel %vm7364_vm6, %v7363_v13, 0.0 }
 0x5d4   : > { %v7375_v44 = vadd.f32 %v7374_v40, %v7373_v32 }
 0x5d5   : > { %v7376_v31 = vsel %vm7364_vm6, %v7362_v15, 0.0 }
 0x5d6   : > { %v7377_v8 = vadd.f32 %v7376_v31, %v7375_v44 }
 0x5d8   : > { %v7379_v17 = vadd.f32 %v7378_v25, %v7377_v8 }
 0x5da   : > { %v7380_v1 = vrot.slane %v7379_v17, 4 }
 0x5dc   : > { %v7381_v61 = vadd.f32 %v7380_v1, %v7379_v17 }
 0x5de   : > { %v7382_v58 = vrot.slane %v7381_v61, 2 }
 0x5e0   : > { %v7383_v7 = vadd.f32 %v7382_v58, %v7381_v61 }
 0x5e2   : > { %v7384_v27 = vrot.slane %v7383_v7, 1 }
 0x5e4   : > { %v7385_v22 = vadd.f32 %v7384_v27, %v7383_v7 }
 0x5e6   : > { %v7387_v50 = vmul.f32 0.015625, %v7385_v22 }
 0x5e8   : > { %v16308_v46 = vsub.f32 %v7356_v59, %v7387_v50  ;;  %v7389_v4 = vsub.f32 %v7357_v36, %v7387_v50  ;;  %v7390_v53 = vsub.f32 %v7358_v3, %v7387_v50  ;;  %v7391_v45 = vsub.f32 %v7359_v29, %v7387_v50 }
 0x5e9   : > { %v7392_v2 = vsub.f32 %v7360_v62, %v7387_v50  ;;  %v7393_v47 = vsub.f32 %v7361_v42, %v7387_v50  ;;  %v7394_v10 = vsub.f32 %v7362_v15, %v7387_v50  ;;  %v7395_v39 = vsub.f32 %v7363_v13, %v7387_v50 }
 0x5ea   : > { %v7396_v20 = vmul.f32 %v16308_v46, %v16308_v46  ;;  %v7397_v12 = vmul.f32 %v7389_v4, %v7389_v4  ;;  %v7398_v21 = vmul.f32 %v7390_v53, %v7390_v53  ;;  %v7399_v0 = vmul.f32 %v7391_v45, %v7391_v45 }
 0x5eb   : > { %v7400_v55 = vmul.f32 %v7392_v2, %v7392_v2  ;;  %v7401_v28 = vmul.f32 %v7393_v47, %v7393_v47  ;;  %v7402_v14 = vmul.f32 %v7394_v10, %v7394_v10  ;;  %v7403_v52 = vmul.f32 %v7395_v39, %v7395_v39 }
 0x5ec   : > { %v7404_v63 = vsel %vm7364_vm6, %v7396_v20, 0.0  ;;  %v7405_v33 = vsel %vm7364_vm6, %v7397_v12, 0.0  ;;  %v7407_v59 = vsel %vm7364_vm6, %v7398_v21, 0.0  ;;  %v7409_v34 = vsel %vm7364_vm6, %v7399_v0, 0.0  ;;  %v7706_v20 = vld [vmem:[#allocation15 + $0x38] sm:$0xff]  ;;  %v7826_v21 = vld [vmem:[#allocation17 + $0x30] sm:$0xff] }
 0x5ed   : > { %v7406_v60 = vadd.f32 %v7405_v33, %v7404_v63  ;;  %v7411_v5 = vsel %vm7364_vm6, %v7400_v55, 0.0  ;;  %v7413_v11 = vsel %vm7364_vm6, %v7401_v28, 0.0  ;;  %v7415_v56 = vsel %vm7364_vm6, %v7402_v14, 0.0  ;;  %v7827_v12 = vld [vmem:[#allocation17 + $0x38] sm:$0xff]  ;;  %v7825_v0 = vld [vmem:[#allocation17 + $0x28] sm:$0xff]  ;;  %v8010_v63 = vld [vmem:[#allocation17 + $0x50] sm:$0xff] }
 0x5ee   : > { %v7417_v29 = vsel %vm7364_vm6, %v7403_v52, 0.0  ;;  %v8009_v33 = vld [vmem:[#allocation17 + $0x48] sm:$0xff]  ;;  %v7820_v55 = vld [vmem:[#allocation17 + $0x18] sm:$0xff] }
 0x5ef   : > { %v7408_v36 = vadd.f32 %v7407_v59, %v7406_v60  ;;  %v7824_v60 = vld [vmem:[#allocation17 + $0x20] sm:$0xff] }
 0x5f0   : > { %v8008_v59 = vld [vmem:[#allocation17 + $0x40] sm:$0xff] }
 0x5f1   : > { %v7410_v16 = vadd.f32 %v7409_v34, %v7408_v36  ;;  %v8193_v36 = vld [vmem:[#allocation17 + $0x98] sm:$0xff] }
 0x5f3   : > { %v7412_v23 = vadd.f32 %v7411_v5, %v7410_v16 }
 0x5f5   : > { %v7414_v57 = vadd.f32 %v7413_v11, %v7412_v23 }
 0x5f7   : > { %v7416_v54 = vadd.f32 %v7415_v56, %v7414_v57 }
 0x5f9   : > { %v7418_v3 = vadd.f32 %v7417_v29, %v7416_v54 }
 0x5fb   : > { %v7419_v41 = vrot.slane %v7418_v3, 4 }
 0x5fd   : > { %v7420_v6 = vadd.f32 %v7419_v41, %v7418_v3  ;;  %v16330_v41 = vpop.permute.xlu1 %7812 }
 0x5ff   : > { %v7421_v51 = vrot.slane %v7420_v6, 2 }
 0x601   : > { %v7422_v30 = vadd.f32 %v7421_v51, %v7420_v6  ;;  %v7808_v6 = vpop.permute.xlu0 %7807 }
 0x603   : > { %v7423_v43 = vrot.slane %v7422_v30, 1 }
 0x605   : > { %v7424_v9 = vadd.f32 %v7423_v43, %v7422_v30 }
 0x607   : > { %v7425_v24 = vmul.f32 0.015625, %v7424_v9  ;;  %v16334_v9 = vpop.permute.xlu1 %8002 }
 0x609   : > { %v7426_v18 = vadd.f32 1e-05, %v7425_v24  ;;  %v16336_v24 = vpop.permute.xlu0 %7997 }
 0x60b   : > { %12822 = vrsqrt.f32 %v7426_v18  ;;  %v7819_v18 = vld [vmem:[#allocation17 + $0x10] sm:$0xff] }
 0x618   : > { %v12823_v38 = vpop.eup %12822 }
 0x619   : > { %v7434_v19 = vmul.f32 %v12823_v38, %v7394_v10  ;;  %v7435_v42 = vmul.f32 %v12823_v38, %v7395_v39  ;;  %v7433_v62 = vmul.f32 %v12823_v38, %v7393_v47  ;;  %v7432_v48 = vmul.f32 %v12823_v38, %v7392_v2  ;;  %v7622_v2 = vld [vmem:[#allocation15 + $0x28] sm:$0xff]  ;;  %v8011_v47 = vld [vmem:[#allocation17 + $0x58] sm:$0xff] }
 0x61a   : > { %v7431_v49 = vmul.f32 %v12823_v38, %v7391_v45  ;;  %v7430_v40 = vmul.f32 %v12823_v38, %v7390_v53  ;;  %v7429_v44 = vmul.f32 %v12823_v38, %v7389_v4  ;;  %v7428_v25 = vmul.f32 %v12823_v38, %v16308_v46  ;;  %v7453_v46 = vld [vmem:[#allocation15 + $0x8] sm:$0xff]  ;;  %v7538_v4 = vld [vmem:[#allocation15 + $0x18] sm:$0xff]  ;;  %v7621_v53 = vld [vmem:[#allocation15 + $0x20] sm:$0xff] }
 0x61b   : > { %v7442_v35 = vmul.f32 0.2, %v7434_v19  ;;  %v7443_v37 = vmul.f32 0.2, %v7435_v42  ;;  %v7441_v26 = vmul.f32 0.2, %v7433_v62 }
 0x61c   : > { %v7440_v13 = vmul.f32 0.2, %v7432_v48  ;;  %v7439_v31 = vmul.f32 0.2, %v7431_v49  ;;  %v7438_v17 = vmul.f32 0.2, %v7430_v40 }
 0x61d   : > { %v7451_v32 = vmax.f32 %v7435_v42, %v7443_v37  ;;  %v7450_v15 = vmax.f32 %v7434_v19, %v7442_v35  ;;  %v7449_v8 = vmax.f32 %v7433_v62, %v7441_v26  ;;  %v7437_v61 = vmul.f32 0.2, %v7429_v44  ;;  %v7705_v45 = vld [vmem:[#allocation15 + $0x30] sm:$0xff]  ;;  %v7818_v35 = vld [vmem:[#allocation17 + $0x8] sm:$0xff] }
 0x61e   : > { %v7448_v1 = vmax.f32 %v7432_v48, %v7440_v13  ;;  %v7447_v58 = vmax.f32 %v7431_v49, %v7439_v31  ;;  %v7436_v7 = vmul.f32 0.2, %v7428_v25  ;;  %v7446_v27 = vmax.f32 %v7430_v40, %v7438_v17  ;;  %v8192_v37 = vld [vmem:[#allocation17 + $0x90] sm:$0xff]  ;;  %v7817_v49 = vld [vmem:[#allocation17] sm:$0xff]  ;;  %v8377_v17 = vld [vmem:[#allocation17 + $0xd8] sm:$0xff] }
 0x61f   : > { %12290 = vmatprep.subr.mxu1 %v7451_v32  ;;  %12309 = vmatprep.subr.mxu0 %v7451_v32  ;;  %v7445_v22 = vmax.f32 %v7429_v44, %v7437_v61  ;;  %v17151_v10 = vmov 0.0   ;;  %v8190_v44 = vld [vmem:[#allocation17 + $0x80] sm:$0xff] }
 0x620   : > { %12291 = vmatpush3.msra.mxu1 %v7451_v32  ;;  %12310 = vmatpush3.msra.mxu0 %v7451_v32  ;;  %v7444_v50 = vmax.f32 %v7428_v25, %v7436_v7  ;;  %7798 = vst.msk [vmem:[#allocation4 + $0x18] sm:$0x1f] %vm7797_vm8, %v17151_v10  ;;  %v8376_v7 = vld [vmem:[#allocation17 + $0xd0] sm:$0xff] }
 0x621   : > { %12292 = vmatprep.subr.mxu1 %v7450_v15  ;;  %12311 = vmatprep.subr.mxu0 %v7450_v15  ;;  %8989 = vst.msk [vmem:[#allocation5 + $0x8] sm:$0x7f] %vm8988_vm10, %v17151_v10 }
 0x622   : > { %12293 = vmatpush3.msra.mxu1 %v7450_v15  ;;  %12312 = vmatpush3.msra.mxu0 %v7450_v15 }
 0x623   : > { %12294 = vmatprep.subr.mxu1 %v7449_v8  ;;  %12313 = vmatprep.subr.mxu0 %v7449_v8 }
 0x624   : > { %12295 = vmatpush3.msra.mxu1 %v7449_v8  ;;  %12314 = vmatpush3.msra.mxu0 %v7449_v8 }
 0x625   : > { %12296 = vmatprep.subr.mxu1 %v7448_v1  ;;  %12315 = vmatprep.subr.mxu0 %v7448_v1 }
 0x626   : > { %12297 = vmatpush3.msra.mxu1 %v7448_v1  ;;  %12316 = vmatpush3.msra.mxu0 %v7448_v1 }
 0x627   : > { %12298 = vmatprep.subr.mxu1 %v7447_v58  ;;  %12317 = vmatprep.subr.mxu0 %v7447_v58 }
 0x628   : > { %12299 = vmatpush3.msra.mxu1 %v7447_v58  ;;  %12318 = vmatpush3.msra.mxu0 %v7447_v58 }
 0x629   : > { %12300 = vmatprep.subr.mxu1 %v7446_v27  ;;  %12319 = vmatprep.subr.mxu0 %v7446_v27 }
 0x62a   : > { %12301 = vmatpush3.msra.mxu1 %v7446_v27  ;;  %12320 = vmatpush3.msra.mxu0 %v7446_v27 }
 0x62b   : > { %12302 = vmatprep.subr.mxu1 %v7445_v22  ;;  %12321 = vmatprep.subr.mxu0 %v7445_v22 }
 0x62c   : > { %12303 = vmatpush3.msra.mxu1 %v7445_v22  ;;  %12322 = vmatpush3.msra.mxu0 %v7445_v22 }
 0x62d   : > { %12304 = vmatprep.subr.mxu1 %v7444_v50  ;;  %12323 = vmatprep.subr.mxu0 %v7444_v50 }
 0x62e   : > { %12305 = vmatpush3.msra.mxu1 %v7444_v50  ;;  %12324 = vmatpush3.msra.mxu0 %v7444_v50 }
 0x62f   : > { %12328 = vmatprep.subr.mxu1 %v7451_v32  ;;  %12347 = vmatprep.subr.mxu0 %v7451_v32 }
 0x630   : > { %12307 = vmatmul.mubr.msk.f32.vlgmr.msra.gmra.mxu1 %vm7454_vm7, %v7453_v46  ;;  %12326 = vmatmul.mubr.msk.f32.vlgmr.msra.gmra.mxu0 %vm7454_vm7, %v7538_v4  ;;  %v8285_v46 = vld [vmem:[#allocation17 + $0xb8] sm:$0xff] }
 0x631   : > { %12329 = vmatpush3.msra.mxu1 %v7451_v32  ;;  %12348 = vmatpush3.msra.mxu0 %v7451_v32  ;;  %v8191_v32 = vld [vmem:[#allocation17 + $0x88] sm:$0xff] }
 0x632   : > { %12330 = vmatprep.subr.mxu1 %v7450_v15  ;;  %12349 = vmatprep.subr.mxu0 %v7450_v15 }
 0x633   : > { %12331 = vmatpush3.msra.mxu1 %v7450_v15  ;;  %12350 = vmatpush3.msra.mxu0 %v7450_v15  ;;  %v8103_v15 = vld [vmem:[#allocation17 + $0x78] sm:$0xff] }
 0x634   : > { %12332 = vmatprep.subr.mxu1 %v7449_v8  ;;  %12351 = vmatprep.subr.mxu0 %v7449_v8 }
 0x635   : > { %12333 = vmatpush3.msra.mxu1 %v7449_v8  ;;  %12352 = vmatpush3.msra.mxu0 %v7449_v8  ;;  %v8102_v8 = vld [vmem:[#allocation17 + $0x70] sm:$0xff] }
 0x636   : > { %12334 = vmatprep.subr.mxu1 %v7448_v1  ;;  %12353 = vmatprep.subr.mxu0 %v7448_v1 }
 0x637   : > { %12335 = vmatpush3.msra.mxu1 %v7448_v1  ;;  %12354 = vmatpush3.msra.mxu0 %v7448_v1 }
 0x638   : > { %12336 = vmatprep.subr.mxu1 %v7447_v58  ;;  %12355 = vmatprep.subr.mxu0 %v7447_v58 }
 0x639   : > { %12337 = vmatpush3.msra.mxu1 %v7447_v58  ;;  %12356 = vmatpush3.msra.mxu0 %v7447_v58  ;;  %v8101_v58 = vld [vmem:[#allocation17 + $0x68] sm:$0xff] }
 0x63a   : > { %12338 = vmatprep.subr.mxu1 %v7446_v27  ;;  %12357 = vmatprep.subr.mxu0 %v7446_v27 }
 0x63b   : > { %12339 = vmatpush3.msra.mxu1 %v7446_v27  ;;  %12358 = vmatpush3.msra.mxu0 %v7446_v27  ;;  %v8100_v27 = vld [vmem:[#allocation17 + $0x60] sm:$0xff] }
 0x63c   : > { %12340 = vmatprep.subr.mxu1 %v7445_v22  ;;  %12359 = vmatprep.subr.mxu0 %v7445_v22 }
 0x63d   : > { %12341 = vmatpush3.msra.mxu1 %v7445_v22  ;;  %12360 = vmatpush3.msra.mxu0 %v7445_v22  ;;  %v8375_v22 = vld [vmem:[#allocation17 + $0xc8] sm:$0xff] }
 0x63e   : > { %12342 = vmatprep.subr.mxu1 %v7444_v50  ;;  %12361 = vmatprep.subr.mxu0 %v7444_v50 }
 0x63f   : > { %12343 = vmatpush3.msra.mxu1 %v7444_v50  ;;  %12344 = vmatprep.mubr.msk.f32.mxu1 %vm7454_vm7, %v7621_v53 }
 0x640   : > { %12362 = vmatpush3.msra.mxu0 %v7444_v50  ;;  %12363 = vmatprep.mubr.msk.f32.mxu0 %vm7454_vm7, %v7705_v45  ;;  %v8374_v45 = vld [vmem:[#allocation17 + $0xc0] sm:$0xff] }
 0x641   : > { %12345 = vmatmul.mubr.msk.f32.vlgmr.msra.gmra.mxu1 %vm7454_vm7, %v7622_v2  ;;  %12364 = vmatmul.mubr.msk.f32.vlgmr.msra.gmra.mxu0 %vm7454_vm7, %v7706_v20 }
 0x642   : > { %12366 = vmatprep.subr.mxu1 %v7827_v12  ;;  %12388 = vmatprep.subr.mxu0 %v8011_v47 }
 0x643   : > { %12367 = vmatpush3.msra.mxu1 %v7827_v12  ;;  %12389 = vmatpush3.msra.mxu0 %v8011_v47  ;;  %v8284_v12 = vld [vmem:[#allocation17 + $0xb0] sm:$0xff]  ;;  %v8559_v47 = vld [vmem:[#allocation17 + $0x118] sm:$0xff] }
 0x644   : > { %12368 = vmatprep.subr.mxu1 %v7826_v21  ;;  %12390 = vmatprep.subr.mxu0 %v8010_v63 }
 0x645   : > { %12369 = vmatpush3.msra.mxu1 %v7826_v21  ;;  %12391 = vmatpush3.msra.mxu0 %v8010_v63  ;;  %v8283_v63 = vld [vmem:[#allocation17 + $0xa8] sm:$0xff] }
 0x646   : > { %12370 = vmatprep.subr.mxu1 %v7825_v0  ;;  %12392 = vmatprep.subr.mxu0 %v8009_v33 }
 0x647   : > { %12371 = vmatpush3.msra.mxu1 %v7825_v0  ;;  %12393 = vmatpush3.msra.mxu0 %v8009_v33  ;;  %v8558_v33 = vld [vmem:[#allocation17 + $0x110] sm:$0xff] }
 0x648   : > { %12372 = vmatprep.subr.mxu1 %v7824_v60  ;;  %12394 = vmatprep.subr.mxu0 %v8008_v59 }
 0x649   : > { %12373 = vmatpush3.msra.mxu1 %v7824_v60  ;;  %12395 = vmatpush3.msra.mxu0 %v8008_v59  ;;  %v8282_v60 = vld [vmem:[#allocation17 + $0xa0] sm:$0xff] }
 0x64a   : > { %12377 = vmatprep.subr.mxu1 %v7820_v55  ;;  %12410 = vmatprep.subr.mxu0 %v8193_v36 }
 0x6f0   : > { %v12308_v39 = vpop.f32.mrf.mxu1  ;;  %v12327_v28 = vpop.f32.mrf.mxu0 }
 0x6f1   : > { %v7789_v23 = vmax.f32 %v12308_v39, %v12327_v28  ;;  %v8556_v28 = vld [vmem:[#allocation17 + $0x100] sm:$0xff] }
 0x6f2   : > { %v7527_v34 = vpop.f32.mrf.mxu1  ;;  %v7611_v16 = vpop.f32.mrf.mxu0 }
 0x6f3   : > { %v7788_v56 = vmax.f32 %v7527_v34, %v7611_v16  ;;  %v8466_v16 = vld [vmem:[#allocation17 + $0xf0] sm:$0xff] }
 0x701   : > { %v12346_v14 = vpop.f32.mrf.mxu1  ;;  %v12365_v5 = vpop.f32.mrf.mxu0 }
 0x702   : > { %v7791_v52 = vmax.f32 %v12346_v14, %v12365_v5  ;;  %v8465_v5 = vld [vmem:[#allocation17 + $0xe8] sm:$0xff] }
 0x703   : > { %v7695_v11 = vpop.f32.mrf.mxu1  ;;  %v7779_v57 = vpop.f32.mrf.mxu0 }
 0x704   : > { %v7793_v54 = vmax.f32 %v7789_v23, %v7791_v52  ;;  %v7790_v29 = vmax.f32 %v7695_v11, %v7779_v57  ;;  %v8464_v23 = vld [vmem:[#allocation17 + $0xe0] sm:$0xff] }
 0x706   : > { %7800 = vst.msk [vmem:[#allocation4 + $0x10] sm:$0xff] %vm7364_vm6, %v7793_v54  ;;  %v7792_v3 = vmax.f32 %v7788_v56, %v7790_v29 }
 0x708   : > { %7799 = vst.msk [vmem:[#allocation4 + $0x8] sm:$0xff] %vm7364_vm6, %v7792_v3 }
 0x70d   : > { %v8188_v1 = vld [vmem:[#allocation4 + $0x10] sm:$0xff] }
 0x70e   : > { %v8370_v2 = vld [vmem:[#allocation4 + $0x13] sm:$0xff] }
 0x70f   : > { %v7821_v51 = vld [vmem:[#allocation4 + $0x4] sm:$0xff]  ;;  %v16332_v30 = vld [vmem:[#allocation4 + $0xc] sm:$0xff]  ;;  %v8372_v21 = vmul.f32 %v8370_v2, %v16330_v41  ;;  %v8552_v34 = vld [vmem:[#allocation4 + $0x15] sm:$0xff] }
 0x710   : > { %v7801_v43 = vld [vmem:[#allocation4 + $0x3] sm:$0xff]  ;;  %12374 = vmatprep.mubr.msk.f32.mxu1 %vm7364_vm6, %v7821_v51  ;;  %v16339_v42 = vld [vmem:[#allocation4 + $0xd] sm:$0xff]  ;;  %v8554_v14 = vmul.f32 %v8552_v34, %v16334_v9 }
 0x711   : > { %v7815_v38 = vmul.f32 %v7808_v6, %v7801_v43  ;;  %v7990_v19 = vld [vmem:[#allocation4 + $0x5] sm:$0xff]  ;;  %12375 = vmatmul.mubr.msk.f32.vlgmr.msra.gmra.mxu1 %vm7364_vm6, %v16332_v30  ;;  %v8006_v48 = vmul.f32 %v16334_v9, %v16339_v42  ;;  %v8096_v50 = vld [vmem:[#allocation4 + $0xf] sm:$0xff]  ;;  %v8553_v0 = vmul.f32 %v16336_v24, %v16339_v42 }
 0x712   : > { %v8005_v62 = vmul.f32 %v16336_v24, %v7990_v19  ;;  %12378 = vmatpush3.msra.mxu1 %v7820_v55  ;;  %v7802_v26 = vld [vmem:[#allocation4 + $0xb] sm:$0xff]  ;;  %v8098_v53 = vmul.f32 %v8096_v50, %v16330_v41  ;;  %v8462_v52 = vld [vmem:[#allocation4 + $0x14] sm:$0xff] }
 0x713   : > { %12385 = vmatprep.mubr.msk.f32.mxu1 %vm7364_vm6, %v7815_v38  ;;  %12379 = vmatprep.subr.mxu1 %v7819_v18  ;;  %v8095_v40 = vld [vmem:[#allocation4 + $0x7] sm:$0xff]  ;;  %v7816_v13 = vmul.f32 %v16330_v41, %v7802_v26  ;;  %v8371_v61 = vmul.f32 %v7808_v6, %v7802_v26  ;;  %v8278_v59 = vld [vmem:[#allocation4 + $0x11] sm:$0xff] }
 0x714   : > { %12396 = vmatprep.mubr.msk.f32.mxu0 %vm7364_vm6, %v8005_v62  ;;  %12380 = vmatpush3.msra.mxu1 %v7819_v18  ;;  %v8097_v31 = vmul.f32 %v8095_v40, %v7808_v6  ;;  %v8187_v25 = vld [vmem:[#allocation4 + $0x8] sm:$0xff]  ;;  %v8280_v39 = vmul.f32 %v8278_v59, %v16334_v9 }
 0x715   : > { %12397 = vmatmul.mubr.msk.f32.vlgmr.msra.gmra.mxu0 %vm7364_vm6, %v8006_v48  ;;  %12381 = vmatprep.subr.mxu1 %v7818_v35  ;;  %v8277_v4 = vld [vmem:[#allocation4 + $0x9] sm:$0xff] }
 0x716   : > { %12411 = vmatpush3.msra.mxu0 %v8193_v36  ;;  %12382 = vmatpush3.msra.mxu1 %v7818_v35  ;;  %v8279_v20 = vmul.f32 %v8277_v4, %v16336_v24  ;;  %v8557_v55 = vld [vmem:[#allocation17 + $0x108] sm:$0xff]  ;;  %v8467_v36 = vld [vmem:[#allocation17 + $0xf8] sm:$0xff] }
 0x717   : > { %12412 = vmatprep.subr.mxu0 %v8192_v37  ;;  %12383 = vmatprep.subr.mxu1 %v7817_v49 }
 0x718   : > { %12413 = vmatpush3.msra.mxu0 %v8192_v37  ;;  %12384 = vmatpush3.msra.mxu1 %v7817_v49 }
 0x719   : > { %12414 = vmatprep.subr.mxu0 %v8191_v32  ;;  %12386 = vmatmul.mubr.msk.f32.vlgmr.msra.gmra.mxu1 %vm7364_vm6, %v7816_v13 }
 0x71a   : > { %12415 = vmatpush3.msra.mxu0 %v8191_v32  ;;  %12399 = vmatprep.subr.mxu1 %v8103_v15 }
 0x71b   : > { %12416 = vmatprep.subr.mxu0 %v8190_v44  ;;  %12400 = vmatpush3.msra.mxu1 %v8103_v15 }
 0x71c   : > { %12407 = vmatprep.mubr.msk.f32.mxu1 %vm7364_vm6, %v8097_v31  ;;  %12417 = vmatpush3.msra.mxu0 %v8190_v44 }
 0x71d   : > { %12418 = vmatprep.mubr.msk.f32.mxu0 %vm7364_vm6, %v8187_v25  ;;  %12401 = vmatprep.subr.mxu1 %v8102_v8 }
 0x71e   : > { %12419 = vmatmul.mubr.msk.f32.vlgmr.msra.gmra.mxu0 %vm7364_vm6, %v8188_v1  ;;  %12432 = vmatprep.subr.mxu0 %v8377_v17 }
 0x71f   : > { %12402 = vmatpush3.msra.mxu1 %v8102_v8  ;;  %12433 = vmatpush3.msra.mxu0 %v8377_v17  ;;  %v10774_v8 = vld [vmem:[#allocation18] ss:$0 sm:$0xff] }
 0x720   : > { %12440 = vmatprep.mubr.msk.f32.mxu0 %vm7364_vm6, %v8371_v61  ;;  %12403 = vmatprep.subr.mxu1 %v8101_v58 }
 0x721   : > { %12434 = vmatprep.subr.mxu0 %v8376_v7  ;;  %12404 = vmatpush3.msra.mxu1 %v8101_v58 }
 0x722   : > { %12435 = vmatpush3.msra.mxu0 %v8376_v7  ;;  %12405 = vmatprep.subr.mxu1 %v8100_v27 }
 0x723   : > { %12436 = vmatprep.subr.mxu0 %v8375_v22  ;;  %12406 = vmatpush3.msra.mxu1 %v8100_v27 }
 0x724   : > { %12437 = vmatpush3.msra.mxu0 %v8375_v22  ;;  %12408 = vmatmul.mubr.msk.f32.vlgmr.msra.gmra.mxu1 %vm7364_vm6, %v8098_v53 }
 0x725   : > { %12421 = vmatprep.subr.mxu1 %v8285_v46  ;;  %12438 = vmatprep.subr.mxu0 %v8374_v45 }
 0x726   : > { %12422 = vmatpush3.msra.mxu1 %v8285_v46  ;;  %12429 = vmatprep.mubr.msk.f32.mxu1 %vm7364_vm6, %v8279_v20 }
 0x727   : > { %12439 = vmatpush3.msra.mxu0 %v8374_v45  ;;  %12423 = vmatprep.subr.mxu1 %v8284_v12 }
 0x728   : > { %12441 = vmatmul.mubr.msk.f32.vlgmr.msra.gmra.mxu0 %vm7364_vm6, %v8372_v21  ;;  %12454 = vmatprep.subr.mxu0 %v8559_v47 }
 0x729   : > { %12424 = vmatpush3.msra.mxu1 %v8284_v12  ;;  %12455 = vmatpush3.msra.mxu0 %v8559_v47 }
 0x72a   : > { %12462 = vmatprep.mubr.msk.f32.mxu0 %vm7364_vm6, %v8553_v0  ;;  %12425 = vmatprep.subr.mxu1 %v8283_v63 }
 0x72b   : > { %12456 = vmatprep.subr.mxu0 %v8558_v33  ;;  %12426 = vmatpush3.msra.mxu1 %v8283_v63 }
 0x72c   : > { %12457 = vmatpush3.msra.mxu0 %v8558_v33  ;;  %12427 = vmatprep.subr.mxu1 %v8282_v60 }
 0x72d   : > { %12458 = vmatprep.subr.mxu0 %v8557_v55  ;;  %12428 = vmatpush3.msra.mxu1 %v8282_v60 }
 0x72e   : > { %12459 = vmatpush3.msra.mxu0 %v8557_v55  ;;  %12430 = vmatmul.mubr.msk.f32.vlgmr.msra.gmra.mxu1 %vm7364_vm6, %v8280_v39 }
 0x72f   : > { %12443 = vmatprep.subr.mxu1 %v8467_v36  ;;  %12460 = vmatprep.subr.mxu0 %v8556_v28 }
 0x730   : > { %12444 = vmatpush3.msra.mxu1 %v8467_v36  ;;  %12451 = vmatprep.mubr.msk.f32.mxu1 %vm7364_vm6, %v16332_v30 }
 0x731   : > { %12461 = vmatpush3.msra.mxu0 %v8556_v28  ;;  %12445 = vmatprep.subr.mxu1 %v8466_v16 }
 0x732   : > { %12463 = vmatmul.mubr.msk.f32.vlgmr.msra.gmra.mxu0 %vm7364_vm6, %v8554_v14  ;;  %12446 = vmatpush3.msra.mxu1 %v8466_v16 }
 0x733   : > { %12479 = vmatprep.subr.mxu0 %v17151_v10  ;;  %12447 = vmatprep.subr.mxu1 %v8465_v5 }
 0x734   : > { %12448 = vmatpush3.msra.mxu1 %v8465_v5  ;;  %12483 = vmatprep.mubr.msk.f32.mxu0 %vm13194_vm9, %v17151_v10 }
 0x735   : > { %12449 = vmatprep.subr.mxu1 %v8464_v23 }
 0x736   : > { %12450 = vmatpush3.msra.mxu1 %v8464_v23 }
 0x737   : > { %12452 = vmatmul.mubr.msk.f32.vlgmr.msra.gmra.mxu1 %vm7364_vm6, %v8462_v52  ;;  %12465 = vmatprep.subr.mxu1 %v17151_v10 }
 0x738   : > { %12469 = vmatprep.mubr.msk.f32.mxu1 %vm13194_vm9, %v17151_v10 }
 0x7d1   : > { %v12376_v11 = vpop.f32.mrf.mxu1 }
 0x7d3   : > { %v7900_v57 = vpop.f32.mrf.mxu1 }
 0x7d5   : > { %v12398_v54 = vpop.f32.mrf.mxu0 }
 0x7d7   : > { %v8084_v51 = vpop.f32.mrf.mxu0 }
 0x7d9   : > { %v12387_v56 = vpop.f32.mrf.mxu1 }
 0x7da   : > { %v7987_v3 = vadd.f32 %v12387_v56, %v12376_v11 }
 0x7db   : > { %v7981_v29 = vpop.f32.mrf.mxu1 }
 0x7dc   : > { %v7982_v6 = vadd.f32 %v7981_v29, %v7900_v57  ;;  %v8094_v30 = vadd.f32 %v12398_v54, %v7987_v3 }
 0x7de   : > { %v12420_v43 = vpop.f32.mrf.mxu0  ;;  %v8093_v18 = vadd.f32 %v8084_v51, %v7982_v6  ;;  %v10778_v6 = vld [vmem:[%s16572_s14 + $0x8] sm:$0xf]  ;;  %v10776_v51 = vld [vmem:[%s16572_s14 + $0x4] sm:$0xf] }
 0x7e0   : > { %v8266_v42 = vpop.f32.mrf.mxu0 }
 0x7e4   : > { %v12409_v41 = vpop.f32.mrf.mxu1 }
 0x7e5   : > { %v8186_v24 = vadd.f32 %v12409_v41, %v8094_v30  ;;  %v8685_v41 = vld [vmem:[%s16572_s14] sm:$0xf]  ;;  %v10780_v30 = vld [vmem:[%s16572_s14 + $0xc] sm:$0xf] }
 0x7e6   : > { %v8176_v9 = vpop.f32.mrf.mxu1 }
 0x7e7   : > { %v8185_v38 = vadd.f32 %v8176_v9, %v8093_v18  ;;  %v8276_v62 = vadd.f32 %v12420_v43, %v8186_v24  ;;  %v9017_v43 = vld [vmem:[#allocation21 + $0x78] sm:$0xff]  ;;  %v9016_v9 = vld [vmem:[#allocation21 + $0x70] sm:$0xff]  ;;  %v9015_v18 = vld [vmem:[#allocation21 + $0x68] sm:$0xff] }
 0x7e8   : > { %v12442_v48 = vpop.f32.mrf.mxu0  ;;  %v9007_v24 = vld [vmem:[#allocation21 + $0x38] sm:$0xff] }
 0x7e9   : > { %v8275_v49 = vadd.f32 %v8266_v42, %v8185_v38  ;;  %v9006_v38 = vld [vmem:[#allocation21 + $0x30] sm:$0xff]  ;;  %v9005_v42 = vld [vmem:[#allocation21 + $0x28] sm:$0xff] }
 0x7ea   : > { %v8450_v32 = vpop.f32.mrf.mxu0 }
 0x7ee   : > { %v12431_v19 = vpop.f32.mrf.mxu1 }
 0x7ef   : > { %v8368_v37 = vadd.f32 %v12431_v19, %v8276_v62  ;;  %v9014_v19 = vld [vmem:[#allocation21 + $0x60] sm:$0xff]  ;;  %v9013_v62 = vld [vmem:[#allocation21 + $0x58] sm:$0xff] }
 0x7f0   : > { %v8358_v35 = vpop.f32.mrf.mxu1 }
 0x7f1   : > { %v8367_v26 = vadd.f32 %v8358_v35, %v8275_v49  ;;  %v8460_v40 = vadd.f32 %v12442_v48, %v8368_v37  ;;  %v9004_v48 = vld [vmem:[#allocation21 + $0x20] sm:$0xff]  ;;  %v9012_v35 = vld [vmem:[#allocation21 + $0x50] sm:$0xff]  ;;  %v9003_v37 = vld [vmem:[#allocation21 + $0x18] sm:$0xff] }
 0x7f2   : > { %v12464_v13 = vpop.f32.mrf.mxu0  ;;  %v9011_v49 = vld [vmem:[#allocation21 + $0x48] sm:$0xff] }
 0x7f3   : > { %v8459_v31 = vadd.f32 %v8450_v32, %v8367_v26  ;;  %v9002_v26 = vld [vmem:[#allocation21 + $0x10] sm:$0xff]  ;;  %v9010_v32 = vld [vmem:[#allocation21 + $0x40] sm:$0xff] }
 0x7f4   : > { %v8632_v61 = vpop.f32.mrf.mxu0 }
 0x7f7   : > { %v12453_v15 = vpop.f32.mrf.mxu1 }
 0x7f8   : > { %v8550_v44 = vadd.f32 %v12453_v15, %v8460_v40  ;;  %v9001_v40 = vld [vmem:[#allocation21 + $0x8] sm:$0xff] }
 0x7f9   : > { %v8540_v25 = vpop.f32.mrf.mxu1 }
 0x7fa   : > { %v8642_v17 = vadd.f32 %v12464_v13, %v8550_v44  ;;  %v8549_v1 = vadd.f32 %v8540_v25, %v8459_v31  ;;  %v9000_v13 = vld [vmem:[#allocation21] sm:$0xff] }
 0x7fc   : > { %v8651_v58 = vadd.f32 %v10774_v8, %v8642_v17  ;;  %v8641_v7 = vadd.f32 %v8632_v61, %v8549_v1 }
 0x7fe   : > { %v8650_v27 = vadd.f32 %v10774_v8, %v8641_v7  ;;  %v8653_v22 = vsel %vm7454_vm7, %v8651_v58, 0.0 }
 0x800   : > { %v8652_v50 = vsel %vm7454_vm7, %v8650_v27, 0.0 }
 0x801   : > { %v8654_v46 = vadd.f32 %v8653_v22, %v8652_v50  ;;  %v9181_v22 = vld [vmem:[#allocation21 + $0xb8] sm:$0xff]  ;;  %v16430_v50 = vpop.permute.xlu0 %8996 }
 0x803   : > { %v8655_v4 = vrot.slane %v8654_v46, 4 }
 0x805   : > { %v8656_v53 = vadd.f32 %v8655_v4, %v8654_v46 }
 0x807   : > { %v8657_v45 = vrot.slane %v8656_v53, 2 }
 0x809   : > { %v8658_v2 = vadd.f32 %v8657_v45, %v8656_v53  ;;  %v9180_v45 = vld [vmem:[#allocation21 + $0xb0] sm:$0xff] }
 0x80b   : > { %v8659_v20 = vrot.slane %v8658_v2, 1 }
 0x80d   : > { %v8660_v12 = vadd.f32 %v8659_v20, %v8658_v2  ;;  %v9265_v2 = vld [vmem:[#allocation21 + $0xf8] sm:$0xff]  ;;  %v9179_v20 = vld [vmem:[#allocation21 + $0xa8] sm:$0xff] }
 0x80f   : > { %v8662_v21 = vmul.f32 0.0625, %v8660_v12  ;;  %v9264_v12 = vld [vmem:[#allocation21 + $0xf0] sm:$0xff] }
 0x811   : > { %v8663_v47 = vsub.f32 %v8650_v27, %v8662_v21  ;;  %v8664_v0 = vsub.f32 %v8651_v58, %v8662_v21  ;;  %v9178_v21 = vld [vmem:[#allocation21 + $0xa0] sm:$0xff] }
 0x813   : > { %v8665_v63 = vmul.f32 %v8663_v47, %v8663_v47  ;;  %v8666_v33 = vmul.f32 %v8664_v0, %v8664_v0 }
 0x815   : > { %v8667_v60 = vsel %vm7454_vm7, %v8665_v63, 0.0  ;;  %v8668_v55 = vsel %vm7454_vm7, %v8666_v33, 0.0  ;;  %v9262_v63 = vld [vmem:[#allocation21 + $0xe0] sm:$0xff]  ;;  %v9176_v33 = vld [vmem:[#allocation21 + $0x90] sm:$0xff] }
 0x816   : > { %v8669_v59 = vadd.f32 %v8668_v55, %v8667_v60  ;;  %v9261_v60 = vld [vmem:[#allocation21 + $0xd8] sm:$0xff]  ;;  %v9175_v55 = vld [vmem:[#allocation21 + $0x88] sm:$0xff] }
 0x818   : > { %v8670_v36 = vrot.slane %v8669_v59, 4 }
 0x81a   : > { %v8671_v39 = vadd.f32 %v8670_v36, %v8669_v59  ;;  %v9260_v59 = vld [vmem:[#allocation21 + $0xd0] sm:$0xff] }
 0x81c   : > { %v8672_v28 = vrot.slane %v8671_v39, 2 }
 0x81e   : > { %v8673_v34 = vadd.f32 %v8672_v28, %v8671_v39  ;;  %v9174_v39 = vld [vmem:[#allocation21 + $0x80] sm:$0xff]  ;;  %v9259_v28 = vld [vmem:[#allocation21 + $0xc8] sm:$0xff] }
 0x820   : > { %v8674_v16 = vrot.slane %v8673_v34, 1 }
 0x822   : > { %v8675_v14 = vadd.f32 %v8674_v16, %v8673_v34  ;;  %v16448_v34 = vpop.permute.xlu1 %9169 }
 0x824   : > { %v8676_v5 = vmul.f32 0.0625, %v8675_v14  ;;  %v9258_v14 = vld [vmem:[#allocation21 + $0xc0] sm:$0xff] }
 0x826   : > { %v8677_v23 = vadd.f32 1e-05, %v8676_v5  ;;  %v9349_v5 = vld [vmem:[#allocation21 + $0x138] sm:$0xff] }
 0x828   : > { %12824 = vrsqrt.f32 %v8677_v23 }
 0x835   : > { %v12825_v52 = vpop.eup %12824 }
 0x836   : > { %v8679_v11 = vmul.f32 %v12825_v52, %v8663_v47  ;;  %v8680_v57 = vmul.f32 %v12825_v52, %v8664_v0  ;;  %v9263_v47 = vld [vmem:[#allocation21 + $0xe8] sm:$0xff]  ;;  %v9177_v0 = vld [vmem:[#allocation21 + $0x98] sm:$0xff]  ;;  %v9348_v52 = vld [vmem:[#allocation21 + $0x130] sm:$0xff] }
 0x838   : > { %v8682_v56 = vmul.f32 0.2, %v8680_v57  ;;  %v8681_v54 = vmul.f32 0.2, %v8679_v11 }
 0x83a   : > { %v8684_v29 = vmax.f32 %v8680_v57, %v8682_v56  ;;  %v8683_v3 = vmax.f32 %v8679_v11, %v8681_v54  ;;  %v9434_v11 = vld [vmem:[#allocation21 + $0x178] sm:$0xff]  ;;  %v9347_v57 = vld [vmem:[#allocation21 + $0x128] sm:$0xff]  ;;  %v9433_v56 = vld [vmem:[#allocation21 + $0x170] sm:$0xff] }
 0x83b   : > { %v9346_v54 = vld [vmem:[#allocation21 + $0x120] sm:$0xff] }
 0x83c   : > { %12466 = vmatpush3.msra.mxu1 %v8684_v29  ;;  %12480 = vmatpush3.msra.mxu0 %v8684_v29 }
 0x83d   : > { %12467 = vmatprep.subr.mxu1 %v17151_v10  ;;  %12481 = vmatprep.subr.mxu0 %v17151_v10 }
 0x83e   : > { %12468 = vmatpush3.msra.mxu1 %v8683_v3  ;;  %12482 = vmatpush3.msra.mxu0 %v8683_v3 }
 0x83f   : > { %12470 = vmatmul.mubr.msk.f32.vlgmr.msra.gmra.mxu1 %vm5867_vm4, %v8685_v41  ;;  %12472 = vmatprep.subr.mxu1 %v17151_v10  ;;  %v9431_v41 = vld [vmem:[#allocation21 + $0x160] sm:$0xff] }
 0x840   : > { %12473 = vmatpush3.msra.mxu1 %v8684_v29  ;;  %12476 = vmatprep.mubr.msk.f32.mxu1 %vm13194_vm9, %v17151_v10 }
 0x841   : > { %12474 = vmatprep.subr.mxu1 %v17151_v10  ;;  %12484 = vmatmul.mubr.msk.f32.vlgmr.msra.gmra.mxu0 %vm5867_vm4, %v10778_v6  ;;  %v9344_v6 = vld [vmem:[#allocation21 + $0x110] sm:$0xff] }
 0x842   : > { %12475 = vmatpush3.msra.mxu1 %v8683_v3  ;;  %12493 = vmatprep.subr.mxu0 %v17151_v10 }
 0x843   : > { %12477 = vmatmul.mubr.msk.f32.vlgmr.msra.gmra.mxu1 %vm5867_vm4, %v10776_v51  ;;  %12486 = vmatprep.subr.mxu1 %v17151_v10  ;;  %v9430_v51 = vld [vmem:[#allocation21 + $0x158] sm:$0xff] }
 0x844   : > { %12487 = vmatpush3.msra.mxu1 %v8684_v29  ;;  %12490 = vmatprep.mubr.msk.f32.mxu1 %vm13194_vm9, %v17151_v10  ;;  %v9432_v29 = vld [vmem:[#allocation21 + $0x168] sm:$0xff] }
 0x845   : > { %12488 = vmatprep.subr.mxu1 %v17151_v10  ;;  %12509 = vmatprep.mubr.msk.f32.mxu0 %vm13194_vm9, %v17151_v10 }
 0x846   : > { %12489 = vmatpush3.msra.mxu1 %v8683_v3  ;;  %12494 = vmatpush3.msra.mxu0 %v9017_v43  ;;  %v9345_v3 = vld [vmem:[#allocation21 + $0x118] sm:$0xff]  ;;  %v9429_v43 = vld [vmem:[#allocation21 + $0x150] sm:$0xff] }
 0x847   : > { %12491 = vmatmul.mubr.msk.f32.vlgmr.msra.gmra.mxu1 %vm5867_vm4, %v10780_v30  ;;  %12512 = vmatprep.subr.mxu1 %v17151_v10  ;;  %v9343_v30 = vld [vmem:[#allocation21 + $0x108] sm:$0xff] }
 0x848   : > { %12528 = vmatprep.mubr.msk.f32.mxu1 %vm13194_vm9, %v17151_v10  ;;  %12495 = vmatprep.subr.mxu0 %v17151_v10 }
 0x849   : > { %12513 = vmatpush3.msra.mxu1 %v9007_v24  ;;  %12496 = vmatpush3.msra.mxu0 %v9016_v9  ;;  %v9342_v9 = vld [vmem:[#allocation21 + $0x100] sm:$0xff]  ;;  %v9428_v24 = vld [vmem:[#allocation21 + $0x148] sm:$0xff] }
 0x84a   : > { %12514 = vmatprep.subr.mxu1 %v17151_v10  ;;  %12497 = vmatprep.subr.mxu0 %v17151_v10 }
 0x84b   : > { %12498 = vmatpush3.msra.mxu0 %v9015_v18  ;;  %12515 = vmatpush3.msra.mxu1 %v9006_v38  ;;  %v9427_v18 = vld [vmem:[#allocation21 + $0x140] sm:$0xff] }
 0x84c   : > { %12499 = vmatprep.subr.mxu0 %v17151_v10  ;;  %12516 = vmatprep.subr.mxu1 %v17151_v10 }
 0x84d   : > { %12500 = vmatpush3.msra.mxu0 %v9014_v19  ;;  %12517 = vmatpush3.msra.mxu1 %v9005_v42  ;;  %v9518_v42 = vld [vmem:[#allocation21 + $0x1b8] sm:$0xff] }
 0x84e   : > { %12501 = vmatprep.subr.mxu0 %v17151_v10  ;;  %12518 = vmatprep.subr.mxu1 %v17151_v10 }
 0x84f   : > { %12502 = vmatpush3.msra.mxu0 %v9013_v62  ;;  %12519 = vmatpush3.msra.mxu1 %v9004_v48  ;;  %v9517_v48 = vld [vmem:[#allocation21 + $0x1b0] sm:$0xff] }
 0x850   : > { %12503 = vmatprep.subr.mxu0 %v17151_v10  ;;  %12520 = vmatprep.subr.mxu1 %v17151_v10 }
 0x851   : > { %12504 = vmatpush3.msra.mxu0 %v9012_v35  ;;  %12521 = vmatpush3.msra.mxu1 %v9003_v37  ;;  %v9602_v35 = vld [vmem:[#allocation21 + $0x1f8] sm:$0xff]  ;;  %v9516_v37 = vld [vmem:[#allocation21 + $0x1a8] sm:$0xff] }
 0x852   : > { %12505 = vmatprep.subr.mxu0 %v17151_v10  ;;  %12522 = vmatprep.subr.mxu1 %v17151_v10 }
 0x853   : > { %12506 = vmatpush3.msra.mxu0 %v9011_v49  ;;  %12523 = vmatpush3.msra.mxu1 %v9002_v26  ;;  %v9601_v49 = vld [vmem:[#allocation21 + $0x1f0] sm:$0xff]  ;;  %v9515_v26 = vld [vmem:[#allocation21 + $0x1a0] sm:$0xff] }
 0x854   : > { %12507 = vmatprep.subr.mxu0 %v17151_v10  ;;  %12524 = vmatprep.subr.mxu1 %v17151_v10 }
 0x855   : > { %12508 = vmatpush3.msra.mxu0 %v9010_v32  ;;  %12525 = vmatpush3.msra.mxu1 %v9001_v40  ;;  %v9600_v32 = vld [vmem:[#allocation21 + $0x1e8] sm:$0xff]  ;;  %v9514_v40 = vld [vmem:[#allocation21 + $0x198] sm:$0xff] }
 0x856   : > { %12526 = vmatprep.subr.mxu1 %v17151_v10  ;;  %12531 = vmatprep.subr.mxu0 %v17151_v10 }
 0x857   : > { %12527 = vmatpush3.msra.mxu1 %v9000_v13  ;;  %v9599_v13 = vld [vmem:[#allocation21 + $0x1e0] sm:$0xff] }
 0x858   : > { %12550 = vmatprep.subr.mxu1 %v17151_v10 }
 0x8ff   : > { %v8755_v15 = vpop.f32.mrf.mxu1 }
 0x901   : > { %v12471_v44 = vpop.f32.mrf.mxu1  ;;  %v8905_v31 = vpop.f32.mrf.mxu0 }
 0x902   : > { %v9598_v44 = vld [vmem:[#allocation21 + $0x1d8] sm:$0xff] }
 0x903   : > { %v8830_v8 = vpop.f32.mrf.mxu1  ;;  %v12485_v25 = vpop.f32.mrf.mxu0 }
 0x904   : > { %v8984_v61 = vmax.f32 %v8755_v15, %v8830_v8  ;;  %v9513_v15 = vld [vmem:[#allocation21 + $0x190] sm:$0xff]  ;;  %v9511_v25 = vld [vmem:[#allocation21 + $0x180] sm:$0xff] }
 0x905   : > { %v12478_v17 = vpop.f32.mrf.mxu1  ;;  %v9597_v8 = vld [vmem:[#allocation21 + $0x1d0] sm:$0xff] }
 0x906   : > { %v9596_v17 = vld [vmem:[#allocation21 + $0x1c8] sm:$0xff] }
 0x907   : > { %v8980_v1 = vpop.f32.mrf.mxu1 }
 0x908   : > { %v8985_v58 = vmax.f32 %v8905_v31, %v8980_v1  ;;  %v9512_v31 = vld [vmem:[#allocation21 + $0x188] sm:$0xff] }
 0x909   : > { %v12492_v7 = vpop.f32.mrf.mxu1 }
 0x90a   : > { %v8986_v27 = vmax.f32 %v8984_v61, %v8985_v58  ;;  %v9595_v61 = vld [vmem:[#allocation21 + $0x1c0] sm:$0xff]  ;;  %v9687_v58 = vld [vmem:[#allocation21 + $0x238] sm:$0xff]  ;;  %v9686_v7 = vld [vmem:[#allocation21 + $0x230] sm:$0xff] }
 0x90c   : > { %8991 = vst.msk [vmem:[#allocation5 + $0x8] sm:$0xf] %vm8990_vm11, %v8986_v27 }
 0x913   : > { %v9008_v46 = vld [vmem:[#allocation5 + $0x6] sm:$0xf]  ;;  %v9593_v27 = vld [vmem:[#allocation5 + $0xa] sm:$0xf] }
 0x914   : > { %v8992_v4 = vld [vmem:[#allocation5 + $0x5] sm:$0xf]  ;;  %12510 = vmatmul.mubr.msk.f32.vlgmr.msra.gmra.mxu0 %vm7454_vm7, %v9008_v46  ;;  %v9424_v38 = vld [vmem:[#allocation5 + $0x9] sm:$0xf] }
 0x915   : > { %v8999_v53 = vmul.f32 %v16430_v50, %v8992_v4  ;;  %12532 = vmatpush3.msra.mxu0 %v9181_v22  ;;  %12547 = vmatprep.mubr.msk.f32.mxu0 %vm13194_vm9, %v17151_v10  ;;  %v9164_v36 = vld [vmem:[#allocation5 + $0x7] sm:$0xf]  ;;  %v9425_v62 = vmul.f32 %v9424_v38, %v16448_v34  ;;  %v9509_v1 = vmul.f32 %v9424_v38, %v16430_v50  ;;  %v9685_v22 = vld [vmem:[#allocation21 + $0x228] sm:$0xff]  ;;  %v9682_v4 = vld [vmem:[#allocation21 + $0x210] sm:$0xff] }
 0x916   : > { %12533 = vmatprep.subr.mxu0 %v17151_v10  ;;  %v9172_v16 = vmul.f32 %v16448_v34, %v9164_v36  ;;  %v9256_v23 = vmul.f32 %v9164_v36, %v16430_v50  ;;  %v9340_v19 = vld [vmem:[#allocation5 + $0x8] sm:$0xf]  ;;  %v9684_v50 = vld [vmem:[#allocation21 + $0x220] sm:$0xff] }
 0x917   : > { %12529 = vmatmul.mubr.msk.f32.vlgmr.msra.gmra.mxu1 %vm7454_vm7, %v8999_v53  ;;  %12534 = vmatpush3.msra.mxu0 %v9180_v45  ;;  %v9683_v46 = vld [vmem:[#allocation21 + $0x218] sm:$0xff]  ;;  %v9681_v53 = vld [vmem:[#allocation21 + $0x208] sm:$0xff] }
 0x918   : > { %12551 = vmatpush3.msra.mxu1 %v9265_v2  ;;  %12535 = vmatprep.subr.mxu0 %v17151_v10  ;;  %v9677_v45 = vld [vmem:[#allocation5 + $0xb] sm:$0xf]  ;;  %v9680_v2 = vld [vmem:[#allocation21 + $0x200] sm:$0xff] }
 0x919   : > { %12552 = vmatprep.subr.mxu1 %v17151_v10  ;;  %12536 = vmatpush3.msra.mxu0 %v9179_v20  ;;  %v9678_v20 = vmul.f32 %v9677_v45, %v16448_v34 }
 0x91a   : > { %12553 = vmatpush3.msra.mxu1 %v9264_v12  ;;  %12537 = vmatprep.subr.mxu0 %v17151_v10 }
 0x91b   : > { %12554 = vmatprep.subr.mxu1 %v17151_v10  ;;  %12538 = vmatpush3.msra.mxu0 %v9178_v21 }
 0x91c   : > { %12555 = vmatpush3.msra.mxu1 %v9263_v47  ;;  %12539 = vmatprep.subr.mxu0 %v17151_v10 }
 0x91d   : > { %12556 = vmatprep.subr.mxu1 %v17151_v10  ;;  %12540 = vmatpush3.msra.mxu0 %v9177_v0 }
 0x91e   : > { %12557 = vmatpush3.msra.mxu1 %v9262_v63  ;;  %12541 = vmatprep.subr.mxu0 %v17151_v10 }
 0x91f   : > { %12558 = vmatprep.subr.mxu1 %v17151_v10  ;;  %12542 = vmatpush3.msra.mxu0 %v9176_v33 }
 0x920   : > { %12559 = vmatpush3.msra.mxu1 %v9261_v60  ;;  %12543 = vmatprep.subr.mxu0 %v17151_v10 }
 0x921   : > { %12560 = vmatprep.subr.mxu1 %v17151_v10  ;;  %12544 = vmatpush3.msra.mxu0 %v9175_v55 }
 0x922   : > { %12561 = vmatpush3.msra.mxu1 %v9260_v59  ;;  %12545 = vmatprep.subr.mxu0 %v17151_v10 }
 0x923   : > { %12562 = vmatprep.subr.mxu1 %v17151_v10  ;;  %12546 = vmatpush3.msra.mxu0 %v9174_v39 }
 0x924   : > { %12563 = vmatpush3.msra.mxu1 %v9259_v28  ;;  %12548 = vmatmul.mubr.msk.f32.vlgmr.msra.gmra.mxu0 %vm7454_vm7, %v9172_v16 }
 0x925   : > { %12564 = vmatprep.subr.mxu1 %v17151_v10  ;;  %12569 = vmatprep.subr.mxu0 %v17151_v10 }
 0x926   : > { %12565 = vmatpush3.msra.mxu1 %v9258_v14  ;;  %12566 = vmatprep.mubr.msk.f32.mxu1 %vm13194_vm9, %v17151_v10 }
 0x927   : > { %12570 = vmatpush3.msra.mxu0 %v9349_v5  ;;  %12567 = vmatmul.mubr.msk.f32.vlgmr.msra.gmra.mxu1 %vm7454_vm7, %v9256_v23 }
 0x928   : > { %12571 = vmatprep.subr.mxu0 %v17151_v10  ;;  %12588 = vmatprep.subr.mxu1 %v17151_v10 }
 0x929   : > { %12572 = vmatpush3.msra.mxu0 %v9348_v52  ;;  %12589 = vmatpush3.msra.mxu1 %v9434_v11 }
 0x92a   : > { %12573 = vmatprep.subr.mxu0 %v17151_v10  ;;  %12590 = vmatprep.subr.mxu1 %v17151_v10 }
 0x92b   : > { %12574 = vmatpush3.msra.mxu0 %v9347_v57  ;;  %12591 = vmatpush3.msra.mxu1 %v9433_v56 }
 0x92c   : > { %12575 = vmatprep.subr.mxu0 %v17151_v10  ;;  %12592 = vmatprep.subr.mxu1 %v17151_v10 }
 0x92d   : > { %12576 = vmatpush3.msra.mxu0 %v9346_v54  ;;  %12593 = vmatpush3.msra.mxu1 %v9432_v29 }
 0x92e   : > { %12577 = vmatprep.subr.mxu0 %v17151_v10  ;;  %12594 = vmatprep.subr.mxu1 %v17151_v10 }
 0x92f   : > { %12578 = vmatpush3.msra.mxu0 %v9345_v3  ;;  %12595 = vmatpush3.msra.mxu1 %v9431_v41  ;;  %v10792_v41 = vld [vmem:[#allocation23] ss:$0 sm:$0xff] }
 0x930   : > { %12579 = vmatprep.subr.mxu0 %v17151_v10  ;;  %12596 = vmatprep.subr.mxu1 %v17151_v10 }
 0x931   : > { %12580 = vmatpush3.msra.mxu0 %v9344_v6  ;;  %12597 = vmatpush3.msra.mxu1 %v9430_v51 }
 0x932   : > { %12581 = vmatprep.subr.mxu0 %v17151_v10  ;;  %12598 = vmatprep.subr.mxu1 %v17151_v10 }
 0x933   : > { %12582 = vmatpush3.msra.mxu0 %v9343_v30  ;;  %12599 = vmatpush3.msra.mxu1 %v9429_v43 }
 0x934   : > { %12583 = vmatprep.subr.mxu0 %v17151_v10  ;;  %12600 = vmatprep.subr.mxu1 %v17151_v10 }
 0x935   : > { %12584 = vmatpush3.msra.mxu0 %v9342_v9  ;;  %12585 = vmatprep.mubr.msk.f32.mxu0 %vm13194_vm9, %v17151_v10 }
 0x936   : > { %12601 = vmatpush3.msra.mxu1 %v9428_v24  ;;  %12586 = vmatmul.mubr.msk.f32.vlgmr.msra.gmra.mxu0 %vm7454_vm7, %v9340_v19 }
 0x937   : > { %12602 = vmatprep.subr.mxu1 %v17151_v10  ;;  %12607 = vmatprep.subr.mxu0 %v17151_v10 }
 0x938   : > { %12603 = vmatpush3.msra.mxu1 %v9427_v18  ;;  %12604 = vmatprep.mubr.msk.f32.mxu1 %vm13194_vm9, %v17151_v10 }
 0x939   : > { %12608 = vmatpush3.msra.mxu0 %v9518_v42  ;;  %12605 = vmatmul.mubr.msk.f32.vlgmr.msra.gmra.mxu1 %vm7454_vm7, %v9425_v62 }
 0x93a   : > { %12609 = vmatprep.subr.mxu0 %v17151_v10  ;;  %12626 = vmatprep.subr.mxu1 %v17151_v10 }
 0x93b   : > { %12610 = vmatpush3.msra.mxu0 %v9517_v48  ;;  %12627 = vmatpush3.msra.mxu1 %v9602_v35 }
 0x93c   : > { %12611 = vmatprep.subr.mxu0 %v17151_v10  ;;  %12628 = vmatprep.subr.mxu1 %v17151_v10 }
 0x93d   : > { %12612 = vmatpush3.msra.mxu0 %v9516_v37  ;;  %12629 = vmatpush3.msra.mxu1 %v9601_v49 }
 0x93e   : > { %12613 = vmatprep.subr.mxu0 %v17151_v10  ;;  %12630 = vmatprep.subr.mxu1 %v17151_v10 }
 0x93f   : > { %12614 = vmatpush3.msra.mxu0 %v9515_v26  ;;  %12631 = vmatpush3.msra.mxu1 %v9600_v32 }
 0x940   : > { %12615 = vmatprep.subr.mxu0 %v17151_v10  ;;  %12632 = vmatprep.subr.mxu1 %v17151_v10 }
 0x941   : > { %12616 = vmatpush3.msra.mxu0 %v9514_v40  ;;  %12633 = vmatpush3.msra.mxu1 %v9599_v13 }
 0x942   : > { %12617 = vmatprep.subr.mxu0 %v17151_v10  ;;  %12634 = vmatprep.subr.mxu1 %v17151_v10 }
 0x943   : > { %12618 = vmatpush3.msra.mxu0 %v9513_v15  ;;  %12635 = vmatpush3.msra.mxu1 %v9598_v44 }
 0x944   : > { %12619 = vmatprep.subr.mxu0 %v17151_v10  ;;  %12636 = vmatprep.subr.mxu1 %v17151_v10 }
 0x945   : > { %12620 = vmatpush3.msra.mxu0 %v9512_v31  ;;  %12637 = vmatpush3.msra.mxu1 %v9597_v8 }
 0x946   : > { %12621 = vmatprep.subr.mxu0 %v17151_v10  ;;  %12638 = vmatprep.subr.mxu1 %v17151_v10 }
 0x947   : > { %12622 = vmatpush3.msra.mxu0 %v9511_v25  ;;  %12623 = vmatprep.mubr.msk.f32.mxu0 %vm13194_vm9, %v17151_v10 }
 0x948   : > { %12639 = vmatpush3.msra.mxu1 %v9596_v17  ;;  %12624 = vmatmul.mubr.msk.f32.vlgmr.msra.gmra.mxu0 %vm7454_vm7, %v9509_v1 }
 0x949   : > { %12640 = vmatprep.subr.mxu1 %v17151_v10  ;;  %12645 = vmatprep.subr.mxu0 %v17151_v10 }
 0x94a   : > { %12641 = vmatpush3.msra.mxu1 %v9595_v61  ;;  %12642 = vmatprep.mubr.msk.f32.mxu1 %vm13194_vm9, %v17151_v10  ;;  %v9794_v61 = vld [vmem:[%s16576_s18] sm:$0x1] }
 0x94b   : > { %12646 = vmatpush3.msra.mxu0 %v9687_v58  ;;  %12643 = vmatmul.mubr.msk.f32.vlgmr.msra.gmra.mxu1 %vm7454_vm7, %v9593_v27  ;;  %v10795_v58 = vld [vmem:[%s16576_s18 + $0x1] sm:$0x1]  ;;  %v10801_v27 = vld [vmem:[%s16576_s18 + $0x3] sm:$0x1] }
 0x94c   : > { %12647 = vmatprep.subr.mxu0 %v17151_v10  ;;  %12661 = vmatprep.mubr.msk.f32.mxu0 %vm13194_vm9, %v17151_v10 }
 0x94d   : > { %12648 = vmatpush3.msra.mxu0 %v9686_v7  ;;  %12664 = vmatprep.subr.mxu1 %v17151_v10  ;;  %v10798_v7 = vld [vmem:[%s16576_s18 + $0x2] sm:$0x1] }
 0x94e   : > { %12649 = vmatprep.subr.mxu0 %v17151_v10  ;;  %12666 = vmatprep.mubr.msk.f32.mxu1 %vm13194_vm9, %v17151_v10 }
 0x94f   : > { %12650 = vmatpush3.msra.mxu0 %v9685_v22 }
 0x950   : > { %12651 = vmatprep.subr.mxu0 %v17151_v10 }
 0x951   : > { %12652 = vmatpush3.msra.mxu0 %v9684_v50 }
 0x952   : > { %12653 = vmatprep.subr.mxu0 %v17151_v10 }
 0x953   : > { %12654 = vmatpush3.msra.mxu0 %v9683_v46 }
 0x954   : > { %12655 = vmatprep.subr.mxu0 %v17151_v10 }
 0x955   : > { %12656 = vmatpush3.msra.mxu0 %v9682_v4 }
 0x956   : > { %12657 = vmatprep.subr.mxu0 %v17151_v10 }
 0x957   : > { %12658 = vmatpush3.msra.mxu0 %v9681_v53 }
 0x958   : > { %12659 = vmatprep.subr.mxu0 %v17151_v10 }
 0x959   : > { %12660 = vmatpush3.msra.mxu0 %v9680_v2 }
 0x95a   : > { %12662 = vmatmul.mubr.msk.f32.vlgmr.msra.gmra.mxu0 %vm7454_vm7, %v9678_v20 }
 0x9d4   : > { %v9087_v12 = vpop.f32.mrf.mxu0 }
 0x9d6   : > { %v12511_v47 = vpop.f32.mrf.mxu0 }
 0x9d7   : > { %v9160_v21 = vpop.f32.mrf.mxu1 }
 0x9d8   : > { %v9161_v16 = vadd.f32 %v9160_v21, %v9087_v12  ;;  %v10099_v21 = vld [vmem:[#allocation24] sm:$0x1] }
 0x9d9   : > { %v12530_v0 = vpop.f32.mrf.mxu1 }
 0x9e4   : > { %v9251_v63 = vpop.f32.mrf.mxu0 }
 0x9e5   : > { %v9255_v14 = vadd.f32 %v9251_v63, %v9161_v16 }
 0x9e6   : > { %v12549_v33 = vpop.f32.mrf.mxu0 }
 0x9e7   : > { %v9335_v60 = vpop.f32.mrf.mxu1  ;;  %v10105_v33 = vld [vmem:[#allocation6] sm:$0x1] }
 0x9e8   : > { %v9339_v52 = vadd.f32 %v9335_v60, %v9255_v14 }
 0x9e9   : > { %v12568_v55 = vpop.f32.mrf.mxu1 }
 0x9f6   : > { %v9419_v59 = vpop.f32.mrf.mxu0 }
 0x9f7   : > { %v9423_v57 = vadd.f32 %v9419_v59, %v9339_v52 }
 0x9f8   : > { %v12587_v36 = vpop.f32.mrf.mxu0 }
 0x9f9   : > { %v9504_v39 = vpop.f32.mrf.mxu1 }
 0x9fa   : > { %v9508_v56 = vadd.f32 %v9504_v39, %v9423_v57 }
 0x9fb   : > { %v12606_v28 = vpop.f32.mrf.mxu1 }
 0xa08   : > { %v9588_v5 = vpop.f32.mrf.mxu0 }
 0xa09   : > { %v9592_v54 = vadd.f32 %v9588_v5, %v9508_v56 }
 0xa0a   : > { %v12625_v23 = vpop.f32.mrf.mxu0 }
 0xa0b   : > { %v9672_v34 = vpop.f32.mrf.mxu1 }
 0xa0c   : > { %v9676_v29 = vadd.f32 %v9672_v34, %v9592_v54 }
 0xa0d   : > { %v12644_v11 = vpop.f32.mrf.mxu1 }
 0xa1a   : > { %v9757_v3 = vpop.f32.mrf.mxu0 }
 0xa1b   : > { %v9761_v6 = vadd.f32 %v9757_v3, %v9676_v29 }
 0xa1c   : > { %v12663_v51 = vpop.f32.mrf.mxu0 }
 0xa1d   : > { %v9769_v30 = vadd.f32 %v10792_v41, %v9761_v6 }
 0xa1f   : > { %v9770_v43 = vsel %vm957_vm1, %v9769_v30, 0.0 }
 0xa20   : > { %v9771_v9 = vrot.slane %v9770_v43, 4 }
 0xa22   : > { %v9772_v24 = vadd.f32 %v9771_v9, %v9770_v43 }
 0xa24   : > { %v9773_v18 = vrot.slane %v9772_v24, 2 }
 0xa26   : > { %v9774_v38 = vadd.f32 %v9773_v18, %v9772_v24 }
 0xa28   : > { %v9775_v19 = vrot.slane %v9774_v38, 1 }
 0xa2a   : > { %v9776_v42 = vadd.f32 %v9775_v19, %v9774_v38 }
 0xa2c   : > { %v9778_v62 = vmul.f32 0.25, %v9776_v42 }
 0xa2e   : > { %v9779_v48 = vsub.f32 %v9769_v30, %v9778_v62 }
 0xa30   : > { %v9780_v35 = vmul.f32 %v9779_v48, %v9779_v48 }
 0xa32   : > { %v9781_v37 = vsel %vm957_vm1, %v9780_v35, 0.0 }
 0xa33   : > { %v9782_v49 = vrot.slane %v9781_v37, 4 }
 0xa35   : > { %v9783_v26 = vadd.f32 %v9782_v49, %v9781_v37 }
 0xa37   : > { %v9784_v32 = vrot.slane %v9783_v26, 2 }
 0xa39   : > { %v9785_v40 = vadd.f32 %v9784_v32, %v9783_v26 }
 0xa3b   : > { %v9786_v13 = vrot.slane %v9785_v40, 1 }
 0xa3d   : > { %v9787_v15 = vadd.f32 %v9786_v13, %v9785_v40 }
 0xa3f   : > { %v9788_v44 = vmul.f32 0.25, %v9787_v15 }
 0xa41   : > { %v9789_v31 = vadd.f32 1e-05, %v9788_v44 }
 0xa43   : > { %12826 = vrsqrt.f32 %v9789_v31 }
 0xa50   : > { %v12827_v8 = vpop.eup %12826 }
 0xa51   : > { %v9791_v25 = vmul.f32 %v12827_v8, %v9779_v48 }
 0xa53   : > { %v9792_v17 = vmul.f32 0.2, %v9791_v25 }
 0xa55   : > { %v9793_v1 = vmax.f32 %v9791_v25, %v9792_v17 }
 0xa57   : > { %12665 = vmatpush3.msk.msra.mxu1 %vm957_vm1, %v9793_v1 }
 0xa58   : > { %12667 = vmatmul.mubr.msk.f32.vlgmr.msra.gmra.mxu1 %vm860_vm2, %v9794_v61  ;;  %12669 = vmatprep.subr.mxu1 %v17151_v10 }
 0xa59   : > { %12670 = vmatpush3.msk.msra.mxu1 %vm957_vm1, %v9793_v1  ;;  %12671 = vmatprep.mubr.msk.f32.mxu1 %vm13194_vm9, %v17151_v10 }
 0xa5a   : > { %12674 = vmatprep.subr.mxu1 %v17151_v10 }
 0xa5c   : > { %12672 = vmatmul.mubr.msk.f32.vlgmr.msra.gmra.mxu1 %vm860_vm2, %v10795_v58 }
 0xa5d   : > { %12675 = vmatpush3.msk.msra.mxu1 %vm957_vm1, %v9793_v1  ;;  %12676 = vmatprep.mubr.msk.f32.mxu1 %vm13194_vm9, %v17151_v10 }
 0xa5e   : > { %12679 = vmatprep.subr.mxu1 %v17151_v10 }
 0xa60   : > { %12677 = vmatmul.mubr.msk.f32.vlgmr.msra.gmra.mxu1 %vm860_vm2, %v10798_v7 }
 0xa61   : > { %12680 = vmatpush3.msk.msra.mxu1 %vm957_vm1, %v9793_v1  ;;  %12681 = vmatprep.mubr.msk.f32.mxu1 %vm13194_vm9, %v17151_v10 }
 0xa64   : > { %12682 = vmatmul.mubr.msk.f32.vlgmr.msra.gmra.mxu1 %vm860_vm2, %v10801_v27 }
 0xb18   : > { %v9867_v22 = vpop.f32.mrf.mxu1 }
 0xb1a   : > { %v12668_v50 = vpop.f32.mrf.mxu1 }
 0xb1c   : > { %v9942_v46 = vpop.f32.mrf.mxu1 }
 0xb1d   : > { %v10096_v20 = vmax.f32 %v9867_v22, %v9942_v46 }
 0xb1e   : > { %v12673_v4 = vpop.f32.mrf.mxu1 }
 0xb20   : > { %v10017_v53 = vpop.f32.mrf.mxu1 }
 0xb22   : > { %v12678_v45 = vpop.f32.mrf.mxu1 }
 0xb24   : > { %v10092_v2 = vpop.f32.mrf.mxu1 }
 0xb25   : > { %v10097_v12 = vmax.f32 %v10017_v53, %v10092_v2 }
 0xb26   : > { %v12683_v47 = vpop.f32.mrf.mxu1 }
 0xb27   : > { %v10098_v0 = vmax.f32 %v10096_v20, %v10097_v12 }
 0xb29   : > { %v10100_v10 = vmul.f32 %v10099_v21, %v10098_v0 }
 0xb2b   : > { %v10102_v63 = vsel %vm10101_vm12, %v10100_v10, 0.0 }
 0xb2c   : > { %10103 = vadd.xlane.f32.xlu0 %v10102_v63 }
 0xbb5   : > { %v10104_v60 = vpop.xlane.xlu0 %10103 }
 0xbb6   : > { %v10106_v55 = vadd.f32 %v10105_v33, %v10104_v60 }
 0xbb8   : > { %10108 = vst.msk [vmem:[%s819_s8] sm:$0x1] %vm10107_vm13, %v10106_v55 }
 0xbb9 PF: > { %s40_s26 = sadd.s32 1, %s13174_s26  }
 0xbba   : > { %p37_p2 = scmp.ge.s32.totalorder %s40_s26, 4  }
 0xbbc   :  { %39 = sbr.rel (!%p37_p2) target bundleno = 15 (0xf), region = 231 }
 0xbc1   :  { %10126 = vsyncpa [#allocation8], 1 }
 0xbc2   :  { %10128 = vsyncpa [#allocation8 + $0x1], 1 }
 0xbc3   :  { %10129 = vsyncpa [#allocation10], 1 }
 0xbc4   :  { %10130 = vsyncpa [#allocation13], 1 }
 0xbc5   :  { %10131 = vsyncpa [#allocation16], 1 }
 0xbc6   :  { %10132 = vsyncpa [#allocation19], 1 }
 0xbc7   :  { %10133 = vsyncpa [#allocation22], 1 }
 0xbc8   :  { %10134 = vsyncpa [#allocation25], 1 }

</bundles_post_ra>
